<compile_context>
chip_gen: v5e
topology: v5e:2x2
jax: 0.10.0
libtpu: 0.0.40
codegen_flags: <defaults>
</compile_context>

<pallas_src>
import functools

import jax
import jax.numpy as jnp
from jax import lax
from jax.experimental import pallas as pl
from jax.experimental.pallas import tpu as pltpu


# ------------------------------ Pallas kernels ------------------------------

def _conv_quads(x_ref, w_ref, n_idx, row_len, m_rows):
    """4-matmul 4x4/stride-2 conv for one sample from phase-stacked planes.

    x_ref : [N, (OH+2)*row_len, Kp] bf16 — four stride-2 phase planes stacked
            along channels (phase-major: phase = 2*p + q), zero-padded to Kp.
    w_ref : [4, Kp, Coutp] bf16 — quadrant index 2*a + b (a = kh//2, b = kw//2),
            K layout matching the phase-major channel stacking.
    Returns a f32 accumulator [m_rows, Coutp]  (m_rows = OH*row_len).
    """
    coutp = w_ref.shape[-1]
    acc = jnp.zeros((m_rows, coutp), jnp.float32)
    for a in range(2):
        for b in range(2):
            tap = x_ref[n_idx, pl.ds(a * row_len + b, m_rows), :]
            acc = acc + jnp.dot(tap, w_ref[2 * a + b],
                                preferred_element_type=jnp.float32)
    return acc


def _conv_lrelu_kernel(x_ref, w_ref, o_ref, *, row_len, slope):
    """Layer 1: fused conv + LeakyReLU (no BatchNorm).  One sample per step."""
    m_rows = o_ref.shape[1]
    acc = _conv_quads(x_ref, w_ref, 0, row_len, m_rows)
    o_ref[0] = jnp.where(acc > 0, acc, slope * acc).astype(o_ref.dtype)


def _conv_bn_lrelu_kernel(x_ref, w_ref, mask_ref, g_ref, b_ref, o_ref, acc_ref,
                          *, row_len, count, eps, slope):
    """Layers 2-4: fused conv + training-mode BatchNorm + LeakyReLU.

    The whole layer's conv output lives in the VMEM scratch `acc_ref`; the
    layout boundary column is excluded from the batch statistics via mask.
    """
    n_batch, m_rows, coutp = o_ref.shape
    m = mask_ref[...]                                   # [m_rows, 1]

    s = jnp.zeros((1, coutp), jnp.float32)
    ss = jnp.zeros((1, coutp), jnp.float32)
    for n in range(n_batch):
        acc = _conv_quads(x_ref, w_ref, n, row_len, m_rows)
        acc_ref[n] = acc
        am = acc * m
        s = s + jnp.sum(am, axis=0, keepdims=True)
        ss = ss + jnp.sum(am * acc, axis=0, keepdims=True)

    # per-channel scale / shift computed once per layer
    inv = 1.0 / count
    mean = s * inv
    var = ss * inv - mean * mean            # biased variance (training-mode BN)
    scale = g_ref[...] * lax.rsqrt(var + eps)
    shift = b_ref[...] - mean * scale

    for n in range(n_batch):
        y = acc_ref[n] * scale + shift
        o_ref[n] = jnp.where(y > 0, y, slope * y).astype(o_ref.dtype)


# ----------------------------- kernel wrappers ------------------------------

_VMEM_LIMIT = 32 * 1024 * 1024   # safe on v5e/v6e (128 MiB) and v7x (64 MiB)


def conv_lrelu(phases, wquads, n_batch, m_rows, row_len, out_dtype, slope=0.2):
    _, r_total, kp = phases.shape
    coutp = wquads.shape[-1]
    kernel = functools.partial(_conv_lrelu_kernel, row_len=row_len, slope=slope)
    return pl.pallas_call(
        kernel,
        out_shape=jax.ShapeDtypeStruct((n_batch, m_rows, coutp), out_dtype),
        grid=(n_batch,),
        in_specs=[pl.BlockSpec((1, r_total, kp), lambda i: (i, 0, 0)),
                  pl.BlockSpec(wquads.shape, lambda i: (0, 0, 0))],
        out_specs=pl.BlockSpec((1, m_rows, coutp), lambda i: (i, 0, 0)),
        compiler_params=pltpu.CompilerParams(
            dimension_semantics=("parallel",),
            vmem_limit_bytes=_VMEM_LIMIT),
    )(phases, wquads)


def conv_bn_lrelu(phases, wquads, mask, gamma, beta, n_batch, m_rows, row_len,
                  count, out_dtype, eps=1e-5, slope=0.2):
    coutp = wquads.shape[-1]
    kernel = functools.partial(_conv_bn_lrelu_kernel, row_len=row_len,
                               count=float(count), eps=eps, slope=slope)
    return pl.pallas_call(
        kernel,
        out_shape=jax.ShapeDtypeStruct((n_batch, m_rows, coutp), out_dtype),
        grid=(1,),
        in_specs=[pl.BlockSpec(phases.shape, lambda i: (0, 0, 0)),
                  pl.BlockSpec(wquads.shape, lambda i: (0, 0, 0)),
                  pl.BlockSpec(mask.shape, lambda i: (0, 0)),
                  pl.BlockSpec(gamma.shape, lambda i: (0, 0)),
                  pl.BlockSpec(beta.shape, lambda i: (0, 0))],
        out_specs=pl.BlockSpec((n_batch, m_rows, coutp), lambda i: (0, 0, 0)),
        scratch_shapes=[pltpu.VMEM((n_batch, m_rows, coutp), jnp.float32)],
        compiler_params=pltpu.CompilerParams(
            dimension_semantics=("arbitrary",),
            vmem_limit_bytes=_VMEM_LIMIT),
    )(phases, wquads, mask, gamma, beta)


# ------------------------- JAX glue (layout plumbing) ------------------------

def _round_up(x, m):
    return (x + m - 1) // m * m


def _phase_stack(x_nhwc, kpad):
    """NHWC -> [N, (OH+2)*(OW+1), Kp] bf16, stride-2 phase planes stacked
    along channels (phase-major layout: phase = 2*p + q), K zero-padded.

    Plane (p, q) holds xpad[:, 2i'+p, 2j'+q, :]; one zero row is appended so
    every in-kernel quadrant slice is a contiguous in-bounds window.
    """
    n, h, w, c = x_nhwc.shape
    oh, ow = h // 2, w // 2
    row_len = ow + 1
    xp = jnp.pad(x_nhwc, ((0, 0), (1, 1), (1, 1), (0, 0)))      # [N, H+2, W+2, C]
    ph = xp.reshape(n, oh + 1, 2, row_len, 2, c)                # [N, i', p, j', q, C]
    ph = jnp.transpose(ph, (0, 1, 3, 2, 4, 5))                  # [N, i', j', p, q, C]
    ph = ph.reshape(n, oh + 1, row_len, 4 * c)
    ph = jnp.pad(ph, ((0, 0), (0, 1), (0, 0), (0, kpad - 4 * c)))
    return ph.reshape(n, (oh + 2) * row_len, kpad).astype(jnp.bfloat16)


def _weight_quads(w_oihw, coutp, kpad):
    """PyTorch [Cout, Cin, 4, 4] -> [4, Kp, Coutp] bf16.

    First index = 2*a + b (a = kh//2, b = kw//2); the K block for phase
    (p, q) = (kh%2, kw%2) sits at [(2p+q)*Cin : (2p+q+1)*Cin], matching the
    phase-major channel stacking of `_phase_stack`.
    """
    cout, cin, kh, kw = w_oihw.shape
    w = jnp.transpose(w_oihw, (2, 3, 1, 0))                     # [kh, kw, Cin, Cout]
    w = w.reshape(2, 2, 2, 2, cin, cout)                        # [a, p, b, q, Cin, Cout]
    w = jnp.transpose(w, (0, 2, 1, 3, 4, 5))                    # [a, b, p, q, Cin, Cout]
    w = w.reshape(4, 4 * cin, cout)
    w = jnp.pad(w, ((0, 0), (0, kpad - 4 * cin), (0, coutp - cout)))
    return w.astype(jnp.bfloat16)


def _valid_mask(oh, ow, row_len):
    """1.0 for real output pixels, 0.0 for the layout boundary column."""
    r = jnp.arange(oh * row_len, dtype=jnp.int32)
    return ((r % row_len) < ow).astype(jnp.float32)[:, None]    # [OH*row_len, 1]


def stage1_d_img_forward(image_nchw, params, eps=1e-5, slope=0.2):
    """Pallas implementation of STAGE1_D_IMG.forward (NCHW in / NCHW out)."""
    x = jnp.transpose(image_nchw, (0, 2, 3, 1))                 # -> NHWC
    layers = (("w1", None, None), ("w2", "g2", "b2"),
              ("w3", "g3", "b3"), ("w4", "g4", "b4"))

    for li, (wk, gk, bk) in enumerate(layers):
        n, h, w, cin = x.shape
        oh, ow = h // 2, w // 2
        row_len = ow + 1
        m_rows = oh * row_len
        cout = params[wk].shape[0]
        coutp = _round_up(cout, 128)                            # lane-dense output
        kpad = _round_up(4 * cin, 8)                            # sublane-aligned K

        phases = _phase_stack(x, kpad)
        wquads = _weight_quads(params[wk], coutp, kpad)
        out_dtype = jnp.float32 if li == len(layers) - 1 else jnp.bfloat16

        if gk is None:
            y = conv_lrelu(phases, wquads, n, m_rows, row_len, out_dtype, slope)
        else:
            mask = _valid_mask(oh, ow, row_len)
            g = jnp.pad(params[gk], (0, coutp - cout)).astype(jnp.float32)[None, :]
            b = jnp.pad(params[bk], (0, coutp - cout)).astype(jnp.float32)[None, :]
            y = conv_bn_lrelu(phases, wquads, mask, g, b, n, m_rows, row_len,
                              count=n * oh * ow, out_dtype=out_dtype,
                              eps=eps, slope=slope)

        # drop the lane / boundary-column padding and go back to NHWC
        x = y.reshape(n, oh, row_len, coutp)[:, :, :ow, :cout]

    return jnp.transpose(x, (0, 3, 1, 2))                       # -> NCHW


# ------------------------------- reference ----------------------------------

def reference_forward(image_nchw, params, eps=1e-5):
    """Pure-JAX reference (bf16 conv inputs to mirror the kernel's precision)."""
    def conv(x, w):
        return lax.conv_general_dilated(
            x.astype(jnp.bfloat16), w.astype(jnp.bfloat16),
            window_strides=(2, 2), padding=((1, 1), (1, 1)),
            dimension_numbers=("NCHW", "OIHW", "NCHW"),
            preferred_element_type=jnp.float32)

    def lrelu(x):
        return jnp.where(x > 0, x, 0.2 * x)

    def bn(x, g, b):
        mean = jnp.mean(x, axis=(0, 2, 3), keepdims=True)
        var = jnp.mean((x - mean) ** 2, axis=(0, 2, 3), keepdims=True)
        xn = (x - mean) * lax.rsqrt(var + eps)
        return xn * g[None, :, None, None] + b[None, :, None, None]

    x = lrelu(conv(image_nchw, params["w1"]))
    x = lrelu(bn(conv(x, params["w2"]), params["g2"], params["b2"]))
    x = lrelu(bn(conv(x, params["w3"]), params["g3"], params["b3"]))
    x = lrelu(bn(conv(x, params["w4"]), params["g4"], params["b4"]))
    return x


# ---------------------------------- main -------------------------------------

if __name__ == "__main__":
    ndf = 8            # small stand-in for cfg.GAN.DF_DIM
    N, H, W = 2, 64, 64

    key = jax.random.PRNGKey(0)
    k0, k1, k2, k3, k4 = jax.random.split(key, 5)
    params = {
        "w1": 0.02 * jax.random.normal(k0, (ndf, 3, 4, 4), jnp.float32),
        "w2": 0.02 * jax.random.normal(k1, (ndf * 2, ndf, 4, 4), jnp.float32),
        "w3": 0.02 * jax.random.normal(k2, (ndf * 4, ndf * 2, 4, 4), jnp.float32),
        "w4": 0.02 * jax.random.normal(k3, (ndf * 8, ndf * 4, 4, 4), jnp.float32),
        "g2": jnp.ones(ndf * 2, jnp.float32), "b2": jnp.zeros(ndf * 2, jnp.float32),
        "g3": jnp.ones(ndf * 4, jnp.float32), "b3": jnp.zeros(ndf * 4, jnp.float32),
        "g4": jnp.ones(ndf * 8, jnp.float32), "b4": jnp.zeros(ndf * 8, jnp.float32),
    }
    image = jax.random.normal(k4, (N, 3, H, W), jnp.float32)     # NCHW input

    fwd = jax.jit(stage1_d_img_forward)
    out = jax.block_until_ready(fwd(image, params))
    assert out.shape == (N, ndf * 8, H // 16, W // 16), out.shape

    ref = jax.block_until_ready(reference_forward(image, params))
    max_err = float(jnp.max(jnp.abs(out - ref)))
    assert jnp.allclose(out, ref, rtol=2e-2, atol=2e-2), max_err

    print("KERNEL_OK")
</pallas_src>

<mosaic_0001>
module attributes {stable_mosaic.version = 11 : i64} {
  func.func @_conv_lrelu_kernel(%arg0: i32, %arg1: memref<1x1122x16xbf16, #tpu.memory_space<vmem>>, %arg2: memref<4x16x128xbf16, #tpu.memory_space<vmem>>, %arg3: memref<1x1056x128xbf16, #tpu.memory_space<vmem>>) attributes {dimension_semantics = [#tpu.dimension_semantics<parallel>], iteration_bounds = array<i64: 2>, scalar_prefetch = 0 : i64, scratch_operands = 0 : i64, tpu.core_type = #tpu.core_type<tc>, window_params = [{transform_indices = @transform_0, window_bounds = array<i64: 1, 1122, 16>}, {pipeline_mode = #tpu.pipeline_mode<synchronous>, transform_indices = @transform_1, window_bounds = array<i64: 4, 16, 128>}, {transform_indices = @transform_2, window_bounds = array<i64: 1, 1056, 128>}]} {
    %cst = arith.constant 0.000000e+00 : f32
    %0 = vector.broadcast %cst : f32 to vector<1056x128xf32>
    %c0 = arith.constant 0 : index
    %c0_0 = arith.constant 0 : index
    %c0_1 = arith.constant 0 : index
    %1 = vector.load %arg1[%c0, %c0_0, %c0_1] : memref<1x1122x16xbf16, #tpu.memory_space<vmem>>, vector<1x1056x16xbf16>
    %2 = vector.shape_cast %1 : vector<1x1056x16xbf16> to vector<1056x16xbf16>
    %c0_2 = arith.constant 0 : index
    %c0_3 = arith.constant 0 : index
    %c0_4 = arith.constant 0 : index
    %3 = vector.load %arg2[%c0_2, %c0_3, %c0_4] : memref<4x16x128xbf16, #tpu.memory_space<vmem>>, vector<1x16x128xbf16>
    %4 = vector.shape_cast %3 : vector<1x16x128xbf16> to vector<16x128xbf16>
    %cst_5 = arith.constant dense<0.000000e+00> : vector<1056x128xf32>
    %5 = tpu.matmul %2, %4, %cst_5 {dimension_numbers = #tpu.dot_dimension_numbers<[1], [0], [0], [1], [0, 0, 1, 1], [], []>} : vector<1056x16xbf16>, vector<16x128xbf16>, vector<1056x128xf32> -> vector<1056x128xf32>
    %6 = arith.addf %0, %5 : vector<1056x128xf32>
    %c0_6 = arith.constant 0 : index
    %c1 = arith.constant 1 : index
    %c0_7 = arith.constant 0 : index
    %7 = vector.load %arg1[%c0_6, %c1, %c0_7] : memref<1x1122x16xbf16, #tpu.memory_space<vmem>>, vector<1x1056x16xbf16>
    %8 = vector.shape_cast %7 : vector<1x1056x16xbf16> to vector<1056x16xbf16>
    %c1_8 = arith.constant 1 : index
    %c0_9 = arith.constant 0 : index
    %c0_10 = arith.constant 0 : index
    %9 = vector.load %arg2[%c1_8, %c0_9, %c0_10] : memref<4x16x128xbf16, #tpu.memory_space<vmem>>, vector<1x16x128xbf16>
    %10 = vector.shape_cast %9 : vector<1x16x128xbf16> to vector<16x128xbf16>
    %cst_11 = arith.constant dense<0.000000e+00> : vector<1056x128xf32>
    %11 = tpu.matmul %8, %10, %cst_11 {dimension_numbers = #tpu.dot_dimension_numbers<[1], [0], [0], [1], [0, 0, 1, 1], [], []>} : vector<1056x16xbf16>, vector<16x128xbf16>, vector<1056x128xf32> -> vector<1056x128xf32>
    %12 = arith.addf %6, %11 : vector<1056x128xf32>
    %c0_12 = arith.constant 0 : index
    %c33 = arith.constant 33 : index
    %c0_13 = arith.constant 0 : index
    %13 = vector.load %arg1[%c0_12, %c33, %c0_13] : memref<1x1122x16xbf16, #tpu.memory_space<vmem>>, vector<1x1056x16xbf16>
    %14 = vector.shape_cast %13 : vector<1x1056x16xbf16> to vector<1056x16xbf16>
    %c2 = arith.constant 2 : index
    %c0_14 = arith.constant 0 : index
    %c0_15 = arith.constant 0 : index
    %15 = vector.load %arg2[%c2, %c0_14, %c0_15] : memref<4x16x128xbf16, #tpu.memory_space<vmem>>, vector<1x16x128xbf16>
    %16 = vector.shape_cast %15 : vector<1x16x128xbf16> to vector<16x128xbf16>
    %cst_16 = arith.constant dense<0.000000e+00> : vector<1056x128xf32>
    %17 = tpu.matmul %14, %16, %cst_16 {dimension_numbers = #tpu.dot_dimension_numbers<[1], [0], [0], [1], [0, 0, 1, 1], [], []>} : vector<1056x16xbf16>, vector<16x128xbf16>, vector<1056x128xf32> -> vector<1056x128xf32>
    %18 = arith.addf %12, %17 : vector<1056x128xf32>
    %c0_17 = arith.constant 0 : index
    %c34 = arith.constant 34 : index
    %c0_18 = arith.constant 0 : index
    %19 = vector.load %arg1[%c0_17, %c34, %c0_18] : memref<1x1122x16xbf16, #tpu.memory_space<vmem>>, vector<1x1056x16xbf16>
    %20 = vector.shape_cast %19 : vector<1x1056x16xbf16> to vector<1056x16xbf16>
    %c3 = arith.constant 3 : index
    %c0_19 = arith.constant 0 : index
    %c0_20 = arith.constant 0 : index
    %21 = vector.load %arg2[%c3, %c0_19, %c0_20] : memref<4x16x128xbf16, #tpu.memory_space<vmem>>, vector<1x16x128xbf16>
    %22 = vector.shape_cast %21 : vector<1x16x128xbf16> to vector<16x128xbf16>
    %cst_21 = arith.constant dense<0.000000e+00> : vector<1056x128xf32>
    %23 = tpu.matmul %20, %22, %cst_21 {dimension_numbers = #tpu.dot_dimension_numbers<[1], [0], [0], [1], [0, 0, 1, 1], [], []>} : vector<1056x16xbf16>, vector<16x128xbf16>, vector<1056x128xf32> -> vector<1056x128xf32>
    %24 = arith.addf %18, %23 : vector<1056x128xf32>
    %cst_22 = arith.constant 0.000000e+00 : f32
    %25 = vector.broadcast %cst_22 : f32 to vector<1056x128xf32>
    %26 = arith.cmpf ogt, %24, %25 : vector<1056x128xf32>
    %cst_23 = arith.constant 2.000000e-01 : f32
    %27 = vector.broadcast %cst_23 : f32 to vector<1056x128xf32>
    %28 = arith.mulf %27, %24 : vector<1056x128xf32>
    %29 = arith.select %26, %24, %28 : vector<1056x128xi1>, vector<1056x128xf32>
    %30 = arith.truncf %29 : vector<1056x128xf32> to vector<1056x128xbf16>
    %c0_24 = arith.constant 0 : index
    %c0_25 = arith.constant 0 : index
    %c0_26 = arith.constant 0 : index
    %31 = vector.load %arg3[%c0_24, %c0_25, %c0_26] : memref<1x1056x128xbf16, #tpu.memory_space<vmem>>, vector<1x1056x128xbf16>
    %32 = vector.shape_cast %31 : vector<1x1056x128xbf16> to vector<1056x128xbf16>
    %33 = vector.shape_cast %30 : vector<1056x128xbf16> to vector<1x1056x128xbf16>
    tpu.vector_store %arg3[%c0_24, %c0_25, %c0_26], %33 {strides = array<i32>} : memref<1x1056x128xbf16, #tpu.memory_space<vmem>>, vector<1x1056x128xbf16>,
    return
  }
  func.func @transform_0(%arg0: i32) -> (i32, i32, i32) {
    %c0_i32 = arith.constant 0 : i32
    %c0_i32_0 = arith.constant 0 : i32
    %c0_i32_1 = arith.constant 0 : i32
    return %arg0, %c0_i32, %c0_i32_0 : i32, i32, i32
  }
  func.func @transform_1(%arg0: i32) -> (i32, i32, i32) {
    %c0_i32 = arith.constant 0 : i32
    %c0_i32_0 = arith.constant 0 : i32
    %c0_i32_1 = arith.constant 0 : i32
    %c0_i32_2 = arith.constant 0 : i32
    return %c0_i32, %c0_i32_0, %c0_i32_1 : i32, i32, i32
  }
  func.func @transform_2(%arg0: i32) -> (i32, i32, i32) {
    %c0_i32 = arith.constant 0 : i32
    %c0_i32_0 = arith.constant 0 : i32
    %c0_i32_1 = arith.constant 0 : i32
    return %arg0, %c0_i32, %c0_i32_0 : i32, i32, i32
  }
}

module attributes {stable_mosaic.version = 11 : i64} {
  func.func @_conv_bn_lrelu_kernel(%arg0: i32, %arg1: memref<2x306x32xbf16, #tpu.memory_space<vmem>>, %arg2: memref<4x32x128xbf16, #tpu.memory_space<vmem>>, %arg3: memref<272x1xf32, #tpu.memory_space<vmem>>, %arg4: memref<1x128xf32, #tpu.memory_space<vmem>>, %arg5: memref<1x128xf32, #tpu.memory_space<vmem>>, %arg6: memref<2x272x128xbf16, #tpu.memory_space<vmem>>, %arg7: memref<2x272x128xf32, #tpu.memory_space<vmem>>) attributes {dimension_semantics = [#tpu.dimension_semantics<arbitrary>], iteration_bounds = array<i64: 1>, scalar_prefetch = 0 : i64, scratch_operands = 1 : i64, tpu.core_type = #tpu.core_type<tc>, window_params = [{pipeline_mode = #tpu.pipeline_mode<synchronous>, transform_indices = @transform_0, window_bounds = array<i64: 2, 306, 32>}, {pipeline_mode = #tpu.pipeline_mode<synchronous>, transform_indices = @transform_1, window_bounds = array<i64: 4, 32, 128>}, {pipeline_mode = #tpu.pipeline_mode<synchronous>, transform_indices = @transform_2, window_bounds = array<i64: 272, 1>}, {pipeline_mode = #tpu.pipeline_mode<synchronous>, transform_indices = @transform_3, window_bounds = array<i64: 1, 128>}, {pipeline_mode = #tpu.pipeline_mode<synchronous>, transform_indices = @transform_4, window_bounds = array<i64: 1, 128>}, {pipeline_mode = #tpu.pipeline_mode<synchronous>, transform_indices = @transform_5, window_bounds = array<i64: 2, 272, 128>}]} {
    %c0 = arith.constant 0 : index
    %c0_0 = arith.constant 0 : index
    %0 = vector.load %arg3[%c0, %c0_0] : memref<272x1xf32, #tpu.memory_space<vmem>>, vector<272x1xf32>
    %cst = arith.constant 0.000000e+00 : f32
    %1 = vector.broadcast %cst : f32 to vector<1x128xf32>
    %cst_1 = arith.constant 0.000000e+00 : f32
    %2 = vector.broadcast %cst_1 : f32 to vector<1x128xf32>
    %cst_2 = arith.constant 0.000000e+00 : f32
    %3 = vector.broadcast %cst_2 : f32 to vector<272x128xf32>
    %c0_3 = arith.constant 0 : index
    %c0_4 = arith.constant 0 : index
    %c0_5 = arith.constant 0 : index
    %4 = vector.load %arg1[%c0_3, %c0_4, %c0_5] : memref<2x306x32xbf16, #tpu.memory_space<vmem>>, vector<1x272x32xbf16>
    %5 = vector.shape_cast %4 : vector<1x272x32xbf16> to vector<272x32xbf16>
    %c0_6 = arith.constant 0 : index
    %c0_7 = arith.constant 0 : index
    %c0_8 = arith.constant 0 : index
    %6 = vector.load %arg2[%c0_6, %c0_7, %c0_8] : memref<4x32x128xbf16, #tpu.memory_space<vmem>>, vector<1x32x128xbf16>
    %7 = vector.shape_cast %6 : vector<1x32x128xbf16> to vector<32x128xbf16>
    %cst_9 = arith.constant dense<0.000000e+00> : vector<272x128xf32>
    %8 = tpu.matmul %5, %7, %cst_9 {dimension_numbers = #tpu.dot_dimension_numbers<[1], [0], [0], [1], [0, 0, 1, 1], [], []>} : vector<272x32xbf16>, vector<32x128xbf16>, vector<272x128xf32> -> vector<272x128xf32>
    %9 = arith.addf %3, %8 : vector<272x128xf32>
    %c0_10 = arith.constant 0 : index
    %c1 = arith.constant 1 : index
    %c0_11 = arith.constant 0 : index
    %10 = vector.load %arg1[%c0_10, %c1, %c0_11] : memref<2x306x32xbf16, #tpu.memory_space<vmem>>, vector<1x272x32xbf16>
    %11 = vector.shape_cast %10 : vector<1x272x32xbf16> to vector<272x32xbf16>
    %c1_12 = arith.constant 1 : index
    %c0_13 = arith.constant 0 : index
    %c0_14 = arith.constant 0 : index
    %12 = vector.load %arg2[%c1_12, %c0_13, %c0_14] : memref<4x32x128xbf16, #tpu.memory_space<vmem>>, vector<1x32x128xbf16>
    %13 = vector.shape_cast %12 : vector<1x32x128xbf16> to vector<32x128xbf16>
    %cst_15 = arith.constant dense<0.000000e+00> : vector<272x128xf32>
    %14 = tpu.matmul %11, %13, %cst_15 {dimension_numbers = #tpu.dot_dimension_numbers<[1], [0], [0], [1], [0, 0, 1, 1], [], []>} : vector<272x32xbf16>, vector<32x128xbf16>, vector<272x128xf32> -> vector<272x128xf32>
    %15 = arith.addf %9, %14 : vector<272x128xf32>
    %c0_16 = arith.constant 0 : index
    %c17 = arith.constant 17 : index
    %c0_17 = arith.constant 0 : index
    %16 = vector.load %arg1[%c0_16, %c17, %c0_17] : memref<2x306x32xbf16, #tpu.memory_space<vmem>>, vector<1x272x32xbf16>
    %17 = vector.shape_cast %16 : vector<1x272x32xbf16> to vector<272x32xbf16>
    %c2 = arith.constant 2 : index
    %c0_18 = arith.constant 0 : index
    %c0_19 = arith.constant 0 : index
    %18 = vector.load %arg2[%c2, %c0_18, %c0_19] : memref<4x32x128xbf16, #tpu.memory_space<vmem>>, vector<1x32x128xbf16>
    %19 = vector.shape_cast %18 : vector<1x32x128xbf16> to vector<32x128xbf16>
    %cst_20 = arith.constant dense<0.000000e+00> : vector<272x128xf32>
    %20 = tpu.matmul %17, %19, %cst_20 {dimension_numbers = #tpu.dot_dimension_numbers<[1], [0], [0], [1], [0, 0, 1, 1], [], []>} : vector<272x32xbf16>, vector<32x128xbf16>, vector<272x128xf32> -> vector<272x128xf32>
    %21 = arith.addf %15, %20 : vector<272x128xf32>
    %c0_21 = arith.constant 0 : index
    %c18 = arith.constant 18 : index
    %c0_22 = arith.constant 0 : index
    %22 = vector.load %arg1[%c0_21, %c18, %c0_22] : memref<2x306x32xbf16, #tpu.memory_space<vmem>>, vector<1x272x32xbf16>
    %23 = vector.shape_cast %22 : vector<1x272x32xbf16> to vector<272x32xbf16>
    %c3 = arith.constant 3 : index
    %c0_23 = arith.constant 0 : index
    %c0_24 = arith.constant 0 : index
    %24 = vector.load %arg2[%c3, %c0_23, %c0_24] : memref<4x32x128xbf16, #tpu.memory_space<vmem>>, vector<1x32x128xbf16>
    %25 = vector.shape_cast %24 : vector<1x32x128xbf16> to vector<32x128xbf16>
    %cst_25 = arith.constant dense<0.000000e+00> : vector<272x128xf32>
    %26 = tpu.matmul %23, %25, %cst_25 {dimension_numbers = #tpu.dot_dimension_numbers<[1], [0], [0], [1], [0, 0, 1, 1], [], []>} : vector<272x32xbf16>, vector<32x128xbf16>, vector<272x128xf32> -> vector<272x128xf32>
    %27 = arith.addf %21, %26 : vector<272x128xf32>
    %c0_26 = arith.constant 0 : index
    %c0_27 = arith.constant 0 : index
    %c0_28 = arith.constant 0 : index
    %28 = vector.load %arg7[%c0_26, %c0_27, %c0_28] : memref<2x272x128xf32, #tpu.memory_space<vmem>>, vector<1x272x128xf32>
    %29 = vector.shape_cast %28 : vector<1x272x128xf32> to vector<272x128xf32>
    %30 = vector.shape_cast %27 : vector<272x128xf32> to vector<1x272x128xf32>
    tpu.vector_store %arg7[%c0_26, %c0_27, %c0_28], %30 {strides = array<i32>} : memref<2x272x128xf32, #tpu.memory_space<vmem>>, vector<1x272x128xf32>,
    %31 = vector.broadcast %0 : vector<272x1xf32> to vector<272x128xf32>
    %32 = arith.mulf %27, %31 : vector<272x128xf32>
    %cst_29 = arith.constant dense<0.000000e+00> : vector<128xf32>
    %33 = vector.multi_reduction <add>, %32, %cst_29 [0] : vector<272x128xf32> to vector<128xf32>
    %34 = vector.shape_cast %33 : vector<128xf32> to vector<1x128xf32>
    %35 = arith.addf %1, %34 : vector<1x128xf32>
    %36 = arith.mulf %32, %27 : vector<272x128xf32>
    %cst_30 = arith.constant dense<0.000000e+00> : vector<128xf32>
    %37 = vector.multi_reduction <add>, %36, %cst_30 [0] : vector<272x128xf32> to vector<128xf32>
    %38 = vector.shape_cast %37 : vector<128xf32> to vector<1x128xf32>
    %39 = arith.addf %2, %38 : vector<1x128xf32>
    %cst_31 = arith.constant 0.000000e+00 : f32
    %40 = vector.broadcast %cst_31 : f32 to vector<272x128xf32>
    %c1_32 = arith.constant 1 : index
    %c0_33 = arith.constant 0 : index
    %c0_34 = arith.constant 0 : index
    %41 = vector.load %arg1[%c1_32, %c0_33, %c0_34] : memref<2x306x32xbf16, #tpu.memory_space<vmem>>, vector<1x272x32xbf16>
    %42 = vector.shape_cast %41 : vector<1x272x32xbf16> to vector<272x32xbf16>
    %c0_35 = arith.constant 0 : index
    %c0_36 = arith.constant 0 : index
    %c0_37 = arith.constant 0 : index
    %43 = vector.load %arg2[%c0_35, %c0_36, %c0_37] : memref<4x32x128xbf16, #tpu.memory_space<vmem>>, vector<1x32x128xbf16>
    %44 = vector.shape_cast %43 : vector<1x32x128xbf16> to vector<32x128xbf16>
    %cst_38 = arith.constant dense<0.000000e+00> : vector<272x128xf32>
    %45 = tpu.matmul %42, %44, %cst_38 {dimension_numbers = #tpu.dot_dimension_numbers<[1], [0], [0], [1], [0, 0, 1, 1], [], []>} : vector<272x32xbf16>, vector<32x128xbf16>, vector<272x128xf32> -> vector<272x128xf32>
    %46 = arith.addf %40, %45 : vector<272x128xf32>
    %c1_39 = arith.constant 1 : index
    %c1_40 = arith.constant 1 : index
    %c0_41 = arith.constant 0 : index
    %47 = vector.load %arg1[%c1_39, %c1_40, %c0_41] : memref<2x306x32xbf16, #tpu.memory_space<vmem>>, vector<1x272x32xbf16>
    %48 = vector.shape_cast %47 : vector<1x272x32xbf16> to vector<272x32xbf16>
    %c1_42 = arith.constant 1 : index
    %c0_43 = arith.constant 0 : index
    %c0_44 = arith.constant 0 : index
    %49 = vector.load %arg2[%c1_42, %c0_43, %c0_44] : memref<4x32x128xbf16, #tpu.memory_space<vmem>>, vector<1x32x128xbf16>
    %50 = vector.shape_cast %49 : vector<1x32x128xbf16> to vector<32x128xbf16>
    %cst_45 = arith.constant dense<0.000000e+00> : vector<272x128xf32>
    %51 = tpu.matmul %48, %50, %cst_45 {dimension_numbers = #tpu.dot_dimension_numbers<[1], [0], [0], [1], [0, 0, 1, 1], [], []>} : vector<272x32xbf16>, vector<32x128xbf16>, vector<272x128xf32> -> vector<272x128xf32>
    %52 = arith.addf %46, %51 : vector<272x128xf32>
    %c1_46 = arith.constant 1 : index
    %c17_47 = arith.constant 17 : index
    %c0_48 = arith.constant 0 : index
    %53 = vector.load %arg1[%c1_46, %c17_47, %c0_48] : memref<2x306x32xbf16, #tpu.memory_space<vmem>>, vector<1x272x32xbf16>
    %54 = vector.shape_cast %53 : vector<1x272x32xbf16> to vector<272x32xbf16>
    %c2_49 = arith.constant 2 : index
    %c0_50 = arith.constant 0 : index
    %c0_51 = arith.constant 0 : index
    %55 = vector.load %arg2[%c2_49, %c0_50, %c0_51] : memref<4x32x128xbf16, #tpu.memory_space<vmem>>, vector<1x32x128xbf16>
    %56 = vector.shape_cast %55 : vector<1x32x128xbf16> to vector<32x128xbf16>
    %cst_52 = arith.constant dense<0.000000e+00> : vector<272x128xf32>
    %57 = tpu.matmul %54, %56, %cst_52 {dimension_numbers = #tpu.dot_dimension_numbers<[1], [0], [0], [1], [0, 0, 1, 1], [], []>} : vector<272x32xbf16>, vector<32x128xbf16>, vector<272x128xf32> -> vector<272x128xf32>
    %58 = arith.addf %52, %57 : vector<272x128xf32>
    %c1_53 = arith.constant 1 : index
    %c18_54 = arith.constant 18 : index
    %c0_55 = arith.constant 0 : index
    %59 = vector.load %arg1[%c1_53, %c18_54, %c0_55] : memref<2x306x32xbf16, #tpu.memory_space<vmem>>, vector<1x272x32xbf16>
    %60 = vector.shape_cast %59 : vector<1x272x32xbf16> to vector<272x32xbf16>
    %c3_56 = arith.constant 3 : index
    %c0_57 = arith.constant 0 : index
    %c0_58 = arith.constant 0 : index
    %61 = vector.load %arg2[%c3_56, %c0_57, %c0_58] : memref<4x32x128xbf16, #tpu.memory_space<vmem>>, vector<1x32x128xbf16>
    %62 = vector.shape_cast %61 : vector<1x32x128xbf16> to vector<32x128xbf16>
    %cst_59 = arith.constant dense<0.000000e+00> : vector<272x128xf32>
    %63 = tpu.matmul %60, %62, %cst_59 {dimension_numbers = #tpu.dot_dimension_numbers<[1], [0], [0], [1], [0, 0, 1, 1], [], []>} : vector<272x32xbf16>, vector<32x128xbf16>, vector<272x128xf32> -> vector<272x128xf32>
    %64 = arith.addf %58, %63 : vector<272x128xf32>
    %c1_60 = arith.constant 1 : index
    %c0_61 = arith.constant 0 : index
    %c0_62 = arith.constant 0 : index
    %65 = vector.load %arg7[%c1_60, %c0_61, %c0_62] : memref<2x272x128xf32, #tpu.memory_space<vmem>>, vector<1x272x128xf32>
    %66 = vector.shape_cast %65 : vector<1x272x128xf32> to vector<272x128xf32>
    %67 = vector.shape_cast %64 : vector<272x128xf32> to vector<1x272x128xf32>
    tpu.vector_store %arg7[%c1_60, %c0_61, %c0_62], %67 {strides = array<i32>} : memref<2x272x128xf32, #tpu.memory_space<vmem>>, vector<1x272x128xf32>,
    %68 = vector.broadcast %0 : vector<272x1xf32> to vector<272x128xf32>
    %69 = arith.mulf %64, %68 : vector<272x128xf32>
    %cst_63 = arith.constant dense<0.000000e+00> : vector<128xf32>
    %70 = vector.multi_reduction <add>, %69, %cst_63 [0] : vector<272x128xf32> to vector<128xf32>
    %71 = vector.shape_cast %70 : vector<128xf32> to vector<1x128xf32>
    %72 = arith.addf %35, %71 : vector<1x128xf32>
    %73 = arith.mulf %69, %64 : vector<272x128xf32>
    %cst_64 = arith.constant dense<0.000000e+00> : vector<128xf32>
    %74 = vector.multi_reduction <add>, %73, %cst_64 [0] : vector<272x128xf32> to vector<128xf32>
    %75 = vector.shape_cast %74 : vector<128xf32> to vector<1x128xf32>
    %76 = arith.addf %39, %75 : vector<1x128xf32>
    %cst_65 = arith.constant 0.001953125 : f32
    %77 = vector.broadcast %cst_65 : f32 to vector<1x128xf32>
    %78 = arith.mulf %72, %77 : vector<1x128xf32>
    %cst_66 = arith.constant 0.001953125 : f32
    %79 = vector.broadcast %cst_66 : f32 to vector<1x128xf32>
    %80 = arith.mulf %76, %79 : vector<1x128xf32>
    %81 = arith.mulf %78, %78 : vector<1x128xf32>
    %82 = arith.subf %80, %81 : vector<1x128xf32>
    %c0_67 = arith.constant 0 : index
    %c0_68 = arith.constant 0 : index
    %83 = vector.load %arg4[%c0_67, %c0_68] : memref<1x128xf32, #tpu.memory_space<vmem>>, vector<1x128xf32>
    %cst_69 = arith.constant 9.99999974E-6 : f32
    %84 = vector.broadcast %cst_69 : f32 to vector<1x128xf32>
    %85 = arith.addf %82, %84 : vector<1x128xf32>
    %86 = math.rsqrt %85 : vector<1x128xf32>
    %87 = arith.mulf %83, %86 : vector<1x128xf32>
    %c0_70 = arith.constant 0 : index
    %c0_71 = arith.constant 0 : index
    %88 = vector.load %arg5[%c0_70, %c0_71] : memref<1x128xf32, #tpu.memory_space<vmem>>, vector<1x128xf32>
    %89 = arith.mulf %78, %87 : vector<1x128xf32>
    %90 = arith.subf %88, %89 : vector<1x128xf32>
    %c0_72 = arith.constant 0 : index
    %c0_73 = arith.constant 0 : index
    %c0_74 = arith.constant 0 : index
    %91 = vector.load %arg7[%c0_72, %c0_73, %c0_74] : memref<2x272x128xf32, #tpu.memory_space<vmem>>, vector<1x272x128xf32>
    %92 = vector.shape_cast %91 : vector<1x272x128xf32> to vector<272x128xf32>
    %93 = vector.broadcast %87 : vector<1x128xf32> to vector<272x128xf32>
    %94 = arith.mulf %92, %93 : vector<272x128xf32>
    %95 = vector.broadcast %90 : vector<1x128xf32> to vector<272x128xf32>
    %96 = arith.addf %94, %95 : vector<272x128xf32>
    %cst_75 = arith.constant 0.000000e+00 : f32
    %97 = vector.broadcast %cst_75 : f32 to vector<272x128xf32>
    %98 = arith.cmpf ogt, %96, %97 : vector<272x128xf32>
    %cst_76 = arith.constant 2.000000e-01 : f32
    %99 = vector.broadcast %cst_76 : f32 to vector<272x128xf32>
    %100 = arith.mulf %99, %96 : vector<272x128xf32>
    %101 = arith.select %98, %96, %100 : vector<272x128xi1>, vector<272x128xf32>
    %102 = arith.truncf %101 : vector<272x128xf32> to vector<272x128xbf16>
    %c0_77 = arith.constant 0 : index
    %c0_78 = arith.constant 0 : index
    %c0_79 = arith.constant 0 : index
    %103 = vector.load %arg6[%c0_77, %c0_78, %c0_79] : memref<2x272x128xbf16, #tpu.memory_space<vmem>>, vector<1x272x128xbf16>
    %104 = vector.shape_cast %103 : vector<1x272x128xbf16> to vector<272x128xbf16>
    %105 = vector.shape_cast %102 : vector<272x128xbf16> to vector<1x272x128xbf16>
    tpu.vector_store %arg6[%c0_77, %c0_78, %c0_79], %105 {strides = array<i32>} : memref<2x272x128xbf16, #tpu.memory_space<vmem>>, vector<1x272x128xbf16>,
    %c1_80 = arith.constant 1 : index
    %c0_81 = arith.constant 0 : index
    %c0_82 = arith.constant 0 : index
    %106 = vector.load %arg7[%c1_80, %c0_81, %c0_82] : memref<2x272x128xf32, #tpu.memory_space<vmem>>, vector<1x272x128xf32>
    %107 = vector.shape_cast %106 : vector<1x272x128xf32> to vector<272x128xf32>
    %108 = vector.broadcast %87 : vector<1x128xf32> to vector<272x128xf32>
    %109 = arith.mulf %107, %108 : vector<272x128xf32>
    %110 = vector.broadcast %90 : vector<1x128xf32> to vector<272x128xf32>
    %111 = arith.addf %109, %110 : vector<272x128xf32>
    %cst_83 = arith.constant 0.000000e+00 : f32
    %112 = vector.broadcast %cst_83 : f32 to vector<272x128xf32>
    %113 = arith.cmpf ogt, %111, %112 : vector<272x128xf32>
    %cst_84 = arith.constant 2.000000e-01 : f32
    %114 = vector.broadcast %cst_84 : f32 to vector<272x128xf32>
    %115 = arith.mulf %114, %111 : vector<272x128xf32>
    %116 = arith.select %113, %111, %115 : vector<272x128xi1>, vector<272x128xf32>
    %117 = arith.truncf %116 : vector<272x128xf32> to vector<272x128xbf16>
    %c1_85 = arith.constant 1 : index
    %c0_86 = arith.constant 0 : index
    %c0_87 = arith.constant 0 : index
    %118 = vector.load %arg6[%c1_85, %c0_86, %c0_87] : memref<2x272x128xbf16, #tpu.memory_space<vmem>>, vector<1x272x128xbf16>
    %119 = vector.shape_cast %118 : vector<1x272x128xbf16> to vector<272x128xbf16>
    %120 = vector.shape_cast %117 : vector<272x128xbf16> to vector<1x272x128xbf16>
    tpu.vector_store %arg6[%c1_85, %c0_86, %c0_87], %120 {strides = array<i32>} : memref<2x272x128xbf16, #tpu.memory_space<vmem>>, vector<1x272x128xbf16>,
    return
  }
  func.func @transform_0(%arg0: i32) -> (i32, i32, i32) {
    %c0_i32 = arith.constant 0 : i32
    %c0_i32_0 = arith.constant 0 : i32
    %c0_i32_1 = arith.constant 0 : i32
    %c0_i32_2 = arith.constant 0 : i32
    return %c0_i32, %c0_i32_0, %c0_i32_1 : i32, i32, i32
  }
  func.func @transform_1(%arg0: i32) -> (i32, i32, i32) {
    %c0_i32 = arith.constant 0 : i32
    %c0_i32_0 = arith.constant 0 : i32
    %c0_i32_1 = arith.constant 0 : i32
    %c0_i32_2 = arith.constant 0 : i32
    return %c0_i32, %c0_i32_0, %c0_i32_1 : i32, i32, i32
  }
  func.func @transform_2(%arg0: i32) -> (i32, i32) {
    %c0_i32 = arith.constant 0 : i32
    %c0_i32_0 = arith.constant 0 : i32
    %c0_i32_1 = arith.constant 0 : i32
    return %c0_i32, %c0_i32_0 : i32, i32
  }
  func.func @transform_3(%arg0: i32) -> (i32, i32) {
    %c0_i32 = arith.constant 0 : i32
    %c0_i32_0 = arith.constant 0 : i32
    %c0_i32_1 = arith.constant 0 : i32
    return %c0_i32, %c0_i32_0 : i32, i32
  }
  func.func @transform_4(%arg0: i32) -> (i32, i32) {
    %c0_i32 = arith.constant 0 : i32
    %c0_i32_0 = arith.constant 0 : i32
    %c0_i32_1 = arith.constant 0 : i32
    return %c0_i32, %c0_i32_0 : i32, i32
  }
  func.func @transform_5(%arg0: i32) -> (i32, i32, i32) {
    %c0_i32 = arith.constant 0 : i32
    %c0_i32_0 = arith.constant 0 : i32
    %c0_i32_1 = arith.constant 0 : i32
    %c0_i32_2 = arith.constant 0 : i32
    return %c0_i32, %c0_i32_0, %c0_i32_1 : i32, i32, i32
  }
}

module attributes {stable_mosaic.version = 11 : i64} {
  func.func @_conv_bn_lrelu_kernel(%arg0: i32, %arg1: memref<2x90x64xbf16, #tpu.memory_space<vmem>>, %arg2: memref<4x64x128xbf16, #tpu.memory_space<vmem>>, %arg3: memref<72x1xf32, #tpu.memory_space<vmem>>, %arg4: memref<1x128xf32, #tpu.memory_space<vmem>>, %arg5: memref<1x128xf32, #tpu.memory_space<vmem>>, %arg6: memref<2x72x128xbf16, #tpu.memory_space<vmem>>, %arg7: memref<2x72x128xf32, #tpu.memory_space<vmem>>) attributes {dimension_semantics = [#tpu.dimension_semantics<arbitrary>], iteration_bounds = array<i64: 1>, scalar_prefetch = 0 : i64, scratch_operands = 1 : i64, tpu.core_type = #tpu.core_type<tc>, window_params = [{pipeline_mode = #tpu.pipeline_mode<synchronous>, transform_indices = @transform_0, window_bounds = array<i64: 2, 90, 64>}, {pipeline_mode = #tpu.pipeline_mode<synchronous>, transform_indices = @transform_1, window_bounds = array<i64: 4, 64, 128>}, {pipeline_mode = #tpu.pipeline_mode<synchronous>, transform_indices = @transform_2, window_bounds = array<i64: 72, 1>}, {pipeline_mode = #tpu.pipeline_mode<synchronous>, transform_indices = @transform_3, window_bounds = array<i64: 1, 128>}, {pipeline_mode = #tpu.pipeline_mode<synchronous>, transform_indices = @transform_4, window_bounds = array<i64: 1, 128>}, {pipeline_mode = #tpu.pipeline_mode<synchronous>, transform_indices = @transform_5, window_bounds = array<i64: 2, 72, 128>}]} {
    %c0 = arith.constant 0 : index
    %c0_0 = arith.constant 0 : index
    %0 = vector.load %arg3[%c0, %c0_0] : memref<72x1xf32, #tpu.memory_space<vmem>>, vector<72x1xf32>
    %cst = arith.constant 0.000000e+00 : f32
    %1 = vector.broadcast %cst : f32 to vector<1x128xf32>
    %cst_1 = arith.constant 0.000000e+00 : f32
    %2 = vector.broadcast %cst_1 : f32 to vector<1x128xf32>
    %cst_2 = arith.constant 0.000000e+00 : f32
    %3 = vector.broadcast %cst_2 : f32 to vector<72x128xf32>
    %c0_3 = arith.constant 0 : index
    %c0_4 = arith.constant 0 : index
    %c0_5 = arith.constant 0 : index
    %4 = vector.load %arg1[%c0_3, %c0_4, %c0_5] : memref<2x90x64xbf16, #tpu.memory_space<vmem>>, vector<1x72x64xbf16>
    %5 = vector.shape_cast %4 : vector<1x72x64xbf16> to vector<72x64xbf16>
    %c0_6 = arith.constant 0 : index
    %c0_7 = arith.constant 0 : index
    %c0_8 = arith.constant 0 : index
    %6 = vector.load %arg2[%c0_6, %c0_7, %c0_8] : memref<4x64x128xbf16, #tpu.memory_space<vmem>>, vector<1x64x128xbf16>
    %7 = vector.shape_cast %6 : vector<1x64x128xbf16> to vector<64x128xbf16>
    %cst_9 = arith.constant dense<0.000000e+00> : vector<72x128xf32>
    %8 = tpu.matmul %5, %7, %cst_9 {dimension_numbers = #tpu.dot_dimension_numbers<[1], [0], [0], [1], [0, 0, 1, 1], [], []>} : vector<72x64xbf16>, vector<64x128xbf16>, vector<72x128xf32> -> vector<72x128xf32>
    %9 = arith.addf %3, %8 : vector<72x128xf32>
    %c0_10 = arith.constant 0 : index
    %c1 = arith.constant 1 : index
    %c0_11 = arith.constant 0 : index
    %10 = vector.load %arg1[%c0_10, %c1, %c0_11] : memref<2x90x64xbf16, #tpu.memory_space<vmem>>, vector<1x72x64xbf16>
    %11 = vector.shape_cast %10 : vector<1x72x64xbf16> to vector<72x64xbf16>
    %c1_12 = arith.constant 1 : index
    %c0_13 = arith.constant 0 : index
    %c0_14 = arith.constant 0 : index
    %12 = vector.load %arg2[%c1_12, %c0_13, %c0_14] : memref<4x64x128xbf16, #tpu.memory_space<vmem>>, vector<1x64x128xbf16>
    %13 = vector.shape_cast %12 : vector<1x64x128xbf16> to vector<64x128xbf16>
    %cst_15 = arith.constant dense<0.000000e+00> : vector<72x128xf32>
    %14 = tpu.matmul %11, %13, %cst_15 {dimension_numbers = #tpu.dot_dimension_numbers<[1], [0], [0], [1], [0, 0, 1, 1], [], []>} : vector<72x64xbf16>, vector<64x128xbf16>, vector<72x128xf32> -> vector<72x128xf32>
    %15 = arith.addf %9, %14 : vector<72x128xf32>
    %c0_16 = arith.constant 0 : index
    %c9 = arith.constant 9 : index
    %c0_17 = arith.constant 0 : index
    %16 = vector.load %arg1[%c0_16, %c9, %c0_17] : memref<2x90x64xbf16, #tpu.memory_space<vmem>>, vector<1x72x64xbf16>
    %17 = vector.shape_cast %16 : vector<1x72x64xbf16> to vector<72x64xbf16>
    %c2 = arith.constant 2 : index
    %c0_18 = arith.constant 0 : index
    %c0_19 = arith.constant 0 : index
    %18 = vector.load %arg2[%c2, %c0_18, %c0_19] : memref<4x64x128xbf16, #tpu.memory_space<vmem>>, vector<1x64x128xbf16>
    %19 = vector.shape_cast %18 : vector<1x64x128xbf16> to vector<64x128xbf16>
    %cst_20 = arith.constant dense<0.000000e+00> : vector<72x128xf32>
    %20 = tpu.matmul %17, %19, %cst_20 {dimension_numbers = #tpu.dot_dimension_numbers<[1], [0], [0], [1], [0, 0, 1, 1], [], []>} : vector<72x64xbf16>, vector<64x128xbf16>, vector<72x128xf32> -> vector<72x128xf32>
    %21 = arith.addf %15, %20 : vector<72x128xf32>
    %c0_21 = arith.constant 0 : index
    %c10 = arith.constant 10 : index
    %c0_22 = arith.constant 0 : index
    %22 = vector.load %arg1[%c0_21, %c10, %c0_22] : memref<2x90x64xbf16, #tpu.memory_space<vmem>>, vector<1x72x64xbf16>
    %23 = vector.shape_cast %22 : vector<1x72x64xbf16> to vector<72x64xbf16>
    %c3 = arith.constant 3 : index
    %c0_23 = arith.constant 0 : index
    %c0_24 = arith.constant 0 : index
    %24 = vector.load %arg2[%c3, %c0_23, %c0_24] : memref<4x64x128xbf16, #tpu.memory_space<vmem>>, vector<1x64x128xbf16>
    %25 = vector.shape_cast %24 : vector<1x64x128xbf16> to vector<64x128xbf16>
    %cst_25 = arith.constant dense<0.000000e+00> : vector<72x128xf32>
    %26 = tpu.matmul %23, %25, %cst_25 {dimension_numbers = #tpu.dot_dimension_numbers<[1], [0], [0], [1], [0, 0, 1, 1], [], []>} : vector<72x64xbf16>, vector<64x128xbf16>, vector<72x128xf32> -> vector<72x128xf32>
    %27 = arith.addf %21, %26 : vector<72x128xf32>
    %c0_26 = arith.constant 0 : index
    %c0_27 = arith.constant 0 : index
    %c0_28 = arith.constant 0 : index
    %28 = vector.load %arg7[%c0_26, %c0_27, %c0_28] : memref<2x72x128xf32, #tpu.memory_space<vmem>>, vector<1x72x128xf32>
    %29 = vector.shape_cast %28 : vector<1x72x128xf32> to vector<72x128xf32>
    %30 = vector.shape_cast %27 : vector<72x128xf32> to vector<1x72x128xf32>
    tpu.vector_store %arg7[%c0_26, %c0_27, %c0_28], %30 {strides = array<i32>} : memref<2x72x128xf32, #tpu.memory_space<vmem>>, vector<1x72x128xf32>,
    %31 = vector.broadcast %0 : vector<72x1xf32> to vector<72x128xf32>
    %32 = arith.mulf %27, %31 : vector<72x128xf32>
    %cst_29 = arith.constant dense<0.000000e+00> : vector<128xf32>
    %33 = vector.multi_reduction <add>, %32, %cst_29 [0] : vector<72x128xf32> to vector<128xf32>
    %34 = vector.shape_cast %33 : vector<128xf32> to vector<1x128xf32>
    %35 = arith.addf %1, %34 : vector<1x128xf32>
    %36 = arith.mulf %32, %27 : vector<72x128xf32>
    %cst_30 = arith.constant dense<0.000000e+00> : vector<128xf32>
    %37 = vector.multi_reduction <add>, %36, %cst_30 [0] : vector<72x128xf32> to vector<128xf32>
    %38 = vector.shape_cast %37 : vector<128xf32> to vector<1x128xf32>
    %39 = arith.addf %2, %38 : vector<1x128xf32>
    %cst_31 = arith.constant 0.000000e+00 : f32
    %40 = vector.broadcast %cst_31 : f32 to vector<72x128xf32>
    %c1_32 = arith.constant 1 : index
    %c0_33 = arith.constant 0 : index
    %c0_34 = arith.constant 0 : index
    %41 = vector.load %arg1[%c1_32, %c0_33, %c0_34] : memref<2x90x64xbf16, #tpu.memory_space<vmem>>, vector<1x72x64xbf16>
    %42 = vector.shape_cast %41 : vector<1x72x64xbf16> to vector<72x64xbf16>
    %c0_35 = arith.constant 0 : index
    %c0_36 = arith.constant 0 : index
    %c0_37 = arith.constant 0 : index
    %43 = vector.load %arg2[%c0_35, %c0_36, %c0_37] : memref<4x64x128xbf16, #tpu.memory_space<vmem>>, vector<1x64x128xbf16>
    %44 = vector.shape_cast %43 : vector<1x64x128xbf16> to vector<64x128xbf16>
    %cst_38 = arith.constant dense<0.000000e+00> : vector<72x128xf32>
    %45 = tpu.matmul %42, %44, %cst_38 {dimension_numbers = #tpu.dot_dimension_numbers<[1], [0], [0], [1], [0, 0, 1, 1], [], []>} : vector<72x64xbf16>, vector<64x128xbf16>, vector<72x128xf32> -> vector<72x128xf32>
    %46 = arith.addf %40, %45 : vector<72x128xf32>
    %c1_39 = arith.constant 1 : index
    %c1_40 = arith.constant 1 : index
    %c0_41 = arith.constant 0 : index
    %47 = vector.load %arg1[%c1_39, %c1_40, %c0_41] : memref<2x90x64xbf16, #tpu.memory_space<vmem>>, vector<1x72x64xbf16>
    %48 = vector.shape_cast %47 : vector<1x72x64xbf16> to vector<72x64xbf16>
    %c1_42 = arith.constant 1 : index
    %c0_43 = arith.constant 0 : index
    %c0_44 = arith.constant 0 : index
    %49 = vector.load %arg2[%c1_42, %c0_43, %c0_44] : memref<4x64x128xbf16, #tpu.memory_space<vmem>>, vector<1x64x128xbf16>
    %50 = vector.shape_cast %49 : vector<1x64x128xbf16> to vector<64x128xbf16>
    %cst_45 = arith.constant dense<0.000000e+00> : vector<72x128xf32>
    %51 = tpu.matmul %48, %50, %cst_45 {dimension_numbers = #tpu.dot_dimension_numbers<[1], [0], [0], [1], [0, 0, 1, 1], [], []>} : vector<72x64xbf16>, vector<64x128xbf16>, vector<72x128xf32> -> vector<72x128xf32>
    %52 = arith.addf %46, %51 : vector<72x128xf32>
    %c1_46 = arith.constant 1 : index
    %c9_47 = arith.constant 9 : index
    %c0_48 = arith.constant 0 : index
    %53 = vector.load %arg1[%c1_46, %c9_47, %c0_48] : memref<2x90x64xbf16, #tpu.memory_space<vmem>>, vector<1x72x64xbf16>
    %54 = vector.shape_cast %53 : vector<1x72x64xbf16> to vector<72x64xbf16>
    %c2_49 = arith.constant 2 : index
    %c0_50 = arith.constant 0 : index
    %c0_51 = arith.constant 0 : index
    %55 = vector.load %arg2[%c2_49, %c0_50, %c0_51] : memref<4x64x128xbf16, #tpu.memory_space<vmem>>, vector<1x64x128xbf16>
    %56 = vector.shape_cast %55 : vector<1x64x128xbf16> to vector<64x128xbf16>
    %cst_52 = arith.constant dense<0.000000e+00> : vector<72x128xf32>
    %57 = tpu.matmul %54, %56, %cst_52 {dimension_numbers = #tpu.dot_dimension_numbers<[1], [0], [0], [1], [0, 0, 1, 1], [], []>} : vector<72x64xbf16>, vector<64x128xbf16>, vector<72x128xf32> -> vector<72x128xf32>
    %58 = arith.addf %52, %57 : vector<72x128xf32>
    %c1_53 = arith.constant 1 : index
    %c10_54 = arith.constant 10 : index
    %c0_55 = arith.constant 0 : index
    %59 = vector.load %arg1[%c1_53, %c10_54, %c0_55] : memref<2x90x64xbf16, #tpu.memory_space<vmem>>, vector<1x72x64xbf16>
    %60 = vector.shape_cast %59 : vector<1x72x64xbf16> to vector<72x64xbf16>
    %c3_56 = arith.constant 3 : index
    %c0_57 = arith.constant 0 : index
    %c0_58 = arith.constant 0 : index
    %61 = vector.load %arg2[%c3_56, %c0_57, %c0_58] : memref<4x64x128xbf16, #tpu.memory_space<vmem>>, vector<1x64x128xbf16>
    %62 = vector.shape_cast %61 : vector<1x64x128xbf16> to vector<64x128xbf16>
    %cst_59 = arith.constant dense<0.000000e+00> : vector<72x128xf32>
    %63 = tpu.matmul %60, %62, %cst_59 {dimension_numbers = #tpu.dot_dimension_numbers<[1], [0], [0], [1], [0, 0, 1, 1], [], []>} : vector<72x64xbf16>, vector<64x128xbf16>, vector<72x128xf32> -> vector<72x128xf32>
    %64 = arith.addf %58, %63 : vector<72x128xf32>
    %c1_60 = arith.constant 1 : index
    %c0_61 = arith.constant 0 : index
    %c0_62 = arith.constant 0 : index
    %65 = vector.load %arg7[%c1_60, %c0_61, %c0_62] : memref<2x72x128xf32, #tpu.memory_space<vmem>>, vector<1x72x128xf32>
    %66 = vector.shape_cast %65 : vector<1x72x128xf32> to vector<72x128xf32>
    %67 = vector.shape_cast %64 : vector<72x128xf32> to vector<1x72x128xf32>
    tpu.vector_store %arg7[%c1_60, %c0_61, %c0_62], %67 {strides = array<i32>} : memref<2x72x128xf32, #tpu.memory_space<vmem>>, vector<1x72x128xf32>,
    %68 = vector.broadcast %0 : vector<72x1xf32> to vector<72x128xf32>
    %69 = arith.mulf %64, %68 : vector<72x128xf32>
    %cst_63 = arith.constant dense<0.000000e+00> : vector<128xf32>
    %70 = vector.multi_reduction <add>, %69, %cst_63 [0] : vector<72x128xf32> to vector<128xf32>
    %71 = vector.shape_cast %70 : vector<128xf32> to vector<1x128xf32>
    %72 = arith.addf %35, %71 : vector<1x128xf32>
    %73 = arith.mulf %69, %64 : vector<72x128xf32>
    %cst_64 = arith.constant dense<0.000000e+00> : vector<128xf32>
    %74 = vector.multi_reduction <add>, %73, %cst_64 [0] : vector<72x128xf32> to vector<128xf32>
    %75 = vector.shape_cast %74 : vector<128xf32> to vector<1x128xf32>
    %76 = arith.addf %39, %75 : vector<1x128xf32>
    %cst_65 = arith.constant 7.812500e-03 : f32
    %77 = vector.broadcast %cst_65 : f32 to vector<1x128xf32>
    %78 = arith.mulf %72, %77 : vector<1x128xf32>
    %cst_66 = arith.constant 7.812500e-03 : f32
    %79 = vector.broadcast %cst_66 : f32 to vector<1x128xf32>
    %80 = arith.mulf %76, %79 : vector<1x128xf32>
    %81 = arith.mulf %78, %78 : vector<1x128xf32>
    %82 = arith.subf %80, %81 : vector<1x128xf32>
    %c0_67 = arith.constant 0 : index
    %c0_68 = arith.constant 0 : index
    %83 = vector.load %arg4[%c0_67, %c0_68] : memref<1x128xf32, #tpu.memory_space<vmem>>, vector<1x128xf32>
    %cst_69 = arith.constant 9.99999974E-6 : f32
    %84 = vector.broadcast %cst_69 : f32 to vector<1x128xf32>
    %85 = arith.addf %82, %84 : vector<1x128xf32>
    %86 = math.rsqrt %85 : vector<1x128xf32>
    %87 = arith.mulf %83, %86 : vector<1x128xf32>
    %c0_70 = arith.constant 0 : index
    %c0_71 = arith.constant 0 : index
    %88 = vector.load %arg5[%c0_70, %c0_71] : memref<1x128xf32, #tpu.memory_space<vmem>>, vector<1x128xf32>
    %89 = arith.mulf %78, %87 : vector<1x128xf32>
    %90 = arith.subf %88, %89 : vector<1x128xf32>
    %c0_72 = arith.constant 0 : index
    %c0_73 = arith.constant 0 : index
    %c0_74 = arith.constant 0 : index
    %91 = vector.load %arg7[%c0_72, %c0_73, %c0_74] : memref<2x72x128xf32, #tpu.memory_space<vmem>>, vector<1x72x128xf32>
    %92 = vector.shape_cast %91 : vector<1x72x128xf32> to vector<72x128xf32>
    %93 = vector.broadcast %87 : vector<1x128xf32> to vector<72x128xf32>
    %94 = arith.mulf %92, %93 : vector<72x128xf32>
    %95 = vector.broadcast %90 : vector<1x128xf32> to vector<72x128xf32>
    %96 = arith.addf %94, %95 : vector<72x128xf32>
    %cst_75 = arith.constant 0.000000e+00 : f32
    %97 = vector.broadcast %cst_75 : f32 to vector<72x128xf32>
    %98 = arith.cmpf ogt, %96, %97 : vector<72x128xf32>
    %cst_76 = arith.constant 2.000000e-01 : f32
    %99 = vector.broadcast %cst_76 : f32 to vector<72x128xf32>
    %100 = arith.mulf %99, %96 : vector<72x128xf32>
    %101 = arith.select %98, %96, %100 : vector<72x128xi1>, vector<72x128xf32>
    %102 = arith.truncf %101 : vector<72x128xf32> to vector<72x128xbf16>
    %c0_77 = arith.constant 0 : index
    %c0_78 = arith.constant 0 : index
    %c0_79 = arith.constant 0 : index
    %103 = vector.load %arg6[%c0_77, %c0_78, %c0_79] : memref<2x72x128xbf16, #tpu.memory_space<vmem>>, vector<1x72x128xbf16>
    %104 = vector.shape_cast %103 : vector<1x72x128xbf16> to vector<72x128xbf16>
    %105 = vector.shape_cast %102 : vector<72x128xbf16> to vector<1x72x128xbf16>
    tpu.vector_store %arg6[%c0_77, %c0_78, %c0_79], %105 {strides = array<i32>} : memref<2x72x128xbf16, #tpu.memory_space<vmem>>, vector<1x72x128xbf16>,
    %c1_80 = arith.constant 1 : index
    %c0_81 = arith.constant 0 : index
    %c0_82 = arith.constant 0 : index
    %106 = vector.load %arg7[%c1_80, %c0_81, %c0_82] : memref<2x72x128xf32, #tpu.memory_space<vmem>>, vector<1x72x128xf32>
    %107 = vector.shape_cast %106 : vector<1x72x128xf32> to vector<72x128xf32>
    %108 = vector.broadcast %87 : vector<1x128xf32> to vector<72x128xf32>
    %109 = arith.mulf %107, %108 : vector<72x128xf32>
    %110 = vector.broadcast %90 : vector<1x128xf32> to vector<72x128xf32>
    %111 = arith.addf %109, %110 : vector<72x128xf32>
    %cst_83 = arith.constant 0.000000e+00 : f32
    %112 = vector.broadcast %cst_83 : f32 to vector<72x128xf32>
    %113 = arith.cmpf ogt, %111, %112 : vector<72x128xf32>
    %cst_84 = arith.constant 2.000000e-01 : f32
    %114 = vector.broadcast %cst_84 : f32 to vector<72x128xf32>
    %115 = arith.mulf %114, %111 : vector<72x128xf32>
    %116 = arith.select %113, %111, %115 : vector<72x128xi1>, vector<72x128xf32>
    %117 = arith.truncf %116 : vector<72x128xf32> to vector<72x128xbf16>
    %c1_85 = arith.constant 1 : index
    %c0_86 = arith.constant 0 : index
    %c0_87 = arith.constant 0 : index
    %118 = vector.load %arg6[%c1_85, %c0_86, %c0_87] : memref<2x72x128xbf16, #tpu.memory_space<vmem>>, vector<1x72x128xbf16>
    %119 = vector.shape_cast %118 : vector<1x72x128xbf16> to vector<72x128xbf16>
    %120 = vector.shape_cast %117 : vector<72x128xbf16> to vector<1x72x128xbf16>
    tpu.vector_store %arg6[%c1_85, %c0_86, %c0_87], %120 {strides = array<i32>} : memref<2x72x128xbf16, #tpu.memory_space<vmem>>, vector<1x72x128xbf16>,
    return
  }
  func.func @transform_0(%arg0: i32) -> (i32, i32, i32) {
    %c0_i32 = arith.constant 0 : i32
    %c0_i32_0 = arith.constant 0 : i32
    %c0_i32_1 = arith.constant 0 : i32
    %c0_i32_2 = arith.constant 0 : i32
    return %c0_i32, %c0_i32_0, %c0_i32_1 : i32, i32, i32
  }
  func.func @transform_1(%arg0: i32) -> (i32, i32, i32) {
    %c0_i32 = arith.constant 0 : i32
    %c0_i32_0 = arith.constant 0 : i32
    %c0_i32_1 = arith.constant 0 : i32
    %c0_i32_2 = arith.constant 0 : i32
    return %c0_i32, %c0_i32_0, %c0_i32_1 : i32, i32, i32
  }
  func.func @transform_2(%arg0: i32) -> (i32, i32) {
    %c0_i32 = arith.constant 0 : i32
    %c0_i32_0 = arith.constant 0 : i32
    %c0_i32_1 = arith.constant 0 : i32
    return %c0_i32, %c0_i32_0 : i32, i32
  }
  func.func @transform_3(%arg0: i32) -> (i32, i32) {
    %c0_i32 = arith.constant 0 : i32
    %c0_i32_0 = arith.constant 0 : i32
    %c0_i32_1 = arith.constant 0 : i32
    return %c0_i32, %c0_i32_0 : i32, i32
  }
  func.func @transform_4(%arg0: i32) -> (i32, i32) {
    %c0_i32 = arith.constant 0 : i32
    %c0_i32_0 = arith.constant 0 : i32
    %c0_i32_1 = arith.constant 0 : i32
    return %c0_i32, %c0_i32_0 : i32, i32
  }
  func.func @transform_5(%arg0: i32) -> (i32, i32, i32) {
    %c0_i32 = arith.constant 0 : i32
    %c0_i32_0 = arith.constant 0 : i32
    %c0_i32_1 = arith.constant 0 : i32
    %c0_i32_2 = arith.constant 0 : i32
    return %c0_i32, %c0_i32_0, %c0_i32_1 : i32, i32, i32
  }
}

module attributes {stable_mosaic.version = 11 : i64} {
  func.func @_conv_bn_lrelu_kernel(%arg0: i32, %arg1: memref<2x30x128xbf16, #tpu.memory_space<vmem>>, %arg2: memref<4x128x128xbf16, #tpu.memory_space<vmem>>, %arg3: memref<20x1xf32, #tpu.memory_space<vmem>>, %arg4: memref<1x128xf32, #tpu.memory_space<vmem>>, %arg5: memref<1x128xf32, #tpu.memory_space<vmem>>, %arg6: memref<2x20x128xf32, #tpu.memory_space<vmem>>, %arg7: memref<2x20x128xf32, #tpu.memory_space<vmem>>) attributes {dimension_semantics = [#tpu.dimension_semantics<arbitrary>], iteration_bounds = array<i64: 1>, scalar_prefetch = 0 : i64, scratch_operands = 1 : i64, tpu.core_type = #tpu.core_type<tc>, window_params = [{pipeline_mode = #tpu.pipeline_mode<synchronous>, transform_indices = @transform_0, window_bounds = array<i64: 2, 30, 128>}, {pipeline_mode = #tpu.pipeline_mode<synchronous>, transform_indices = @transform_1, window_bounds = array<i64: 4, 128, 128>}, {pipeline_mode = #tpu.pipeline_mode<synchronous>, transform_indices = @transform_2, window_bounds = array<i64: 20, 1>}, {pipeline_mode = #tpu.pipeline_mode<synchronous>, transform_indices = @transform_3, window_bounds = array<i64: 1, 128>}, {pipeline_mode = #tpu.pipeline_mode<synchronous>, transform_indices = @transform_4, window_bounds = array<i64: 1, 128>}, {pipeline_mode = #tpu.pipeline_mode<synchronous>, transform_indices = @transform_5, window_bounds = array<i64: 2, 20, 128>}]} {
    %c0 = arith.constant 0 : index
    %c0_0 = arith.constant 0 : index
    %0 = vector.load %arg3[%c0, %c0_0] : memref<20x1xf32, #tpu.memory_space<vmem>>, vector<20x1xf32>
    %cst = arith.constant 0.000000e+00 : f32
    %1 = vector.broadcast %cst : f32 to vector<1x128xf32>
    %cst_1 = arith.constant 0.000000e+00 : f32
    %2 = vector.broadcast %cst_1 : f32 to vector<1x128xf32>
    %cst_2 = arith.constant 0.000000e+00 : f32
    %3 = vector.broadcast %cst_2 : f32 to vector<20x128xf32>
    %c0_3 = arith.constant 0 : index
    %c0_4 = arith.constant 0 : index
    %c0_5 = arith.constant 0 : index
    %4 = vector.load %arg1[%c0_3, %c0_4, %c0_5] : memref<2x30x128xbf16, #tpu.memory_space<vmem>>, vector<1x20x128xbf16>
    %5 = vector.shape_cast %4 : vector<1x20x128xbf16> to vector<20x128xbf16>
    %c0_6 = arith.constant 0 : index
    %c0_7 = arith.constant 0 : index
    %c0_8 = arith.constant 0 : index
    %6 = vector.load %arg2[%c0_6, %c0_7, %c0_8] : memref<4x128x128xbf16, #tpu.memory_space<vmem>>, vector<1x128x128xbf16>
    %7 = vector.shape_cast %6 : vector<1x128x128xbf16> to vector<128x128xbf16>
    %cst_9 = arith.constant dense<0.000000e+00> : vector<20x128xf32>
    %8 = tpu.matmul %5, %7, %cst_9 {dimension_numbers = #tpu.dot_dimension_numbers<[1], [0], [0], [1], [0, 0, 1, 1], [], []>} : vector<20x128xbf16>, vector<128x128xbf16>, vector<20x128xf32> -> vector<20x128xf32>
    %9 = arith.addf %3, %8 : vector<20x128xf32>
    %c0_10 = arith.constant 0 : index
    %c1 = arith.constant 1 : index
    %c0_11 = arith.constant 0 : index
    %10 = vector.load %arg1[%c0_10, %c1, %c0_11] : memref<2x30x128xbf16, #tpu.memory_space<vmem>>, vector<1x20x128xbf16>
    %11 = vector.shape_cast %10 : vector<1x20x128xbf16> to vector<20x128xbf16>
    %c1_12 = arith.constant 1 : index
    %c0_13 = arith.constant 0 : index
    %c0_14 = arith.constant 0 : index
    %12 = vector.load %arg2[%c1_12, %c0_13, %c0_14] : memref<4x128x128xbf16, #tpu.memory_space<vmem>>, vector<1x128x128xbf16>
    %13 = vector.shape_cast %12 : vector<1x128x128xbf16> to vector<128x128xbf16>
    %cst_15 = arith.constant dense<0.000000e+00> : vector<20x128xf32>
    %14 = tpu.matmul %11, %13, %cst_15 {dimension_numbers = #tpu.dot_dimension_numbers<[1], [0], [0], [1], [0, 0, 1, 1], [], []>} : vector<20x128xbf16>, vector<128x128xbf16>, vector<20x128xf32> -> vector<20x128xf32>
    %15 = arith.addf %9, %14 : vector<20x128xf32>
    %c0_16 = arith.constant 0 : index
    %c5 = arith.constant 5 : index
    %c0_17 = arith.constant 0 : index
    %16 = vector.load %arg1[%c0_16, %c5, %c0_17] : memref<2x30x128xbf16, #tpu.memory_space<vmem>>, vector<1x20x128xbf16>
    %17 = vector.shape_cast %16 : vector<1x20x128xbf16> to vector<20x128xbf16>
    %c2 = arith.constant 2 : index
    %c0_18 = arith.constant 0 : index
    %c0_19 = arith.constant 0 : index
    %18 = vector.load %arg2[%c2, %c0_18, %c0_19] : memref<4x128x128xbf16, #tpu.memory_space<vmem>>, vector<1x128x128xbf16>
    %19 = vector.shape_cast %18 : vector<1x128x128xbf16> to vector<128x128xbf16>
    %cst_20 = arith.constant dense<0.000000e+00> : vector<20x128xf32>
    %20 = tpu.matmul %17, %19, %cst_20 {dimension_numbers = #tpu.dot_dimension_numbers<[1], [0], [0], [1], [0, 0, 1, 1], [], []>} : vector<20x128xbf16>, vector<128x128xbf16>, vector<20x128xf32> -> vector<20x128xf32>
    %21 = arith.addf %15, %20 : vector<20x128xf32>
    %c0_21 = arith.constant 0 : index
    %c6 = arith.constant 6 : index
    %c0_22 = arith.constant 0 : index
    %22 = vector.load %arg1[%c0_21, %c6, %c0_22] : memref<2x30x128xbf16, #tpu.memory_space<vmem>>, vector<1x20x128xbf16>
    %23 = vector.shape_cast %22 : vector<1x20x128xbf16> to vector<20x128xbf16>
    %c3 = arith.constant 3 : index
    %c0_23 = arith.constant 0 : index
    %c0_24 = arith.constant 0 : index
    %24 = vector.load %arg2[%c3, %c0_23, %c0_24] : memref<4x128x128xbf16, #tpu.memory_space<vmem>>, vector<1x128x128xbf16>
    %25 = vector.shape_cast %24 : vector<1x128x128xbf16> to vector<128x128xbf16>
    %cst_25 = arith.constant dense<0.000000e+00> : vector<20x128xf32>
    %26 = tpu.matmul %23, %25, %cst_25 {dimension_numbers = #tpu.dot_dimension_numbers<[1], [0], [0], [1], [0, 0, 1, 1], [], []>} : vector<20x128xbf16>, vector<128x128xbf16>, vector<20x128xf32> -> vector<20x128xf32>
    %27 = arith.addf %21, %26 : vector<20x128xf32>
    %c0_26 = arith.constant 0 : index
    %c0_27 = arith.constant 0 : index
    %c0_28 = arith.constant 0 : index
    %28 = vector.load %arg7[%c0_26, %c0_27, %c0_28] : memref<2x20x128xf32, #tpu.memory_space<vmem>>, vector<1x20x128xf32>
    %29 = vector.shape_cast %28 : vector<1x20x128xf32> to vector<20x128xf32>
    %30 = vector.shape_cast %27 : vector<20x128xf32> to vector<1x20x128xf32>
    tpu.vector_store %arg7[%c0_26, %c0_27, %c0_28], %30 {strides = array<i32>} : memref<2x20x128xf32, #tpu.memory_space<vmem>>, vector<1x20x128xf32>,
    %31 = vector.broadcast %0 : vector<20x1xf32> to vector<20x128xf32>
    %32 = arith.mulf %27, %31 : vector<20x128xf32>
    %cst_29 = arith.constant dense<0.000000e+00> : vector<128xf32>
    %33 = vector.multi_reduction <add>, %32, %cst_29 [0] : vector<20x128xf32> to vector<128xf32>
    %34 = vector.shape_cast %33 : vector<128xf32> to vector<1x128xf32>
    %35 = arith.addf %1, %34 : vector<1x128xf32>
    %36 = arith.mulf %32, %27 : vector<20x128xf32>
    %cst_30 = arith.constant dense<0.000000e+00> : vector<128xf32>
    %37 = vector.multi_reduction <add>, %36, %cst_30 [0] : vector<20x128xf32> to vector<128xf32>
    %38 = vector.shape_cast %37 : vector<128xf32> to vector<1x128xf32>
    %39 = arith.addf %2, %38 : vector<1x128xf32>
    %cst_31 = arith.constant 0.000000e+00 : f32
    %40 = vector.broadcast %cst_31 : f32 to vector<20x128xf32>
    %c1_32 = arith.constant 1 : index
    %c0_33 = arith.constant 0 : index
    %c0_34 = arith.constant 0 : index
    %41 = vector.load %arg1[%c1_32, %c0_33, %c0_34] : memref<2x30x128xbf16, #tpu.memory_space<vmem>>, vector<1x20x128xbf16>
    %42 = vector.shape_cast %41 : vector<1x20x128xbf16> to vector<20x128xbf16>
    %c0_35 = arith.constant 0 : index
    %c0_36 = arith.constant 0 : index
    %c0_37 = arith.constant 0 : index
    %43 = vector.load %arg2[%c0_35, %c0_36, %c0_37] : memref<4x128x128xbf16, #tpu.memory_space<vmem>>, vector<1x128x128xbf16>
    %44 = vector.shape_cast %43 : vector<1x128x128xbf16> to vector<128x128xbf16>
    %cst_38 = arith.constant dense<0.000000e+00> : vector<20x128xf32>
    %45 = tpu.matmul %42, %44, %cst_38 {dimension_numbers = #tpu.dot_dimension_numbers<[1], [0], [0], [1], [0, 0, 1, 1], [], []>} : vector<20x128xbf16>, vector<128x128xbf16>, vector<20x128xf32> -> vector<20x128xf32>
    %46 = arith.addf %40, %45 : vector<20x128xf32>
    %c1_39 = arith.constant 1 : index
    %c1_40 = arith.constant 1 : index
    %c0_41 = arith.constant 0 : index
    %47 = vector.load %arg1[%c1_39, %c1_40, %c0_41] : memref<2x30x128xbf16, #tpu.memory_space<vmem>>, vector<1x20x128xbf16>
    %48 = vector.shape_cast %47 : vector<1x20x128xbf16> to vector<20x128xbf16>
    %c1_42 = arith.constant 1 : index
    %c0_43 = arith.constant 0 : index
    %c0_44 = arith.constant 0 : index
    %49 = vector.load %arg2[%c1_42, %c0_43, %c0_44] : memref<4x128x128xbf16, #tpu.memory_space<vmem>>, vector<1x128x128xbf16>
    %50 = vector.shape_cast %49 : vector<1x128x128xbf16> to vector<128x128xbf16>
    %cst_45 = arith.constant dense<0.000000e+00> : vector<20x128xf32>
    %51 = tpu.matmul %48, %50, %cst_45 {dimension_numbers = #tpu.dot_dimension_numbers<[1], [0], [0], [1], [0, 0, 1, 1], [], []>} : vector<20x128xbf16>, vector<128x128xbf16>, vector<20x128xf32> -> vector<20x128xf32>
    %52 = arith.addf %46, %51 : vector<20x128xf32>
    %c1_46 = arith.constant 1 : index
    %c5_47 = arith.constant 5 : index
    %c0_48 = arith.constant 0 : index
    %53 = vector.load %arg1[%c1_46, %c5_47, %c0_48] : memref<2x30x128xbf16, #tpu.memory_space<vmem>>, vector<1x20x128xbf16>
    %54 = vector.shape_cast %53 : vector<1x20x128xbf16> to vector<20x128xbf16>
    %c2_49 = arith.constant 2 : index
    %c0_50 = arith.constant 0 : index
    %c0_51 = arith.constant 0 : index
    %55 = vector.load %arg2[%c2_49, %c0_50, %c0_51] : memref<4x128x128xbf16, #tpu.memory_space<vmem>>, vector<1x128x128xbf16>
    %56 = vector.shape_cast %55 : vector<1x128x128xbf16> to vector<128x128xbf16>
    %cst_52 = arith.constant dense<0.000000e+00> : vector<20x128xf32>
    %57 = tpu.matmul %54, %56, %cst_52 {dimension_numbers = #tpu.dot_dimension_numbers<[1], [0], [0], [1], [0, 0, 1, 1], [], []>} : vector<20x128xbf16>, vector<128x128xbf16>, vector<20x128xf32> -> vector<20x128xf32>
    %58 = arith.addf %52, %57 : vector<20x128xf32>
    %c1_53 = arith.constant 1 : index
    %c6_54 = arith.constant 6 : index
    %c0_55 = arith.constant 0 : index
    %59 = vector.load %arg1[%c1_53, %c6_54, %c0_55] : memref<2x30x128xbf16, #tpu.memory_space<vmem>>, vector<1x20x128xbf16>
    %60 = vector.shape_cast %59 : vector<1x20x128xbf16> to vector<20x128xbf16>
    %c3_56 = arith.constant 3 : index
    %c0_57 = arith.constant 0 : index
    %c0_58 = arith.constant 0 : index
    %61 = vector.load %arg2[%c3_56, %c0_57, %c0_58] : memref<4x128x128xbf16, #tpu.memory_space<vmem>>, vector<1x128x128xbf16>
    %62 = vector.shape_cast %61 : vector<1x128x128xbf16> to vector<128x128xbf16>
    %cst_59 = arith.constant dense<0.000000e+00> : vector<20x128xf32>
    %63 = tpu.matmul %60, %62, %cst_59 {dimension_numbers = #tpu.dot_dimension_numbers<[1], [0], [0], [1], [0, 0, 1, 1], [], []>} : vector<20x128xbf16>, vector<128x128xbf16>, vector<20x128xf32> -> vector<20x128xf32>
    %64 = arith.addf %58, %63 : vector<20x128xf32>
    %c1_60 = arith.constant 1 : index
    %c0_61 = arith.constant 0 : index
    %c0_62 = arith.constant 0 : index
    %65 = vector.load %arg7[%c1_60, %c0_61, %c0_62] : memref<2x20x128xf32, #tpu.memory_space<vmem>>, vector<1x20x128xf32>
    %66 = vector.shape_cast %65 : vector<1x20x128xf32> to vector<20x128xf32>
    %67 = vector.shape_cast %64 : vector<20x128xf32> to vector<1x20x128xf32>
    tpu.vector_store %arg7[%c1_60, %c0_61, %c0_62], %67 {strides = array<i32>} : memref<2x20x128xf32, #tpu.memory_space<vmem>>, vector<1x20x128xf32>,
    %68 = vector.broadcast %0 : vector<20x1xf32> to vector<20x128xf32>
    %69 = arith.mulf %64, %68 : vector<20x128xf32>
    %cst_63 = arith.constant dense<0.000000e+00> : vector<128xf32>
    %70 = vector.multi_reduction <add>, %69, %cst_63 [0] : vector<20x128xf32> to vector<128xf32>
    %71 = vector.shape_cast %70 : vector<128xf32> to vector<1x128xf32>
    %72 = arith.addf %35, %71 : vector<1x128xf32>
    %73 = arith.mulf %69, %64 : vector<20x128xf32>
    %cst_64 = arith.constant dense<0.000000e+00> : vector<128xf32>
    %74 = vector.multi_reduction <add>, %73, %cst_64 [0] : vector<20x128xf32> to vector<128xf32>
    %75 = vector.shape_cast %74 : vector<128xf32> to vector<1x128xf32>
    %76 = arith.addf %39, %75 : vector<1x128xf32>
    %cst_65 = arith.constant 3.125000e-02 : f32
    %77 = vector.broadcast %cst_65 : f32 to vector<1x128xf32>
    %78 = arith.mulf %72, %77 : vector<1x128xf32>
    %cst_66 = arith.constant 3.125000e-02 : f32
    %79 = vector.broadcast %cst_66 : f32 to vector<1x128xf32>
    %80 = arith.mulf %76, %79 : vector<1x128xf32>
    %81 = arith.mulf %78, %78 : vector<1x128xf32>
    %82 = arith.subf %80, %81 : vector<1x128xf32>
    %c0_67 = arith.constant 0 : index
    %c0_68 = arith.constant 0 : index
    %83 = vector.load %arg4[%c0_67, %c0_68] : memref<1x128xf32, #tpu.memory_space<vmem>>, vector<1x128xf32>
    %cst_69 = arith.constant 9.99999974E-6 : f32
    %84 = vector.broadcast %cst_69 : f32 to vector<1x128xf32>
    %85 = arith.addf %82, %84 : vector<1x128xf32>
    %86 = math.rsqrt %85 : vector<1x128xf32>
    %87 = arith.mulf %83, %86 : vector<1x128xf32>
    %c0_70 = arith.constant 0 : index
    %c0_71 = arith.constant 0 : index
    %88 = vector.load %arg5[%c0_70, %c0_71] : memref<1x128xf32, #tpu.memory_space<vmem>>, vector<1x128xf32>
    %89 = arith.mulf %78, %87 : vector<1x128xf32>
    %90 = arith.subf %88, %89 : vector<1x128xf32>
    %c0_72 = arith.constant 0 : index
    %c0_73 = arith.constant 0 : index
    %c0_74 = arith.constant 0 : index
    %91 = vector.load %arg7[%c0_72, %c0_73, %c0_74] : memref<2x20x128xf32, #tpu.memory_space<vmem>>, vector<1x20x128xf32>
    %92 = vector.shape_cast %91 : vector<1x20x128xf32> to vector<20x128xf32>
    %93 = vector.broadcast %87 : vector<1x128xf32> to vector<20x128xf32>
    %94 = arith.mulf %92, %93 : vector<20x128xf32>
    %95 = vector.broadcast %90 : vector<1x128xf32> to vector<20x128xf32>
    %96 = arith.addf %94, %95 : vector<20x128xf32>
    %cst_75 = arith.constant 0.000000e+00 : f32
    %97 = vector.broadcast %cst_75 : f32 to vector<20x128xf32>
    %98 = arith.cmpf ogt, %96, %97 : vector<20x128xf32>
    %cst_76 = arith.constant 2.000000e-01 : f32
    %99 = vector.broadcast %cst_76 : f32 to vector<20x128xf32>
    %100 = arith.mulf %99, %96 : vector<20x128xf32>
    %101 = arith.select %98, %96, %100 : vector<20x128xi1>, vector<20x128xf32>
    %c0_77 = arith.constant 0 : index
    %c0_78 = arith.constant 0 : index
    %c0_79 = arith.constant 0 : index
    %102 = vector.load %arg6[%c0_77, %c0_78, %c0_79] : memref<2x20x128xf32, #tpu.memory_space<vmem>>, vector<1x20x128xf32>
    %103 = vector.shape_cast %102 : vector<1x20x128xf32> to vector<20x128xf32>
    %104 = vector.shape_cast %101 : vector<20x128xf32> to vector<1x20x128xf32>
    tpu.vector_store %arg6[%c0_77, %c0_78, %c0_79], %104 {strides = array<i32>} : memref<2x20x128xf32, #tpu.memory_space<vmem>>, vector<1x20x128xf32>,
    %c1_80 = arith.constant 1 : index
    %c0_81 = arith.constant 0 : index
    %c0_82 = arith.constant 0 : index
    %105 = vector.load %arg7[%c1_80, %c0_81, %c0_82] : memref<2x20x128xf32, #tpu.memory_space<vmem>>, vector<1x20x128xf32>
    %106 = vector.shape_cast %105 : vector<1x20x128xf32> to vector<20x128xf32>
    %107 = vector.broadcast %87 : vector<1x128xf32> to vector<20x128xf32>
    %108 = arith.mulf %106, %107 : vector<20x128xf32>
    %109 = vector.broadcast %90 : vector<1x128xf32> to vector<20x128xf32>
    %110 = arith.addf %108, %109 : vector<20x128xf32>
    %cst_83 = arith.constant 0.000000e+00 : f32
    %111 = vector.broadcast %cst_83 : f32 to vector<20x128xf32>
    %112 = arith.cmpf ogt, %110, %111 : vector<20x128xf32>
    %cst_84 = arith.constant 2.000000e-01 : f32
    %113 = vector.broadcast %cst_84 : f32 to vector<20x128xf32>
    %114 = arith.mulf %113, %110 : vector<20x128xf32>
    %115 = arith.select %112, %110, %114 : vector<20x128xi1>, vector<20x128xf32>
    %c1_85 = arith.constant 1 : index
    %c0_86 = arith.constant 0 : index
    %c0_87 = arith.constant 0 : index
    %116 = vector.load %arg6[%c1_85, %c0_86, %c0_87] : memref<2x20x128xf32, #tpu.memory_space<vmem>>, vector<1x20x128xf32>
    %117 = vector.shape_cast %116 : vector<1x20x128xf32> to vector<20x128xf32>
    %118 = vector.shape_cast %115 : vector<20x128xf32> to vector<1x20x128xf32>
    tpu.vector_store %arg6[%c1_85, %c0_86, %c0_87], %118 {strides = array<i32>} : memref<2x20x128xf32, #tpu.memory_space<vmem>>, vector<1x20x128xf32>,
    return
  }
  func.func @transform_0(%arg0: i32) -> (i32, i32, i32) {
    %c0_i32 = arith.constant 0 : i32
    %c0_i32_0 = arith.constant 0 : i32
    %c0_i32_1 = arith.constant 0 : i32
    %c0_i32_2 = arith.constant 0 : i32
    return %c0_i32, %c0_i32_0, %c0_i32_1 : i32, i32, i32
  }
  func.func @transform_1(%arg0: i32) -> (i32, i32, i32) {
    %c0_i32 = arith.constant 0 : i32
    %c0_i32_0 = arith.constant 0 : i32
    %c0_i32_1 = arith.constant 0 : i32
    %c0_i32_2 = arith.constant 0 : i32
    return %c0_i32, %c0_i32_0, %c0_i32_1 : i32, i32, i32
  }
  func.func @transform_2(%arg0: i32) -> (i32, i32) {
    %c0_i32 = arith.constant 0 : i32
    %c0_i32_0 = arith.constant 0 : i32
    %c0_i32_1 = arith.constant 0 : i32
    return %c0_i32, %c0_i32_0 : i32, i32
  }
  func.func @transform_3(%arg0: i32) -> (i32, i32) {
    %c0_i32 = arith.constant 0 : i32
    %c0_i32_0 = arith.constant 0 : i32
    %c0_i32_1 = arith.constant 0 : i32
    return %c0_i32, %c0_i32_0 : i32, i32
  }
  func.func @transform_4(%arg0: i32) -> (i32, i32) {
    %c0_i32 = arith.constant 0 : i32
    %c0_i32_0 = arith.constant 0 : i32
    %c0_i32_1 = arith.constant 0 : i32
    return %c0_i32, %c0_i32_0 : i32, i32
  }
  func.func @transform_5(%arg0: i32) -> (i32, i32, i32) {
    %c0_i32 = arith.constant 0 : i32
    %c0_i32_0 = arith.constant 0 : i32
    %c0_i32_1 = arith.constant 0 : i32
    %c0_i32_2 = arith.constant 0 : i32
    return %c0_i32, %c0_i32_0, %c0_i32_1 : i32, i32, i32
  }
}

</mosaic_0001>

<bundles_post_ra>
// kernel: stage1_d_img_forward.4
= control target key start
LH: loop header
LB: loop body
LE: loop exit
PB: predicated region body
PF: predicated region fallthrough
CT: control target
= control target key end

     0   :  { %s6767_s9 = smov 0   ;;  %s7753_s0 = inlined_call_operand.vmem [shape: bf16[2,1122,16], index: 0, kind: input, shape index: {}]   ;;  %s7754_s1 = inlined_call_operand.vmem [shape: bf16[4,16,128], index: 1, kind: input, shape index: {}]   ;;  %s7755_s2 = inlined_call_operand.vmem [shape: bf16[2,1056,128], index: 2, kind: output, shape index: {}]  }
   0x1 LB: > { %s5377_s10 = sadd.s32 4294967295, %s6750_s9   ;;  %p5381_p0 = scmp.ge.s32.totalorder %s6750_s9, 1  ;;  %s6750_s9 = sphi %s6767_s9, %s12_s9  }
   0x2   : > { %p112_p1 = scmp.lt.s32.totalorder %s6750_s9, 3 }
   0x4   : > { %p113_p2 = pnand %p5381_p0, %p112_p1 }
   0x5   : > { %p134_p3 = scmp.lt.s32.totalorder (!%p113_p2), %s5377_s10, 1 }
   0x6   : > { %116 = sbr.rel (%p113_p2) target bundleno = 1215 (0x4bf), region = 28 }
   0xb   : > { %v6262_v0 = vld [vmem:[%s7754_s1] sm:$0xff]  ;;  %v6330_v1 = vld [vmem:[%s7754_s1 + $0x18] sm:$0xff]  ;;  %v6329_v2 = vld [vmem:[%s7754_s1 + $0x10] sm:$0xff]  ;;  %s7757_s10 = smov (!%p134_p3, %s5377_s10), 1  ;;  %vm1155_vm0 = vcmask 130048   ;;  %vm3853_vm1 = vcmask 1046528  }
   0xc   : > { %v6263_v3 = vld [vmem:[%s7754_s1 + $0x8] sm:$0xff]  ;;  %1838 = vmatpush.bf16.msra.mxu1 %v6262_v0  ;;  %4198 = vmatpush.bf16.msra.mxu3 %v6330_v1  ;;  %s6734_s19 = smul.u32 564, %s7757_s10  ;;  %vm616_vm2 = vsmask.f32 7424 }
   0xd   : > { %3382 = vmatpush.bf16.msra.mxu2 %v6329_v2  ;;  %1361 = vmatpush.bf16.msra.mxu0 %v6263_v3  ;;  %s6735_s23 = smul.u32 528, %s7757_s10 }
   0xe   : > { %s6793_s22 = scalar_lea.vmem %s7753_s0, %s6734_s19 }
   0xf   : > { %v6196_v4 = vld [vmem:[%s6793_s22] sm:$0xff]  ;;  %v6666_v5 = vld [vmem:[%s6793_s22 + $0x10] sm:$0xf0]  ;;  %v6264_v6 = vld [vmem:[%s6793_s22 + $0x18] sm:$0xff]  ;;  %s6901_s26 = scalar_lea.vmem %s7755_s2, %s6735_s23 }
  0x10   : > { %v6667_v7 = vld [vmem:[%s6793_s22 + $0x10] sm:$0xe]  ;;  %v6197_v9 = vld [vmem:[%s6793_s22 + $0x8] sm:$0xff]  ;;  %v620_v10 = vshll.u32 %v6196_v4, 16  ;;  %5724 = vmatmul.msk.bf16.vlgmr.msra.gmra.mxu1 %vm1155_vm0, %v6196_v4  ;;  %v3855_v12 = vrot.slane %v6264_v6, 1  ;;  %v2647_v15 = vshll.u32 %v6264_v6, 16 }
  0x11   : > { %v6665_v8 = vld [vmem:[%s6793_s22 + $0x10] sm:$0xff]   ;;  %v6668_v11 = vor.u32 %v6667_v7, %v6666_v5  ;;  %v618_v16 = vshrl.u32 %v6196_v4, 16  ;;  %v625_v17 = vshll.u32 %v6197_v9, 16  ;;  %v6265_v29 = vld [vmem:[%s6793_s22 + $0x20] sm:$0xff]  ;;  %v629_v30 = vshrl.u32 %v6197_v9, 16  ;;  %v6199_v42 = vld [vmem:[%s6793_s22 + $0x18] sm:$0xff] }
  0x12   : > { %v2640_v13 = vshrl.u32 %v6665_v8, 16  ;;  %v2642_v14 = vshll.u32 %v6665_v8, 16  ;;  %v622_v19 = vrot.slane %v620_v10, 1  ;;  %v2649_v21 = vrot.slane %v2647_v15, 1  ;;  %v6198_v28 = vld [vmem:[%s6793_s22 + $0x10] sm:$0xff]  ;;  %v6266_v43 = vld [vmem:[%s6793_s22 + $0x28] sm:$0xff] }
  0x13   : > { %v3854_v18 = vrot.slane %v6668_v11, 1  ;;  %v627_v22 = vrot.slane %v625_v17, 1  ;;  %v633_v31 = vshll.u32 %v6198_v28, 16  ;;  %v2651_v32 = vshrl.u32 %v6264_v6, 16  ;;  %v6200_v56 = vld [vmem:[%s6793_s22 + $0x20] sm:$0xff]  ;;  %v6267_v57 = vld [vmem:[%s6793_s22 + $0x30] sm:$0xff] }
  0x14   : > { %v2644_v20 = vrot.slane %v2642_v14, 1  ;;  %v623_v24 = vor.u32 %v622_v19, %v618_v16  ;;  %v2655_v33 = vshll.u32 %v6265_v29, 16  ;;  %v3857_v34 = vrot.slane %v6265_v29, 1  ;;  %v6201_v6 = vld [vmem:[%s6793_s22 + $0x28] sm:$0xff]  ;;  %v6268_v7 = vld [vmem:[%s6793_s22 + $0x38] sm:$0xff] }
  0x15   : > { %v3856_v23 = vsel %vm3853_vm1, %v3854_v18, %v3855_v12  ;;  %v631_v35 = vor.u32 %v629_v30, %v627_v22  ;;  %v635_v36 = vrot.slane %v633_v31, 1  ;;  %v2653_v37 = vor.u32 %v2651_v32, %v2649_v21 }
  0x16   : > { %6128 = vmatmul.msk.bf16.vlgmr.msra.gmra.mxu3 %vm1155_vm0, %v3856_v23  ;;  %v2645_v25 = vor.u32 %v2644_v20, %v2640_v13  ;;  %v628_v26 = vsel %vm616_vm2, %v623_v24, %v627_v22  ;;  %v2657_v38 = vrot.slane %v2655_v33, 1  ;;  %v3858_v39 = vsel %vm3853_vm1, %v3855_v12, %v3857_v34  ;;  %v6202_v20 = vld [vmem:[%s6793_s22 + $0x30] sm:$0xff] }
  0x17   : > { %5654 = vmatmul.msk.bf16.vlgmr.msra.gmra.mxu0 %vm1155_vm0, %v628_v26  ;;  %v636_v40 = vsel %vm616_vm2, %v631_v35, %v635_v36  ;;  %v637_v44 = vshrl.u32 %v6198_v28, 16  ;;  %v641_v45 = vshll.u32 %v6199_v42, 16  ;;  %v2659_v46 = vshrl.u32 %v6265_v29, 16  ;;  %v6270_v35 = vld [vmem:[%s6793_s22 + $0x48] sm:$0xff] }
  0x18   : > { %v2650_v27 = vsel %vm616_vm2, %v2645_v25, %v2649_v21  ;;  %v2658_v41 = vsel %vm616_vm2, %v2653_v37, %v2657_v38  ;;  %v2663_v47 = vshll.u32 %v6266_v43, 16  ;;  %v3859_v48 = vrot.slane %v6266_v43, 1  ;;  %v6269_v21 = vld [vmem:[%s6793_s22 + $0x40] sm:$0xff] }
  0x19   : > { %6056 = vmatmul.msk.bf16.vlgmr.msra.gmra.mxu2 %vm1155_vm0, %v2650_v27  ;;  %v639_v49 = vor.u32 %v637_v44, %v635_v36  ;;  %v643_v50 = vrot.slane %v641_v45, 1  ;;  %v2661_v51 = vor.u32 %v2659_v46, %v2657_v38  ;;  %v645_v58 = vshrl.u32 %v6199_v42, 16 }
  0x1a   : > { %v2665_v52 = vrot.slane %v2663_v47, 1  ;;  %v3860_v53 = vsel %vm3853_vm1, %v3857_v34, %v3859_v48  ;;  %v649_v59 = vshll.u32 %v6200_v56, 16  ;;  %v2667_v60 = vshrl.u32 %v6266_v43, 16  ;;  %v6203_v34 = vld [vmem:[%s6793_s22 + $0x38] sm:$0xff] }
  0x1b   : > { %v644_v54 = vsel %vm616_vm2, %v639_v49, %v643_v50  ;;  %v2671_v61 = vshll.u32 %v6267_v57, 16  ;;  %v3861_v62 = vrot.slane %v6267_v57, 1  ;;  %v647_v63 = vor.u32 %v645_v58, %v643_v50  ;;  %v6271_v49 = vld [vmem:[%s6793_s22 + $0x50] sm:$0xff] }
  0x1c   : > { %v2666_v55 = vsel %vm616_vm2, %v2661_v51, %v2665_v52  ;;  %v651_v0 = vrot.slane %v649_v59, 1  ;;  %v2669_v1 = vor.u32 %v2667_v60, %v2665_v52  ;;  %v653_v8 = vshrl.u32 %v6200_v56, 16 }
  0x1d   : > { %v2673_v2 = vrot.slane %v2671_v61, 1  ;;  %v3862_v3 = vsel %vm3853_vm1, %v3859_v48, %v3861_v62  ;;  %v2675_v10 = vshrl.u32 %v6267_v57, 16  ;;  %v2679_v11 = vshll.u32 %v6268_v7, 16  ;;  %v6204_v48 = vld [vmem:[%s6793_s22 + $0x40] sm:$0xff] }
  0x1e   : > { %v652_v4 = vsel %vm616_vm2, %v647_v63, %v651_v0  ;;  %v3863_v12 = vrot.slane %v6268_v7, 1  ;;  %v655_v13 = vor.u32 %v653_v8, %v651_v0  ;;  %v661_v22 = vshrl.u32 %v6201_v6, 16  ;;  %v6272_v63 = vld [vmem:[%s6793_s22 + $0x58] sm:$0xff] }
  0x1f   : > { %v2674_v5 = vsel %vm616_vm2, %v2669_v1, %v2673_v2  ;;  %v2677_v15 = vor.u32 %v2675_v10, %v2673_v2  ;;  %v2681_v16 = vrot.slane %v2679_v11, 1  ;;  %v665_v23 = vshll.u32 %v6202_v20, 16 }
  0x20   : > { %5725 = vmatmul.msk.bf16.gmra.mxu1 %vm1155_vm0, %v6197_v9  ;;  %v657_v9 = vshll.u32 %v6201_v6, 16  ;;  %v3864_v17 = vsel %vm3853_vm1, %v3861_v62, %v3863_v12  ;;  %v2683_v24 = vshrl.u32 %v6268_v7, 16  ;;  %v2687_v25 = vshll.u32 %v6269_v21, 16  ;;  %v6205_v62 = vld [vmem:[%s6793_s22 + $0x48] sm:$0xff] }
  0x21   : > { %v2682_v19 = vsel %vm616_vm2, %v2677_v15, %v2681_v16  ;;  %v3865_v26 = vrot.slane %v6269_v21, 1  ;;  %v669_v36 = vshrl.u32 %v6202_v20, 16  ;;  %v673_v37 = vshll.u32 %v6203_v34, 16 }
  0x22   : > { %v659_v14 = vrot.slane %v657_v9, 1  ;;  %v2685_v29 = vor.u32 %v2683_v24, %v2681_v16  ;;  %v2689_v30 = vrot.slane %v2687_v25, 1  ;;  %v2691_v38 = vshrl.u32 %v6269_v21, 16  ;;  %v6206_v16 = vld [vmem:[%s6793_s22 + $0x50] sm:$0xff] }
  0x23   : > { %v3866_v31 = vsel %vm3853_vm1, %v3863_v12, %v3865_v26  ;;  %v677_v50 = vshrl.u32 %v6203_v34, 16  ;;  %v681_v51 = vshll.u32 %v6204_v48, 16  ;;  %v2699_v52 = vshrl.u32 %v6270_v35, 16 }
  0x24   : > { %v660_v18 = vsel %vm616_vm2, %v655_v13, %v659_v14  ;;  %v663_v27 = vor.u32 %v661_v22, %v659_v14  ;;  %v2690_v33 = vsel %vm616_vm2, %v2685_v29, %v2689_v30  ;;  %v2693_v43 = vor.u32 %v2691_v38, %v2689_v30 }
  0x25   : > { %v685_v0 = vshrl.u32 %v6204_v48, 16  ;;  %v689_v1 = vshll.u32 %v6205_v62, 16  ;;  %v693_v21 = vshrl.u32 %v6205_v62, 16  ;;  %v697_v22 = vshll.u32 %v6206_v16, 16 }
  0x26   : > { %6129 = vmatmul.msk.bf16.gmra.mxu3 %vm1155_vm0, %v3858_v39  ;;  %v2695_v39 = vshll.u32 %v6270_v35, 16  ;;  %v2715_v24 = vshrl.u32 %v6272_v63, 16 }
  0x27   : > { %5655 = vmatmul.msk.bf16.gmra.mxu0 %vm1155_vm0, %v636_v40  ;;  %v3867_v40 = vrot.slane %v6270_v35, 1  ;;  %v691_v7 = vrot.slane %v689_v1, 1  ;;  %v699_v30 = vrot.slane %v697_v22, 1 }
  0x28   : > { %v2697_v44 = vrot.slane %v2695_v39, 1 }
  0x29   : > { %6057 = vmatmul.msk.bf16.gmra.mxu2 %vm1155_vm0, %v2658_v41  ;;  %v3868_v45 = vsel %vm3853_vm1, %v3865_v26, %v3867_v40  ;;  %v695_v29 = vor.u32 %v693_v21, %v691_v7 }
  0x2a   : > { %v2698_v47 = vsel %vm616_vm2, %v2693_v43, %v2697_v44  ;;  %v2701_v57 = vor.u32 %v2699_v52, %v2697_v44 }
  0x2b   : > { %v700_v39 = vsel %vm616_vm2, %v695_v29, %v699_v30 }
  0x30   : > { %5726 = vmatmul.msk.bf16.gmra.mxu1 %vm1155_vm0, %v6198_v28  ;;  %v667_v28 = vrot.slane %v665_v23, 1 }
  0x32   : > { %v668_v32 = vsel %vm616_vm2, %v663_v27, %v667_v28  ;;  %v671_v41 = vor.u32 %v669_v36, %v667_v28 }
  0x36   : > { %6130 = vmatmul.msk.bf16.gmra.mxu3 %vm1155_vm0, %v3860_v53  ;;  %v2703_v53 = vshll.u32 %v6271_v49, 16 }
  0x37   : > { %5656 = vmatmul.msk.bf16.gmra.mxu0 %vm1155_vm0, %v644_v54  ;;  %v3869_v54 = vrot.slane %v6271_v49, 1 }
  0x38   : > { %v2705_v58 = vrot.slane %v2703_v53, 1 }
  0x39   : > { %6058 = vmatmul.msk.bf16.gmra.mxu2 %vm1155_vm0, %v2666_v55  ;;  %v3870_v59 = vsel %vm3853_vm1, %v3867_v40, %v3869_v54 }
  0x3a   : > { %v2706_v61 = vsel %vm616_vm2, %v2701_v57, %v2705_v58 }
  0x40   : > { %5727 = vmatmul.msk.bf16.gmra.mxu1 %vm1155_vm0, %v6199_v42  ;;  %v675_v42 = vrot.slane %v673_v37, 1 }
  0x42   : > { %v676_v46 = vsel %vm616_vm2, %v671_v41, %v675_v42  ;;  %v679_v55 = vor.u32 %v677_v50, %v675_v42 }
  0x46   : > { %6131 = vmatmul.msk.bf16.gmra.mxu3 %vm1155_vm0, %v3862_v3  ;;  %v2707_v3 = vshrl.u32 %v6271_v49, 16 }
  0x47   : > { %5657 = vmatmul.msk.bf16.gmra.mxu0 %vm1155_vm0, %v652_v4  ;;  %v2711_v4 = vshll.u32 %v6272_v63, 16 }
  0x48   : > { %v2709_v8 = vor.u32 %v2707_v3, %v2705_v58 }
  0x49   : > { %6059 = vmatmul.msk.bf16.gmra.mxu2 %vm1155_vm0, %v2674_v5  ;;  %v3871_v5 = vrot.slane %v6272_v63, 1  ;;  %v2713_v9 = vrot.slane %v2711_v4, 1 }
  0x4b   : > { %v3872_v10 = vsel %vm3853_vm1, %v3869_v54, %v3871_v5  ;;  %v2714_v13 = vsel %vm616_vm2, %v2709_v8, %v2713_v9  ;;  %v701_v54 = vshrl.u32 %v6206_v16, 16 }
  0x50   : > { %5728 = vmatmul.msk.bf16.gmra.mxu1 %vm1155_vm0, %v6200_v56  ;;  %v683_v56 = vrot.slane %v681_v51, 1 }
  0x52   : > { %v684_v60 = vsel %vm616_vm2, %v679_v55, %v683_v56 }
  0x56   : > { %6132 = vmatmul.msk.bf16.gmra.mxu3 %vm1155_vm0, %v3864_v17  ;;  %v6882_v17 = vld [vmem:[%s6793_s22 + $0x60] sm:$0xff] }
  0x57   : > { %5658 = vmatmul.msk.bf16.gmra.mxu0 %vm1155_vm0, %v660_v18  ;;  %v2719_v25 = vshll.u32 %v6882_v17, 16  ;;  %v3873_v27 = vrot.slane %v6882_v17, 1  ;;  %v2723_v57 = vshrl.u32 %v6882_v17, 16 }
  0x59   : > { %6060 = vmatmul.msk.bf16.gmra.mxu2 %vm1155_vm0, %v2682_v19  ;;  %v3874_v35 = vsel %vm3853_vm1, %v3871_v5, %v3873_v27 }
  0x60   : > { %5729 = vmatmul.msk.bf16.gmra.mxu1 %vm1155_vm0, %v6201_v6  ;;  %v687_v6 = vor.u32 %v685_v0, %v683_v56 }
  0x62   : > { %v692_v12 = vsel %vm616_vm2, %v687_v6, %v691_v7 }
  0x66   : > { %6133 = vmatmul.msk.bf16.gmra.mxu3 %vm1155_vm0, %v3866_v31  ;;  %v2717_v31 = vor.u32 %v2715_v24, %v2713_v9 }
  0x67   : > { %5659 = vmatmul.msk.bf16.gmra.mxu0 %vm1155_vm0, %v668_v32  ;;  %v2721_v32 = vrot.slane %v2719_v25, 1 }
  0x69   : > { %6061 = vmatmul.msk.bf16.gmra.mxu2 %vm1155_vm0, %v2690_v33  ;;  %v2722_v40 = vsel %vm616_vm2, %v2717_v31, %v2721_v32  ;;  %v2725_v0 = vor.u32 %v2723_v57, %v2721_v32 }
  0x70   : > { %5730 = vmatmul.msk.bf16.gmra.mxu1 %vm1155_vm0, %v6202_v20 }
  0x76   : > { %6134 = vmatmul.msk.bf16.gmra.mxu3 %vm1155_vm0, %v3868_v45 }
  0x77   : > { %5660 = vmatmul.msk.bf16.gmra.mxu0 %vm1155_vm0, %v676_v46  ;;  %v6207_v46 = vld [vmem:[%s6793_s22 + $0x58] sm:$0xff] }
  0x78   : > { %v705_v55 = vshll.u32 %v6207_v46, 16 }
  0x79   : > { %6062 = vmatmul.msk.bf16.gmra.mxu2 %vm1155_vm0, %v2698_v47  ;;  %v6896_v47 = vld [vmem:[%s6793_s22 + $0x68] sm:$0xff] }
  0x7a   : > { %v2727_v58 = vshll.u32 %v6896_v47, 16  ;;  %v707_v63 = vrot.slane %v705_v55, 1 }
  0x7c   : > { %v2729_v1 = vrot.slane %v2727_v58, 1 }
  0x7e   : > { %v2730_v9 = vsel %vm616_vm2, %v2725_v0, %v2729_v1 }
  0x80   : > { %5731 = vmatmul.msk.bf16.gmra.mxu1 %vm1155_vm0, %v6203_v34 }
  0x86   : > { %6135 = vmatmul.msk.bf16.gmra.mxu3 %vm1155_vm0, %v3870_v59 }
  0x87   : > { %5661 = vmatmul.msk.bf16.gmra.mxu0 %vm1155_vm0, %v684_v60  ;;  %v3875_v60 = vrot.slane %v6896_v47, 1 }
  0x89   : > { %6063 = vmatmul.msk.bf16.gmra.mxu2 %vm1155_vm0, %v2706_v61  ;;  %v3876_v4 = vsel %vm3853_vm1, %v3873_v27, %v3875_v60 }
  0x8d   : > { %v1840_v2 = vpop.f32.mrf.mxu1 }
  0x90   : > { %5732 = vmatmul.msk.bf16.gmra.mxu1 %vm1155_vm0, %v6204_v48 }
  0x94   : > { %v1363_v11 = vpop.f32.mrf.mxu0 }
  0x95   : > { %v1842_v14 = vpop.f32.mrf.mxu1  ;;  %v1841_v18 = vadd.f32 %v1840_v2, %v1363_v11 }
  0x96   : > { %6136 = vmatmul.msk.bf16.gmra.mxu3 %vm1155_vm0, %v3872_v10 }
  0x97   : > { %5662 = vmatmul.msk.bf16.gmra.mxu0 %vm1155_vm0, %v692_v12 }
  0x99   : > { %6064 = vmatmul.msk.bf16.gmra.mxu2 %vm1155_vm0, %v2714_v13  ;;  %v4200_v15 = vpop.f32.mrf.mxu3 }
  0x9c   : > { %v3384_v19 = vpop.f32.mrf.mxu2  ;;  %v1365_v20 = vpop.f32.mrf.mxu0 }
  0x9d   : > { %v1845_v23 = vpop.f32.mrf.mxu1  ;;  %v3714_v26 = vadd.f32 %v3384_v19, %v1841_v18  ;;  %v1843_v34 = vadd.f32 %v1842_v14, %v1365_v20 }
  0x9f   : > { %v4530_v33 = vadd.f32 %v4200_v15, %v3714_v26  ;;  %v6208_v15 = vld [vmem:[%s6793_s22 + $0x60] sm:$0xff]  ;;  %v2731_v26 = vshrl.u32 %v6896_v47, 16 }
  0xa0   : > { %5733 = vmatmul.msk.bf16.gmra.mxu1 %vm1155_vm0, %v6205_v62  ;;  %v703_v62 = vor.u32 %v701_v54, %v699_v30  ;;  %v713_v24 = vshll.u32 %v6208_v15, 16 }
  0xa1   : > { %v4202_v28 = vpop.f32.mrf.mxu3  ;;  %v4794_v42 = vmul.f32 0.2, %v4530_v33  ;;  %vm4662_vm3 = vcmp.gt.f32.partialorder %v4530_v33, 0.0 }
  0xa2   : > { %v708_v8 = vsel %vm616_vm2, %v703_v62, %v707_v63  ;;  %v715_v32 = vrot.slane %v713_v24, 1 }
  0xa3   : > { %v4926_v48 = vsel %vm4662_vm3, %v4530_v33, %v4794_v42  ;;  %v2733_v33 = vor.u32 %v2731_v26, %v2729_v1 }
  0xa4   : > { %v3386_v36 = vpop.f32.mrf.mxu2  ;;  %v1368_v38 = vpop.f32.mrf.mxu0 }
  0xa5   : > { %v3715_v37 = vadd.f32 %v3386_v36, %v1843_v34  ;;  %v1847_v41 = vpop.f32.mrf.mxu1  ;;  %v1846_v50 = vadd.f32 %v1845_v23, %v1368_v38  ;;  %v709_v23 = vshrl.u32 %v6207_v46, 16 }
  0xa6   : > { %6137 = vmatmul.msk.bf16.gmra.mxu3 %vm1155_vm0, %v3874_v35 }
  0xa7   : > { %v4531_v43 = vadd.f32 %v4202_v28, %v3715_v37  ;;  %5663 = vmatmul.msk.bf16.gmra.mxu0 %vm1155_vm0, %v700_v39  ;;  %v711_v31 = vor.u32 %v709_v23, %v707_v63 }
  0xa9   : > { %vm4663_vm4 = vcmp.gt.f32.partialorder %v4531_v43, 0.0  ;;  %v4795_v44 = vmul.f32 0.2, %v4531_v43  ;;  %6065 = vmatmul.msk.bf16.gmra.mxu2 %vm1155_vm0, %v2722_v40  ;;  %v4205_v45 = vpop.f32.mrf.mxu3 }
  0xab   : > { %v4927_v49 = vsel %vm4663_vm4, %v4531_v43, %v4795_v44 }
  0xac   : > { %v6338_v51 = vpack.c.bf16 %v4927_v49, %v4926_v48  ;;  %v3389_v52 = vpop.f32.mrf.mxu2  ;;  %v1370_v53 = vpop.f32.mrf.mxu0  ;;  %v6209_v48 = vld [vmem:[%s6793_s22 + $0x68] sm:$0xff]  ;;  %v6931_v49 = vld [vmem:[%s6793_s22 + $0x78] sm:$0xff] }
  0xad   : > { %v1850_v56 = vpop.f32.mrf.mxu1  ;;  %v3716_v59 = vadd.f32 %v3389_v52, %v1846_v50  ;;  %v1848_v3 = vadd.f32 %v1847_v41, %v1370_v53  ;;  %v716_v41 = vsel %vm616_vm2, %v711_v31, %v715_v32  ;;  %v721_v57 = vshll.u32 %v6209_v48, 16 }
  0xae   : > { %6339 = vst [vmem:[%s6901_s26] sm:$0xff] %v6338_v51   ;;  %v3879_v62 = vrot.slane %v6931_v49, 1 }
  0xaf   : > { %v4532_v2 = vadd.f32 %v4205_v45, %v3716_v59  ;;  %v723_v1 = vrot.slane %v721_v57, 1 }
  0xb0   : > { %5734 = vmatmul.msk.bf16.gmra.mxu1 %vm1155_vm0, %v6206_v16  ;;  %v6916_v16 = vld [vmem:[%s6793_s22 + $0x70] sm:$0xff] }
  0xb1   : > { %v4207_v61 = vpop.f32.mrf.mxu3  ;;  %v4796_v11 = vmul.f32 0.2, %v4532_v2  ;;  %vm4664_vm5 = vcmp.gt.f32.partialorder %v4532_v2, 0.0  ;;  %v2735_v27 = vshll.u32 %v6916_v16, 16  ;;  %v3877_v29 = vrot.slane %v6916_v16, 1 }
  0xb2   : > { %v2739_v59 = vshrl.u32 %v6916_v16, 16 }
  0xb3   : > { %v4928_v17 = vsel %vm4664_vm5, %v4532_v2, %v4796_v11  ;;  %v2737_v34 = vrot.slane %v2735_v27, 1  ;;  %v3878_v37 = vsel %vm3853_vm1, %v3875_v60, %v3877_v29  ;;  %v2743_v60 = vshll.u32 %v6931_v49, 16 }
  0xb4   : > { %v3391_v5 = vpop.f32.mrf.mxu2  ;;  %v1373_v7 = vpop.f32.mrf.mxu0 }
  0xb5   : > { %v3717_v6 = vadd.f32 %v3391_v5, %v1848_v3  ;;  %v1852_v10 = vpop.f32.mrf.mxu1  ;;  %v1851_v19 = vadd.f32 %v1850_v56, %v1373_v7  ;;  %v2738_v42 = vsel %vm616_vm2, %v2733_v33, %v2737_v34  ;;  %v717_v56 = vshrl.u32 %v6208_v15, 16 }
  0xb6   : > { %6138 = vmatmul.msk.bf16.gmra.mxu3 %vm1155_vm0, %v3876_v4  ;;  %v2741_v2 = vor.u32 %v2739_v59, %v2737_v34  ;;  %v2745_v3 = vrot.slane %v2743_v60, 1 }
  0xb7   : > { %v4533_v12 = vadd.f32 %v4207_v61, %v3717_v6  ;;  %5664 = vmatmul.msk.bf16.gmra.mxu0 %vm1155_vm0, %v708_v8  ;;  %v719_v0 = vor.u32 %v717_v56, %v715_v32  ;;  %v3880_v6 = vsel %vm3853_vm1, %v3877_v29, %v3879_v62 }
  0xb8   : > { %v2746_v11 = vsel %vm616_vm2, %v2741_v2, %v2745_v3 }
  0xb9   : > { %vm4665_vm6 = vcmp.gt.f32.partialorder %v4533_v12, 0.0  ;;  %v4797_v13 = vmul.f32 0.2, %v4533_v12  ;;  %6066 = vmatmul.msk.bf16.gmra.mxu2 %vm1155_vm0, %v2730_v9  ;;  %v4210_v14 = vpop.f32.mrf.mxu3 }
  0xbb   : > { %v4929_v18 = vsel %vm4665_vm6, %v4533_v12, %v4797_v13 }
  0xbc   : > { %v6343_v20 = vpack.c.bf16 %v4929_v18, %v4928_v17  ;;  %v3394_v21 = vpop.f32.mrf.mxu2  ;;  %v1375_v22 = vpop.f32.mrf.mxu0  ;;  %v6210_v17 = vld [vmem:[%s6793_s22 + $0x70] sm:$0xff]  ;;  %v6946_v18 = vld [vmem:[%s6793_s22 + $0x80] sm:$0xff] }
  0xbd   : > { %v1855_v25 = vpop.f32.mrf.mxu1  ;;  %v3718_v28 = vadd.f32 %v3394_v21, %v1851_v19  ;;  %v1853_v36 = vadd.f32 %v1852_v10, %v1375_v22  ;;  %v724_v10 = vsel %vm616_vm2, %v719_v0, %v723_v1  ;;  %v729_v26 = vshll.u32 %v6210_v17, 16 }
  0xbe   : > { %6669 = vst [vmem:[%s6901_s26 + $0x8] sm:$0xff] %v6343_v20   ;;  %v2751_v29 = vshll.u32 %v6946_v18, 16  ;;  %v3881_v31 = vrot.slane %v6946_v18, 1 }
  0xbf   : > { %v4534_v35 = vadd.f32 %v4210_v14, %v3718_v28  ;;  %v2747_v28 = vshrl.u32 %v6931_v49, 16  ;;  %v731_v34 = vrot.slane %v729_v26, 1 }
  0xc0   : > { %5735 = vmatmul.msk.bf16.gmra.mxu1 %vm1155_vm0, %v6207_v46 }
  0xc1   : > { %v4212_v30 = vpop.f32.mrf.mxu3  ;;  %v4798_v44 = vmul.f32 0.2, %v4534_v35  ;;  %vm4666_vm7 = vcmp.gt.f32.partialorder %v4534_v35, 0.0 }
  0xc3   : > { %v4930_v50 = vsel %vm4666_vm7, %v4534_v35, %v4798_v44  ;;  %v2749_v35 = vor.u32 %v2747_v28, %v2745_v3 }
  0xc4   : > { %v3396_v38 = vpop.f32.mrf.mxu2  ;;  %v1378_v40 = vpop.f32.mrf.mxu0 }
  0xc5   : > { %v3719_v39 = vadd.f32 %v3396_v38, %v1853_v36  ;;  %v1857_v43 = vpop.f32.mrf.mxu1  ;;  %v1856_v52 = vadd.f32 %v1855_v25, %v1378_v40  ;;  %v725_v25 = vshrl.u32 %v6209_v48, 16  ;;  %v2753_v36 = vrot.slane %v2751_v29, 1 }
  0xc6   : > { %6139 = vmatmul.msk.bf16.gmra.mxu3 %vm1155_vm0, %v3878_v37 }
  0xc7   : > { %v4535_v45 = vadd.f32 %v4212_v30, %v3719_v39  ;;  %5665 = vmatmul.msk.bf16.gmra.mxu0 %vm1155_vm0, %v716_v41  ;;  %v727_v33 = vor.u32 %v725_v25, %v723_v1  ;;  %v3882_v39 = vsel %vm3853_vm1, %v3879_v62, %v3881_v31  ;;  %v2754_v44 = vsel %vm616_vm2, %v2749_v35, %v2753_v36 }
  0xc9   : > { %vm4667_vm8 = vcmp.gt.f32.partialorder %v4535_v45, 0.0  ;;  %v4799_v46 = vmul.f32 0.2, %v4535_v45  ;;  %6067 = vmatmul.msk.bf16.gmra.mxu2 %vm1155_vm0, %v2738_v42  ;;  %v4215_v47 = vpop.f32.mrf.mxu3 }
  0xcb   : > { %v4931_v51 = vsel %vm4667_vm8, %v4535_v45, %v4799_v46 }
  0xcc   : > { %v6348_v53 = vpack.c.bf16 %v4931_v51, %v4930_v50  ;;  %v3399_v54 = vpop.f32.mrf.mxu2  ;;  %v1380_v55 = vpop.f32.mrf.mxu0  ;;  %v6211_v50 = vld [vmem:[%s6793_s22 + $0x78] sm:$0xff]  ;;  %v6961_v51 = vld [vmem:[%s6793_s22 + $0x88] sm:$0xff] }
  0xcd   : > { %v1860_v58 = vpop.f32.mrf.mxu1  ;;  %v3720_v61 = vadd.f32 %v3399_v54, %v1856_v52  ;;  %v1858_v5 = vadd.f32 %v1857_v43, %v1380_v55  ;;  %v732_v43 = vsel %vm616_vm2, %v727_v33, %v731_v34  ;;  %v737_v59 = vshll.u32 %v6211_v50, 16 }
  0xce   : > { %6670 = vst [vmem:[%s6901_s26 + $0x10] sm:$0xff] %v6348_v53   ;;  %v2759_v62 = vshll.u32 %v6961_v51, 16  ;;  %v3883_v0 = vrot.slane %v6961_v51, 1 }
  0xcf   : > { %v4536_v4 = vadd.f32 %v4215_v47, %v3720_v61  ;;  %v2755_v61 = vshrl.u32 %v6946_v18, 16  ;;  %v739_v3 = vrot.slane %v737_v59, 1 }
  0xd0   : > { %5736 = vmatmul.msk.bf16.gmra.mxu1 %vm1155_vm0, %v6208_v15 }
  0xd1   : > { %v4217_v63 = vpop.f32.mrf.mxu3  ;;  %v4800_v13 = vmul.f32 0.2, %v4536_v4  ;;  %vm4668_vm9 = vcmp.gt.f32.partialorder %v4536_v4, 0.0 }
  0xd3   : > { %v4932_v19 = vsel %vm4668_vm9, %v4536_v4, %v4800_v13  ;;  %v2757_v4 = vor.u32 %v2755_v61, %v2753_v36 }
  0xd4   : > { %v3401_v7 = vpop.f32.mrf.mxu2  ;;  %v1383_v9 = vpop.f32.mrf.mxu0 }
  0xd5   : > { %v3721_v8 = vadd.f32 %v3401_v7, %v1858_v5  ;;  %v1862_v12 = vpop.f32.mrf.mxu1  ;;  %v1861_v21 = vadd.f32 %v1860_v58, %v1383_v9  ;;  %v733_v58 = vshrl.u32 %v6210_v17, 16  ;;  %v2761_v5 = vrot.slane %v2759_v62, 1 }
  0xd6   : > { %6140 = vmatmul.msk.bf16.gmra.mxu3 %vm1155_vm0, %v3880_v6 }
  0xd7   : > { %v4537_v14 = vadd.f32 %v4217_v63, %v3721_v8  ;;  %5666 = vmatmul.msk.bf16.gmra.mxu0 %vm1155_vm0, %v724_v10  ;;  %v735_v2 = vor.u32 %v733_v58, %v731_v34  ;;  %v3884_v8 = vsel %vm3853_vm1, %v3881_v31, %v3883_v0  ;;  %v2762_v13 = vsel %vm616_vm2, %v2757_v4, %v2761_v5 }
  0xd9   : > { %vm4669_vm10 = vcmp.gt.f32.partialorder %v4537_v14, 0.0  ;;  %v4801_v15 = vmul.f32 0.2, %v4537_v14  ;;  %6068 = vmatmul.msk.bf16.gmra.mxu2 %vm1155_vm0, %v2746_v11  ;;  %v4220_v16 = vpop.f32.mrf.mxu3 }
  0xdb   : > { %v4933_v20 = vsel %vm4669_vm10, %v4537_v14, %v4801_v15 }
  0xdc   : > { %v6353_v22 = vpack.c.bf16 %v4933_v20, %v4932_v19  ;;  %v3404_v23 = vpop.f32.mrf.mxu2  ;;  %v1385_v24 = vpop.f32.mrf.mxu0  ;;  %v6212_v19 = vld [vmem:[%s6793_s22 + $0x80] sm:$0xff]  ;;  %v6976_v20 = vld [vmem:[%s6793_s22 + $0x90] sm:$0xff] }
  0xdd   : > { %v1865_v27 = vpop.f32.mrf.mxu1  ;;  %v3722_v30 = vadd.f32 %v3404_v23, %v1861_v21  ;;  %v1863_v38 = vadd.f32 %v1862_v12, %v1385_v24  ;;  %v740_v12 = vsel %vm616_vm2, %v735_v2, %v739_v3  ;;  %v745_v28 = vshll.u32 %v6212_v19, 16 }
  0xde   : > { %6671 = vst [vmem:[%s6901_s26 + $0x18] sm:$0xff] %v6353_v22   ;;  %v2767_v31 = vshll.u32 %v6976_v20, 16  ;;  %v3885_v33 = vrot.slane %v6976_v20, 1 }
  0xdf   : > { %v4538_v37 = vadd.f32 %v4220_v16, %v3722_v30  ;;  %v2763_v30 = vshrl.u32 %v6961_v51, 16  ;;  %v747_v36 = vrot.slane %v745_v28, 1 }
  0xe0   : > { %5737 = vmatmul.msk.bf16.gmra.mxu1 %vm1155_vm0, %v6209_v48 }
  0xe1   : > { %v4222_v32 = vpop.f32.mrf.mxu3  ;;  %v4802_v46 = vmul.f32 0.2, %v4538_v37  ;;  %vm4670_vm11 = vcmp.gt.f32.partialorder %v4538_v37, 0.0 }
  0xe3   : > { %v4934_v52 = vsel %vm4670_vm11, %v4538_v37, %v4802_v46  ;;  %v2765_v37 = vor.u32 %v2763_v30, %v2761_v5 }
  0xe4   : > { %v3406_v40 = vpop.f32.mrf.mxu2  ;;  %v1388_v42 = vpop.f32.mrf.mxu0 }
  0xe5   : > { %v3723_v41 = vadd.f32 %v3406_v40, %v1863_v38  ;;  %v1867_v45 = vpop.f32.mrf.mxu1  ;;  %v1866_v54 = vadd.f32 %v1865_v27, %v1388_v42  ;;  %v741_v27 = vshrl.u32 %v6211_v50, 16  ;;  %v2769_v38 = vrot.slane %v2767_v31, 1 }
  0xe6   : > { %6141 = vmatmul.msk.bf16.gmra.mxu3 %vm1155_vm0, %v3882_v39 }
  0xe7   : > { %v4539_v47 = vadd.f32 %v4222_v32, %v3723_v41  ;;  %5667 = vmatmul.msk.bf16.gmra.mxu0 %vm1155_vm0, %v732_v43  ;;  %v743_v35 = vor.u32 %v741_v27, %v739_v3  ;;  %v3886_v41 = vsel %vm3853_vm1, %v3883_v0, %v3885_v33  ;;  %v2770_v46 = vsel %vm616_vm2, %v2765_v37, %v2769_v38 }
  0xe9   : > { %vm4671_vm12 = vcmp.gt.f32.partialorder %v4539_v47, 0.0  ;;  %v4803_v48 = vmul.f32 0.2, %v4539_v47  ;;  %6069 = vmatmul.msk.bf16.gmra.mxu2 %vm1155_vm0, %v2754_v44  ;;  %v4225_v49 = vpop.f32.mrf.mxu3 }
  0xeb   : > { %v4935_v53 = vsel %vm4671_vm12, %v4539_v47, %v4803_v48 }
  0xec   : > { %v6358_v55 = vpack.c.bf16 %v4935_v53, %v4934_v52  ;;  %v3409_v56 = vpop.f32.mrf.mxu2  ;;  %v1390_v57 = vpop.f32.mrf.mxu0  ;;  %v6213_v52 = vld [vmem:[%s6793_s22 + $0x88] sm:$0xff]  ;;  %v6991_v53 = vld [vmem:[%s6793_s22 + $0x98] sm:$0xff] }
  0xed   : > { %v1870_v60 = vpop.f32.mrf.mxu1  ;;  %v3724_v63 = vadd.f32 %v3409_v56, %v1866_v54  ;;  %v1868_v7 = vadd.f32 %v1867_v45, %v1390_v57  ;;  %v748_v45 = vsel %vm616_vm2, %v743_v35, %v747_v36  ;;  %v753_v61 = vshll.u32 %v6213_v52, 16 }
  0xee   : > { %6672 = vst [vmem:[%s6901_s26 + $0x20] sm:$0xff] %v6358_v55   ;;  %v2775_v0 = vshll.u32 %v6991_v53, 16  ;;  %v3887_v2 = vrot.slane %v6991_v53, 1 }
  0xef   : > { %v4540_v6 = vadd.f32 %v4225_v49, %v3724_v63  ;;  %v2771_v63 = vshrl.u32 %v6976_v20, 16  ;;  %v755_v5 = vrot.slane %v753_v61, 1 }
  0xf0   : > { %5738 = vmatmul.msk.bf16.gmra.mxu1 %vm1155_vm0, %v6210_v17 }
  0xf1   : > { %v4227_v1 = vpop.f32.mrf.mxu3  ;;  %v4804_v15 = vmul.f32 0.2, %v4540_v6  ;;  %vm4672_vm13 = vcmp.gt.f32.partialorder %v4540_v6, 0.0 }
  0xf3   : > { %v4936_v21 = vsel %vm4672_vm13, %v4540_v6, %v4804_v15  ;;  %v2773_v6 = vor.u32 %v2771_v63, %v2769_v38 }
  0xf4   : > { %v3411_v9 = vpop.f32.mrf.mxu2  ;;  %v1393_v11 = vpop.f32.mrf.mxu0 }
  0xf5   : > { %v3725_v10 = vadd.f32 %v3411_v9, %v1868_v7  ;;  %v1872_v14 = vpop.f32.mrf.mxu1  ;;  %v1871_v23 = vadd.f32 %v1870_v60, %v1393_v11  ;;  %v749_v60 = vshrl.u32 %v6212_v19, 16  ;;  %v2777_v7 = vrot.slane %v2775_v0, 1 }
  0xf6   : > { %6142 = vmatmul.msk.bf16.gmra.mxu3 %vm1155_vm0, %v3884_v8 }
  0xf7   : > { %v4541_v16 = vadd.f32 %v4227_v1, %v3725_v10  ;;  %5668 = vmatmul.msk.bf16.gmra.mxu0 %vm1155_vm0, %v740_v12  ;;  %v751_v4 = vor.u32 %v749_v60, %v747_v36  ;;  %v3888_v10 = vsel %vm3853_vm1, %v3885_v33, %v3887_v2  ;;  %v2778_v15 = vsel %vm616_vm2, %v2773_v6, %v2777_v7 }
  0xf9   : > { %vm4673_vm14 = vcmp.gt.f32.partialorder %v4541_v16, 0.0  ;;  %v4805_v17 = vmul.f32 0.2, %v4541_v16  ;;  %6070 = vmatmul.msk.bf16.gmra.mxu2 %vm1155_vm0, %v2762_v13  ;;  %v4230_v18 = vpop.f32.mrf.mxu3 }
  0xfb   : > { %v4937_v22 = vsel %vm4673_vm14, %v4541_v16, %v4805_v17 }
  0xfc   : > { %v6363_v24 = vpack.c.bf16 %v4937_v22, %v4936_v21  ;;  %v3414_v25 = vpop.f32.mrf.mxu2  ;;  %v1395_v26 = vpop.f32.mrf.mxu0  ;;  %v6214_v21 = vld [vmem:[%s6793_s22 + $0x90] sm:$0xff]  ;;  %v7006_v22 = vld [vmem:[%s6793_s22 + $0xa0] sm:$0xff] }
  0xfd   : > { %v1875_v29 = vpop.f32.mrf.mxu1  ;;  %v3726_v32 = vadd.f32 %v3414_v25, %v1871_v23  ;;  %v1873_v40 = vadd.f32 %v1872_v14, %v1395_v26  ;;  %v756_v14 = vsel %vm616_vm2, %v751_v4, %v755_v5  ;;  %v761_v30 = vshll.u32 %v6214_v21, 16 }
  0xfe   : > { %6673 = vst [vmem:[%s6901_s26 + $0x28] sm:$0xff] %v6363_v24   ;;  %v2783_v33 = vshll.u32 %v7006_v22, 16  ;;  %v3889_v35 = vrot.slane %v7006_v22, 1 }
  0xff   : > { %v4542_v39 = vadd.f32 %v4230_v18, %v3726_v32  ;;  %v2779_v32 = vshrl.u32 %v6991_v53, 16  ;;  %v763_v38 = vrot.slane %v761_v30, 1 }
 0x100   : > { %5739 = vmatmul.msk.bf16.gmra.mxu1 %vm1155_vm0, %v6211_v50 }
 0x101   : > { %v4232_v34 = vpop.f32.mrf.mxu3  ;;  %v4806_v48 = vmul.f32 0.2, %v4542_v39  ;;  %vm4674_vm15 = vcmp.gt.f32.partialorder %v4542_v39, 0.0 }
 0x103   : > { %v4938_v54 = vsel %vm4674_vm15, %v4542_v39, %v4806_v48  ;;  %v2781_v39 = vor.u32 %v2779_v32, %v2777_v7 }
 0x104   : > { %v3416_v42 = vpop.f32.mrf.mxu2  ;;  %v1398_v44 = vpop.f32.mrf.mxu0 }
 0x105   : > { %v3727_v43 = vadd.f32 %v3416_v42, %v1873_v40  ;;  %v1877_v47 = vpop.f32.mrf.mxu1  ;;  %v1876_v56 = vadd.f32 %v1875_v29, %v1398_v44  ;;  %v757_v29 = vshrl.u32 %v6213_v52, 16  ;;  %v2785_v40 = vrot.slane %v2783_v33, 1 }
 0x106   : > { %6143 = vmatmul.msk.bf16.gmra.mxu3 %vm1155_vm0, %v3886_v41 }
 0x107   : > { %v4543_v49 = vadd.f32 %v4232_v34, %v3727_v43  ;;  %5669 = vmatmul.msk.bf16.gmra.mxu0 %vm1155_vm0, %v748_v45  ;;  %v759_v37 = vor.u32 %v757_v29, %v755_v5  ;;  %v3890_v43 = vsel %vm3853_vm1, %v3887_v2, %v3889_v35  ;;  %v2786_v48 = vsel %vm616_vm2, %v2781_v39, %v2785_v40 }
 0x109   : > { %vm4675_vm3 = vcmp.gt.f32.partialorder %v4543_v49, 0.0  ;;  %v4807_v50 = vmul.f32 0.2, %v4543_v49  ;;  %6071 = vmatmul.msk.bf16.gmra.mxu2 %vm1155_vm0, %v2770_v46  ;;  %v4235_v51 = vpop.f32.mrf.mxu3 }
 0x10b   : > { %v4939_v55 = vsel %vm4675_vm3, %v4543_v49, %v4807_v50 }
 0x10c   : > { %v6368_v57 = vpack.c.bf16 %v4939_v55, %v4938_v54  ;;  %v3419_v58 = vpop.f32.mrf.mxu2  ;;  %v1400_v59 = vpop.f32.mrf.mxu0  ;;  %v6215_v54 = vld [vmem:[%s6793_s22 + $0x98] sm:$0xff]  ;;  %v7021_v55 = vld [vmem:[%s6793_s22 + $0xa8] sm:$0xff] }
 0x10d   : > { %v1880_v62 = vpop.f32.mrf.mxu1  ;;  %v3728_v1 = vadd.f32 %v3419_v58, %v1876_v56  ;;  %v1878_v9 = vadd.f32 %v1877_v47, %v1400_v59  ;;  %v764_v47 = vsel %vm616_vm2, %v759_v37, %v763_v38  ;;  %v769_v63 = vshll.u32 %v6215_v54, 16 }
 0x10e   : > { %6674 = vst [vmem:[%s6901_s26 + $0x30] sm:$0xff] %v6368_v57   ;;  %v2791_v2 = vshll.u32 %v7021_v55, 16  ;;  %v3891_v4 = vrot.slane %v7021_v55, 1 }
 0x10f   : > { %v4544_v8 = vadd.f32 %v4235_v51, %v3728_v1  ;;  %v2787_v1 = vshrl.u32 %v7006_v22, 16  ;;  %v771_v7 = vrot.slane %v769_v63, 1 }
 0x110   : > { %5740 = vmatmul.msk.bf16.gmra.mxu1 %vm1155_vm0, %v6212_v19 }
 0x111   : > { %v4237_v3 = vpop.f32.mrf.mxu3  ;;  %v4808_v17 = vmul.f32 0.2, %v4544_v8  ;;  %vm4676_vm4 = vcmp.gt.f32.partialorder %v4544_v8, 0.0 }
 0x113   : > { %v4940_v23 = vsel %vm4676_vm4, %v4544_v8, %v4808_v17  ;;  %v2789_v8 = vor.u32 %v2787_v1, %v2785_v40 }
 0x114   : > { %v3421_v11 = vpop.f32.mrf.mxu2  ;;  %v1403_v13 = vpop.f32.mrf.mxu0 }
 0x115   : > { %v3729_v12 = vadd.f32 %v3421_v11, %v1878_v9  ;;  %v1882_v16 = vpop.f32.mrf.mxu1  ;;  %v1881_v25 = vadd.f32 %v1880_v62, %v1403_v13  ;;  %v765_v62 = vshrl.u32 %v6214_v21, 16  ;;  %v2793_v9 = vrot.slane %v2791_v2, 1 }
 0x116   : > { %6144 = vmatmul.msk.bf16.gmra.mxu3 %vm1155_vm0, %v3888_v10 }
 0x117   : > { %v4545_v18 = vadd.f32 %v4237_v3, %v3729_v12  ;;  %5670 = vmatmul.msk.bf16.gmra.mxu0 %vm1155_vm0, %v756_v14  ;;  %v767_v6 = vor.u32 %v765_v62, %v763_v38  ;;  %v3892_v12 = vsel %vm3853_vm1, %v3889_v35, %v3891_v4  ;;  %v2794_v17 = vsel %vm616_vm2, %v2789_v8, %v2793_v9 }
 0x119   : > { %vm4677_vm5 = vcmp.gt.f32.partialorder %v4545_v18, 0.0  ;;  %v4809_v19 = vmul.f32 0.2, %v4545_v18  ;;  %6072 = vmatmul.msk.bf16.gmra.mxu2 %vm1155_vm0, %v2778_v15  ;;  %v4240_v20 = vpop.f32.mrf.mxu3 }
 0x11b   : > { %v4941_v24 = vsel %vm4677_vm5, %v4545_v18, %v4809_v19 }
 0x11c   : > { %v6373_v26 = vpack.c.bf16 %v4941_v24, %v4940_v23  ;;  %v3424_v27 = vpop.f32.mrf.mxu2  ;;  %v1405_v28 = vpop.f32.mrf.mxu0  ;;  %v6216_v23 = vld [vmem:[%s6793_s22 + $0xa0] sm:$0xff]  ;;  %v7036_v24 = vld [vmem:[%s6793_s22 + $0xb0] sm:$0xff] }
 0x11d   : > { %v1885_v31 = vpop.f32.mrf.mxu1  ;;  %v3730_v34 = vadd.f32 %v3424_v27, %v1881_v25  ;;  %v1883_v42 = vadd.f32 %v1882_v16, %v1405_v28  ;;  %v772_v16 = vsel %vm616_vm2, %v767_v6, %v771_v7  ;;  %v777_v32 = vshll.u32 %v6216_v23, 16 }
 0x11e   : > { %6675 = vst [vmem:[%s6901_s26 + $0x38] sm:$0xff] %v6373_v26   ;;  %v2799_v35 = vshll.u32 %v7036_v24, 16  ;;  %v3893_v37 = vrot.slane %v7036_v24, 1 }
 0x11f   : > { %v4546_v41 = vadd.f32 %v4240_v20, %v3730_v34  ;;  %v2795_v34 = vshrl.u32 %v7021_v55, 16  ;;  %v779_v40 = vrot.slane %v777_v32, 1 }
 0x120   : > { %5741 = vmatmul.msk.bf16.gmra.mxu1 %vm1155_vm0, %v6213_v52 }
 0x121   : > { %v4242_v36 = vpop.f32.mrf.mxu3  ;;  %v4810_v50 = vmul.f32 0.2, %v4546_v41  ;;  %vm4678_vm6 = vcmp.gt.f32.partialorder %v4546_v41, 0.0 }
 0x123   : > { %v4942_v56 = vsel %vm4678_vm6, %v4546_v41, %v4810_v50  ;;  %v2797_v41 = vor.u32 %v2795_v34, %v2793_v9 }
 0x124   : > { %v3426_v44 = vpop.f32.mrf.mxu2  ;;  %v1408_v46 = vpop.f32.mrf.mxu0 }
 0x125   : > { %v3731_v45 = vadd.f32 %v3426_v44, %v1883_v42  ;;  %v1887_v49 = vpop.f32.mrf.mxu1  ;;  %v1886_v58 = vadd.f32 %v1885_v31, %v1408_v46  ;;  %v773_v31 = vshrl.u32 %v6215_v54, 16  ;;  %v2801_v42 = vrot.slane %v2799_v35, 1 }
 0x126   : > { %6145 = vmatmul.msk.bf16.gmra.mxu3 %vm1155_vm0, %v3890_v43 }
 0x127   : > { %v4547_v51 = vadd.f32 %v4242_v36, %v3731_v45  ;;  %5671 = vmatmul.msk.bf16.gmra.mxu0 %vm1155_vm0, %v764_v47  ;;  %v775_v39 = vor.u32 %v773_v31, %v771_v7  ;;  %v3894_v45 = vsel %vm3853_vm1, %v3891_v4, %v3893_v37  ;;  %v2802_v50 = vsel %vm616_vm2, %v2797_v41, %v2801_v42 }
 0x129   : > { %vm4679_vm7 = vcmp.gt.f32.partialorder %v4547_v51, 0.0  ;;  %v4811_v52 = vmul.f32 0.2, %v4547_v51  ;;  %6073 = vmatmul.msk.bf16.gmra.mxu2 %vm1155_vm0, %v2786_v48  ;;  %v4245_v53 = vpop.f32.mrf.mxu3 }
 0x12b   : > { %v4943_v57 = vsel %vm4679_vm7, %v4547_v51, %v4811_v52 }
 0x12c   : > { %v6378_v59 = vpack.c.bf16 %v4943_v57, %v4942_v56  ;;  %v3429_v60 = vpop.f32.mrf.mxu2  ;;  %v1410_v61 = vpop.f32.mrf.mxu0  ;;  %v6217_v56 = vld [vmem:[%s6793_s22 + $0xa8] sm:$0xff]  ;;  %v7051_v57 = vld [vmem:[%s6793_s22 + $0xb8] sm:$0xff] }
 0x12d   : > { %v1890_v0 = vpop.f32.mrf.mxu1  ;;  %v3732_v3 = vadd.f32 %v3429_v60, %v1886_v58  ;;  %v1888_v11 = vadd.f32 %v1887_v49, %v1410_v61  ;;  %v780_v49 = vsel %vm616_vm2, %v775_v39, %v779_v40  ;;  %v785_v1 = vshll.u32 %v6217_v56, 16 }
 0x12e   : > { %6676 = vst [vmem:[%s6901_s26 + $0x40] sm:$0xff] %v6378_v59   ;;  %v2807_v4 = vshll.u32 %v7051_v57, 16  ;;  %v3895_v6 = vrot.slane %v7051_v57, 1 }
 0x12f   : > { %v4548_v10 = vadd.f32 %v4245_v53, %v3732_v3  ;;  %v2803_v3 = vshrl.u32 %v7036_v24, 16  ;;  %v787_v9 = vrot.slane %v785_v1, 1 }
 0x130   : > { %5742 = vmatmul.msk.bf16.gmra.mxu1 %vm1155_vm0, %v6214_v21 }
 0x131   : > { %v4247_v5 = vpop.f32.mrf.mxu3  ;;  %v4812_v19 = vmul.f32 0.2, %v4548_v10  ;;  %vm4680_vm8 = vcmp.gt.f32.partialorder %v4548_v10, 0.0 }
 0x133   : > { %v4944_v25 = vsel %vm4680_vm8, %v4548_v10, %v4812_v19  ;;  %v2805_v10 = vor.u32 %v2803_v3, %v2801_v42 }
 0x134   : > { %v3431_v13 = vpop.f32.mrf.mxu2  ;;  %v1413_v15 = vpop.f32.mrf.mxu0 }
 0x135   : > { %v3733_v14 = vadd.f32 %v3431_v13, %v1888_v11  ;;  %v1892_v18 = vpop.f32.mrf.mxu1  ;;  %v1891_v27 = vadd.f32 %v1890_v0, %v1413_v15  ;;  %v781_v0 = vshrl.u32 %v6216_v23, 16  ;;  %v2809_v11 = vrot.slane %v2807_v4, 1 }
 0x136   : > { %6146 = vmatmul.msk.bf16.gmra.mxu3 %vm1155_vm0, %v3892_v12 }
 0x137   : > { %v4549_v20 = vadd.f32 %v4247_v5, %v3733_v14  ;;  %5672 = vmatmul.msk.bf16.gmra.mxu0 %vm1155_vm0, %v772_v16  ;;  %v783_v8 = vor.u32 %v781_v0, %v779_v40  ;;  %v3896_v14 = vsel %vm3853_vm1, %v3893_v37, %v3895_v6  ;;  %v2810_v19 = vsel %vm616_vm2, %v2805_v10, %v2809_v11 }
 0x139   : > { %vm4681_vm9 = vcmp.gt.f32.partialorder %v4549_v20, 0.0  ;;  %v4813_v21 = vmul.f32 0.2, %v4549_v20  ;;  %6074 = vmatmul.msk.bf16.gmra.mxu2 %vm1155_vm0, %v2794_v17  ;;  %v4250_v22 = vpop.f32.mrf.mxu3 }
 0x13b   : > { %v4945_v26 = vsel %vm4681_vm9, %v4549_v20, %v4813_v21 }
 0x13c   : > { %v6383_v28 = vpack.c.bf16 %v4945_v26, %v4944_v25  ;;  %v3434_v29 = vpop.f32.mrf.mxu2  ;;  %v1415_v30 = vpop.f32.mrf.mxu0  ;;  %v6218_v25 = vld [vmem:[%s6793_s22 + $0xb0] sm:$0xff]  ;;  %v7066_v26 = vld [vmem:[%s6793_s22 + $0xc0] sm:$0xff] }
 0x13d   : > { %v1895_v33 = vpop.f32.mrf.mxu1  ;;  %v3734_v36 = vadd.f32 %v3434_v29, %v1891_v27  ;;  %v1893_v44 = vadd.f32 %v1892_v18, %v1415_v30  ;;  %v788_v18 = vsel %vm616_vm2, %v783_v8, %v787_v9  ;;  %v793_v34 = vshll.u32 %v6218_v25, 16 }
 0x13e   : > { %6677 = vst [vmem:[%s6901_s26 + $0x48] sm:$0xff] %v6383_v28   ;;  %v2815_v37 = vshll.u32 %v7066_v26, 16  ;;  %v3897_v39 = vrot.slane %v7066_v26, 1 }
 0x13f   : > { %v4550_v43 = vadd.f32 %v4250_v22, %v3734_v36  ;;  %v2811_v36 = vshrl.u32 %v7051_v57, 16  ;;  %v795_v42 = vrot.slane %v793_v34, 1 }
 0x140   : > { %5743 = vmatmul.msk.bf16.gmra.mxu1 %vm1155_vm0, %v6215_v54 }
 0x141   : > { %v4252_v38 = vpop.f32.mrf.mxu3  ;;  %v4814_v52 = vmul.f32 0.2, %v4550_v43  ;;  %vm4682_vm10 = vcmp.gt.f32.partialorder %v4550_v43, 0.0 }
 0x143   : > { %v4946_v58 = vsel %vm4682_vm10, %v4550_v43, %v4814_v52  ;;  %v2813_v43 = vor.u32 %v2811_v36, %v2809_v11 }
 0x144   : > { %v3436_v46 = vpop.f32.mrf.mxu2  ;;  %v1418_v48 = vpop.f32.mrf.mxu0 }
 0x145   : > { %v3735_v47 = vadd.f32 %v3436_v46, %v1893_v44  ;;  %v1897_v51 = vpop.f32.mrf.mxu1  ;;  %v1896_v60 = vadd.f32 %v1895_v33, %v1418_v48  ;;  %v789_v33 = vshrl.u32 %v6217_v56, 16  ;;  %v2817_v44 = vrot.slane %v2815_v37, 1 }
 0x146   : > { %6147 = vmatmul.msk.bf16.gmra.mxu3 %vm1155_vm0, %v3894_v45 }
 0x147   : > { %v4551_v53 = vadd.f32 %v4252_v38, %v3735_v47  ;;  %5673 = vmatmul.msk.bf16.gmra.mxu0 %vm1155_vm0, %v780_v49  ;;  %v791_v41 = vor.u32 %v789_v33, %v787_v9  ;;  %v3898_v47 = vsel %vm3853_vm1, %v3895_v6, %v3897_v39  ;;  %v2818_v52 = vsel %vm616_vm2, %v2813_v43, %v2817_v44 }
 0x149   : > { %vm4683_vm11 = vcmp.gt.f32.partialorder %v4551_v53, 0.0  ;;  %v4815_v54 = vmul.f32 0.2, %v4551_v53  ;;  %6075 = vmatmul.msk.bf16.gmra.mxu2 %vm1155_vm0, %v2802_v50  ;;  %v4255_v55 = vpop.f32.mrf.mxu3 }
 0x14b   : > { %v4947_v59 = vsel %vm4683_vm11, %v4551_v53, %v4815_v54 }
 0x14c   : > { %v6388_v61 = vpack.c.bf16 %v4947_v59, %v4946_v58  ;;  %v3439_v62 = vpop.f32.mrf.mxu2  ;;  %v1420_v63 = vpop.f32.mrf.mxu0  ;;  %v6219_v58 = vld [vmem:[%s6793_s22 + $0xb8] sm:$0xff]  ;;  %v7081_v59 = vld [vmem:[%s6793_s22 + $0xc8] sm:$0xff] }
 0x14d   : > { %v1900_v2 = vpop.f32.mrf.mxu1  ;;  %v3736_v5 = vadd.f32 %v3439_v62, %v1896_v60  ;;  %v1898_v13 = vadd.f32 %v1897_v51, %v1420_v63  ;;  %v796_v51 = vsel %vm616_vm2, %v791_v41, %v795_v42  ;;  %v801_v3 = vshll.u32 %v6219_v58, 16 }
 0x14e   : > { %6678 = vst [vmem:[%s6901_s26 + $0x50] sm:$0xff] %v6388_v61   ;;  %v2823_v6 = vshll.u32 %v7081_v59, 16  ;;  %v3899_v8 = vrot.slane %v7081_v59, 1 }
 0x14f   : > { %v4552_v12 = vadd.f32 %v4255_v55, %v3736_v5  ;;  %v2819_v5 = vshrl.u32 %v7066_v26, 16  ;;  %v803_v11 = vrot.slane %v801_v3, 1 }
 0x150   : > { %5744 = vmatmul.msk.bf16.gmra.mxu1 %vm1155_vm0, %v6216_v23 }
 0x151   : > { %v4257_v7 = vpop.f32.mrf.mxu3  ;;  %v4816_v21 = vmul.f32 0.2, %v4552_v12  ;;  %vm4684_vm12 = vcmp.gt.f32.partialorder %v4552_v12, 0.0 }
 0x153   : > { %v4948_v27 = vsel %vm4684_vm12, %v4552_v12, %v4816_v21  ;;  %v2821_v12 = vor.u32 %v2819_v5, %v2817_v44 }
 0x154   : > { %v3441_v15 = vpop.f32.mrf.mxu2  ;;  %v1423_v17 = vpop.f32.mrf.mxu0 }
 0x155   : > { %v3737_v16 = vadd.f32 %v3441_v15, %v1898_v13  ;;  %v1902_v20 = vpop.f32.mrf.mxu1  ;;  %v1901_v29 = vadd.f32 %v1900_v2, %v1423_v17  ;;  %v797_v2 = vshrl.u32 %v6218_v25, 16  ;;  %v2825_v13 = vrot.slane %v2823_v6, 1 }
 0x156   : > { %6148 = vmatmul.msk.bf16.gmra.mxu3 %vm1155_vm0, %v3896_v14 }
 0x157   : > { %v4553_v22 = vadd.f32 %v4257_v7, %v3737_v16  ;;  %5674 = vmatmul.msk.bf16.gmra.mxu0 %vm1155_vm0, %v788_v18  ;;  %v799_v10 = vor.u32 %v797_v2, %v795_v42  ;;  %v3900_v16 = vsel %vm3853_vm1, %v3897_v39, %v3899_v8  ;;  %v2826_v21 = vsel %vm616_vm2, %v2821_v12, %v2825_v13 }
 0x159   : > { %vm4685_vm13 = vcmp.gt.f32.partialorder %v4553_v22, 0.0  ;;  %v4817_v23 = vmul.f32 0.2, %v4553_v22  ;;  %6076 = vmatmul.msk.bf16.gmra.mxu2 %vm1155_vm0, %v2810_v19  ;;  %v4260_v24 = vpop.f32.mrf.mxu3 }
 0x15b   : > { %v4949_v28 = vsel %vm4685_vm13, %v4553_v22, %v4817_v23 }
 0x15c   : > { %v6393_v30 = vpack.c.bf16 %v4949_v28, %v4948_v27  ;;  %v3444_v31 = vpop.f32.mrf.mxu2  ;;  %v1425_v32 = vpop.f32.mrf.mxu0  ;;  %v6220_v27 = vld [vmem:[%s6793_s22 + $0xc0] sm:$0xff]  ;;  %v7096_v28 = vld [vmem:[%s6793_s22 + $0xd0] sm:$0xff] }
 0x15d   : > { %v1905_v35 = vpop.f32.mrf.mxu1  ;;  %v3738_v38 = vadd.f32 %v3444_v31, %v1901_v29  ;;  %v1903_v46 = vadd.f32 %v1902_v20, %v1425_v32  ;;  %v804_v20 = vsel %vm616_vm2, %v799_v10, %v803_v11  ;;  %v809_v36 = vshll.u32 %v6220_v27, 16 }
 0x15e   : > { %6679 = vst [vmem:[%s6901_s26 + $0x58] sm:$0xff] %v6393_v30   ;;  %v2831_v39 = vshll.u32 %v7096_v28, 16  ;;  %v3901_v41 = vrot.slane %v7096_v28, 1 }
 0x15f   : > { %v4554_v45 = vadd.f32 %v4260_v24, %v3738_v38  ;;  %v2827_v38 = vshrl.u32 %v7081_v59, 16  ;;  %v811_v44 = vrot.slane %v809_v36, 1 }
 0x160   : > { %5745 = vmatmul.msk.bf16.gmra.mxu1 %vm1155_vm0, %v6217_v56 }
 0x161   : > { %v4262_v40 = vpop.f32.mrf.mxu3  ;;  %v4818_v54 = vmul.f32 0.2, %v4554_v45  ;;  %vm4686_vm14 = vcmp.gt.f32.partialorder %v4554_v45, 0.0 }
 0x163   : > { %v4950_v60 = vsel %vm4686_vm14, %v4554_v45, %v4818_v54  ;;  %v2829_v45 = vor.u32 %v2827_v38, %v2825_v13 }
 0x164   : > { %v3446_v48 = vpop.f32.mrf.mxu2  ;;  %v1428_v50 = vpop.f32.mrf.mxu0 }
 0x165   : > { %v3739_v49 = vadd.f32 %v3446_v48, %v1903_v46  ;;  %v1907_v53 = vpop.f32.mrf.mxu1  ;;  %v1906_v62 = vadd.f32 %v1905_v35, %v1428_v50  ;;  %v805_v35 = vshrl.u32 %v6219_v58, 16  ;;  %v2833_v46 = vrot.slane %v2831_v39, 1 }
 0x166   : > { %6149 = vmatmul.msk.bf16.gmra.mxu3 %vm1155_vm0, %v3898_v47 }
 0x167   : > { %v4555_v55 = vadd.f32 %v4262_v40, %v3739_v49  ;;  %5675 = vmatmul.msk.bf16.gmra.mxu0 %vm1155_vm0, %v796_v51  ;;  %v807_v43 = vor.u32 %v805_v35, %v803_v11  ;;  %v3902_v49 = vsel %vm3853_vm1, %v3899_v8, %v3901_v41  ;;  %v2834_v54 = vsel %vm616_vm2, %v2829_v45, %v2833_v46 }
 0x169   : > { %vm4687_vm15 = vcmp.gt.f32.partialorder %v4555_v55, 0.0  ;;  %v4819_v56 = vmul.f32 0.2, %v4555_v55  ;;  %6077 = vmatmul.msk.bf16.gmra.mxu2 %vm1155_vm0, %v2818_v52  ;;  %v4265_v57 = vpop.f32.mrf.mxu3 }
 0x16b   : > { %v4951_v61 = vsel %vm4687_vm15, %v4555_v55, %v4819_v56 }
 0x16c   : > { %v6398_v63 = vpack.c.bf16 %v4951_v61, %v4950_v60  ;;  %v3449_v0 = vpop.f32.mrf.mxu2  ;;  %v1430_v1 = vpop.f32.mrf.mxu0  ;;  %v6221_v60 = vld [vmem:[%s6793_s22 + $0xc8] sm:$0xff]  ;;  %v7111_v61 = vld [vmem:[%s6793_s22 + $0xd8] sm:$0xff] }
 0x16d   : > { %v1910_v4 = vpop.f32.mrf.mxu1  ;;  %v3740_v7 = vadd.f32 %v3449_v0, %v1906_v62  ;;  %v1908_v15 = vadd.f32 %v1907_v53, %v1430_v1  ;;  %v812_v53 = vsel %vm616_vm2, %v807_v43, %v811_v44  ;;  %v817_v5 = vshll.u32 %v6221_v60, 16 }
 0x16e   : > { %6680 = vst [vmem:[%s6901_s26 + $0x60] sm:$0xff] %v6398_v63   ;;  %v2839_v8 = vshll.u32 %v7111_v61, 16  ;;  %v3903_v10 = vrot.slane %v7111_v61, 1 }
 0x16f   : > { %v4556_v14 = vadd.f32 %v4265_v57, %v3740_v7  ;;  %v2835_v7 = vshrl.u32 %v7096_v28, 16  ;;  %v819_v13 = vrot.slane %v817_v5, 1 }
 0x170   : > { %5746 = vmatmul.msk.bf16.gmra.mxu1 %vm1155_vm0, %v6218_v25 }
 0x171   : > { %v4267_v9 = vpop.f32.mrf.mxu3  ;;  %v4820_v23 = vmul.f32 0.2, %v4556_v14  ;;  %vm4688_vm3 = vcmp.gt.f32.partialorder %v4556_v14, 0.0 }
 0x173   : > { %v4952_v29 = vsel %vm4688_vm3, %v4556_v14, %v4820_v23  ;;  %v2837_v14 = vor.u32 %v2835_v7, %v2833_v46 }
 0x174   : > { %v3451_v17 = vpop.f32.mrf.mxu2  ;;  %v1433_v19 = vpop.f32.mrf.mxu0 }
 0x175   : > { %v3741_v18 = vadd.f32 %v3451_v17, %v1908_v15  ;;  %v1912_v22 = vpop.f32.mrf.mxu1  ;;  %v1911_v31 = vadd.f32 %v1910_v4, %v1433_v19  ;;  %v813_v4 = vshrl.u32 %v6220_v27, 16  ;;  %v2841_v15 = vrot.slane %v2839_v8, 1 }
 0x176   : > { %6150 = vmatmul.msk.bf16.gmra.mxu3 %vm1155_vm0, %v3900_v16 }
 0x177   : > { %v4557_v24 = vadd.f32 %v4267_v9, %v3741_v18  ;;  %5676 = vmatmul.msk.bf16.gmra.mxu0 %vm1155_vm0, %v804_v20  ;;  %v815_v12 = vor.u32 %v813_v4, %v811_v44  ;;  %v3904_v18 = vsel %vm3853_vm1, %v3901_v41, %v3903_v10  ;;  %v2842_v23 = vsel %vm616_vm2, %v2837_v14, %v2841_v15 }
 0x179   : > { %vm4689_vm4 = vcmp.gt.f32.partialorder %v4557_v24, 0.0  ;;  %v4821_v25 = vmul.f32 0.2, %v4557_v24  ;;  %6078 = vmatmul.msk.bf16.gmra.mxu2 %vm1155_vm0, %v2826_v21  ;;  %v4270_v26 = vpop.f32.mrf.mxu3 }
 0x17b   : > { %v4953_v30 = vsel %vm4689_vm4, %v4557_v24, %v4821_v25 }
 0x17c   : > { %v6403_v32 = vpack.c.bf16 %v4953_v30, %v4952_v29  ;;  %v3454_v33 = vpop.f32.mrf.mxu2  ;;  %v1435_v34 = vpop.f32.mrf.mxu0  ;;  %v6222_v29 = vld [vmem:[%s6793_s22 + $0xd0] sm:$0xff]  ;;  %v7126_v30 = vld [vmem:[%s6793_s22 + $0xe0] sm:$0xff] }
 0x17d   : > { %v1915_v37 = vpop.f32.mrf.mxu1  ;;  %v3742_v40 = vadd.f32 %v3454_v33, %v1911_v31  ;;  %v1913_v48 = vadd.f32 %v1912_v22, %v1435_v34  ;;  %v820_v22 = vsel %vm616_vm2, %v815_v12, %v819_v13  ;;  %v825_v38 = vshll.u32 %v6222_v29, 16 }
 0x17e   : > { %6681 = vst [vmem:[%s6901_s26 + $0x68] sm:$0xff] %v6403_v32   ;;  %v2847_v41 = vshll.u32 %v7126_v30, 16  ;;  %v3905_v43 = vrot.slane %v7126_v30, 1 }
 0x17f   : > { %v4558_v47 = vadd.f32 %v4270_v26, %v3742_v40  ;;  %v2843_v40 = vshrl.u32 %v7111_v61, 16  ;;  %v827_v46 = vrot.slane %v825_v38, 1 }
 0x180   : > { %5747 = vmatmul.msk.bf16.gmra.mxu1 %vm1155_vm0, %v6219_v58 }
 0x181   : > { %v4272_v42 = vpop.f32.mrf.mxu3  ;;  %v4822_v56 = vmul.f32 0.2, %v4558_v47  ;;  %vm4690_vm5 = vcmp.gt.f32.partialorder %v4558_v47, 0.0 }
 0x183   : > { %v4954_v62 = vsel %vm4690_vm5, %v4558_v47, %v4822_v56  ;;  %v2845_v47 = vor.u32 %v2843_v40, %v2841_v15 }
 0x184   : > { %v3456_v50 = vpop.f32.mrf.mxu2  ;;  %v1438_v52 = vpop.f32.mrf.mxu0 }
 0x185   : > { %v3743_v51 = vadd.f32 %v3456_v50, %v1913_v48  ;;  %v1917_v55 = vpop.f32.mrf.mxu1  ;;  %v1916_v0 = vadd.f32 %v1915_v37, %v1438_v52  ;;  %v821_v37 = vshrl.u32 %v6221_v60, 16  ;;  %v2849_v48 = vrot.slane %v2847_v41, 1 }
 0x186   : > { %6151 = vmatmul.msk.bf16.gmra.mxu3 %vm1155_vm0, %v3902_v49 }
 0x187   : > { %v4559_v57 = vadd.f32 %v4272_v42, %v3743_v51  ;;  %5677 = vmatmul.msk.bf16.gmra.mxu0 %vm1155_vm0, %v812_v53  ;;  %v823_v45 = vor.u32 %v821_v37, %v819_v13  ;;  %v3906_v51 = vsel %vm3853_vm1, %v3903_v10, %v3905_v43  ;;  %v2850_v56 = vsel %vm616_vm2, %v2845_v47, %v2849_v48 }
 0x189   : > { %vm4691_vm6 = vcmp.gt.f32.partialorder %v4559_v57, 0.0  ;;  %v4823_v58 = vmul.f32 0.2, %v4559_v57  ;;  %6079 = vmatmul.msk.bf16.gmra.mxu2 %vm1155_vm0, %v2834_v54  ;;  %v4275_v59 = vpop.f32.mrf.mxu3 }
 0x18b   : > { %v4955_v63 = vsel %vm4691_vm6, %v4559_v57, %v4823_v58 }
 0x18c   : > { %v6408_v1 = vpack.c.bf16 %v4955_v63, %v4954_v62  ;;  %v3459_v2 = vpop.f32.mrf.mxu2  ;;  %v1440_v3 = vpop.f32.mrf.mxu0  ;;  %v6223_v62 = vld [vmem:[%s6793_s22 + $0xd8] sm:$0xff]  ;;  %v7141_v63 = vld [vmem:[%s6793_s22 + $0xe8] sm:$0xff] }
 0x18d   : > { %v1920_v6 = vpop.f32.mrf.mxu1  ;;  %v3744_v9 = vadd.f32 %v3459_v2, %v1916_v0  ;;  %v1918_v17 = vadd.f32 %v1917_v55, %v1440_v3  ;;  %v828_v55 = vsel %vm616_vm2, %v823_v45, %v827_v46  ;;  %v833_v7 = vshll.u32 %v6223_v62, 16 }
 0x18e   : > { %6682 = vst [vmem:[%s6901_s26 + $0x70] sm:$0xff] %v6408_v1   ;;  %v2855_v10 = vshll.u32 %v7141_v63, 16  ;;  %v3907_v12 = vrot.slane %v7141_v63, 1 }
 0x18f   : > { %v4560_v16 = vadd.f32 %v4275_v59, %v3744_v9  ;;  %v2851_v9 = vshrl.u32 %v7126_v30, 16  ;;  %v835_v15 = vrot.slane %v833_v7, 1 }
 0x190   : > { %5748 = vmatmul.msk.bf16.gmra.mxu1 %vm1155_vm0, %v6220_v27 }
 0x191   : > { %v4277_v11 = vpop.f32.mrf.mxu3  ;;  %v4824_v25 = vmul.f32 0.2, %v4560_v16  ;;  %vm4692_vm7 = vcmp.gt.f32.partialorder %v4560_v16, 0.0 }
 0x193   : > { %v4956_v31 = vsel %vm4692_vm7, %v4560_v16, %v4824_v25  ;;  %v2853_v16 = vor.u32 %v2851_v9, %v2849_v48 }
 0x194   : > { %v3461_v19 = vpop.f32.mrf.mxu2  ;;  %v1443_v21 = vpop.f32.mrf.mxu0 }
 0x195   : > { %v3745_v20 = vadd.f32 %v3461_v19, %v1918_v17  ;;  %v1922_v24 = vpop.f32.mrf.mxu1  ;;  %v1921_v33 = vadd.f32 %v1920_v6, %v1443_v21  ;;  %v829_v6 = vshrl.u32 %v6222_v29, 16  ;;  %v2857_v17 = vrot.slane %v2855_v10, 1 }
 0x196   : > { %6152 = vmatmul.msk.bf16.gmra.mxu3 %vm1155_vm0, %v3904_v18 }
 0x197   : > { %v4561_v26 = vadd.f32 %v4277_v11, %v3745_v20  ;;  %5678 = vmatmul.msk.bf16.gmra.mxu0 %vm1155_vm0, %v820_v22  ;;  %v831_v14 = vor.u32 %v829_v6, %v827_v46  ;;  %v3908_v20 = vsel %vm3853_vm1, %v3905_v43, %v3907_v12  ;;  %v2858_v25 = vsel %vm616_vm2, %v2853_v16, %v2857_v17 }
 0x199   : > { %vm4693_vm8 = vcmp.gt.f32.partialorder %v4561_v26, 0.0  ;;  %v4825_v27 = vmul.f32 0.2, %v4561_v26  ;;  %6080 = vmatmul.msk.bf16.gmra.mxu2 %vm1155_vm0, %v2842_v23  ;;  %v4280_v28 = vpop.f32.mrf.mxu3 }
 0x19b   : > { %v4957_v32 = vsel %vm4693_vm8, %v4561_v26, %v4825_v27 }
 0x19c   : > { %v6413_v34 = vpack.c.bf16 %v4957_v32, %v4956_v31  ;;  %v3464_v35 = vpop.f32.mrf.mxu2  ;;  %v1445_v36 = vpop.f32.mrf.mxu0  ;;  %v6224_v31 = vld [vmem:[%s6793_s22 + $0xe0] sm:$0xff]  ;;  %v7156_v32 = vld [vmem:[%s6793_s22 + $0xf0] sm:$0xff] }
 0x19d   : > { %v1925_v39 = vpop.f32.mrf.mxu1  ;;  %v3746_v42 = vadd.f32 %v3464_v35, %v1921_v33  ;;  %v1923_v50 = vadd.f32 %v1922_v24, %v1445_v36  ;;  %v836_v24 = vsel %vm616_vm2, %v831_v14, %v835_v15  ;;  %v841_v40 = vshll.u32 %v6224_v31, 16 }
 0x19e   : > { %6683 = vst [vmem:[%s6901_s26 + $0x78] sm:$0xff] %v6413_v34   ;;  %v2863_v43 = vshll.u32 %v7156_v32, 16  ;;  %v3909_v45 = vrot.slane %v7156_v32, 1 }
 0x19f   : > { %v4562_v49 = vadd.f32 %v4280_v28, %v3746_v42  ;;  %v2859_v42 = vshrl.u32 %v7141_v63, 16  ;;  %v843_v48 = vrot.slane %v841_v40, 1 }
 0x1a0   : > { %5749 = vmatmul.msk.bf16.gmra.mxu1 %vm1155_vm0, %v6221_v60 }
 0x1a1   : > { %v4282_v44 = vpop.f32.mrf.mxu3  ;;  %v4826_v58 = vmul.f32 0.2, %v4562_v49  ;;  %vm4694_vm9 = vcmp.gt.f32.partialorder %v4562_v49, 0.0 }
 0x1a3   : > { %v4958_v0 = vsel %vm4694_vm9, %v4562_v49, %v4826_v58  ;;  %v2861_v49 = vor.u32 %v2859_v42, %v2857_v17 }
 0x1a4   : > { %v3466_v52 = vpop.f32.mrf.mxu2  ;;  %v1448_v54 = vpop.f32.mrf.mxu0 }
 0x1a5   : > { %v3747_v53 = vadd.f32 %v3466_v52, %v1923_v50  ;;  %v1927_v57 = vpop.f32.mrf.mxu1  ;;  %v1926_v2 = vadd.f32 %v1925_v39, %v1448_v54  ;;  %v837_v39 = vshrl.u32 %v6223_v62, 16  ;;  %v2865_v50 = vrot.slane %v2863_v43, 1 }
 0x1a6   : > { %6153 = vmatmul.msk.bf16.gmra.mxu3 %vm1155_vm0, %v3906_v51 }
 0x1a7   : > { %v4563_v59 = vadd.f32 %v4282_v44, %v3747_v53  ;;  %5679 = vmatmul.msk.bf16.gmra.mxu0 %vm1155_vm0, %v828_v55  ;;  %v839_v47 = vor.u32 %v837_v39, %v835_v15  ;;  %v3910_v53 = vsel %vm3853_vm1, %v3907_v12, %v3909_v45  ;;  %v2866_v58 = vsel %vm616_vm2, %v2861_v49, %v2865_v50 }
 0x1a9   : > { %vm4695_vm10 = vcmp.gt.f32.partialorder %v4563_v59, 0.0  ;;  %v4827_v60 = vmul.f32 0.2, %v4563_v59  ;;  %6081 = vmatmul.msk.bf16.gmra.mxu2 %vm1155_vm0, %v2850_v56  ;;  %v4285_v61 = vpop.f32.mrf.mxu3 }
 0x1ab   : > { %v4959_v1 = vsel %vm4695_vm10, %v4563_v59, %v4827_v60 }
 0x1ac   : > { %v6418_v3 = vpack.c.bf16 %v4959_v1, %v4958_v0  ;;  %v3469_v4 = vpop.f32.mrf.mxu2  ;;  %v1450_v5 = vpop.f32.mrf.mxu0  ;;  %v6225_v0 = vld [vmem:[%s6793_s22 + $0xe8] sm:$0xff]  ;;  %v7171_v1 = vld [vmem:[%s6793_s22 + $0xf8] sm:$0xff] }
 0x1ad   : > { %v1930_v8 = vpop.f32.mrf.mxu1  ;;  %v3748_v11 = vadd.f32 %v3469_v4, %v1926_v2  ;;  %v1928_v19 = vadd.f32 %v1927_v57, %v1450_v5  ;;  %v844_v57 = vsel %vm616_vm2, %v839_v47, %v843_v48  ;;  %v849_v9 = vshll.u32 %v6225_v0, 16 }
 0x1ae   : > { %6684 = vst [vmem:[%s6901_s26 + $0x80] sm:$0xff] %v6418_v3   ;;  %v2871_v12 = vshll.u32 %v7171_v1, 16  ;;  %v3911_v14 = vrot.slane %v7171_v1, 1 }
 0x1af   : > { %v4564_v18 = vadd.f32 %v4285_v61, %v3748_v11  ;;  %v2867_v11 = vshrl.u32 %v7156_v32, 16  ;;  %v851_v17 = vrot.slane %v849_v9, 1 }
 0x1b0   : > { %5750 = vmatmul.msk.bf16.gmra.mxu1 %vm1155_vm0, %v6222_v29 }
 0x1b1   : > { %v4287_v13 = vpop.f32.mrf.mxu3  ;;  %v4828_v27 = vmul.f32 0.2, %v4564_v18  ;;  %vm4696_vm11 = vcmp.gt.f32.partialorder %v4564_v18, 0.0 }
 0x1b3   : > { %v4960_v33 = vsel %vm4696_vm11, %v4564_v18, %v4828_v27  ;;  %v2869_v18 = vor.u32 %v2867_v11, %v2865_v50 }
 0x1b4   : > { %v3471_v21 = vpop.f32.mrf.mxu2  ;;  %v1453_v23 = vpop.f32.mrf.mxu0 }
 0x1b5   : > { %v3749_v22 = vadd.f32 %v3471_v21, %v1928_v19  ;;  %v1932_v26 = vpop.f32.mrf.mxu1  ;;  %v1931_v35 = vadd.f32 %v1930_v8, %v1453_v23  ;;  %v845_v8 = vshrl.u32 %v6224_v31, 16  ;;  %v2873_v19 = vrot.slane %v2871_v12, 1 }
 0x1b6   : > { %6154 = vmatmul.msk.bf16.gmra.mxu3 %vm1155_vm0, %v3908_v20 }
 0x1b7   : > { %v4565_v28 = vadd.f32 %v4287_v13, %v3749_v22  ;;  %5680 = vmatmul.msk.bf16.gmra.mxu0 %vm1155_vm0, %v836_v24  ;;  %v847_v16 = vor.u32 %v845_v8, %v843_v48  ;;  %v3912_v22 = vsel %vm3853_vm1, %v3909_v45, %v3911_v14  ;;  %v2874_v27 = vsel %vm616_vm2, %v2869_v18, %v2873_v19 }
 0x1b9   : > { %vm4697_vm12 = vcmp.gt.f32.partialorder %v4565_v28, 0.0  ;;  %v4829_v29 = vmul.f32 0.2, %v4565_v28  ;;  %6082 = vmatmul.msk.bf16.gmra.mxu2 %vm1155_vm0, %v2858_v25  ;;  %v4290_v30 = vpop.f32.mrf.mxu3 }
 0x1bb   : > { %v4961_v34 = vsel %vm4697_vm12, %v4565_v28, %v4829_v29 }
 0x1bc   : > { %v6423_v36 = vpack.c.bf16 %v4961_v34, %v4960_v33  ;;  %v3474_v37 = vpop.f32.mrf.mxu2  ;;  %v1455_v38 = vpop.f32.mrf.mxu0  ;;  %v6226_v33 = vld [vmem:[%s6793_s22 + $0xf0] sm:$0xff]  ;;  %v7186_v34 = vld [vmem:[%s6793_s22 + $0x100] sm:$0xff] }
 0x1bd   : > { %v1935_v41 = vpop.f32.mrf.mxu1  ;;  %v3750_v44 = vadd.f32 %v3474_v37, %v1931_v35  ;;  %v1933_v52 = vadd.f32 %v1932_v26, %v1455_v38  ;;  %v852_v26 = vsel %vm616_vm2, %v847_v16, %v851_v17  ;;  %v857_v42 = vshll.u32 %v6226_v33, 16 }
 0x1be   : > { %6685 = vst [vmem:[%s6901_s26 + $0x88] sm:$0xff] %v6423_v36   ;;  %v2879_v45 = vshll.u32 %v7186_v34, 16  ;;  %v3913_v47 = vrot.slane %v7186_v34, 1 }
 0x1bf   : > { %v4566_v51 = vadd.f32 %v4290_v30, %v3750_v44  ;;  %v2875_v44 = vshrl.u32 %v7171_v1, 16  ;;  %v859_v50 = vrot.slane %v857_v42, 1 }
 0x1c0   : > { %5751 = vmatmul.msk.bf16.gmra.mxu1 %vm1155_vm0, %v6223_v62 }
 0x1c1   : > { %v4292_v46 = vpop.f32.mrf.mxu3  ;;  %v4830_v60 = vmul.f32 0.2, %v4566_v51  ;;  %vm4698_vm13 = vcmp.gt.f32.partialorder %v4566_v51, 0.0 }
 0x1c3   : > { %v4962_v2 = vsel %vm4698_vm13, %v4566_v51, %v4830_v60  ;;  %v2877_v51 = vor.u32 %v2875_v44, %v2873_v19 }
 0x1c4   : > { %v3476_v54 = vpop.f32.mrf.mxu2  ;;  %v1458_v56 = vpop.f32.mrf.mxu0 }
 0x1c5   : > { %v3751_v55 = vadd.f32 %v3476_v54, %v1933_v52  ;;  %v1937_v59 = vpop.f32.mrf.mxu1  ;;  %v1936_v4 = vadd.f32 %v1935_v41, %v1458_v56  ;;  %v853_v41 = vshrl.u32 %v6225_v0, 16  ;;  %v2881_v52 = vrot.slane %v2879_v45, 1 }
 0x1c6   : > { %6155 = vmatmul.msk.bf16.gmra.mxu3 %vm1155_vm0, %v3910_v53 }
 0x1c7   : > { %v4567_v61 = vadd.f32 %v4292_v46, %v3751_v55  ;;  %5681 = vmatmul.msk.bf16.gmra.mxu0 %vm1155_vm0, %v844_v57  ;;  %v855_v49 = vor.u32 %v853_v41, %v851_v17  ;;  %v3914_v55 = vsel %vm3853_vm1, %v3911_v14, %v3913_v47  ;;  %v2882_v60 = vsel %vm616_vm2, %v2877_v51, %v2881_v52 }
 0x1c9   : > { %vm4699_vm14 = vcmp.gt.f32.partialorder %v4567_v61, 0.0  ;;  %v4831_v62 = vmul.f32 0.2, %v4567_v61  ;;  %6083 = vmatmul.msk.bf16.gmra.mxu2 %vm1155_vm0, %v2866_v58  ;;  %v4295_v63 = vpop.f32.mrf.mxu3 }
 0x1cb   : > { %v4963_v3 = vsel %vm4699_vm14, %v4567_v61, %v4831_v62 }
 0x1cc   : > { %v6428_v5 = vpack.c.bf16 %v4963_v3, %v4962_v2  ;;  %v3479_v6 = vpop.f32.mrf.mxu2  ;;  %v1460_v7 = vpop.f32.mrf.mxu0  ;;  %v6227_v2 = vld [vmem:[%s6793_s22 + $0xf8] sm:$0xff]  ;;  %v7201_v3 = vld [vmem:[%s6793_s22 + $0x108] sm:$0xff] }
 0x1cd   : > { %v1940_v10 = vpop.f32.mrf.mxu1  ;;  %v3752_v13 = vadd.f32 %v3479_v6, %v1936_v4  ;;  %v1938_v21 = vadd.f32 %v1937_v59, %v1460_v7  ;;  %v860_v59 = vsel %vm616_vm2, %v855_v49, %v859_v50  ;;  %v865_v11 = vshll.u32 %v6227_v2, 16 }
 0x1ce   : > { %6686 = vst [vmem:[%s6901_s26 + $0x90] sm:$0xff] %v6428_v5   ;;  %v2887_v14 = vshll.u32 %v7201_v3, 16  ;;  %v3915_v16 = vrot.slane %v7201_v3, 1 }
 0x1cf   : > { %v4568_v20 = vadd.f32 %v4295_v63, %v3752_v13  ;;  %v2883_v13 = vshrl.u32 %v7186_v34, 16  ;;  %v867_v19 = vrot.slane %v865_v11, 1 }
 0x1d0   : > { %5752 = vmatmul.msk.bf16.gmra.mxu1 %vm1155_vm0, %v6224_v31 }
 0x1d1   : > { %v4297_v15 = vpop.f32.mrf.mxu3  ;;  %v4832_v29 = vmul.f32 0.2, %v4568_v20  ;;  %vm4700_vm15 = vcmp.gt.f32.partialorder %v4568_v20, 0.0 }
 0x1d3   : > { %v4964_v35 = vsel %vm4700_vm15, %v4568_v20, %v4832_v29  ;;  %v2885_v20 = vor.u32 %v2883_v13, %v2881_v52 }
 0x1d4   : > { %v3481_v23 = vpop.f32.mrf.mxu2  ;;  %v1463_v25 = vpop.f32.mrf.mxu0 }
 0x1d5   : > { %v3753_v24 = vadd.f32 %v3481_v23, %v1938_v21  ;;  %v1942_v28 = vpop.f32.mrf.mxu1  ;;  %v1941_v37 = vadd.f32 %v1940_v10, %v1463_v25  ;;  %v861_v10 = vshrl.u32 %v6226_v33, 16  ;;  %v2889_v21 = vrot.slane %v2887_v14, 1 }
 0x1d6   : > { %6156 = vmatmul.msk.bf16.gmra.mxu3 %vm1155_vm0, %v3912_v22 }
 0x1d7   : > { %v4569_v30 = vadd.f32 %v4297_v15, %v3753_v24  ;;  %5682 = vmatmul.msk.bf16.gmra.mxu0 %vm1155_vm0, %v852_v26  ;;  %v863_v18 = vor.u32 %v861_v10, %v859_v50  ;;  %v3916_v24 = vsel %vm3853_vm1, %v3913_v47, %v3915_v16  ;;  %v2890_v29 = vsel %vm616_vm2, %v2885_v20, %v2889_v21 }
 0x1d9   : > { %vm4701_vm3 = vcmp.gt.f32.partialorder %v4569_v30, 0.0  ;;  %v4833_v31 = vmul.f32 0.2, %v4569_v30  ;;  %6084 = vmatmul.msk.bf16.gmra.mxu2 %vm1155_vm0, %v2874_v27  ;;  %v4300_v32 = vpop.f32.mrf.mxu3 }
 0x1db   : > { %v4965_v36 = vsel %vm4701_vm3, %v4569_v30, %v4833_v31 }
 0x1dc   : > { %v6433_v38 = vpack.c.bf16 %v4965_v36, %v4964_v35  ;;  %v3484_v39 = vpop.f32.mrf.mxu2  ;;  %v1465_v40 = vpop.f32.mrf.mxu0  ;;  %v6228_v35 = vld [vmem:[%s6793_s22 + $0x100] sm:$0xff]  ;;  %v7216_v36 = vld [vmem:[%s6793_s22 + $0x110] sm:$0xff] }
 0x1dd   : > { %v1945_v43 = vpop.f32.mrf.mxu1  ;;  %v3754_v46 = vadd.f32 %v3484_v39, %v1941_v37  ;;  %v1943_v54 = vadd.f32 %v1942_v28, %v1465_v40  ;;  %v868_v28 = vsel %vm616_vm2, %v863_v18, %v867_v19  ;;  %v873_v44 = vshll.u32 %v6228_v35, 16 }
 0x1de   : > { %6687 = vst [vmem:[%s6901_s26 + $0x98] sm:$0xff] %v6433_v38   ;;  %v2895_v47 = vshll.u32 %v7216_v36, 16  ;;  %v3917_v49 = vrot.slane %v7216_v36, 1 }
 0x1df   : > { %v4570_v53 = vadd.f32 %v4300_v32, %v3754_v46  ;;  %v2891_v46 = vshrl.u32 %v7201_v3, 16  ;;  %v875_v52 = vrot.slane %v873_v44, 1 }
 0x1e0   : > { %5753 = vmatmul.msk.bf16.gmra.mxu1 %vm1155_vm0, %v6225_v0 }
 0x1e1   : > { %v4302_v48 = vpop.f32.mrf.mxu3  ;;  %v4834_v62 = vmul.f32 0.2, %v4570_v53  ;;  %vm4702_vm4 = vcmp.gt.f32.partialorder %v4570_v53, 0.0 }
 0x1e3   : > { %v4966_v4 = vsel %vm4702_vm4, %v4570_v53, %v4834_v62  ;;  %v2893_v53 = vor.u32 %v2891_v46, %v2889_v21 }
 0x1e4   : > { %v3486_v56 = vpop.f32.mrf.mxu2  ;;  %v1468_v58 = vpop.f32.mrf.mxu0 }
 0x1e5   : > { %v3755_v57 = vadd.f32 %v3486_v56, %v1943_v54  ;;  %v1947_v61 = vpop.f32.mrf.mxu1  ;;  %v1946_v6 = vadd.f32 %v1945_v43, %v1468_v58  ;;  %v869_v43 = vshrl.u32 %v6227_v2, 16  ;;  %v2897_v54 = vrot.slane %v2895_v47, 1 }
 0x1e6   : > { %6157 = vmatmul.msk.bf16.gmra.mxu3 %vm1155_vm0, %v3914_v55 }
 0x1e7   : > { %v4571_v63 = vadd.f32 %v4302_v48, %v3755_v57  ;;  %5683 = vmatmul.msk.bf16.gmra.mxu0 %vm1155_vm0, %v860_v59  ;;  %v871_v51 = vor.u32 %v869_v43, %v867_v19  ;;  %v3918_v57 = vsel %vm3853_vm1, %v3915_v16, %v3917_v49  ;;  %v2898_v62 = vsel %vm616_vm2, %v2893_v53, %v2897_v54 }
 0x1e9   : > { %vm4703_vm5 = vcmp.gt.f32.partialorder %v4571_v63, 0.0  ;;  %v4835_v0 = vmul.f32 0.2, %v4571_v63  ;;  %6085 = vmatmul.msk.bf16.gmra.mxu2 %vm1155_vm0, %v2882_v60  ;;  %v4305_v1 = vpop.f32.mrf.mxu3 }
 0x1eb   : > { %v4967_v5 = vsel %vm4703_vm5, %v4571_v63, %v4835_v0 }
 0x1ec   : > { %v6438_v7 = vpack.c.bf16 %v4967_v5, %v4966_v4  ;;  %v3489_v8 = vpop.f32.mrf.mxu2  ;;  %v1470_v9 = vpop.f32.mrf.mxu0  ;;  %v6229_v4 = vld [vmem:[%s6793_s22 + $0x108] sm:$0xff]  ;;  %v7231_v5 = vld [vmem:[%s6793_s22 + $0x118] sm:$0xff] }
 0x1ed   : > { %v1950_v12 = vpop.f32.mrf.mxu1  ;;  %v3756_v15 = vadd.f32 %v3489_v8, %v1946_v6  ;;  %v1948_v23 = vadd.f32 %v1947_v61, %v1470_v9  ;;  %v876_v61 = vsel %vm616_vm2, %v871_v51, %v875_v52  ;;  %v881_v13 = vshll.u32 %v6229_v4, 16 }
 0x1ee   : > { %6688 = vst [vmem:[%s6901_s26 + $0xa0] sm:$0xff] %v6438_v7   ;;  %v2903_v16 = vshll.u32 %v7231_v5, 16  ;;  %v3919_v18 = vrot.slane %v7231_v5, 1 }
 0x1ef   : > { %v4572_v22 = vadd.f32 %v4305_v1, %v3756_v15  ;;  %v2899_v15 = vshrl.u32 %v7216_v36, 16  ;;  %v883_v21 = vrot.slane %v881_v13, 1 }
 0x1f0   : > { %5754 = vmatmul.msk.bf16.gmra.mxu1 %vm1155_vm0, %v6226_v33 }
 0x1f1   : > { %v4307_v17 = vpop.f32.mrf.mxu3  ;;  %v4836_v31 = vmul.f32 0.2, %v4572_v22  ;;  %vm4704_vm6 = vcmp.gt.f32.partialorder %v4572_v22, 0.0 }
 0x1f3   : > { %v4968_v37 = vsel %vm4704_vm6, %v4572_v22, %v4836_v31  ;;  %v2901_v22 = vor.u32 %v2899_v15, %v2897_v54 }
 0x1f4   : > { %v3491_v25 = vpop.f32.mrf.mxu2  ;;  %v1473_v27 = vpop.f32.mrf.mxu0 }
 0x1f5   : > { %v3757_v26 = vadd.f32 %v3491_v25, %v1948_v23  ;;  %v1952_v30 = vpop.f32.mrf.mxu1  ;;  %v1951_v39 = vadd.f32 %v1950_v12, %v1473_v27  ;;  %v877_v12 = vshrl.u32 %v6228_v35, 16  ;;  %v2905_v23 = vrot.slane %v2903_v16, 1 }
 0x1f6   : > { %6158 = vmatmul.msk.bf16.gmra.mxu3 %vm1155_vm0, %v3916_v24 }
 0x1f7   : > { %v4573_v32 = vadd.f32 %v4307_v17, %v3757_v26  ;;  %5684 = vmatmul.msk.bf16.gmra.mxu0 %vm1155_vm0, %v868_v28  ;;  %v879_v20 = vor.u32 %v877_v12, %v875_v52  ;;  %v3920_v26 = vsel %vm3853_vm1, %v3917_v49, %v3919_v18  ;;  %v2906_v31 = vsel %vm616_vm2, %v2901_v22, %v2905_v23 }
 0x1f9   : > { %vm4705_vm7 = vcmp.gt.f32.partialorder %v4573_v32, 0.0  ;;  %v4837_v33 = vmul.f32 0.2, %v4573_v32  ;;  %6086 = vmatmul.msk.bf16.gmra.mxu2 %vm1155_vm0, %v2890_v29  ;;  %v4310_v34 = vpop.f32.mrf.mxu3 }
 0x1fb   : > { %v4969_v38 = vsel %vm4705_vm7, %v4573_v32, %v4837_v33 }
 0x1fc   : > { %v6443_v40 = vpack.c.bf16 %v4969_v38, %v4968_v37  ;;  %v3494_v41 = vpop.f32.mrf.mxu2  ;;  %v1475_v42 = vpop.f32.mrf.mxu0  ;;  %v6230_v37 = vld [vmem:[%s6793_s22 + $0x110] sm:$0xff]  ;;  %v7246_v38 = vld [vmem:[%s6793_s22 + $0x120] sm:$0xff] }
 0x1fd   : > { %v1955_v45 = vpop.f32.mrf.mxu1  ;;  %v3758_v48 = vadd.f32 %v3494_v41, %v1951_v39  ;;  %v1953_v56 = vadd.f32 %v1952_v30, %v1475_v42  ;;  %v884_v30 = vsel %vm616_vm2, %v879_v20, %v883_v21  ;;  %v889_v46 = vshll.u32 %v6230_v37, 16 }
 0x1fe   : > { %6689 = vst [vmem:[%s6901_s26 + $0xa8] sm:$0xff] %v6443_v40   ;;  %v2911_v49 = vshll.u32 %v7246_v38, 16  ;;  %v3921_v51 = vrot.slane %v7246_v38, 1 }
 0x1ff   : > { %v4574_v55 = vadd.f32 %v4310_v34, %v3758_v48  ;;  %v2907_v48 = vshrl.u32 %v7231_v5, 16  ;;  %v891_v54 = vrot.slane %v889_v46, 1 }
 0x200   : > { %5755 = vmatmul.msk.bf16.gmra.mxu1 %vm1155_vm0, %v6227_v2 }
 0x201   : > { %v4312_v50 = vpop.f32.mrf.mxu3  ;;  %v4838_v0 = vmul.f32 0.2, %v4574_v55  ;;  %vm4706_vm8 = vcmp.gt.f32.partialorder %v4574_v55, 0.0 }
 0x203   : > { %v4970_v6 = vsel %vm4706_vm8, %v4574_v55, %v4838_v0  ;;  %v2909_v55 = vor.u32 %v2907_v48, %v2905_v23 }
 0x204   : > { %v3496_v58 = vpop.f32.mrf.mxu2  ;;  %v1478_v60 = vpop.f32.mrf.mxu0 }
 0x205   : > { %v3759_v59 = vadd.f32 %v3496_v58, %v1953_v56  ;;  %v1957_v63 = vpop.f32.mrf.mxu1  ;;  %v1956_v8 = vadd.f32 %v1955_v45, %v1478_v60  ;;  %v885_v45 = vshrl.u32 %v6229_v4, 16  ;;  %v2913_v56 = vrot.slane %v2911_v49, 1 }
 0x206   : > { %6159 = vmatmul.msk.bf16.gmra.mxu3 %vm1155_vm0, %v3918_v57 }
 0x207   : > { %v4575_v1 = vadd.f32 %v4312_v50, %v3759_v59  ;;  %5685 = vmatmul.msk.bf16.gmra.mxu0 %vm1155_vm0, %v876_v61  ;;  %v887_v53 = vor.u32 %v885_v45, %v883_v21  ;;  %v3922_v59 = vsel %vm3853_vm1, %v3919_v18, %v3921_v51  ;;  %v2914_v0 = vsel %vm616_vm2, %v2909_v55, %v2913_v56 }
 0x209   : > { %vm4707_vm9 = vcmp.gt.f32.partialorder %v4575_v1, 0.0  ;;  %v4839_v2 = vmul.f32 0.2, %v4575_v1  ;;  %6087 = vmatmul.msk.bf16.gmra.mxu2 %vm1155_vm0, %v2898_v62  ;;  %v4315_v3 = vpop.f32.mrf.mxu3 }
 0x20b   : > { %v4971_v7 = vsel %vm4707_vm9, %v4575_v1, %v4839_v2 }
 0x20c   : > { %v6448_v9 = vpack.c.bf16 %v4971_v7, %v4970_v6  ;;  %v3499_v10 = vpop.f32.mrf.mxu2  ;;  %v1480_v11 = vpop.f32.mrf.mxu0  ;;  %v6231_v6 = vld [vmem:[%s6793_s22 + $0x118] sm:$0xff]  ;;  %v7261_v7 = vld [vmem:[%s6793_s22 + $0x128] sm:$0xff] }
 0x20d   : > { %v1960_v14 = vpop.f32.mrf.mxu1  ;;  %v3760_v17 = vadd.f32 %v3499_v10, %v1956_v8  ;;  %v1958_v25 = vadd.f32 %v1957_v63, %v1480_v11  ;;  %v892_v63 = vsel %vm616_vm2, %v887_v53, %v891_v54  ;;  %v897_v15 = vshll.u32 %v6231_v6, 16 }
 0x20e   : > { %6690 = vst [vmem:[%s6901_s26 + $0xb0] sm:$0xff] %v6448_v9   ;;  %v2919_v18 = vshll.u32 %v7261_v7, 16  ;;  %v3923_v20 = vrot.slane %v7261_v7, 1 }
 0x20f   : > { %v4576_v24 = vadd.f32 %v4315_v3, %v3760_v17  ;;  %v2915_v17 = vshrl.u32 %v7246_v38, 16  ;;  %v899_v23 = vrot.slane %v897_v15, 1 }
 0x210   : > { %5756 = vmatmul.msk.bf16.gmra.mxu1 %vm1155_vm0, %v6228_v35 }
 0x211   : > { %v4317_v19 = vpop.f32.mrf.mxu3  ;;  %v4840_v33 = vmul.f32 0.2, %v4576_v24  ;;  %vm4708_vm10 = vcmp.gt.f32.partialorder %v4576_v24, 0.0 }
 0x213   : > { %v4972_v39 = vsel %vm4708_vm10, %v4576_v24, %v4840_v33  ;;  %v2917_v24 = vor.u32 %v2915_v17, %v2913_v56 }
 0x214   : > { %v3501_v27 = vpop.f32.mrf.mxu2  ;;  %v1483_v29 = vpop.f32.mrf.mxu0 }
 0x215   : > { %v3761_v28 = vadd.f32 %v3501_v27, %v1958_v25  ;;  %v1962_v32 = vpop.f32.mrf.mxu1  ;;  %v1961_v41 = vadd.f32 %v1960_v14, %v1483_v29  ;;  %v893_v14 = vshrl.u32 %v6230_v37, 16  ;;  %v2921_v25 = vrot.slane %v2919_v18, 1 }
 0x216   : > { %6160 = vmatmul.msk.bf16.gmra.mxu3 %vm1155_vm0, %v3920_v26 }
 0x217   : > { %v4577_v34 = vadd.f32 %v4317_v19, %v3761_v28  ;;  %5686 = vmatmul.msk.bf16.gmra.mxu0 %vm1155_vm0, %v884_v30  ;;  %v895_v22 = vor.u32 %v893_v14, %v891_v54  ;;  %v3924_v28 = vsel %vm3853_vm1, %v3921_v51, %v3923_v20  ;;  %v2922_v33 = vsel %vm616_vm2, %v2917_v24, %v2921_v25 }
 0x219   : > { %vm4709_vm11 = vcmp.gt.f32.partialorder %v4577_v34, 0.0  ;;  %v4841_v35 = vmul.f32 0.2, %v4577_v34  ;;  %6088 = vmatmul.msk.bf16.gmra.mxu2 %vm1155_vm0, %v2906_v31  ;;  %v4320_v36 = vpop.f32.mrf.mxu3 }
 0x21b   : > { %v4973_v40 = vsel %vm4709_vm11, %v4577_v34, %v4841_v35 }
 0x21c   : > { %v6453_v42 = vpack.c.bf16 %v4973_v40, %v4972_v39  ;;  %v3504_v43 = vpop.f32.mrf.mxu2  ;;  %v1485_v44 = vpop.f32.mrf.mxu0  ;;  %v6232_v39 = vld [vmem:[%s6793_s22 + $0x120] sm:$0xff]  ;;  %v7276_v40 = vld [vmem:[%s6793_s22 + $0x130] sm:$0xff] }
 0x21d   : > { %v1965_v47 = vpop.f32.mrf.mxu1  ;;  %v3762_v50 = vadd.f32 %v3504_v43, %v1961_v41  ;;  %v1963_v58 = vadd.f32 %v1962_v32, %v1485_v44  ;;  %v900_v32 = vsel %vm616_vm2, %v895_v22, %v899_v23  ;;  %v905_v48 = vshll.u32 %v6232_v39, 16 }
 0x21e   : > { %6691 = vst [vmem:[%s6901_s26 + $0xb8] sm:$0xff] %v6453_v42   ;;  %v2927_v51 = vshll.u32 %v7276_v40, 16  ;;  %v3925_v53 = vrot.slane %v7276_v40, 1 }
 0x21f   : > { %v4578_v57 = vadd.f32 %v4320_v36, %v3762_v50  ;;  %v2923_v50 = vshrl.u32 %v7261_v7, 16  ;;  %v907_v56 = vrot.slane %v905_v48, 1 }
 0x220   : > { %5757 = vmatmul.msk.bf16.gmra.mxu1 %vm1155_vm0, %v6229_v4 }
 0x221   : > { %v4322_v52 = vpop.f32.mrf.mxu3  ;;  %v4842_v2 = vmul.f32 0.2, %v4578_v57  ;;  %vm4710_vm12 = vcmp.gt.f32.partialorder %v4578_v57, 0.0 }
 0x223   : > { %v4974_v8 = vsel %vm4710_vm12, %v4578_v57, %v4842_v2  ;;  %v2925_v57 = vor.u32 %v2923_v50, %v2921_v25 }
 0x224   : > { %v3506_v60 = vpop.f32.mrf.mxu2  ;;  %v1488_v62 = vpop.f32.mrf.mxu0 }
 0x225   : > { %v3763_v61 = vadd.f32 %v3506_v60, %v1963_v58  ;;  %v1967_v1 = vpop.f32.mrf.mxu1  ;;  %v1966_v10 = vadd.f32 %v1965_v47, %v1488_v62  ;;  %v901_v47 = vshrl.u32 %v6231_v6, 16  ;;  %v2929_v58 = vrot.slane %v2927_v51, 1 }
 0x226   : > { %6161 = vmatmul.msk.bf16.gmra.mxu3 %vm1155_vm0, %v3922_v59 }
 0x227   : > { %v4579_v3 = vadd.f32 %v4322_v52, %v3763_v61  ;;  %5687 = vmatmul.msk.bf16.gmra.mxu0 %vm1155_vm0, %v892_v63  ;;  %v903_v55 = vor.u32 %v901_v47, %v899_v23  ;;  %v3926_v61 = vsel %vm3853_vm1, %v3923_v20, %v3925_v53  ;;  %v2930_v2 = vsel %vm616_vm2, %v2925_v57, %v2929_v58 }
 0x229   : > { %vm4711_vm13 = vcmp.gt.f32.partialorder %v4579_v3, 0.0  ;;  %v4843_v4 = vmul.f32 0.2, %v4579_v3  ;;  %6089 = vmatmul.msk.bf16.gmra.mxu2 %vm1155_vm0, %v2914_v0  ;;  %v4325_v5 = vpop.f32.mrf.mxu3 }
 0x22b   : > { %v4975_v9 = vsel %vm4711_vm13, %v4579_v3, %v4843_v4 }
 0x22c   : > { %v6458_v11 = vpack.c.bf16 %v4975_v9, %v4974_v8  ;;  %v3509_v12 = vpop.f32.mrf.mxu2  ;;  %v1490_v13 = vpop.f32.mrf.mxu0  ;;  %v6233_v8 = vld [vmem:[%s6793_s22 + $0x128] sm:$0xff]  ;;  %v7291_v9 = vld [vmem:[%s6793_s22 + $0x138] sm:$0xff] }
 0x22d   : > { %v1970_v16 = vpop.f32.mrf.mxu1  ;;  %v3764_v19 = vadd.f32 %v3509_v12, %v1966_v10  ;;  %v1968_v27 = vadd.f32 %v1967_v1, %v1490_v13  ;;  %v908_v1 = vsel %vm616_vm2, %v903_v55, %v907_v56  ;;  %v913_v17 = vshll.u32 %v6233_v8, 16 }
 0x22e   : > { %6692 = vst [vmem:[%s6901_s26 + $0xc0] sm:$0xff] %v6458_v11   ;;  %v2935_v20 = vshll.u32 %v7291_v9, 16  ;;  %v3927_v22 = vrot.slane %v7291_v9, 1 }
 0x22f   : > { %v4580_v26 = vadd.f32 %v4325_v5, %v3764_v19  ;;  %v2931_v19 = vshrl.u32 %v7276_v40, 16  ;;  %v915_v25 = vrot.slane %v913_v17, 1 }
 0x230   : > { %5758 = vmatmul.msk.bf16.gmra.mxu1 %vm1155_vm0, %v6230_v37 }
 0x231   : > { %v4327_v21 = vpop.f32.mrf.mxu3  ;;  %v4844_v35 = vmul.f32 0.2, %v4580_v26  ;;  %vm4712_vm14 = vcmp.gt.f32.partialorder %v4580_v26, 0.0 }
 0x233   : > { %v4976_v41 = vsel %vm4712_vm14, %v4580_v26, %v4844_v35  ;;  %v2933_v26 = vor.u32 %v2931_v19, %v2929_v58 }
 0x234   : > { %v3511_v29 = vpop.f32.mrf.mxu2  ;;  %v1493_v31 = vpop.f32.mrf.mxu0 }
 0x235   : > { %v3765_v30 = vadd.f32 %v3511_v29, %v1968_v27  ;;  %v1972_v34 = vpop.f32.mrf.mxu1  ;;  %v1971_v43 = vadd.f32 %v1970_v16, %v1493_v31  ;;  %v909_v16 = vshrl.u32 %v6232_v39, 16  ;;  %v2937_v27 = vrot.slane %v2935_v20, 1 }
 0x236   : > { %6162 = vmatmul.msk.bf16.gmra.mxu3 %vm1155_vm0, %v3924_v28 }
 0x237   : > { %v4581_v36 = vadd.f32 %v4327_v21, %v3765_v30  ;;  %5688 = vmatmul.msk.bf16.gmra.mxu0 %vm1155_vm0, %v900_v32  ;;  %v911_v24 = vor.u32 %v909_v16, %v907_v56  ;;  %v3928_v30 = vsel %vm3853_vm1, %v3925_v53, %v3927_v22  ;;  %v2938_v35 = vsel %vm616_vm2, %v2933_v26, %v2937_v27 }
 0x239   : > { %vm4713_vm15 = vcmp.gt.f32.partialorder %v4581_v36, 0.0  ;;  %v4845_v37 = vmul.f32 0.2, %v4581_v36  ;;  %6090 = vmatmul.msk.bf16.gmra.mxu2 %vm1155_vm0, %v2922_v33  ;;  %v4330_v38 = vpop.f32.mrf.mxu3 }
 0x23b   : > { %v4977_v42 = vsel %vm4713_vm15, %v4581_v36, %v4845_v37 }
 0x23c   : > { %v6463_v44 = vpack.c.bf16 %v4977_v42, %v4976_v41  ;;  %v3514_v45 = vpop.f32.mrf.mxu2  ;;  %v1495_v46 = vpop.f32.mrf.mxu0  ;;  %v6234_v41 = vld [vmem:[%s6793_s22 + $0x130] sm:$0xff]  ;;  %v7306_v42 = vld [vmem:[%s6793_s22 + $0x140] sm:$0xff] }
 0x23d   : > { %v1975_v49 = vpop.f32.mrf.mxu1  ;;  %v3766_v52 = vadd.f32 %v3514_v45, %v1971_v43  ;;  %v1973_v60 = vadd.f32 %v1972_v34, %v1495_v46  ;;  %v916_v34 = vsel %vm616_vm2, %v911_v24, %v915_v25  ;;  %v921_v50 = vshll.u32 %v6234_v41, 16 }
 0x23e   : > { %6693 = vst [vmem:[%s6901_s26 + $0xc8] sm:$0xff] %v6463_v44   ;;  %v2943_v53 = vshll.u32 %v7306_v42, 16  ;;  %v3929_v55 = vrot.slane %v7306_v42, 1 }
 0x23f   : > { %v4582_v59 = vadd.f32 %v4330_v38, %v3766_v52  ;;  %v2939_v52 = vshrl.u32 %v7291_v9, 16  ;;  %v923_v58 = vrot.slane %v921_v50, 1 }
 0x240   : > { %5759 = vmatmul.msk.bf16.gmra.mxu1 %vm1155_vm0, %v6231_v6 }
 0x241   : > { %v4332_v54 = vpop.f32.mrf.mxu3  ;;  %v4846_v4 = vmul.f32 0.2, %v4582_v59  ;;  %vm4714_vm3 = vcmp.gt.f32.partialorder %v4582_v59, 0.0 }
 0x243   : > { %v4978_v10 = vsel %vm4714_vm3, %v4582_v59, %v4846_v4  ;;  %v2941_v59 = vor.u32 %v2939_v52, %v2937_v27 }
 0x244   : > { %v3516_v62 = vpop.f32.mrf.mxu2  ;;  %v1498_v0 = vpop.f32.mrf.mxu0 }
 0x245   : > { %v3767_v63 = vadd.f32 %v3516_v62, %v1973_v60  ;;  %v1977_v3 = vpop.f32.mrf.mxu1  ;;  %v1976_v12 = vadd.f32 %v1975_v49, %v1498_v0  ;;  %v917_v49 = vshrl.u32 %v6233_v8, 16  ;;  %v2945_v60 = vrot.slane %v2943_v53, 1 }
 0x246   : > { %6163 = vmatmul.msk.bf16.gmra.mxu3 %vm1155_vm0, %v3926_v61 }
 0x247   : > { %v4583_v5 = vadd.f32 %v4332_v54, %v3767_v63  ;;  %5689 = vmatmul.msk.bf16.gmra.mxu0 %vm1155_vm0, %v908_v1  ;;  %v919_v57 = vor.u32 %v917_v49, %v915_v25  ;;  %v3930_v63 = vsel %vm3853_vm1, %v3927_v22, %v3929_v55  ;;  %v2946_v4 = vsel %vm616_vm2, %v2941_v59, %v2945_v60 }
 0x249   : > { %vm4715_vm4 = vcmp.gt.f32.partialorder %v4583_v5, 0.0  ;;  %v4847_v6 = vmul.f32 0.2, %v4583_v5  ;;  %6091 = vmatmul.msk.bf16.gmra.mxu2 %vm1155_vm0, %v2930_v2  ;;  %v4335_v7 = vpop.f32.mrf.mxu3 }
 0x24b   : > { %v4979_v11 = vsel %vm4715_vm4, %v4583_v5, %v4847_v6 }
 0x24c   : > { %v6468_v13 = vpack.c.bf16 %v4979_v11, %v4978_v10  ;;  %v3519_v14 = vpop.f32.mrf.mxu2  ;;  %v1500_v15 = vpop.f32.mrf.mxu0  ;;  %v6235_v10 = vld [vmem:[%s6793_s22 + $0x138] sm:$0xff]  ;;  %v7321_v11 = vld [vmem:[%s6793_s22 + $0x148] sm:$0xff] }
 0x24d   : > { %v1980_v18 = vpop.f32.mrf.mxu1  ;;  %v3768_v21 = vadd.f32 %v3519_v14, %v1976_v12  ;;  %v1978_v29 = vadd.f32 %v1977_v3, %v1500_v15  ;;  %v924_v3 = vsel %vm616_vm2, %v919_v57, %v923_v58  ;;  %v929_v19 = vshll.u32 %v6235_v10, 16 }
 0x24e   : > { %6694 = vst [vmem:[%s6901_s26 + $0xd0] sm:$0xff] %v6468_v13   ;;  %v2951_v22 = vshll.u32 %v7321_v11, 16  ;;  %v3931_v24 = vrot.slane %v7321_v11, 1 }
 0x24f   : > { %v4584_v28 = vadd.f32 %v4335_v7, %v3768_v21  ;;  %v2947_v21 = vshrl.u32 %v7306_v42, 16  ;;  %v931_v27 = vrot.slane %v929_v19, 1 }
 0x250   : > { %5760 = vmatmul.msk.bf16.gmra.mxu1 %vm1155_vm0, %v6232_v39 }
 0x251   : > { %v4337_v23 = vpop.f32.mrf.mxu3  ;;  %v4848_v37 = vmul.f32 0.2, %v4584_v28  ;;  %vm4716_vm5 = vcmp.gt.f32.partialorder %v4584_v28, 0.0 }
 0x253   : > { %v4980_v43 = vsel %vm4716_vm5, %v4584_v28, %v4848_v37  ;;  %v2949_v28 = vor.u32 %v2947_v21, %v2945_v60 }
 0x254   : > { %v3521_v31 = vpop.f32.mrf.mxu2  ;;  %v1503_v33 = vpop.f32.mrf.mxu0 }
 0x255   : > { %v3769_v32 = vadd.f32 %v3521_v31, %v1978_v29  ;;  %v1982_v36 = vpop.f32.mrf.mxu1  ;;  %v1981_v45 = vadd.f32 %v1980_v18, %v1503_v33  ;;  %v925_v18 = vshrl.u32 %v6234_v41, 16  ;;  %v2953_v29 = vrot.slane %v2951_v22, 1 }
 0x256   : > { %6164 = vmatmul.msk.bf16.gmra.mxu3 %vm1155_vm0, %v3928_v30 }
 0x257   : > { %v4585_v38 = vadd.f32 %v4337_v23, %v3769_v32  ;;  %5690 = vmatmul.msk.bf16.gmra.mxu0 %vm1155_vm0, %v916_v34  ;;  %v927_v26 = vor.u32 %v925_v18, %v923_v58  ;;  %v3932_v32 = vsel %vm3853_vm1, %v3929_v55, %v3931_v24  ;;  %v2954_v37 = vsel %vm616_vm2, %v2949_v28, %v2953_v29 }
 0x259   : > { %vm4717_vm6 = vcmp.gt.f32.partialorder %v4585_v38, 0.0  ;;  %v4849_v39 = vmul.f32 0.2, %v4585_v38  ;;  %6092 = vmatmul.msk.bf16.gmra.mxu2 %vm1155_vm0, %v2938_v35  ;;  %v4340_v40 = vpop.f32.mrf.mxu3 }
 0x25b   : > { %v4981_v44 = vsel %vm4717_vm6, %v4585_v38, %v4849_v39 }
 0x25c   : > { %v6473_v46 = vpack.c.bf16 %v4981_v44, %v4980_v43  ;;  %v3524_v47 = vpop.f32.mrf.mxu2  ;;  %v1505_v48 = vpop.f32.mrf.mxu0  ;;  %v6236_v43 = vld [vmem:[%s6793_s22 + $0x140] sm:$0xff]  ;;  %v7336_v44 = vld [vmem:[%s6793_s22 + $0x150] sm:$0xff] }
 0x25d   : > { %v1985_v51 = vpop.f32.mrf.mxu1  ;;  %v3770_v54 = vadd.f32 %v3524_v47, %v1981_v45  ;;  %v1983_v62 = vadd.f32 %v1982_v36, %v1505_v48  ;;  %v932_v36 = vsel %vm616_vm2, %v927_v26, %v931_v27  ;;  %v937_v52 = vshll.u32 %v6236_v43, 16 }
 0x25e   : > { %6695 = vst [vmem:[%s6901_s26 + $0xd8] sm:$0xff] %v6473_v46   ;;  %v2959_v55 = vshll.u32 %v7336_v44, 16  ;;  %v3933_v57 = vrot.slane %v7336_v44, 1 }
 0x25f   : > { %v4586_v61 = vadd.f32 %v4340_v40, %v3770_v54  ;;  %v2955_v54 = vshrl.u32 %v7321_v11, 16  ;;  %v939_v60 = vrot.slane %v937_v52, 1 }
 0x260   : > { %5761 = vmatmul.msk.bf16.gmra.mxu1 %vm1155_vm0, %v6233_v8 }
 0x261   : > { %v4342_v56 = vpop.f32.mrf.mxu3  ;;  %v4850_v6 = vmul.f32 0.2, %v4586_v61  ;;  %vm4718_vm7 = vcmp.gt.f32.partialorder %v4586_v61, 0.0 }
 0x263   : > { %v4982_v12 = vsel %vm4718_vm7, %v4586_v61, %v4850_v6  ;;  %v2957_v61 = vor.u32 %v2955_v54, %v2953_v29 }
 0x264   : > { %v3526_v0 = vpop.f32.mrf.mxu2  ;;  %v1508_v2 = vpop.f32.mrf.mxu0 }
 0x265   : > { %v3771_v1 = vadd.f32 %v3526_v0, %v1983_v62  ;;  %v1987_v5 = vpop.f32.mrf.mxu1  ;;  %v1986_v14 = vadd.f32 %v1985_v51, %v1508_v2  ;;  %v933_v51 = vshrl.u32 %v6235_v10, 16  ;;  %v2961_v62 = vrot.slane %v2959_v55, 1 }
 0x266   : > { %6165 = vmatmul.msk.bf16.gmra.mxu3 %vm1155_vm0, %v3930_v63 }
 0x267   : > { %v4587_v7 = vadd.f32 %v4342_v56, %v3771_v1  ;;  %5691 = vmatmul.msk.bf16.gmra.mxu0 %vm1155_vm0, %v924_v3  ;;  %v935_v59 = vor.u32 %v933_v51, %v931_v27  ;;  %v3934_v1 = vsel %vm3853_vm1, %v3931_v24, %v3933_v57  ;;  %v2962_v6 = vsel %vm616_vm2, %v2957_v61, %v2961_v62 }
 0x269   : > { %vm4719_vm8 = vcmp.gt.f32.partialorder %v4587_v7, 0.0  ;;  %v4851_v8 = vmul.f32 0.2, %v4587_v7  ;;  %6093 = vmatmul.msk.bf16.gmra.mxu2 %vm1155_vm0, %v2946_v4  ;;  %v4345_v9 = vpop.f32.mrf.mxu3 }
 0x26b   : > { %v4983_v13 = vsel %vm4719_vm8, %v4587_v7, %v4851_v8 }
 0x26c   : > { %v6478_v15 = vpack.c.bf16 %v4983_v13, %v4982_v12  ;;  %v3529_v16 = vpop.f32.mrf.mxu2  ;;  %v1510_v17 = vpop.f32.mrf.mxu0  ;;  %v6237_v12 = vld [vmem:[%s6793_s22 + $0x148] sm:$0xff]  ;;  %v7351_v13 = vld [vmem:[%s6793_s22 + $0x158] sm:$0xff] }
 0x26d   : > { %v1990_v20 = vpop.f32.mrf.mxu1  ;;  %v3772_v23 = vadd.f32 %v3529_v16, %v1986_v14  ;;  %v1988_v31 = vadd.f32 %v1987_v5, %v1510_v17  ;;  %v940_v5 = vsel %vm616_vm2, %v935_v59, %v939_v60  ;;  %v945_v21 = vshll.u32 %v6237_v12, 16 }
 0x26e   : > { %6696 = vst [vmem:[%s6901_s26 + $0xe0] sm:$0xff] %v6478_v15   ;;  %v2967_v24 = vshll.u32 %v7351_v13, 16  ;;  %v3935_v26 = vrot.slane %v7351_v13, 1 }
 0x26f   : > { %v4588_v30 = vadd.f32 %v4345_v9, %v3772_v23  ;;  %v2963_v23 = vshrl.u32 %v7336_v44, 16  ;;  %v947_v29 = vrot.slane %v945_v21, 1 }
 0x270   : > { %5762 = vmatmul.msk.bf16.gmra.mxu1 %vm1155_vm0, %v6234_v41 }
 0x271   : > { %v4347_v25 = vpop.f32.mrf.mxu3  ;;  %v4852_v39 = vmul.f32 0.2, %v4588_v30  ;;  %vm4720_vm9 = vcmp.gt.f32.partialorder %v4588_v30, 0.0 }
 0x273   : > { %v4984_v45 = vsel %vm4720_vm9, %v4588_v30, %v4852_v39  ;;  %v2965_v30 = vor.u32 %v2963_v23, %v2961_v62 }
 0x274   : > { %v3531_v33 = vpop.f32.mrf.mxu2  ;;  %v1513_v35 = vpop.f32.mrf.mxu0 }
 0x275   : > { %v3773_v34 = vadd.f32 %v3531_v33, %v1988_v31  ;;  %v1992_v38 = vpop.f32.mrf.mxu1  ;;  %v1991_v47 = vadd.f32 %v1990_v20, %v1513_v35  ;;  %v941_v20 = vshrl.u32 %v6236_v43, 16  ;;  %v2969_v31 = vrot.slane %v2967_v24, 1 }
 0x276   : > { %6166 = vmatmul.msk.bf16.gmra.mxu3 %vm1155_vm0, %v3932_v32 }
 0x277   : > { %v4589_v40 = vadd.f32 %v4347_v25, %v3773_v34  ;;  %5692 = vmatmul.msk.bf16.gmra.mxu0 %vm1155_vm0, %v932_v36  ;;  %v943_v28 = vor.u32 %v941_v20, %v939_v60  ;;  %v3936_v34 = vsel %vm3853_vm1, %v3933_v57, %v3935_v26  ;;  %v2970_v39 = vsel %vm616_vm2, %v2965_v30, %v2969_v31 }
 0x279   : > { %vm4721_vm10 = vcmp.gt.f32.partialorder %v4589_v40, 0.0  ;;  %v4853_v41 = vmul.f32 0.2, %v4589_v40  ;;  %6094 = vmatmul.msk.bf16.gmra.mxu2 %vm1155_vm0, %v2954_v37  ;;  %v4350_v42 = vpop.f32.mrf.mxu3 }
 0x27b   : > { %v4985_v46 = vsel %vm4721_vm10, %v4589_v40, %v4853_v41 }
 0x27c   : > { %v6483_v48 = vpack.c.bf16 %v4985_v46, %v4984_v45  ;;  %v3534_v49 = vpop.f32.mrf.mxu2  ;;  %v1515_v50 = vpop.f32.mrf.mxu0  ;;  %v6238_v45 = vld [vmem:[%s6793_s22 + $0x150] sm:$0xff]  ;;  %v7366_v46 = vld [vmem:[%s6793_s22 + $0x160] sm:$0xff] }
 0x27d   : > { %v1995_v53 = vpop.f32.mrf.mxu1  ;;  %v3774_v56 = vadd.f32 %v3534_v49, %v1991_v47  ;;  %v1993_v0 = vadd.f32 %v1992_v38, %v1515_v50  ;;  %v948_v38 = vsel %vm616_vm2, %v943_v28, %v947_v29  ;;  %v953_v54 = vshll.u32 %v6238_v45, 16 }
 0x27e   : > { %6697 = vst [vmem:[%s6901_s26 + $0xe8] sm:$0xff] %v6483_v48   ;;  %v2975_v57 = vshll.u32 %v7366_v46, 16  ;;  %v3937_v59 = vrot.slane %v7366_v46, 1 }
 0x27f   : > { %v4590_v63 = vadd.f32 %v4350_v42, %v3774_v56  ;;  %v2971_v56 = vshrl.u32 %v7351_v13, 16  ;;  %v955_v62 = vrot.slane %v953_v54, 1 }
 0x280   : > { %5763 = vmatmul.msk.bf16.gmra.mxu1 %vm1155_vm0, %v6235_v10 }
 0x281   : > { %v4352_v58 = vpop.f32.mrf.mxu3  ;;  %v4854_v8 = vmul.f32 0.2, %v4590_v63  ;;  %vm4722_vm11 = vcmp.gt.f32.partialorder %v4590_v63, 0.0 }
 0x283   : > { %v4986_v14 = vsel %vm4722_vm11, %v4590_v63, %v4854_v8  ;;  %v2973_v63 = vor.u32 %v2971_v56, %v2969_v31 }
 0x284   : > { %v3536_v2 = vpop.f32.mrf.mxu2  ;;  %v1518_v4 = vpop.f32.mrf.mxu0 }
 0x285   : > { %v3775_v3 = vadd.f32 %v3536_v2, %v1993_v0  ;;  %v1997_v7 = vpop.f32.mrf.mxu1  ;;  %v1996_v16 = vadd.f32 %v1995_v53, %v1518_v4  ;;  %v949_v53 = vshrl.u32 %v6237_v12, 16  ;;  %v2977_v0 = vrot.slane %v2975_v57, 1 }
 0x286   : > { %6167 = vmatmul.msk.bf16.gmra.mxu3 %vm1155_vm0, %v3934_v1 }
 0x287   : > { %v4591_v9 = vadd.f32 %v4352_v58, %v3775_v3  ;;  %5693 = vmatmul.msk.bf16.gmra.mxu0 %vm1155_vm0, %v940_v5  ;;  %v951_v61 = vor.u32 %v949_v53, %v947_v29  ;;  %v3938_v3 = vsel %vm3853_vm1, %v3935_v26, %v3937_v59  ;;  %v2978_v8 = vsel %vm616_vm2, %v2973_v63, %v2977_v0 }
 0x289   : > { %vm4723_vm12 = vcmp.gt.f32.partialorder %v4591_v9, 0.0  ;;  %v4855_v10 = vmul.f32 0.2, %v4591_v9  ;;  %6095 = vmatmul.msk.bf16.gmra.mxu2 %vm1155_vm0, %v2962_v6  ;;  %v4355_v11 = vpop.f32.mrf.mxu3 }
 0x28b   : > { %v4987_v15 = vsel %vm4723_vm12, %v4591_v9, %v4855_v10 }
 0x28c   : > { %v6488_v17 = vpack.c.bf16 %v4987_v15, %v4986_v14  ;;  %v3539_v18 = vpop.f32.mrf.mxu2  ;;  %v1520_v19 = vpop.f32.mrf.mxu0  ;;  %v6239_v14 = vld [vmem:[%s6793_s22 + $0x158] sm:$0xff]  ;;  %v7381_v15 = vld [vmem:[%s6793_s22 + $0x168] sm:$0xff] }
 0x28d   : > { %v2000_v22 = vpop.f32.mrf.mxu1  ;;  %v3776_v25 = vadd.f32 %v3539_v18, %v1996_v16  ;;  %v1998_v33 = vadd.f32 %v1997_v7, %v1520_v19  ;;  %v956_v7 = vsel %vm616_vm2, %v951_v61, %v955_v62  ;;  %v961_v23 = vshll.u32 %v6239_v14, 16 }
 0x28e   : > { %6698 = vst [vmem:[%s6901_s26 + $0xf0] sm:$0xff] %v6488_v17   ;;  %v2983_v26 = vshll.u32 %v7381_v15, 16  ;;  %v3939_v28 = vrot.slane %v7381_v15, 1 }
 0x28f   : > { %v4592_v32 = vadd.f32 %v4355_v11, %v3776_v25  ;;  %v2979_v25 = vshrl.u32 %v7366_v46, 16  ;;  %v963_v31 = vrot.slane %v961_v23, 1 }
 0x290   : > { %5764 = vmatmul.msk.bf16.gmra.mxu1 %vm1155_vm0, %v6236_v43 }
 0x291   : > { %v4357_v27 = vpop.f32.mrf.mxu3  ;;  %v4856_v41 = vmul.f32 0.2, %v4592_v32  ;;  %vm4724_vm13 = vcmp.gt.f32.partialorder %v4592_v32, 0.0 }
 0x293   : > { %v4988_v47 = vsel %vm4724_vm13, %v4592_v32, %v4856_v41  ;;  %v2981_v32 = vor.u32 %v2979_v25, %v2977_v0 }
 0x294   : > { %v3541_v35 = vpop.f32.mrf.mxu2  ;;  %v1523_v37 = vpop.f32.mrf.mxu0 }
 0x295   : > { %v3777_v36 = vadd.f32 %v3541_v35, %v1998_v33  ;;  %v2002_v40 = vpop.f32.mrf.mxu1  ;;  %v2001_v49 = vadd.f32 %v2000_v22, %v1523_v37  ;;  %v957_v22 = vshrl.u32 %v6238_v45, 16  ;;  %v2985_v33 = vrot.slane %v2983_v26, 1 }
 0x296   : > { %6168 = vmatmul.msk.bf16.gmra.mxu3 %vm1155_vm0, %v3936_v34 }
 0x297   : > { %v4593_v42 = vadd.f32 %v4357_v27, %v3777_v36  ;;  %5694 = vmatmul.msk.bf16.gmra.mxu0 %vm1155_vm0, %v948_v38  ;;  %v959_v30 = vor.u32 %v957_v22, %v955_v62  ;;  %v3940_v36 = vsel %vm3853_vm1, %v3937_v59, %v3939_v28  ;;  %v2986_v41 = vsel %vm616_vm2, %v2981_v32, %v2985_v33 }
 0x299   : > { %vm4725_vm14 = vcmp.gt.f32.partialorder %v4593_v42, 0.0  ;;  %v4857_v43 = vmul.f32 0.2, %v4593_v42  ;;  %6096 = vmatmul.msk.bf16.gmra.mxu2 %vm1155_vm0, %v2970_v39  ;;  %v4360_v44 = vpop.f32.mrf.mxu3 }
 0x29b   : > { %v4989_v48 = vsel %vm4725_vm14, %v4593_v42, %v4857_v43 }
 0x29c   : > { %v6493_v50 = vpack.c.bf16 %v4989_v48, %v4988_v47  ;;  %v3544_v51 = vpop.f32.mrf.mxu2  ;;  %v1525_v52 = vpop.f32.mrf.mxu0  ;;  %v6240_v47 = vld [vmem:[%s6793_s22 + $0x160] sm:$0xff]  ;;  %v7396_v48 = vld [vmem:[%s6793_s22 + $0x170] sm:$0xff] }
 0x29d   : > { %v2005_v55 = vpop.f32.mrf.mxu1  ;;  %v3778_v58 = vadd.f32 %v3544_v51, %v2001_v49  ;;  %v2003_v2 = vadd.f32 %v2002_v40, %v1525_v52  ;;  %v964_v40 = vsel %vm616_vm2, %v959_v30, %v963_v31  ;;  %v969_v56 = vshll.u32 %v6240_v47, 16 }
 0x29e   : > { %6699 = vst [vmem:[%s6901_s26 + $0xf8] sm:$0xff] %v6493_v50   ;;  %v2991_v59 = vshll.u32 %v7396_v48, 16  ;;  %v3941_v61 = vrot.slane %v7396_v48, 1 }
 0x29f   : > { %v4594_v1 = vadd.f32 %v4360_v44, %v3778_v58  ;;  %v2987_v58 = vshrl.u32 %v7381_v15, 16  ;;  %v971_v0 = vrot.slane %v969_v56, 1 }
 0x2a0   : > { %5765 = vmatmul.msk.bf16.gmra.mxu1 %vm1155_vm0, %v6237_v12 }
 0x2a1   : > { %v4362_v60 = vpop.f32.mrf.mxu3  ;;  %v4858_v10 = vmul.f32 0.2, %v4594_v1  ;;  %vm4726_vm15 = vcmp.gt.f32.partialorder %v4594_v1, 0.0 }
 0x2a3   : > { %v4990_v16 = vsel %vm4726_vm15, %v4594_v1, %v4858_v10  ;;  %v2989_v1 = vor.u32 %v2987_v58, %v2985_v33 }
 0x2a4   : > { %v3546_v4 = vpop.f32.mrf.mxu2  ;;  %v1528_v6 = vpop.f32.mrf.mxu0 }
 0x2a5   : > { %v3779_v5 = vadd.f32 %v3546_v4, %v2003_v2  ;;  %v2007_v9 = vpop.f32.mrf.mxu1  ;;  %v2006_v18 = vadd.f32 %v2005_v55, %v1528_v6  ;;  %v965_v55 = vshrl.u32 %v6239_v14, 16  ;;  %v2993_v2 = vrot.slane %v2991_v59, 1 }
 0x2a6   : > { %6169 = vmatmul.msk.bf16.gmra.mxu3 %vm1155_vm0, %v3938_v3 }
 0x2a7   : > { %v4595_v11 = vadd.f32 %v4362_v60, %v3779_v5  ;;  %5695 = vmatmul.msk.bf16.gmra.mxu0 %vm1155_vm0, %v956_v7  ;;  %v967_v63 = vor.u32 %v965_v55, %v963_v31  ;;  %v3942_v5 = vsel %vm3853_vm1, %v3939_v28, %v3941_v61  ;;  %v2994_v10 = vsel %vm616_vm2, %v2989_v1, %v2993_v2 }
 0x2a9   : > { %vm4727_vm3 = vcmp.gt.f32.partialorder %v4595_v11, 0.0  ;;  %v4859_v12 = vmul.f32 0.2, %v4595_v11  ;;  %6097 = vmatmul.msk.bf16.gmra.mxu2 %vm1155_vm0, %v2978_v8  ;;  %v4365_v13 = vpop.f32.mrf.mxu3 }
 0x2ab   : > { %v4991_v17 = vsel %vm4727_vm3, %v4595_v11, %v4859_v12 }
 0x2ac   : > { %v6498_v19 = vpack.c.bf16 %v4991_v17, %v4990_v16  ;;  %v3549_v20 = vpop.f32.mrf.mxu2  ;;  %v1530_v21 = vpop.f32.mrf.mxu0  ;;  %v6241_v16 = vld [vmem:[%s6793_s22 + $0x168] sm:$0xff]  ;;  %v7411_v17 = vld [vmem:[%s6793_s22 + $0x178] sm:$0xff] }
 0x2ad   : > { %v2010_v24 = vpop.f32.mrf.mxu1  ;;  %v3780_v27 = vadd.f32 %v3549_v20, %v2006_v18  ;;  %v2008_v35 = vadd.f32 %v2007_v9, %v1530_v21  ;;  %v972_v9 = vsel %vm616_vm2, %v967_v63, %v971_v0  ;;  %v977_v25 = vshll.u32 %v6241_v16, 16 }
 0x2ae   : > { %6700 = vst [vmem:[%s6901_s26 + $0x100] sm:$0xff] %v6498_v19   ;;  %v2999_v28 = vshll.u32 %v7411_v17, 16  ;;  %v3943_v30 = vrot.slane %v7411_v17, 1 }
 0x2af   : > { %v4596_v34 = vadd.f32 %v4365_v13, %v3780_v27  ;;  %v2995_v27 = vshrl.u32 %v7396_v48, 16  ;;  %v979_v33 = vrot.slane %v977_v25, 1 }
 0x2b0   : > { %5766 = vmatmul.msk.bf16.gmra.mxu1 %vm1155_vm0, %v6238_v45 }
 0x2b1   : > { %v4367_v29 = vpop.f32.mrf.mxu3  ;;  %v4860_v43 = vmul.f32 0.2, %v4596_v34  ;;  %vm4728_vm4 = vcmp.gt.f32.partialorder %v4596_v34, 0.0 }
 0x2b3   : > { %v4992_v49 = vsel %vm4728_vm4, %v4596_v34, %v4860_v43  ;;  %v2997_v34 = vor.u32 %v2995_v27, %v2993_v2 }
 0x2b4   : > { %v3551_v37 = vpop.f32.mrf.mxu2  ;;  %v1533_v39 = vpop.f32.mrf.mxu0 }
 0x2b5   : > { %v3781_v38 = vadd.f32 %v3551_v37, %v2008_v35  ;;  %v2012_v42 = vpop.f32.mrf.mxu1  ;;  %v2011_v51 = vadd.f32 %v2010_v24, %v1533_v39  ;;  %v973_v24 = vshrl.u32 %v6240_v47, 16  ;;  %v3001_v35 = vrot.slane %v2999_v28, 1 }
 0x2b6   : > { %6170 = vmatmul.msk.bf16.gmra.mxu3 %vm1155_vm0, %v3940_v36 }
 0x2b7   : > { %v4597_v44 = vadd.f32 %v4367_v29, %v3781_v38  ;;  %5696 = vmatmul.msk.bf16.gmra.mxu0 %vm1155_vm0, %v964_v40  ;;  %v975_v32 = vor.u32 %v973_v24, %v971_v0  ;;  %v3944_v38 = vsel %vm3853_vm1, %v3941_v61, %v3943_v30  ;;  %v3002_v43 = vsel %vm616_vm2, %v2997_v34, %v3001_v35 }
 0x2b9   : > { %vm4729_vm5 = vcmp.gt.f32.partialorder %v4597_v44, 0.0  ;;  %v4861_v45 = vmul.f32 0.2, %v4597_v44  ;;  %6098 = vmatmul.msk.bf16.gmra.mxu2 %vm1155_vm0, %v2986_v41  ;;  %v4370_v46 = vpop.f32.mrf.mxu3 }
 0x2bb   : > { %v4993_v50 = vsel %vm4729_vm5, %v4597_v44, %v4861_v45 }
 0x2bc   : > { %v6503_v52 = vpack.c.bf16 %v4993_v50, %v4992_v49  ;;  %v3554_v53 = vpop.f32.mrf.mxu2  ;;  %v1535_v54 = vpop.f32.mrf.mxu0  ;;  %v6242_v49 = vld [vmem:[%s6793_s22 + $0x170] sm:$0xff]  ;;  %v7426_v50 = vld [vmem:[%s6793_s22 + $0x180] sm:$0xff] }
 0x2bd   : > { %v2015_v57 = vpop.f32.mrf.mxu1  ;;  %v3782_v60 = vadd.f32 %v3554_v53, %v2011_v51  ;;  %v2013_v4 = vadd.f32 %v2012_v42, %v1535_v54  ;;  %v980_v42 = vsel %vm616_vm2, %v975_v32, %v979_v33  ;;  %v985_v58 = vshll.u32 %v6242_v49, 16 }
 0x2be   : > { %6701 = vst [vmem:[%s6901_s26 + $0x108] sm:$0xff] %v6503_v52   ;;  %v3007_v61 = vshll.u32 %v7426_v50, 16  ;;  %v3945_v63 = vrot.slane %v7426_v50, 1 }
 0x2bf   : > { %v4598_v3 = vadd.f32 %v4370_v46, %v3782_v60  ;;  %v3003_v60 = vshrl.u32 %v7411_v17, 16  ;;  %v987_v2 = vrot.slane %v985_v58, 1 }
 0x2c0   : > { %5767 = vmatmul.msk.bf16.gmra.mxu1 %vm1155_vm0, %v6239_v14 }
 0x2c1   : > { %v4372_v62 = vpop.f32.mrf.mxu3  ;;  %v4862_v12 = vmul.f32 0.2, %v4598_v3  ;;  %vm4730_vm6 = vcmp.gt.f32.partialorder %v4598_v3, 0.0 }
 0x2c3   : > { %v4994_v18 = vsel %vm4730_vm6, %v4598_v3, %v4862_v12  ;;  %v3005_v3 = vor.u32 %v3003_v60, %v3001_v35 }
 0x2c4   : > { %v3556_v6 = vpop.f32.mrf.mxu2  ;;  %v1538_v8 = vpop.f32.mrf.mxu0 }
 0x2c5   : > { %v3783_v7 = vadd.f32 %v3556_v6, %v2013_v4  ;;  %v2017_v11 = vpop.f32.mrf.mxu1  ;;  %v2016_v20 = vadd.f32 %v2015_v57, %v1538_v8  ;;  %v981_v57 = vshrl.u32 %v6241_v16, 16  ;;  %v3009_v4 = vrot.slane %v3007_v61, 1 }
 0x2c6   : > { %6171 = vmatmul.msk.bf16.gmra.mxu3 %vm1155_vm0, %v3942_v5 }
 0x2c7   : > { %v4599_v13 = vadd.f32 %v4372_v62, %v3783_v7  ;;  %5697 = vmatmul.msk.bf16.gmra.mxu0 %vm1155_vm0, %v972_v9  ;;  %v983_v1 = vor.u32 %v981_v57, %v979_v33  ;;  %v3946_v7 = vsel %vm3853_vm1, %v3943_v30, %v3945_v63  ;;  %v3010_v12 = vsel %vm616_vm2, %v3005_v3, %v3009_v4 }
 0x2c9   : > { %vm4731_vm7 = vcmp.gt.f32.partialorder %v4599_v13, 0.0  ;;  %v4863_v14 = vmul.f32 0.2, %v4599_v13  ;;  %6099 = vmatmul.msk.bf16.gmra.mxu2 %vm1155_vm0, %v2994_v10  ;;  %v4375_v15 = vpop.f32.mrf.mxu3 }
 0x2cb   : > { %v4995_v19 = vsel %vm4731_vm7, %v4599_v13, %v4863_v14 }
 0x2cc   : > { %v6508_v21 = vpack.c.bf16 %v4995_v19, %v4994_v18  ;;  %v3559_v22 = vpop.f32.mrf.mxu2  ;;  %v1540_v23 = vpop.f32.mrf.mxu0  ;;  %v6243_v18 = vld [vmem:[%s6793_s22 + $0x178] sm:$0xff]  ;;  %v7441_v19 = vld [vmem:[%s6793_s22 + $0x188] sm:$0xff] }
 0x2cd   : > { %v2020_v26 = vpop.f32.mrf.mxu1  ;;  %v3784_v29 = vadd.f32 %v3559_v22, %v2016_v20  ;;  %v2018_v37 = vadd.f32 %v2017_v11, %v1540_v23  ;;  %v988_v11 = vsel %vm616_vm2, %v983_v1, %v987_v2  ;;  %v993_v27 = vshll.u32 %v6243_v18, 16 }
 0x2ce   : > { %6702 = vst [vmem:[%s6901_s26 + $0x110] sm:$0xff] %v6508_v21   ;;  %v3015_v30 = vshll.u32 %v7441_v19, 16  ;;  %v3947_v32 = vrot.slane %v7441_v19, 1 }
 0x2cf   : > { %v4600_v36 = vadd.f32 %v4375_v15, %v3784_v29  ;;  %v3011_v29 = vshrl.u32 %v7426_v50, 16  ;;  %v995_v35 = vrot.slane %v993_v27, 1 }
 0x2d0   : > { %5768 = vmatmul.msk.bf16.gmra.mxu1 %vm1155_vm0, %v6240_v47 }
 0x2d1   : > { %v4377_v31 = vpop.f32.mrf.mxu3  ;;  %v4864_v45 = vmul.f32 0.2, %v4600_v36  ;;  %vm4732_vm8 = vcmp.gt.f32.partialorder %v4600_v36, 0.0 }
 0x2d3   : > { %v4996_v51 = vsel %vm4732_vm8, %v4600_v36, %v4864_v45  ;;  %v3013_v36 = vor.u32 %v3011_v29, %v3009_v4 }
 0x2d4   : > { %v3561_v39 = vpop.f32.mrf.mxu2  ;;  %v1543_v41 = vpop.f32.mrf.mxu0 }
 0x2d5   : > { %v3785_v40 = vadd.f32 %v3561_v39, %v2018_v37  ;;  %v2022_v44 = vpop.f32.mrf.mxu1  ;;  %v2021_v53 = vadd.f32 %v2020_v26, %v1543_v41  ;;  %v989_v26 = vshrl.u32 %v6242_v49, 16  ;;  %v3017_v37 = vrot.slane %v3015_v30, 1 }
 0x2d6   : > { %6172 = vmatmul.msk.bf16.gmra.mxu3 %vm1155_vm0, %v3944_v38 }
 0x2d7   : > { %v4601_v46 = vadd.f32 %v4377_v31, %v3785_v40  ;;  %5698 = vmatmul.msk.bf16.gmra.mxu0 %vm1155_vm0, %v980_v42  ;;  %v991_v34 = vor.u32 %v989_v26, %v987_v2  ;;  %v3948_v40 = vsel %vm3853_vm1, %v3945_v63, %v3947_v32  ;;  %v3018_v45 = vsel %vm616_vm2, %v3013_v36, %v3017_v37 }
 0x2d9   : > { %vm4733_vm9 = vcmp.gt.f32.partialorder %v4601_v46, 0.0  ;;  %v4865_v47 = vmul.f32 0.2, %v4601_v46  ;;  %6100 = vmatmul.msk.bf16.gmra.mxu2 %vm1155_vm0, %v3002_v43  ;;  %v4380_v48 = vpop.f32.mrf.mxu3 }
 0x2db   : > { %v4997_v52 = vsel %vm4733_vm9, %v4601_v46, %v4865_v47 }
 0x2dc   : > { %v6513_v54 = vpack.c.bf16 %v4997_v52, %v4996_v51  ;;  %v3564_v55 = vpop.f32.mrf.mxu2  ;;  %v1545_v56 = vpop.f32.mrf.mxu0  ;;  %v6244_v51 = vld [vmem:[%s6793_s22 + $0x180] sm:$0xff]  ;;  %v7456_v52 = vld [vmem:[%s6793_s22 + $0x190] sm:$0xff] }
 0x2dd   : > { %v2025_v59 = vpop.f32.mrf.mxu1  ;;  %v3786_v62 = vadd.f32 %v3564_v55, %v2021_v53  ;;  %v2023_v6 = vadd.f32 %v2022_v44, %v1545_v56  ;;  %v996_v44 = vsel %vm616_vm2, %v991_v34, %v995_v35  ;;  %v1001_v60 = vshll.u32 %v6244_v51, 16 }
 0x2de   : > { %6703 = vst [vmem:[%s6901_s26 + $0x118] sm:$0xff] %v6513_v54   ;;  %v3023_v63 = vshll.u32 %v7456_v52, 16  ;;  %v3949_v1 = vrot.slane %v7456_v52, 1 }
 0x2df   : > { %v4602_v5 = vadd.f32 %v4380_v48, %v3786_v62  ;;  %v3019_v62 = vshrl.u32 %v7441_v19, 16  ;;  %v1003_v4 = vrot.slane %v1001_v60, 1 }
 0x2e0   : > { %5769 = vmatmul.msk.bf16.gmra.mxu1 %vm1155_vm0, %v6241_v16 }
 0x2e1   : > { %v4382_v0 = vpop.f32.mrf.mxu3  ;;  %v4866_v14 = vmul.f32 0.2, %v4602_v5  ;;  %vm4734_vm10 = vcmp.gt.f32.partialorder %v4602_v5, 0.0 }
 0x2e3   : > { %v4998_v20 = vsel %vm4734_vm10, %v4602_v5, %v4866_v14  ;;  %v3021_v5 = vor.u32 %v3019_v62, %v3017_v37 }
 0x2e4   : > { %v3566_v8 = vpop.f32.mrf.mxu2  ;;  %v1548_v10 = vpop.f32.mrf.mxu0 }
 0x2e5   : > { %v3787_v9 = vadd.f32 %v3566_v8, %v2023_v6  ;;  %v2027_v13 = vpop.f32.mrf.mxu1  ;;  %v2026_v22 = vadd.f32 %v2025_v59, %v1548_v10  ;;  %v997_v59 = vshrl.u32 %v6243_v18, 16  ;;  %v3025_v6 = vrot.slane %v3023_v63, 1 }
 0x2e6   : > { %6173 = vmatmul.msk.bf16.gmra.mxu3 %vm1155_vm0, %v3946_v7 }
 0x2e7   : > { %v4603_v15 = vadd.f32 %v4382_v0, %v3787_v9  ;;  %5699 = vmatmul.msk.bf16.gmra.mxu0 %vm1155_vm0, %v988_v11  ;;  %v999_v3 = vor.u32 %v997_v59, %v995_v35  ;;  %v3950_v9 = vsel %vm3853_vm1, %v3947_v32, %v3949_v1  ;;  %v3026_v14 = vsel %vm616_vm2, %v3021_v5, %v3025_v6 }
 0x2e9   : > { %vm4735_vm11 = vcmp.gt.f32.partialorder %v4603_v15, 0.0  ;;  %v4867_v16 = vmul.f32 0.2, %v4603_v15  ;;  %6101 = vmatmul.msk.bf16.gmra.mxu2 %vm1155_vm0, %v3010_v12  ;;  %v4385_v17 = vpop.f32.mrf.mxu3 }
 0x2eb   : > { %v4999_v21 = vsel %vm4735_vm11, %v4603_v15, %v4867_v16 }
 0x2ec   : > { %v6518_v23 = vpack.c.bf16 %v4999_v21, %v4998_v20  ;;  %v3569_v24 = vpop.f32.mrf.mxu2  ;;  %v1550_v25 = vpop.f32.mrf.mxu0  ;;  %v6245_v20 = vld [vmem:[%s6793_s22 + $0x188] sm:$0xff]  ;;  %v7471_v21 = vld [vmem:[%s6793_s22 + $0x198] sm:$0xff] }
 0x2ed   : > { %v2030_v28 = vpop.f32.mrf.mxu1  ;;  %v3788_v31 = vadd.f32 %v3569_v24, %v2026_v22  ;;  %v2028_v39 = vadd.f32 %v2027_v13, %v1550_v25  ;;  %v1004_v13 = vsel %vm616_vm2, %v999_v3, %v1003_v4  ;;  %v1009_v29 = vshll.u32 %v6245_v20, 16 }
 0x2ee   : > { %6704 = vst [vmem:[%s6901_s26 + $0x120] sm:$0xff] %v6518_v23   ;;  %v3031_v32 = vshll.u32 %v7471_v21, 16  ;;  %v3951_v34 = vrot.slane %v7471_v21, 1 }
 0x2ef   : > { %v4604_v38 = vadd.f32 %v4385_v17, %v3788_v31  ;;  %v3027_v31 = vshrl.u32 %v7456_v52, 16  ;;  %v1011_v37 = vrot.slane %v1009_v29, 1 }
 0x2f0   : > { %5770 = vmatmul.msk.bf16.gmra.mxu1 %vm1155_vm0, %v6242_v49 }
 0x2f1   : > { %v4387_v33 = vpop.f32.mrf.mxu3  ;;  %v4868_v47 = vmul.f32 0.2, %v4604_v38  ;;  %vm4736_vm12 = vcmp.gt.f32.partialorder %v4604_v38, 0.0 }
 0x2f3   : > { %v5000_v53 = vsel %vm4736_vm12, %v4604_v38, %v4868_v47  ;;  %v3029_v38 = vor.u32 %v3027_v31, %v3025_v6 }
 0x2f4   : > { %v3571_v41 = vpop.f32.mrf.mxu2  ;;  %v1553_v43 = vpop.f32.mrf.mxu0 }
 0x2f5   : > { %v3789_v42 = vadd.f32 %v3571_v41, %v2028_v39  ;;  %v2032_v46 = vpop.f32.mrf.mxu1  ;;  %v2031_v55 = vadd.f32 %v2030_v28, %v1553_v43  ;;  %v1005_v28 = vshrl.u32 %v6244_v51, 16  ;;  %v3033_v39 = vrot.slane %v3031_v32, 1 }
 0x2f6   : > { %6174 = vmatmul.msk.bf16.gmra.mxu3 %vm1155_vm0, %v3948_v40 }
 0x2f7   : > { %v4605_v48 = vadd.f32 %v4387_v33, %v3789_v42  ;;  %5700 = vmatmul.msk.bf16.gmra.mxu0 %vm1155_vm0, %v996_v44  ;;  %v1007_v36 = vor.u32 %v1005_v28, %v1003_v4  ;;  %v3952_v42 = vsel %vm3853_vm1, %v3949_v1, %v3951_v34  ;;  %v3034_v47 = vsel %vm616_vm2, %v3029_v38, %v3033_v39 }
 0x2f9   : > { %vm4737_vm13 = vcmp.gt.f32.partialorder %v4605_v48, 0.0  ;;  %v4869_v49 = vmul.f32 0.2, %v4605_v48  ;;  %6102 = vmatmul.msk.bf16.gmra.mxu2 %vm1155_vm0, %v3018_v45  ;;  %v4390_v50 = vpop.f32.mrf.mxu3 }
 0x2fb   : > { %v5001_v54 = vsel %vm4737_vm13, %v4605_v48, %v4869_v49 }
 0x2fc   : > { %v6523_v56 = vpack.c.bf16 %v5001_v54, %v5000_v53  ;;  %v3574_v57 = vpop.f32.mrf.mxu2  ;;  %v1555_v58 = vpop.f32.mrf.mxu0  ;;  %v6246_v53 = vld [vmem:[%s6793_s22 + $0x190] sm:$0xff]  ;;  %v7486_v54 = vld [vmem:[%s6793_s22 + $0x1a0] sm:$0xff] }
 0x2fd   : > { %v2035_v61 = vpop.f32.mrf.mxu1  ;;  %v3790_v0 = vadd.f32 %v3574_v57, %v2031_v55  ;;  %v2033_v8 = vadd.f32 %v2032_v46, %v1555_v58  ;;  %v1012_v46 = vsel %vm616_vm2, %v1007_v36, %v1011_v37  ;;  %v1017_v62 = vshll.u32 %v6246_v53, 16 }
 0x2fe   : > { %6705 = vst [vmem:[%s6901_s26 + $0x128] sm:$0xff] %v6523_v56   ;;  %v3039_v1 = vshll.u32 %v7486_v54, 16  ;;  %v3953_v3 = vrot.slane %v7486_v54, 1 }
 0x2ff   : > { %v4606_v7 = vadd.f32 %v4390_v50, %v3790_v0  ;;  %v3035_v0 = vshrl.u32 %v7471_v21, 16  ;;  %v1019_v6 = vrot.slane %v1017_v62, 1 }
 0x300   : > { %5771 = vmatmul.msk.bf16.gmra.mxu1 %vm1155_vm0, %v6243_v18 }
 0x301   : > { %v4392_v2 = vpop.f32.mrf.mxu3  ;;  %v4870_v16 = vmul.f32 0.2, %v4606_v7  ;;  %vm4738_vm14 = vcmp.gt.f32.partialorder %v4606_v7, 0.0 }
 0x303   : > { %v5002_v22 = vsel %vm4738_vm14, %v4606_v7, %v4870_v16  ;;  %v3037_v7 = vor.u32 %v3035_v0, %v3033_v39 }
 0x304   : > { %v3576_v10 = vpop.f32.mrf.mxu2  ;;  %v1558_v12 = vpop.f32.mrf.mxu0 }
 0x305   : > { %v3791_v11 = vadd.f32 %v3576_v10, %v2033_v8  ;;  %v2037_v15 = vpop.f32.mrf.mxu1  ;;  %v2036_v24 = vadd.f32 %v2035_v61, %v1558_v12  ;;  %v1013_v61 = vshrl.u32 %v6245_v20, 16  ;;  %v3041_v8 = vrot.slane %v3039_v1, 1 }
 0x306   : > { %6175 = vmatmul.msk.bf16.gmra.mxu3 %vm1155_vm0, %v3950_v9 }
 0x307   : > { %v4607_v17 = vadd.f32 %v4392_v2, %v3791_v11  ;;  %5701 = vmatmul.msk.bf16.gmra.mxu0 %vm1155_vm0, %v1004_v13  ;;  %v1015_v5 = vor.u32 %v1013_v61, %v1011_v37  ;;  %v3954_v11 = vsel %vm3853_vm1, %v3951_v34, %v3953_v3  ;;  %v3042_v16 = vsel %vm616_vm2, %v3037_v7, %v3041_v8 }
 0x309   : > { %vm4739_vm15 = vcmp.gt.f32.partialorder %v4607_v17, 0.0  ;;  %v4871_v18 = vmul.f32 0.2, %v4607_v17  ;;  %6103 = vmatmul.msk.bf16.gmra.mxu2 %vm1155_vm0, %v3026_v14  ;;  %v4395_v19 = vpop.f32.mrf.mxu3 }
 0x30b   : > { %v5003_v23 = vsel %vm4739_vm15, %v4607_v17, %v4871_v18 }
 0x30c   : > { %v6528_v25 = vpack.c.bf16 %v5003_v23, %v5002_v22  ;;  %v3579_v26 = vpop.f32.mrf.mxu2  ;;  %v1560_v27 = vpop.f32.mrf.mxu0  ;;  %v6247_v22 = vld [vmem:[%s6793_s22 + $0x198] sm:$0xff]  ;;  %v7501_v23 = vld [vmem:[%s6793_s22 + $0x1a8] sm:$0xff] }
 0x30d   : > { %v2040_v30 = vpop.f32.mrf.mxu1  ;;  %v3792_v33 = vadd.f32 %v3579_v26, %v2036_v24  ;;  %v2038_v41 = vadd.f32 %v2037_v15, %v1560_v27  ;;  %v1020_v15 = vsel %vm616_vm2, %v1015_v5, %v1019_v6  ;;  %v1025_v31 = vshll.u32 %v6247_v22, 16 }
 0x30e   : > { %6706 = vst [vmem:[%s6901_s26 + $0x130] sm:$0xff] %v6528_v25   ;;  %v3047_v34 = vshll.u32 %v7501_v23, 16  ;;  %v3955_v36 = vrot.slane %v7501_v23, 1 }
 0x30f   : > { %v4608_v40 = vadd.f32 %v4395_v19, %v3792_v33  ;;  %v3043_v33 = vshrl.u32 %v7486_v54, 16  ;;  %v1027_v39 = vrot.slane %v1025_v31, 1 }
 0x310   : > { %5772 = vmatmul.msk.bf16.gmra.mxu1 %vm1155_vm0, %v6244_v51 }
 0x311   : > { %v4397_v35 = vpop.f32.mrf.mxu3  ;;  %v4872_v49 = vmul.f32 0.2, %v4608_v40  ;;  %vm4740_vm3 = vcmp.gt.f32.partialorder %v4608_v40, 0.0 }
 0x313   : > { %v5004_v55 = vsel %vm4740_vm3, %v4608_v40, %v4872_v49  ;;  %v3045_v40 = vor.u32 %v3043_v33, %v3041_v8 }
 0x314   : > { %v3581_v43 = vpop.f32.mrf.mxu2  ;;  %v1563_v45 = vpop.f32.mrf.mxu0 }
 0x315   : > { %v3793_v44 = vadd.f32 %v3581_v43, %v2038_v41  ;;  %v2042_v48 = vpop.f32.mrf.mxu1  ;;  %v2041_v57 = vadd.f32 %v2040_v30, %v1563_v45  ;;  %v1021_v30 = vshrl.u32 %v6246_v53, 16  ;;  %v3049_v41 = vrot.slane %v3047_v34, 1 }
 0x316   : > { %6176 = vmatmul.msk.bf16.gmra.mxu3 %vm1155_vm0, %v3952_v42 }
 0x317   : > { %v4609_v50 = vadd.f32 %v4397_v35, %v3793_v44  ;;  %5702 = vmatmul.msk.bf16.gmra.mxu0 %vm1155_vm0, %v1012_v46  ;;  %v1023_v38 = vor.u32 %v1021_v30, %v1019_v6  ;;  %v3956_v44 = vsel %vm3853_vm1, %v3953_v3, %v3955_v36  ;;  %v3050_v49 = vsel %vm616_vm2, %v3045_v40, %v3049_v41 }
 0x319   : > { %vm4741_vm4 = vcmp.gt.f32.partialorder %v4609_v50, 0.0  ;;  %v4873_v51 = vmul.f32 0.2, %v4609_v50  ;;  %6104 = vmatmul.msk.bf16.gmra.mxu2 %vm1155_vm0, %v3034_v47  ;;  %v4400_v52 = vpop.f32.mrf.mxu3 }
 0x31b   : > { %v5005_v56 = vsel %vm4741_vm4, %v4609_v50, %v4873_v51 }
 0x31c   : > { %v6533_v58 = vpack.c.bf16 %v5005_v56, %v5004_v55  ;;  %v3584_v59 = vpop.f32.mrf.mxu2  ;;  %v1565_v60 = vpop.f32.mrf.mxu0  ;;  %v6248_v55 = vld [vmem:[%s6793_s22 + $0x1a0] sm:$0xff]  ;;  %v7516_v56 = vld [vmem:[%s6793_s22 + $0x1b0] sm:$0xff] }
 0x31d   : > { %v2045_v63 = vpop.f32.mrf.mxu1  ;;  %v3794_v2 = vadd.f32 %v3584_v59, %v2041_v57  ;;  %v2043_v10 = vadd.f32 %v2042_v48, %v1565_v60  ;;  %v1028_v48 = vsel %vm616_vm2, %v1023_v38, %v1027_v39  ;;  %v1033_v0 = vshll.u32 %v6248_v55, 16 }
 0x31e   : > { %6707 = vst [vmem:[%s6901_s26 + $0x138] sm:$0xff] %v6533_v58   ;;  %v3055_v3 = vshll.u32 %v7516_v56, 16  ;;  %v3957_v5 = vrot.slane %v7516_v56, 1 }
 0x31f   : > { %v4610_v9 = vadd.f32 %v4400_v52, %v3794_v2  ;;  %v3051_v2 = vshrl.u32 %v7501_v23, 16  ;;  %v1035_v8 = vrot.slane %v1033_v0, 1 }
 0x320   : > { %5773 = vmatmul.msk.bf16.gmra.mxu1 %vm1155_vm0, %v6245_v20 }
 0x321   : > { %v4402_v4 = vpop.f32.mrf.mxu3  ;;  %v4874_v18 = vmul.f32 0.2, %v4610_v9  ;;  %vm4742_vm5 = vcmp.gt.f32.partialorder %v4610_v9, 0.0 }
 0x323   : > { %v5006_v24 = vsel %vm4742_vm5, %v4610_v9, %v4874_v18  ;;  %v3053_v9 = vor.u32 %v3051_v2, %v3049_v41 }
 0x324   : > { %v3586_v12 = vpop.f32.mrf.mxu2  ;;  %v1568_v14 = vpop.f32.mrf.mxu0 }
 0x325   : > { %v3795_v13 = vadd.f32 %v3586_v12, %v2043_v10  ;;  %v2047_v17 = vpop.f32.mrf.mxu1  ;;  %v2046_v26 = vadd.f32 %v2045_v63, %v1568_v14  ;;  %v1029_v63 = vshrl.u32 %v6247_v22, 16  ;;  %v3057_v10 = vrot.slane %v3055_v3, 1 }
 0x326   : > { %6177 = vmatmul.msk.bf16.gmra.mxu3 %vm1155_vm0, %v3954_v11 }
 0x327   : > { %v4611_v19 = vadd.f32 %v4402_v4, %v3795_v13  ;;  %5703 = vmatmul.msk.bf16.gmra.mxu0 %vm1155_vm0, %v1020_v15  ;;  %v1031_v7 = vor.u32 %v1029_v63, %v1027_v39  ;;  %v3958_v13 = vsel %vm3853_vm1, %v3955_v36, %v3957_v5  ;;  %v3058_v18 = vsel %vm616_vm2, %v3053_v9, %v3057_v10 }
 0x329   : > { %vm4743_vm6 = vcmp.gt.f32.partialorder %v4611_v19, 0.0  ;;  %v4875_v20 = vmul.f32 0.2, %v4611_v19  ;;  %6105 = vmatmul.msk.bf16.gmra.mxu2 %vm1155_vm0, %v3042_v16  ;;  %v4405_v21 = vpop.f32.mrf.mxu3 }
 0x32b   : > { %v5007_v25 = vsel %vm4743_vm6, %v4611_v19, %v4875_v20 }
 0x32c   : > { %v6538_v27 = vpack.c.bf16 %v5007_v25, %v5006_v24  ;;  %v3589_v28 = vpop.f32.mrf.mxu2  ;;  %v1570_v29 = vpop.f32.mrf.mxu0  ;;  %v6249_v24 = vld [vmem:[%s6793_s22 + $0x1a8] sm:$0xff]  ;;  %v7531_v25 = vld [vmem:[%s6793_s22 + $0x1b8] sm:$0xff] }
 0x32d   : > { %v2050_v32 = vpop.f32.mrf.mxu1  ;;  %v3796_v35 = vadd.f32 %v3589_v28, %v2046_v26  ;;  %v2048_v43 = vadd.f32 %v2047_v17, %v1570_v29  ;;  %v1036_v17 = vsel %vm616_vm2, %v1031_v7, %v1035_v8  ;;  %v1041_v33 = vshll.u32 %v6249_v24, 16 }
 0x32e   : > { %6708 = vst [vmem:[%s6901_s26 + $0x140] sm:$0xff] %v6538_v27   ;;  %v3063_v36 = vshll.u32 %v7531_v25, 16  ;;  %v3959_v38 = vrot.slane %v7531_v25, 1 }
 0x32f   : > { %v4612_v42 = vadd.f32 %v4405_v21, %v3796_v35  ;;  %v3059_v35 = vshrl.u32 %v7516_v56, 16  ;;  %v1043_v41 = vrot.slane %v1041_v33, 1 }
 0x330   : > { %5774 = vmatmul.msk.bf16.gmra.mxu1 %vm1155_vm0, %v6246_v53 }
 0x331   : > { %v4407_v37 = vpop.f32.mrf.mxu3  ;;  %v4876_v51 = vmul.f32 0.2, %v4612_v42  ;;  %vm4744_vm7 = vcmp.gt.f32.partialorder %v4612_v42, 0.0 }
 0x333   : > { %v5008_v57 = vsel %vm4744_vm7, %v4612_v42, %v4876_v51  ;;  %v3061_v42 = vor.u32 %v3059_v35, %v3057_v10 }
 0x334   : > { %v3591_v45 = vpop.f32.mrf.mxu2  ;;  %v1573_v47 = vpop.f32.mrf.mxu0 }
 0x335   : > { %v3797_v46 = vadd.f32 %v3591_v45, %v2048_v43  ;;  %v2052_v50 = vpop.f32.mrf.mxu1  ;;  %v2051_v59 = vadd.f32 %v2050_v32, %v1573_v47  ;;  %v1037_v32 = vshrl.u32 %v6248_v55, 16  ;;  %v3065_v43 = vrot.slane %v3063_v36, 1 }
 0x336   : > { %6178 = vmatmul.msk.bf16.gmra.mxu3 %vm1155_vm0, %v3956_v44 }
 0x337   : > { %v4613_v52 = vadd.f32 %v4407_v37, %v3797_v46  ;;  %5704 = vmatmul.msk.bf16.gmra.mxu0 %vm1155_vm0, %v1028_v48  ;;  %v1039_v40 = vor.u32 %v1037_v32, %v1035_v8  ;;  %v3960_v46 = vsel %vm3853_vm1, %v3957_v5, %v3959_v38  ;;  %v3066_v51 = vsel %vm616_vm2, %v3061_v42, %v3065_v43 }
 0x339   : > { %vm4745_vm8 = vcmp.gt.f32.partialorder %v4613_v52, 0.0  ;;  %v4877_v53 = vmul.f32 0.2, %v4613_v52  ;;  %6106 = vmatmul.msk.bf16.gmra.mxu2 %vm1155_vm0, %v3050_v49  ;;  %v4410_v54 = vpop.f32.mrf.mxu3 }
 0x33b   : > { %v5009_v58 = vsel %vm4745_vm8, %v4613_v52, %v4877_v53 }
 0x33c   : > { %v6543_v60 = vpack.c.bf16 %v5009_v58, %v5008_v57  ;;  %v3594_v61 = vpop.f32.mrf.mxu2  ;;  %v1575_v62 = vpop.f32.mrf.mxu0  ;;  %v6250_v57 = vld [vmem:[%s6793_s22 + $0x1b0] sm:$0xff]  ;;  %v7546_v58 = vld [vmem:[%s6793_s22 + $0x1c0] sm:$0xff] }
 0x33d   : > { %v2055_v1 = vpop.f32.mrf.mxu1  ;;  %v3798_v4 = vadd.f32 %v3594_v61, %v2051_v59  ;;  %v2053_v12 = vadd.f32 %v2052_v50, %v1575_v62  ;;  %v1044_v50 = vsel %vm616_vm2, %v1039_v40, %v1043_v41  ;;  %v1049_v2 = vshll.u32 %v6250_v57, 16 }
 0x33e   : > { %6709 = vst [vmem:[%s6901_s26 + $0x148] sm:$0xff] %v6543_v60   ;;  %v3071_v5 = vshll.u32 %v7546_v58, 16  ;;  %v3961_v7 = vrot.slane %v7546_v58, 1 }
 0x33f   : > { %v4614_v11 = vadd.f32 %v4410_v54, %v3798_v4  ;;  %v3067_v4 = vshrl.u32 %v7531_v25, 16  ;;  %v1051_v10 = vrot.slane %v1049_v2, 1 }
 0x340   : > { %5775 = vmatmul.msk.bf16.gmra.mxu1 %vm1155_vm0, %v6247_v22 }
 0x341   : > { %v4412_v6 = vpop.f32.mrf.mxu3  ;;  %v4878_v20 = vmul.f32 0.2, %v4614_v11  ;;  %vm4746_vm9 = vcmp.gt.f32.partialorder %v4614_v11, 0.0 }
 0x343   : > { %v5010_v26 = vsel %vm4746_vm9, %v4614_v11, %v4878_v20  ;;  %v3069_v11 = vor.u32 %v3067_v4, %v3065_v43 }
 0x344   : > { %v3596_v14 = vpop.f32.mrf.mxu2  ;;  %v1578_v16 = vpop.f32.mrf.mxu0 }
 0x345   : > { %v3799_v15 = vadd.f32 %v3596_v14, %v2053_v12  ;;  %v2057_v19 = vpop.f32.mrf.mxu1  ;;  %v2056_v28 = vadd.f32 %v2055_v1, %v1578_v16  ;;  %v1045_v1 = vshrl.u32 %v6249_v24, 16  ;;  %v3073_v12 = vrot.slane %v3071_v5, 1 }
 0x346   : > { %6179 = vmatmul.msk.bf16.gmra.mxu3 %vm1155_vm0, %v3958_v13 }
 0x347   : > { %v4615_v21 = vadd.f32 %v4412_v6, %v3799_v15  ;;  %5705 = vmatmul.msk.bf16.gmra.mxu0 %vm1155_vm0, %v1036_v17  ;;  %v1047_v9 = vor.u32 %v1045_v1, %v1043_v41  ;;  %v3962_v15 = vsel %vm3853_vm1, %v3959_v38, %v3961_v7  ;;  %v3074_v20 = vsel %vm616_vm2, %v3069_v11, %v3073_v12 }
 0x349   : > { %vm4747_vm10 = vcmp.gt.f32.partialorder %v4615_v21, 0.0  ;;  %v4879_v22 = vmul.f32 0.2, %v4615_v21  ;;  %6107 = vmatmul.msk.bf16.gmra.mxu2 %vm1155_vm0, %v3058_v18  ;;  %v4415_v23 = vpop.f32.mrf.mxu3 }
 0x34b   : > { %v5011_v27 = vsel %vm4747_vm10, %v4615_v21, %v4879_v22 }
 0x34c   : > { %v6548_v29 = vpack.c.bf16 %v5011_v27, %v5010_v26  ;;  %v3599_v30 = vpop.f32.mrf.mxu2  ;;  %v1580_v31 = vpop.f32.mrf.mxu0  ;;  %v6251_v26 = vld [vmem:[%s6793_s22 + $0x1b8] sm:$0xff]  ;;  %v7561_v27 = vld [vmem:[%s6793_s22 + $0x1c8] sm:$0xff] }
 0x34d   : > { %v2060_v34 = vpop.f32.mrf.mxu1  ;;  %v3800_v37 = vadd.f32 %v3599_v30, %v2056_v28  ;;  %v2058_v45 = vadd.f32 %v2057_v19, %v1580_v31  ;;  %v1052_v19 = vsel %vm616_vm2, %v1047_v9, %v1051_v10  ;;  %v1057_v35 = vshll.u32 %v6251_v26, 16 }
 0x34e   : > { %6710 = vst [vmem:[%s6901_s26 + $0x150] sm:$0xff] %v6548_v29   ;;  %v3079_v38 = vshll.u32 %v7561_v27, 16  ;;  %v3963_v40 = vrot.slane %v7561_v27, 1 }
 0x34f   : > { %v4616_v44 = vadd.f32 %v4415_v23, %v3800_v37  ;;  %v3075_v37 = vshrl.u32 %v7546_v58, 16  ;;  %v1059_v43 = vrot.slane %v1057_v35, 1 }
 0x350   : > { %5776 = vmatmul.msk.bf16.gmra.mxu1 %vm1155_vm0, %v6248_v55 }
 0x351   : > { %v4417_v39 = vpop.f32.mrf.mxu3  ;;  %v4880_v53 = vmul.f32 0.2, %v4616_v44  ;;  %vm4748_vm11 = vcmp.gt.f32.partialorder %v4616_v44, 0.0 }
 0x353   : > { %v5012_v59 = vsel %vm4748_vm11, %v4616_v44, %v4880_v53  ;;  %v3077_v44 = vor.u32 %v3075_v37, %v3073_v12 }
 0x354   : > { %v3601_v47 = vpop.f32.mrf.mxu2  ;;  %v1583_v49 = vpop.f32.mrf.mxu0 }
 0x355   : > { %v3801_v48 = vadd.f32 %v3601_v47, %v2058_v45  ;;  %v2062_v52 = vpop.f32.mrf.mxu1  ;;  %v2061_v61 = vadd.f32 %v2060_v34, %v1583_v49  ;;  %v1053_v34 = vshrl.u32 %v6250_v57, 16  ;;  %v3081_v45 = vrot.slane %v3079_v38, 1 }
 0x356   : > { %6180 = vmatmul.msk.bf16.gmra.mxu3 %vm1155_vm0, %v3960_v46 }
 0x357   : > { %v4617_v54 = vadd.f32 %v4417_v39, %v3801_v48  ;;  %5706 = vmatmul.msk.bf16.gmra.mxu0 %vm1155_vm0, %v1044_v50  ;;  %v1055_v42 = vor.u32 %v1053_v34, %v1051_v10  ;;  %v3964_v48 = vsel %vm3853_vm1, %v3961_v7, %v3963_v40  ;;  %v3082_v53 = vsel %vm616_vm2, %v3077_v44, %v3081_v45 }
 0x359   : > { %vm4749_vm12 = vcmp.gt.f32.partialorder %v4617_v54, 0.0  ;;  %v4881_v55 = vmul.f32 0.2, %v4617_v54  ;;  %6108 = vmatmul.msk.bf16.gmra.mxu2 %vm1155_vm0, %v3066_v51  ;;  %v4420_v56 = vpop.f32.mrf.mxu3 }
 0x35b   : > { %v5013_v60 = vsel %vm4749_vm12, %v4617_v54, %v4881_v55 }
 0x35c   : > { %v6553_v62 = vpack.c.bf16 %v5013_v60, %v5012_v59  ;;  %v3604_v63 = vpop.f32.mrf.mxu2  ;;  %v1585_v0 = vpop.f32.mrf.mxu0  ;;  %v6252_v59 = vld [vmem:[%s6793_s22 + $0x1c0] sm:$0xff]  ;;  %v7576_v60 = vld [vmem:[%s6793_s22 + $0x1d0] sm:$0xff] }
 0x35d   : > { %v2065_v3 = vpop.f32.mrf.mxu1  ;;  %v3802_v6 = vadd.f32 %v3604_v63, %v2061_v61  ;;  %v2063_v14 = vadd.f32 %v2062_v52, %v1585_v0  ;;  %v1060_v52 = vsel %vm616_vm2, %v1055_v42, %v1059_v43  ;;  %v1065_v4 = vshll.u32 %v6252_v59, 16 }
 0x35e   : > { %6711 = vst [vmem:[%s6901_s26 + $0x158] sm:$0xff] %v6553_v62   ;;  %v3087_v7 = vshll.u32 %v7576_v60, 16  ;;  %v3965_v9 = vrot.slane %v7576_v60, 1 }
 0x35f   : > { %v4618_v13 = vadd.f32 %v4420_v56, %v3802_v6  ;;  %v3083_v6 = vshrl.u32 %v7561_v27, 16  ;;  %v1067_v12 = vrot.slane %v1065_v4, 1 }
 0x360   : > { %5777 = vmatmul.msk.bf16.gmra.mxu1 %vm1155_vm0, %v6249_v24 }
 0x361   : > { %v4422_v8 = vpop.f32.mrf.mxu3  ;;  %v4882_v22 = vmul.f32 0.2, %v4618_v13  ;;  %vm4750_vm13 = vcmp.gt.f32.partialorder %v4618_v13, 0.0 }
 0x363   : > { %v5014_v28 = vsel %vm4750_vm13, %v4618_v13, %v4882_v22  ;;  %v3085_v13 = vor.u32 %v3083_v6, %v3081_v45 }
 0x364   : > { %v3606_v16 = vpop.f32.mrf.mxu2  ;;  %v1588_v18 = vpop.f32.mrf.mxu0 }
 0x365   : > { %v3803_v17 = vadd.f32 %v3606_v16, %v2063_v14  ;;  %v2067_v21 = vpop.f32.mrf.mxu1  ;;  %v2066_v30 = vadd.f32 %v2065_v3, %v1588_v18  ;;  %v1061_v3 = vshrl.u32 %v6251_v26, 16  ;;  %v3089_v14 = vrot.slane %v3087_v7, 1 }
 0x366   : > { %6181 = vmatmul.msk.bf16.gmra.mxu3 %vm1155_vm0, %v3962_v15 }
 0x367   : > { %v4619_v23 = vadd.f32 %v4422_v8, %v3803_v17  ;;  %5707 = vmatmul.msk.bf16.gmra.mxu0 %vm1155_vm0, %v1052_v19  ;;  %v1063_v11 = vor.u32 %v1061_v3, %v1059_v43  ;;  %v3966_v17 = vsel %vm3853_vm1, %v3963_v40, %v3965_v9  ;;  %v3090_v22 = vsel %vm616_vm2, %v3085_v13, %v3089_v14 }
 0x369   : > { %vm4751_vm14 = vcmp.gt.f32.partialorder %v4619_v23, 0.0  ;;  %v4883_v24 = vmul.f32 0.2, %v4619_v23  ;;  %6109 = vmatmul.msk.bf16.gmra.mxu2 %vm1155_vm0, %v3074_v20  ;;  %v4425_v25 = vpop.f32.mrf.mxu3 }
 0x36b   : > { %v5015_v29 = vsel %vm4751_vm14, %v4619_v23, %v4883_v24 }
 0x36c   : > { %v6558_v31 = vpack.c.bf16 %v5015_v29, %v5014_v28  ;;  %v3609_v32 = vpop.f32.mrf.mxu2  ;;  %v1590_v33 = vpop.f32.mrf.mxu0  ;;  %v6253_v28 = vld [vmem:[%s6793_s22 + $0x1c8] sm:$0xff]  ;;  %v7591_v29 = vld [vmem:[%s6793_s22 + $0x1d8] sm:$0xff] }
 0x36d   : > { %v2070_v36 = vpop.f32.mrf.mxu1  ;;  %v3804_v39 = vadd.f32 %v3609_v32, %v2066_v30  ;;  %v2068_v47 = vadd.f32 %v2067_v21, %v1590_v33  ;;  %v1068_v21 = vsel %vm616_vm2, %v1063_v11, %v1067_v12  ;;  %v1073_v37 = vshll.u32 %v6253_v28, 16 }
 0x36e   : > { %6712 = vst [vmem:[%s6901_s26 + $0x160] sm:$0xff] %v6558_v31   ;;  %v3095_v40 = vshll.u32 %v7591_v29, 16  ;;  %v3967_v42 = vrot.slane %v7591_v29, 1 }
 0x36f   : > { %v4620_v46 = vadd.f32 %v4425_v25, %v3804_v39  ;;  %v3091_v39 = vshrl.u32 %v7576_v60, 16  ;;  %v1075_v45 = vrot.slane %v1073_v37, 1 }
 0x370   : > { %5778 = vmatmul.msk.bf16.gmra.mxu1 %vm1155_vm0, %v6250_v57 }
 0x371   : > { %v4427_v41 = vpop.f32.mrf.mxu3  ;;  %v4884_v55 = vmul.f32 0.2, %v4620_v46  ;;  %vm4752_vm15 = vcmp.gt.f32.partialorder %v4620_v46, 0.0 }
 0x373   : > { %v5016_v61 = vsel %vm4752_vm15, %v4620_v46, %v4884_v55  ;;  %v3093_v46 = vor.u32 %v3091_v39, %v3089_v14 }
 0x374   : > { %v3611_v49 = vpop.f32.mrf.mxu2  ;;  %v1593_v51 = vpop.f32.mrf.mxu0 }
 0x375   : > { %v3805_v50 = vadd.f32 %v3611_v49, %v2068_v47  ;;  %v2072_v54 = vpop.f32.mrf.mxu1  ;;  %v2071_v63 = vadd.f32 %v2070_v36, %v1593_v51  ;;  %v1069_v36 = vshrl.u32 %v6252_v59, 16  ;;  %v3097_v47 = vrot.slane %v3095_v40, 1 }
 0x376   : > { %6182 = vmatmul.msk.bf16.gmra.mxu3 %vm1155_vm0, %v3964_v48 }
 0x377   : > { %v4621_v56 = vadd.f32 %v4427_v41, %v3805_v50  ;;  %5708 = vmatmul.msk.bf16.gmra.mxu0 %vm1155_vm0, %v1060_v52  ;;  %v1071_v44 = vor.u32 %v1069_v36, %v1067_v12  ;;  %v3968_v50 = vsel %vm3853_vm1, %v3965_v9, %v3967_v42  ;;  %v3098_v55 = vsel %vm616_vm2, %v3093_v46, %v3097_v47 }
 0x379   : > { %vm4753_vm3 = vcmp.gt.f32.partialorder %v4621_v56, 0.0  ;;  %v4885_v57 = vmul.f32 0.2, %v4621_v56  ;;  %6110 = vmatmul.msk.bf16.gmra.mxu2 %vm1155_vm0, %v3082_v53  ;;  %v4430_v58 = vpop.f32.mrf.mxu3 }
 0x37b   : > { %v5017_v62 = vsel %vm4753_vm3, %v4621_v56, %v4885_v57 }
 0x37c   : > { %v6563_v0 = vpack.c.bf16 %v5017_v62, %v5016_v61  ;;  %v3614_v1 = vpop.f32.mrf.mxu2  ;;  %v1595_v2 = vpop.f32.mrf.mxu0  ;;  %v6254_v61 = vld [vmem:[%s6793_s22 + $0x1d0] sm:$0xff]  ;;  %v7606_v62 = vld [vmem:[%s6793_s22 + $0x1e0] sm:$0xff] }
 0x37d   : > { %v2075_v5 = vpop.f32.mrf.mxu1  ;;  %v3806_v8 = vadd.f32 %v3614_v1, %v2071_v63  ;;  %v2073_v16 = vadd.f32 %v2072_v54, %v1595_v2  ;;  %v1076_v54 = vsel %vm616_vm2, %v1071_v44, %v1075_v45  ;;  %v1081_v6 = vshll.u32 %v6254_v61, 16 }
 0x37e   : > { %6713 = vst [vmem:[%s6901_s26 + $0x168] sm:$0xff] %v6563_v0   ;;  %v3103_v9 = vshll.u32 %v7606_v62, 16  ;;  %v3969_v11 = vrot.slane %v7606_v62, 1 }
 0x37f   : > { %v4622_v15 = vadd.f32 %v4430_v58, %v3806_v8  ;;  %v3099_v8 = vshrl.u32 %v7591_v29, 16  ;;  %v1083_v14 = vrot.slane %v1081_v6, 1 }
 0x380   : > { %5779 = vmatmul.msk.bf16.gmra.mxu1 %vm1155_vm0, %v6251_v26 }
 0x381   : > { %v4432_v10 = vpop.f32.mrf.mxu3  ;;  %v4886_v24 = vmul.f32 0.2, %v4622_v15  ;;  %vm4754_vm4 = vcmp.gt.f32.partialorder %v4622_v15, 0.0 }
 0x383   : > { %v5018_v30 = vsel %vm4754_vm4, %v4622_v15, %v4886_v24  ;;  %v3101_v15 = vor.u32 %v3099_v8, %v3097_v47 }
 0x384   : > { %v3616_v18 = vpop.f32.mrf.mxu2  ;;  %v1598_v20 = vpop.f32.mrf.mxu0 }
 0x385   : > { %v3807_v19 = vadd.f32 %v3616_v18, %v2073_v16  ;;  %v2077_v23 = vpop.f32.mrf.mxu1  ;;  %v2076_v32 = vadd.f32 %v2075_v5, %v1598_v20  ;;  %v1077_v5 = vshrl.u32 %v6253_v28, 16  ;;  %v3105_v16 = vrot.slane %v3103_v9, 1 }
 0x386   : > { %6183 = vmatmul.msk.bf16.gmra.mxu3 %vm1155_vm0, %v3966_v17 }
 0x387   : > { %v4623_v25 = vadd.f32 %v4432_v10, %v3807_v19  ;;  %5709 = vmatmul.msk.bf16.gmra.mxu0 %vm1155_vm0, %v1068_v21  ;;  %v1079_v13 = vor.u32 %v1077_v5, %v1075_v45  ;;  %v3970_v19 = vsel %vm3853_vm1, %v3967_v42, %v3969_v11  ;;  %v3106_v24 = vsel %vm616_vm2, %v3101_v15, %v3105_v16 }
 0x389   : > { %vm4755_vm5 = vcmp.gt.f32.partialorder %v4623_v25, 0.0  ;;  %v4887_v26 = vmul.f32 0.2, %v4623_v25  ;;  %6111 = vmatmul.msk.bf16.gmra.mxu2 %vm1155_vm0, %v3090_v22  ;;  %v4435_v27 = vpop.f32.mrf.mxu3 }
 0x38b   : > { %v5019_v31 = vsel %vm4755_vm5, %v4623_v25, %v4887_v26 }
 0x38c   : > { %v6568_v33 = vpack.c.bf16 %v5019_v31, %v5018_v30  ;;  %v3619_v34 = vpop.f32.mrf.mxu2  ;;  %v1600_v35 = vpop.f32.mrf.mxu0  ;;  %v6255_v30 = vld [vmem:[%s6793_s22 + $0x1d8] sm:$0xff]  ;;  %v7621_v31 = vld [vmem:[%s6793_s22 + $0x1e8] sm:$0xff] }
 0x38d   : > { %v2080_v38 = vpop.f32.mrf.mxu1  ;;  %v3808_v41 = vadd.f32 %v3619_v34, %v2076_v32  ;;  %v2078_v49 = vadd.f32 %v2077_v23, %v1600_v35  ;;  %v1084_v23 = vsel %vm616_vm2, %v1079_v13, %v1083_v14  ;;  %v1089_v39 = vshll.u32 %v6255_v30, 16 }
 0x38e   : > { %6714 = vst [vmem:[%s6901_s26 + $0x170] sm:$0xff] %v6568_v33   ;;  %v3111_v42 = vshll.u32 %v7621_v31, 16  ;;  %v3971_v44 = vrot.slane %v7621_v31, 1 }
 0x38f   : > { %v4624_v48 = vadd.f32 %v4435_v27, %v3808_v41  ;;  %v3107_v41 = vshrl.u32 %v7606_v62, 16  ;;  %v1091_v47 = vrot.slane %v1089_v39, 1 }
 0x390   : > { %5780 = vmatmul.msk.bf16.gmra.mxu1 %vm1155_vm0, %v6252_v59 }
 0x391   : > { %v4437_v43 = vpop.f32.mrf.mxu3  ;;  %v4888_v57 = vmul.f32 0.2, %v4624_v48  ;;  %vm4756_vm6 = vcmp.gt.f32.partialorder %v4624_v48, 0.0 }
 0x393   : > { %v5020_v63 = vsel %vm4756_vm6, %v4624_v48, %v4888_v57  ;;  %v3109_v48 = vor.u32 %v3107_v41, %v3105_v16 }
 0x394   : > { %v3621_v51 = vpop.f32.mrf.mxu2  ;;  %v1603_v53 = vpop.f32.mrf.mxu0 }
 0x395   : > { %v3809_v52 = vadd.f32 %v3621_v51, %v2078_v49  ;;  %v2082_v56 = vpop.f32.mrf.mxu1  ;;  %v2081_v1 = vadd.f32 %v2080_v38, %v1603_v53  ;;  %v1085_v38 = vshrl.u32 %v6254_v61, 16  ;;  %v3113_v49 = vrot.slane %v3111_v42, 1 }
 0x396   : > { %6184 = vmatmul.msk.bf16.gmra.mxu3 %vm1155_vm0, %v3968_v50 }
 0x397   : > { %v4625_v58 = vadd.f32 %v4437_v43, %v3809_v52  ;;  %5710 = vmatmul.msk.bf16.gmra.mxu0 %vm1155_vm0, %v1076_v54  ;;  %v1087_v46 = vor.u32 %v1085_v38, %v1083_v14  ;;  %v3972_v52 = vsel %vm3853_vm1, %v3969_v11, %v3971_v44  ;;  %v3114_v57 = vsel %vm616_vm2, %v3109_v48, %v3113_v49 }
 0x399   : > { %vm4757_vm7 = vcmp.gt.f32.partialorder %v4625_v58, 0.0  ;;  %v4889_v59 = vmul.f32 0.2, %v4625_v58  ;;  %6112 = vmatmul.msk.bf16.gmra.mxu2 %vm1155_vm0, %v3098_v55  ;;  %v4440_v60 = vpop.f32.mrf.mxu3 }
 0x39b   : > { %v5021_v0 = vsel %vm4757_vm7, %v4625_v58, %v4889_v59 }
 0x39c   : > { %v6573_v2 = vpack.c.bf16 %v5021_v0, %v5020_v63  ;;  %v3624_v3 = vpop.f32.mrf.mxu2  ;;  %v1605_v4 = vpop.f32.mrf.mxu0  ;;  %v6256_v63 = vld [vmem:[%s6793_s22 + $0x1e0] sm:$0xff]  ;;  %v7636_v0 = vld [vmem:[%s6793_s22 + $0x1f0] sm:$0xff] }
 0x39d   : > { %v2085_v7 = vpop.f32.mrf.mxu1  ;;  %v3810_v10 = vadd.f32 %v3624_v3, %v2081_v1  ;;  %v2083_v18 = vadd.f32 %v2082_v56, %v1605_v4  ;;  %v1092_v56 = vsel %vm616_vm2, %v1087_v46, %v1091_v47  ;;  %v1097_v8 = vshll.u32 %v6256_v63, 16 }
 0x39e   : > { %6715 = vst [vmem:[%s6901_s26 + $0x178] sm:$0xff] %v6573_v2   ;;  %v3119_v11 = vshll.u32 %v7636_v0, 16  ;;  %v3973_v13 = vrot.slane %v7636_v0, 1 }
 0x39f   : > { %v4626_v17 = vadd.f32 %v4440_v60, %v3810_v10  ;;  %v3115_v10 = vshrl.u32 %v7621_v31, 16  ;;  %v1099_v16 = vrot.slane %v1097_v8, 1 }
 0x3a0   : > { %5781 = vmatmul.msk.bf16.gmra.mxu1 %vm1155_vm0, %v6253_v28 }
 0x3a1   : > { %v4442_v12 = vpop.f32.mrf.mxu3  ;;  %v4890_v26 = vmul.f32 0.2, %v4626_v17  ;;  %vm4758_vm8 = vcmp.gt.f32.partialorder %v4626_v17, 0.0 }
 0x3a3   : > { %v5022_v32 = vsel %vm4758_vm8, %v4626_v17, %v4890_v26  ;;  %v3117_v17 = vor.u32 %v3115_v10, %v3113_v49 }
 0x3a4   : > { %v3626_v20 = vpop.f32.mrf.mxu2  ;;  %v1608_v22 = vpop.f32.mrf.mxu0 }
 0x3a5   : > { %v3811_v21 = vadd.f32 %v3626_v20, %v2083_v18  ;;  %v2087_v25 = vpop.f32.mrf.mxu1  ;;  %v2086_v34 = vadd.f32 %v2085_v7, %v1608_v22  ;;  %v1093_v7 = vshrl.u32 %v6255_v30, 16  ;;  %v3121_v18 = vrot.slane %v3119_v11, 1 }
 0x3a6   : > { %6185 = vmatmul.msk.bf16.gmra.mxu3 %vm1155_vm0, %v3970_v19 }
 0x3a7   : > { %v4627_v27 = vadd.f32 %v4442_v12, %v3811_v21  ;;  %5711 = vmatmul.msk.bf16.gmra.mxu0 %vm1155_vm0, %v1084_v23  ;;  %v1095_v15 = vor.u32 %v1093_v7, %v1091_v47  ;;  %v3974_v21 = vsel %vm3853_vm1, %v3971_v44, %v3973_v13  ;;  %v3122_v26 = vsel %vm616_vm2, %v3117_v17, %v3121_v18 }
 0x3a9   : > { %vm4759_vm9 = vcmp.gt.f32.partialorder %v4627_v27, 0.0  ;;  %v4891_v28 = vmul.f32 0.2, %v4627_v27  ;;  %6113 = vmatmul.msk.bf16.gmra.mxu2 %vm1155_vm0, %v3106_v24  ;;  %v4445_v29 = vpop.f32.mrf.mxu3 }
 0x3ab   : > { %v5023_v33 = vsel %vm4759_vm9, %v4627_v27, %v4891_v28 }
 0x3ac   : > { %v6578_v35 = vpack.c.bf16 %v5023_v33, %v5022_v32  ;;  %v3629_v36 = vpop.f32.mrf.mxu2  ;;  %v1610_v37 = vpop.f32.mrf.mxu0  ;;  %v6257_v32 = vld [vmem:[%s6793_s22 + $0x1e8] sm:$0xff]  ;;  %v7651_v33 = vld [vmem:[%s6793_s22 + $0x1f8] sm:$0xff] }
 0x3ad   : > { %v2090_v40 = vpop.f32.mrf.mxu1  ;;  %v3812_v43 = vadd.f32 %v3629_v36, %v2086_v34  ;;  %v2088_v51 = vadd.f32 %v2087_v25, %v1610_v37  ;;  %v1100_v25 = vsel %vm616_vm2, %v1095_v15, %v1099_v16  ;;  %v1105_v41 = vshll.u32 %v6257_v32, 16 }
 0x3ae   : > { %6716 = vst [vmem:[%s6901_s26 + $0x180] sm:$0xff] %v6578_v35   ;;  %v3127_v44 = vshll.u32 %v7651_v33, 16  ;;  %v3975_v46 = vrot.slane %v7651_v33, 1 }
 0x3af   : > { %v4628_v50 = vadd.f32 %v4445_v29, %v3812_v43  ;;  %v3123_v43 = vshrl.u32 %v7636_v0, 16  ;;  %v1107_v49 = vrot.slane %v1105_v41, 1 }
 0x3b0   : > { %5782 = vmatmul.msk.bf16.gmra.mxu1 %vm1155_vm0, %v6254_v61 }
 0x3b1   : > { %v4447_v45 = vpop.f32.mrf.mxu3  ;;  %v4892_v59 = vmul.f32 0.2, %v4628_v50  ;;  %vm4760_vm10 = vcmp.gt.f32.partialorder %v4628_v50, 0.0 }
 0x3b3   : > { %v5024_v1 = vsel %vm4760_vm10, %v4628_v50, %v4892_v59  ;;  %v3125_v50 = vor.u32 %v3123_v43, %v3121_v18 }
 0x3b4   : > { %v3631_v53 = vpop.f32.mrf.mxu2  ;;  %v1613_v55 = vpop.f32.mrf.mxu0 }
 0x3b5   : > { %v3813_v54 = vadd.f32 %v3631_v53, %v2088_v51  ;;  %v2092_v58 = vpop.f32.mrf.mxu1  ;;  %v2091_v3 = vadd.f32 %v2090_v40, %v1613_v55  ;;  %v1101_v40 = vshrl.u32 %v6256_v63, 16  ;;  %v3129_v51 = vrot.slane %v3127_v44, 1 }
 0x3b6   : > { %6186 = vmatmul.msk.bf16.gmra.mxu3 %vm1155_vm0, %v3972_v52 }
 0x3b7   : > { %v4629_v60 = vadd.f32 %v4447_v45, %v3813_v54  ;;  %5712 = vmatmul.msk.bf16.gmra.mxu0 %vm1155_vm0, %v1092_v56  ;;  %v1103_v48 = vor.u32 %v1101_v40, %v1099_v16  ;;  %v3976_v54 = vsel %vm3853_vm1, %v3973_v13, %v3975_v46  ;;  %v3130_v59 = vsel %vm616_vm2, %v3125_v50, %v3129_v51 }
 0x3b9   : > { %vm4761_vm11 = vcmp.gt.f32.partialorder %v4629_v60, 0.0  ;;  %v4893_v61 = vmul.f32 0.2, %v4629_v60  ;;  %6114 = vmatmul.msk.bf16.gmra.mxu2 %vm1155_vm0, %v3114_v57  ;;  %v4450_v62 = vpop.f32.mrf.mxu3 }
 0x3bb   : > { %v5025_v2 = vsel %vm4761_vm11, %v4629_v60, %v4893_v61 }
 0x3bc   : > { %v6583_v4 = vpack.c.bf16 %v5025_v2, %v5024_v1  ;;  %v3634_v5 = vpop.f32.mrf.mxu2  ;;  %v1615_v6 = vpop.f32.mrf.mxu0  ;;  %v6258_v1 = vld [vmem:[%s6793_s22 + $0x1f0] sm:$0xff]  ;;  %v7666_v2 = vld [vmem:[%s6793_s22 + $0x200] sm:$0xff] }
 0x3bd   : > { %v2095_v9 = vpop.f32.mrf.mxu1  ;;  %v3814_v12 = vadd.f32 %v3634_v5, %v2091_v3  ;;  %v2093_v20 = vadd.f32 %v2092_v58, %v1615_v6  ;;  %v1108_v58 = vsel %vm616_vm2, %v1103_v48, %v1107_v49  ;;  %v1113_v10 = vshll.u32 %v6258_v1, 16 }
 0x3be   : > { %6717 = vst [vmem:[%s6901_s26 + $0x188] sm:$0xff] %v6583_v4   ;;  %v3135_v13 = vshll.u32 %v7666_v2, 16  ;;  %v3977_v15 = vrot.slane %v7666_v2, 1 }
 0x3bf   : > { %v4630_v19 = vadd.f32 %v4450_v62, %v3814_v12  ;;  %v3131_v12 = vshrl.u32 %v7651_v33, 16  ;;  %v1115_v18 = vrot.slane %v1113_v10, 1 }
 0x3c0   : > { %5783 = vmatmul.msk.bf16.gmra.mxu1 %vm1155_vm0, %v6255_v30 }
 0x3c1   : > { %v4452_v14 = vpop.f32.mrf.mxu3  ;;  %v4894_v28 = vmul.f32 0.2, %v4630_v19  ;;  %vm4762_vm12 = vcmp.gt.f32.partialorder %v4630_v19, 0.0 }
 0x3c3   : > { %v5026_v34 = vsel %vm4762_vm12, %v4630_v19, %v4894_v28  ;;  %v3133_v19 = vor.u32 %v3131_v12, %v3129_v51 }
 0x3c4   : > { %v3636_v22 = vpop.f32.mrf.mxu2  ;;  %v1618_v24 = vpop.f32.mrf.mxu0 }
 0x3c5   : > { %v3815_v23 = vadd.f32 %v3636_v22, %v2093_v20  ;;  %v2097_v27 = vpop.f32.mrf.mxu1  ;;  %v2096_v36 = vadd.f32 %v2095_v9, %v1618_v24  ;;  %v1109_v9 = vshrl.u32 %v6257_v32, 16  ;;  %v3137_v20 = vrot.slane %v3135_v13, 1 }
 0x3c6   : > { %6187 = vmatmul.msk.bf16.gmra.mxu3 %vm1155_vm0, %v3974_v21 }
 0x3c7   : > { %v4631_v29 = vadd.f32 %v4452_v14, %v3815_v23  ;;  %5713 = vmatmul.msk.bf16.gmra.mxu0 %vm1155_vm0, %v1100_v25  ;;  %v1111_v17 = vor.u32 %v1109_v9, %v1107_v49  ;;  %v3978_v23 = vsel %vm3853_vm1, %v3975_v46, %v3977_v15  ;;  %v3138_v28 = vsel %vm616_vm2, %v3133_v19, %v3137_v20 }
 0x3c9   : > { %vm4763_vm13 = vcmp.gt.f32.partialorder %v4631_v29, 0.0  ;;  %v4895_v30 = vmul.f32 0.2, %v4631_v29  ;;  %6115 = vmatmul.msk.bf16.gmra.mxu2 %vm1155_vm0, %v3122_v26  ;;  %v4455_v31 = vpop.f32.mrf.mxu3 }
 0x3cb   : > { %v5027_v35 = vsel %vm4763_vm13, %v4631_v29, %v4895_v30 }
 0x3cc   : > { %v6588_v37 = vpack.c.bf16 %v5027_v35, %v5026_v34  ;;  %v3639_v38 = vpop.f32.mrf.mxu2  ;;  %v1620_v39 = vpop.f32.mrf.mxu0  ;;  %v6259_v34 = vld [vmem:[%s6793_s22 + $0x1f8] sm:$0xff]  ;;  %v7681_v35 = vld [vmem:[%s6793_s22 + $0x208] sm:$0xff] }
 0x3cd   : > { %v2100_v42 = vpop.f32.mrf.mxu1  ;;  %v3816_v45 = vadd.f32 %v3639_v38, %v2096_v36  ;;  %v2098_v53 = vadd.f32 %v2097_v27, %v1620_v39  ;;  %v1116_v27 = vsel %vm616_vm2, %v1111_v17, %v1115_v18  ;;  %v1121_v43 = vshll.u32 %v6259_v34, 16 }
 0x3ce   : > { %6718 = vst [vmem:[%s6901_s26 + $0x190] sm:$0xff] %v6588_v37   ;;  %v3143_v46 = vshll.u32 %v7681_v35, 16  ;;  %v3979_v48 = vrot.slane %v7681_v35, 1 }
 0x3cf   : > { %v4632_v52 = vadd.f32 %v4455_v31, %v3816_v45  ;;  %v3139_v45 = vshrl.u32 %v7666_v2, 16  ;;  %v1123_v51 = vrot.slane %v1121_v43, 1 }
 0x3d0   : > { %5784 = vmatmul.msk.bf16.gmra.mxu1 %vm1155_vm0, %v6256_v63 }
 0x3d1   : > { %v4457_v47 = vpop.f32.mrf.mxu3  ;;  %v4896_v61 = vmul.f32 0.2, %v4632_v52  ;;  %vm4764_vm14 = vcmp.gt.f32.partialorder %v4632_v52, 0.0 }
 0x3d3   : > { %v5028_v3 = vsel %vm4764_vm14, %v4632_v52, %v4896_v61  ;;  %v3141_v52 = vor.u32 %v3139_v45, %v3137_v20 }
 0x3d4   : > { %v3641_v55 = vpop.f32.mrf.mxu2  ;;  %v1623_v57 = vpop.f32.mrf.mxu0 }
 0x3d5   : > { %v3817_v56 = vadd.f32 %v3641_v55, %v2098_v53  ;;  %v2102_v60 = vpop.f32.mrf.mxu1  ;;  %v2101_v5 = vadd.f32 %v2100_v42, %v1623_v57  ;;  %v1117_v42 = vshrl.u32 %v6258_v1, 16  ;;  %v3145_v53 = vrot.slane %v3143_v46, 1 }
 0x3d6   : > { %6188 = vmatmul.msk.bf16.gmra.mxu3 %vm1155_vm0, %v3976_v54 }
 0x3d7   : > { %v4633_v62 = vadd.f32 %v4457_v47, %v3817_v56  ;;  %5714 = vmatmul.msk.bf16.gmra.mxu0 %vm1155_vm0, %v1108_v58  ;;  %v1119_v50 = vor.u32 %v1117_v42, %v1115_v18  ;;  %v3980_v56 = vsel %vm3853_vm1, %v3977_v15, %v3979_v48  ;;  %v3146_v61 = vsel %vm616_vm2, %v3141_v52, %v3145_v53 }
 0x3d9   : > { %vm4765_vm15 = vcmp.gt.f32.partialorder %v4633_v62, 0.0  ;;  %v4897_v63 = vmul.f32 0.2, %v4633_v62  ;;  %6116 = vmatmul.msk.bf16.gmra.mxu2 %vm1155_vm0, %v3130_v59  ;;  %v4460_v0 = vpop.f32.mrf.mxu3 }
 0x3db   : > { %v5029_v4 = vsel %vm4765_vm15, %v4633_v62, %v4897_v63 }
 0x3dc   : > { %v6593_v6 = vpack.c.bf16 %v5029_v4, %v5028_v3  ;;  %v3644_v7 = vpop.f32.mrf.mxu2  ;;  %v1625_v8 = vpop.f32.mrf.mxu0  ;;  %v6260_v3 = vld [vmem:[%s6793_s22 + $0x200] sm:$0xff]  ;;  %v7696_v4 = vld [vmem:[%s6793_s22 + $0x210] sm:$0xff] }
 0x3dd   : > { %v2105_v11 = vpop.f32.mrf.mxu1  ;;  %v3818_v14 = vadd.f32 %v3644_v7, %v2101_v5  ;;  %v2103_v22 = vadd.f32 %v2102_v60, %v1625_v8  ;;  %v1124_v60 = vsel %vm616_vm2, %v1119_v50, %v1123_v51  ;;  %v1129_v12 = vshll.u32 %v6260_v3, 16 }
 0x3de   : > { %6719 = vst [vmem:[%s6901_s26 + $0x198] sm:$0xff] %v6593_v6   ;;  %v3151_v15 = vshll.u32 %v7696_v4, 16  ;;  %v3981_v17 = vrot.slane %v7696_v4, 1 }
 0x3df   : > { %v4634_v21 = vadd.f32 %v4460_v0, %v3818_v14  ;;  %v3147_v14 = vshrl.u32 %v7681_v35, 16  ;;  %v1131_v20 = vrot.slane %v1129_v12, 1 }
 0x3e0   : > { %5785 = vmatmul.msk.bf16.gmra.mxu1 %vm1155_vm0, %v6257_v32 }
 0x3e1   : > { %v4462_v16 = vpop.f32.mrf.mxu3  ;;  %v4898_v30 = vmul.f32 0.2, %v4634_v21  ;;  %vm4766_vm3 = vcmp.gt.f32.partialorder %v4634_v21, 0.0 }
 0x3e3   : > { %v5030_v36 = vsel %vm4766_vm3, %v4634_v21, %v4898_v30  ;;  %v3149_v21 = vor.u32 %v3147_v14, %v3145_v53 }
 0x3e4   : > { %v3646_v24 = vpop.f32.mrf.mxu2  ;;  %v1628_v26 = vpop.f32.mrf.mxu0 }
 0x3e5   : > { %v3819_v25 = vadd.f32 %v3646_v24, %v2103_v22  ;;  %v2107_v29 = vpop.f32.mrf.mxu1  ;;  %v2106_v38 = vadd.f32 %v2105_v11, %v1628_v26  ;;  %v1125_v11 = vshrl.u32 %v6259_v34, 16  ;;  %v3153_v22 = vrot.slane %v3151_v15, 1 }
 0x3e6   : > { %6189 = vmatmul.msk.bf16.gmra.mxu3 %vm1155_vm0, %v3978_v23 }
 0x3e7   : > { %v4635_v31 = vadd.f32 %v4462_v16, %v3819_v25  ;;  %5715 = vmatmul.msk.bf16.gmra.mxu0 %vm1155_vm0, %v1116_v27  ;;  %v1127_v19 = vor.u32 %v1125_v11, %v1123_v51  ;;  %v3982_v25 = vsel %vm3853_vm1, %v3979_v48, %v3981_v17  ;;  %v3154_v30 = vsel %vm616_vm2, %v3149_v21, %v3153_v22 }
 0x3e9   : > { %vm4767_vm4 = vcmp.gt.f32.partialorder %v4635_v31, 0.0  ;;  %v4899_v32 = vmul.f32 0.2, %v4635_v31  ;;  %6117 = vmatmul.msk.bf16.gmra.mxu2 %vm1155_vm0, %v3138_v28  ;;  %v4465_v33 = vpop.f32.mrf.mxu3 }
 0x3eb   : > { %v5031_v37 = vsel %vm4767_vm4, %v4635_v31, %v4899_v32 }
 0x3ec   : > { %v6598_v39 = vpack.c.bf16 %v5031_v37, %v5030_v36  ;;  %v3649_v40 = vpop.f32.mrf.mxu2  ;;  %v1630_v41 = vpop.f32.mrf.mxu0  ;;  %v7710_v36 = vld [vmem:[%s6793_s22 + $0x208] sm:$0xff]  ;;  %v7713_v37 = vld [vmem:[%s6793_s22 + $0x218] sm:$0xff] }
 0x3ed   : > { %v2110_v44 = vpop.f32.mrf.mxu1  ;;  %v3820_v47 = vadd.f32 %v3649_v40, %v2106_v38  ;;  %v2108_v55 = vadd.f32 %v2107_v29, %v1630_v41  ;;  %v1132_v29 = vsel %vm616_vm2, %v1127_v19, %v1131_v20  ;;  %v1137_v45 = vshll.u32 %v7710_v36, 16 }
 0x3ee   : > { %6720 = vst [vmem:[%s6901_s26 + $0x1a0] sm:$0xff] %v6598_v39   ;;  %v3159_v48 = vshll.u32 %v7713_v37, 16  ;;  %v3983_v50 = vrot.slane %v7713_v37, 1 }
 0x3ef   : > { %v4636_v54 = vadd.f32 %v4465_v33, %v3820_v47  ;;  %v3155_v47 = vshrl.u32 %v7696_v4, 16  ;;  %v1139_v53 = vrot.slane %v1137_v45, 1 }
 0x3f0   : > { %5786 = vmatmul.msk.bf16.gmra.mxu1 %vm1155_vm0, %v6258_v1 }
 0x3f1   : > { %v4467_v49 = vpop.f32.mrf.mxu3  ;;  %v4900_v63 = vmul.f32 0.2, %v4636_v54  ;;  %vm4768_vm5 = vcmp.gt.f32.partialorder %v4636_v54, 0.0 }
 0x3f3   : > { %v5032_v5 = vsel %vm4768_vm5, %v4636_v54, %v4900_v63  ;;  %v3157_v54 = vor.u32 %v3155_v47, %v3153_v22 }
 0x3f4   : > { %v3651_v57 = vpop.f32.mrf.mxu2  ;;  %v1633_v59 = vpop.f32.mrf.mxu0 }
 0x3f5   : > { %v3821_v58 = vadd.f32 %v3651_v57, %v2108_v55  ;;  %v2112_v62 = vpop.f32.mrf.mxu1  ;;  %v2111_v7 = vadd.f32 %v2110_v44, %v1633_v59  ;;  %v1133_v44 = vshrl.u32 %v6260_v3, 16  ;;  %v3161_v55 = vrot.slane %v3159_v48, 1 }
 0x3f6   : > { %6190 = vmatmul.msk.bf16.gmra.mxu3 %vm1155_vm0, %v3980_v56  ;;  %v279_v56 = vld [vmem:[%s6793_s22 + $0x210] sm:$0x1]  ;;  %v3984_v59 = vsel %vm3853_vm1, %v3981_v17, %v3983_v50  ;;  %v1141_v17 = vshrl.u32 %v7710_v36, 16 }
 0x3f7   : > { %v4637_v0 = vadd.f32 %v4467_v49, %v3821_v58  ;;  %5716 = vmatmul.msk.bf16.gmra.mxu0 %vm1155_vm0, %v1124_v60  ;;  %v1135_v52 = vor.u32 %v1133_v44, %v1131_v20  ;;  %v2302_v60 = vld [vmem:[%s6793_s22 + $0x220] sm:$0x1]  ;;  %v3163_v20 = vshrl.u32 %v7713_v37, 16 }
 0x3f8   : > { %v2571_v4 = vunpack.c.l.b16 %v2302_v60 }
 0x3f9   : > { %vm4769_vm6 = vcmp.gt.f32.partialorder %v4637_v0, 0.0  ;;  %v4901_v1 = vmul.f32 0.2, %v4637_v0  ;;  %6118 = vmatmul.msk.bf16.gmra.mxu2 %vm1155_vm0, %v3146_v61  ;;  %v4470_v2 = vpop.f32.mrf.mxu3 }
 0x3fb   : > { %v5033_v6 = vsel %vm4769_vm6, %v4637_v0, %v4901_v1  ;;  %v1140_v0 = vsel %vm616_vm2, %v1135_v52, %v1139_v53  ;;  %v548_v1 = vunpack.c.l.b16 %v279_v56 }
 0x3fc   : > { %v6603_v8 = vpack.c.bf16 %v5033_v6, %v5032_v5  ;;  %v3654_v9 = vpop.f32.mrf.mxu2  ;;  %v1635_v10 = vpop.f32.mrf.mxu0 }
 0x3fd   : > { %v2115_v13 = vpop.f32.mrf.mxu1  ;;  %v3822_v16 = vadd.f32 %v3654_v9, %v2111_v7  ;;  %v2113_v24 = vadd.f32 %v2112_v62, %v1635_v10  ;;  %v615_v9 = vpack.c.b16 %v548_v1, %v548_v1  ;;  %v2638_v10 = vpack.c.b16 %v2571_v4, %v2571_v4 }
 0x3fe   : > { %6721 = vst [vmem:[%s6901_s26 + $0x1a8] sm:$0xff] %v6603_v8  }
 0x3ff   : > { %v4638_v23 = vadd.f32 %v4470_v2, %v3822_v16  ;;  %v3162_v2 = vsel %vm616_vm2, %v3157_v54, %v3161_v55  ;;  %v3167_v21 = vshll.u32 %v2638_v10, 16 }
 0x400   : > { %5787 = vmatmul.msk.bf16.gmra.mxu1 %vm1155_vm0, %v6259_v34 }
 0x401   : > { %v4472_v18 = vpop.f32.mrf.mxu3  ;;  %v4902_v32 = vmul.f32 0.2, %v4638_v23  ;;  %vm4770_vm7 = vcmp.gt.f32.partialorder %v4638_v23, 0.0 }
 0x403   : > { %v5034_v38 = vsel %vm4770_vm7, %v4638_v23, %v4902_v32  ;;  %v3985_v23 = vrot.slane %v2638_v10, 1 }
 0x404   : > { %v3656_v26 = vpop.f32.mrf.mxu2  ;;  %v1638_v28 = vpop.f32.mrf.mxu0 }
 0x405   : > { %v3823_v27 = vadd.f32 %v3656_v26, %v2113_v24  ;;  %v2117_v31 = vpop.f32.mrf.mxu1  ;;  %v2116_v40 = vadd.f32 %v2115_v13, %v1638_v28  ;;  %v3169_v28 = vrot.slane %v3167_v21, 1 }
 0x406   : > { %6191 = vmatmul.msk.bf16.gmra.mxu3 %vm1155_vm0, %v3982_v25  ;;  %v1143_v25 = vor.u32 %v1141_v17, %v1139_v53 }
 0x407   : > { %v4639_v33 = vadd.f32 %v4472_v18, %v3823_v27  ;;  %5717 = vmatmul.msk.bf16.gmra.mxu0 %vm1155_vm0, %v1132_v29  ;;  %v1145_v18 = vshll.u32 %v615_v9, 16  ;;  %v3165_v27 = vor.u32 %v3163_v20, %v3161_v55 }
 0x409   : > { %vm4771_vm8 = vcmp.gt.f32.partialorder %v4639_v33, 0.0  ;;  %v4903_v34 = vmul.f32 0.2, %v4639_v33  ;;  %6119 = vmatmul.msk.bf16.gmra.mxu2 %vm1155_vm0, %v3154_v30  ;;  %v4475_v35 = vpop.f32.mrf.mxu3  ;;  %v1147_v26 = vrot.slane %v1145_v18, 1  ;;  %v3170_v37 = vsel %vm616_vm2, %v3165_v27, %v3169_v28 }
 0x40b   : > { %v5035_v39 = vsel %vm4771_vm8, %v4639_v33, %v4903_v34 }
 0x40c   : > { %v6608_v41 = vpack.c.bf16 %v5035_v39, %v5034_v38  ;;  %v3659_v42 = vpop.f32.mrf.mxu2  ;;  %v1640_v43 = vpop.f32.mrf.mxu0 }
 0x40d   : > { %v2120_v46 = vpop.f32.mrf.mxu1  ;;  %v3824_v49 = vadd.f32 %v3659_v42, %v2116_v40  ;;  %v2118_v58 = vadd.f32 %v2117_v31, %v1640_v43  ;;  %v3986_v31 = vsel %vm3853_vm1, %v3983_v50, %v3985_v23 }
 0x40e   : > { %6722 = vst [vmem:[%s6901_s26 + $0x1b0] sm:$0xff] %v6608_v41  }
 0x40f   : > { %v4640_v57 = vadd.f32 %v4475_v35, %v3824_v49  ;;  %v1148_v35 = vsel %vm616_vm2, %v1143_v25, %v1147_v26 }
 0x410   : > { %5788 = vmatmul.msk.bf16.gmra.mxu1 %vm1155_vm0, %v6260_v3 }
 0x411   : > { %v4477_v51 = vpop.f32.mrf.mxu3  ;;  %v4904_v5 = vmul.f32 0.2, %v4640_v57  ;;  %vm4772_vm9 = vcmp.gt.f32.partialorder %v4640_v57, 0.0 }
 0x413   : > { %v5036_v11 = vsel %vm4772_vm9, %v4640_v57, %v4904_v5 }
 0x414   : > { %v3661_v61 = vpop.f32.mrf.mxu2  ;;  %v1643_v63 = vpop.f32.mrf.mxu0 }
 0x415   : > { %v3825_v62 = vadd.f32 %v3661_v61, %v2118_v58  ;;  %v2122_v3 = vpop.f32.mrf.mxu1  ;;  %v2121_v13 = vadd.f32 %v2120_v46, %v1643_v63 }
 0x416   : > { %6192 = vmatmul.msk.bf16.gmra.mxu3 %vm1155_vm0, %v3984_v59 }
 0x417   : > { %v4641_v6 = vadd.f32 %v4477_v51, %v3825_v62  ;;  %5718 = vmatmul.msk.bf16.gmra.mxu0 %vm1155_vm0, %v1140_v0 }
 0x419   : > { %vm4773_vm10 = vcmp.gt.f32.partialorder %v4641_v6, 0.0  ;;  %v4905_v7 = vmul.f32 0.2, %v4641_v6  ;;  %6120 = vmatmul.msk.bf16.gmra.mxu2 %vm1155_vm0, %v3162_v2  ;;  %v4480_v8 = vpop.f32.mrf.mxu3 }
 0x41b   : > { %v5037_v12 = vsel %vm4773_vm10, %v4641_v6, %v4905_v7 }
 0x41c   : > { %v6613_v14 = vpack.c.bf16 %v5037_v12, %v5036_v11  ;;  %v3664_v15 = vpop.f32.mrf.mxu2  ;;  %v1645_v16 = vpop.f32.mrf.mxu0 }
 0x41d   : > { %v2125_v19 = vpop.f32.mrf.mxu1  ;;  %v3826_v22 = vadd.f32 %v3664_v15, %v2121_v13  ;;  %v2123_v30 = vadd.f32 %v2122_v3, %v1645_v16 }
 0x41e   : > { %6723 = vst [vmem:[%s6901_s26 + $0x1b8] sm:$0xff] %v6613_v14  }
 0x41f   : > { %v4642_v29 = vadd.f32 %v4480_v8, %v3826_v22 }
 0x420   : > { %5789 = vmatmul.msk.bf16.gmra.mxu1 %vm1155_vm0, %v7710_v36 }
 0x421   : > { %v4482_v24 = vpop.f32.mrf.mxu3  ;;  %v4906_v36 = vmul.f32 0.2, %v4642_v29  ;;  %vm4774_vm11 = vcmp.gt.f32.partialorder %v4642_v29, 0.0 }
 0x423   : > { %v5038_v42 = vsel %vm4774_vm11, %v4642_v29, %v4906_v36 }
 0x424   : > { %v3666_v32 = vpop.f32.mrf.mxu2  ;;  %v1648_v34 = vpop.f32.mrf.mxu0 }
 0x425   : > { %v3827_v33 = vadd.f32 %v3666_v32, %v2123_v30  ;;  %v2127_v38 = vpop.f32.mrf.mxu1  ;;  %v2126_v44 = vadd.f32 %v2125_v19, %v1648_v34 }
 0x426   : > { %6193 = vmatmul.msk.bf16.gmra.mxu3 %vm1155_vm0, %v3986_v31 }
 0x427   : > { %v4643_v39 = vadd.f32 %v4482_v24, %v3827_v33  ;;  %5719 = vmatmul.msk.bf16.gmra.mxu0 %vm1155_vm0, %v1148_v35 }
 0x429   : > { %vm4775_vm12 = vcmp.gt.f32.partialorder %v4643_v39, 0.0  ;;  %v4907_v40 = vmul.f32 0.2, %v4643_v39  ;;  %6121 = vmatmul.msk.bf16.gmra.mxu2 %vm1155_vm0, %v3170_v37  ;;  %v4485_v41 = vpop.f32.mrf.mxu3 }
 0x42b   : > { %v5039_v43 = vsel %vm4775_vm12, %v4643_v39, %v4907_v40 }
 0x42c   : > { %v6618_v45 = vpack.c.bf16 %v5039_v43, %v5038_v42  ;;  %v3669_v46 = vpop.f32.mrf.mxu2  ;;  %v1650_v47 = vpop.f32.mrf.mxu0 }
 0x42d   : > { %v2130_v48 = vpop.f32.mrf.mxu1  ;;  %v3828_v49 = vadd.f32 %v3669_v46, %v2126_v44  ;;  %v2128_v52 = vadd.f32 %v2127_v38, %v1650_v47 }
 0x42e   : > { %6724 = vst [vmem:[%s6901_s26 + $0x1c0] sm:$0xff] %v6618_v45  }
 0x42f   : > { %v4644_v51 = vadd.f32 %v4485_v41, %v3828_v49 }
 0x431   : > { %v4487_v50 = vpop.f32.mrf.mxu3  ;;  %v4908_v57 = vmul.f32 0.2, %v4644_v51  ;;  %vm4776_vm0 = vcmp.gt.f32.partialorder %v4644_v51, 0.0 }
 0x433   : > { %v5040_v61 = vsel %vm4776_vm0, %v4644_v51, %v4908_v57 }
 0x434   : > { %v3671_v53 = vpop.f32.mrf.mxu2  ;;  %v1653_v55 = vpop.f32.mrf.mxu0 }
 0x435   : > { %v3829_v54 = vadd.f32 %v3671_v53, %v2128_v52  ;;  %v2132_v56 = vpop.f32.mrf.mxu1  ;;  %v2131_v63 = vadd.f32 %v2130_v48, %v1653_v55 }
 0x437   : > { %v4645_v58 = vadd.f32 %v4487_v50, %v3829_v54 }
 0x439   : > { %vm4777_vm1 = vcmp.gt.f32.partialorder %v4645_v58, 0.0  ;;  %v4909_v59 = vmul.f32 0.2, %v4645_v58  ;;  %v4490_v60 = vpop.f32.mrf.mxu3 }
 0x43b   : > { %v5041_v62 = vsel %vm4777_vm1, %v4645_v58, %v4909_v59 }
 0x43c   : > { %v6623_v0 = vpack.c.bf16 %v5041_v62, %v5040_v61  ;;  %v3674_v1 = vpop.f32.mrf.mxu2  ;;  %v1655_v2 = vpop.f32.mrf.mxu0 }
 0x43d   : > { %v2135_v3 = vpop.f32.mrf.mxu1  ;;  %v3830_v4 = vadd.f32 %v3674_v1, %v2131_v63  ;;  %v2133_v7 = vadd.f32 %v2132_v56, %v1655_v2 }
 0x43e   : > { %6725 = vst [vmem:[%s6901_s26 + $0x1c8] sm:$0xff] %v6623_v0  }
 0x43f   : > { %v4646_v6 = vadd.f32 %v4490_v60, %v3830_v4 }
 0x441   : > { %v4492_v5 = vpop.f32.mrf.mxu3  ;;  %v4910_v12 = vmul.f32 0.2, %v4646_v6  ;;  %vm4778_vm2 = vcmp.gt.f32.partialorder %v4646_v6, 0.0 }
 0x443   : > { %v5042_v16 = vsel %vm4778_vm2, %v4646_v6, %v4910_v12 }
 0x444   : > { %v3676_v8 = vpop.f32.mrf.mxu2  ;;  %v1658_v10 = vpop.f32.mrf.mxu0 }
 0x445   : > { %v3831_v9 = vadd.f32 %v3676_v8, %v2133_v7  ;;  %v2137_v11 = vpop.f32.mrf.mxu1  ;;  %v2136_v18 = vadd.f32 %v2135_v3, %v1658_v10 }
 0x447   : > { %v4647_v13 = vadd.f32 %v4492_v5, %v3831_v9 }
 0x449   : > { %vm4779_vm13 = vcmp.gt.f32.partialorder %v4647_v13, 0.0  ;;  %v4911_v14 = vmul.f32 0.2, %v4647_v13  ;;  %v4495_v15 = vpop.f32.mrf.mxu3 }
 0x44b   : > { %v5043_v17 = vsel %vm4779_vm13, %v4647_v13, %v4911_v14 }
 0x44c   : > { %v6628_v19 = vpack.c.bf16 %v5043_v17, %v5042_v16  ;;  %v3679_v20 = vpop.f32.mrf.mxu2  ;;  %v1660_v21 = vpop.f32.mrf.mxu0 }
 0x44d   : > { %v2140_v22 = vpop.f32.mrf.mxu1  ;;  %v3832_v23 = vadd.f32 %v3679_v20, %v2136_v18  ;;  %v2138_v26 = vadd.f32 %v2137_v11, %v1660_v21 }
 0x44e   : > { %6726 = vst [vmem:[%s6901_s26 + $0x1d0] sm:$0xff] %v6628_v19  }
 0x44f   : > { %v4648_v25 = vadd.f32 %v4495_v15, %v3832_v23 }
 0x451   : > { %v4497_v24 = vpop.f32.mrf.mxu3  ;;  %v4912_v31 = vmul.f32 0.2, %v4648_v25  ;;  %vm4780_vm14 = vcmp.gt.f32.partialorder %v4648_v25, 0.0 }
 0x453   : > { %v5044_v35 = vsel %vm4780_vm14, %v4648_v25, %v4912_v31 }
 0x454   : > { %v3681_v27 = vpop.f32.mrf.mxu2  ;;  %v1663_v29 = vpop.f32.mrf.mxu0 }
 0x455   : > { %v3833_v28 = vadd.f32 %v3681_v27, %v2138_v26  ;;  %v2142_v30 = vpop.f32.mrf.mxu1  ;;  %v2141_v38 = vadd.f32 %v2140_v22, %v1663_v29 }
 0x457   : > { %v4649_v32 = vadd.f32 %v4497_v24, %v3833_v28 }
 0x459   : > { %vm4781_vm15 = vcmp.gt.f32.partialorder %v4649_v32, 0.0  ;;  %v4913_v33 = vmul.f32 0.2, %v4649_v32  ;;  %v4500_v34 = vpop.f32.mrf.mxu3 }
 0x45b   : > { %v5045_v37 = vsel %vm4781_vm15, %v4649_v32, %v4913_v33 }
 0x45c   : > { %v6633_v36 = vpack.c.bf16 %v5045_v37, %v5044_v35  ;;  %v3684_v39 = vpop.f32.mrf.mxu2  ;;  %v1665_v40 = vpop.f32.mrf.mxu0 }
 0x45d   : > { %v2145_v41 = vpop.f32.mrf.mxu1  ;;  %v3834_v42 = vadd.f32 %v3684_v39, %v2141_v38  ;;  %v2143_v45 = vadd.f32 %v2142_v30, %v1665_v40 }
 0x45e   : > { %6727 = vst [vmem:[%s6901_s26 + $0x1d8] sm:$0xff] %v6633_v36  }
 0x45f   : > { %v4650_v44 = vadd.f32 %v4500_v34, %v3834_v42 }
 0x461   : > { %v4502_v43 = vpop.f32.mrf.mxu3  ;;  %v4914_v50 = vmul.f32 0.2, %v4650_v44  ;;  %vm4782_vm3 = vcmp.gt.f32.partialorder %v4650_v44, 0.0 }
 0x463   : > { %v5046_v54 = vsel %vm4782_vm3, %v4650_v44, %v4914_v50 }
 0x464   : > { %v3686_v46 = vpop.f32.mrf.mxu2  ;;  %v1668_v48 = vpop.f32.mrf.mxu0 }
 0x465   : > { %v3835_v47 = vadd.f32 %v3686_v46, %v2143_v45  ;;  %v2147_v49 = vpop.f32.mrf.mxu1  ;;  %v2146_v56 = vadd.f32 %v2145_v41, %v1668_v48 }
 0x467   : > { %v4651_v51 = vadd.f32 %v4502_v43, %v3835_v47 }
 0x469   : > { %vm4783_vm4 = vcmp.gt.f32.partialorder %v4651_v51, 0.0  ;;  %v4915_v52 = vmul.f32 0.2, %v4651_v51  ;;  %v4505_v53 = vpop.f32.mrf.mxu3 }
 0x46b   : > { %v5047_v55 = vsel %vm4783_vm4, %v4651_v51, %v4915_v52 }
 0x46c   : > { %v6638_v57 = vpack.c.bf16 %v5047_v55, %v5046_v54  ;;  %v3689_v58 = vpop.f32.mrf.mxu2  ;;  %v1670_v59 = vpop.f32.mrf.mxu0 }
 0x46d   : > { %v2150_v60 = vpop.f32.mrf.mxu1  ;;  %v3836_v61 = vadd.f32 %v3689_v58, %v2146_v56  ;;  %v2148_v0 = vadd.f32 %v2147_v49, %v1670_v59 }
 0x46e   : > { %6728 = vst [vmem:[%s6901_s26 + $0x1e0] sm:$0xff] %v6638_v57  }
 0x46f   : > { %v4652_v63 = vadd.f32 %v4505_v53, %v3836_v61 }
 0x471   : > { %v4507_v62 = vpop.f32.mrf.mxu3  ;;  %v4916_v5 = vmul.f32 0.2, %v4652_v63  ;;  %vm4784_vm5 = vcmp.gt.f32.partialorder %v4652_v63, 0.0 }
 0x473   : > { %v5048_v9 = vsel %vm4784_vm5, %v4652_v63, %v4916_v5 }
 0x474   : > { %v3691_v1 = vpop.f32.mrf.mxu2  ;;  %v1673_v3 = vpop.f32.mrf.mxu0 }
 0x475   : > { %v3837_v2 = vadd.f32 %v3691_v1, %v2148_v0  ;;  %v2152_v4 = vpop.f32.mrf.mxu1  ;;  %v2151_v11 = vadd.f32 %v2150_v60, %v1673_v3 }
 0x477   : > { %v4653_v6 = vadd.f32 %v4507_v62, %v3837_v2 }
 0x479   : > { %vm4785_vm6 = vcmp.gt.f32.partialorder %v4653_v6, 0.0  ;;  %v4917_v7 = vmul.f32 0.2, %v4653_v6  ;;  %v4510_v8 = vpop.f32.mrf.mxu3 }
 0x47b   : > { %v5049_v10 = vsel %vm4785_vm6, %v4653_v6, %v4917_v7 }
 0x47c   : > { %v6643_v12 = vpack.c.bf16 %v5049_v10, %v5048_v9  ;;  %v3694_v13 = vpop.f32.mrf.mxu2  ;;  %v1675_v14 = vpop.f32.mrf.mxu0 }
 0x47d   : > { %v3838_v15 = vadd.f32 %v3694_v13, %v2151_v11  ;;  %v2155_v16 = vpop.f32.mrf.mxu1  ;;  %v2153_v19 = vadd.f32 %v2152_v4, %v1675_v14 }
 0x47e   : > { %6729 = vst [vmem:[%s6901_s26 + $0x1e8] sm:$0xff] %v6643_v12  }
 0x47f   : > { %v4654_v18 = vadd.f32 %v4510_v8, %v3838_v15 }
 0x481   : > { %v4512_v17 = vpop.f32.mrf.mxu3  ;;  %v4918_v23 = vmul.f32 0.2, %v4654_v18  ;;  %vm4786_vm7 = vcmp.gt.f32.partialorder %v4654_v18, 0.0 }
 0x483   : > { %v5050_v28 = vsel %vm4786_vm7, %v4654_v18, %v4918_v23 }
 0x484   : > { %v3696_v20 = vpop.f32.mrf.mxu2  ;;  %v1678_v22 = vpop.f32.mrf.mxu0 }
 0x485   : > { %v3839_v21 = vadd.f32 %v3696_v20, %v2153_v19  ;;  %v2157_v27 = vpop.f32.mrf.mxu1  ;;  %v2156_v30 = vadd.f32 %v2155_v16, %v1678_v22 }
 0x487   : > { %v4655_v24 = vadd.f32 %v4512_v17, %v3839_v21 }
 0x489   : > { %vm4787_vm8 = vcmp.gt.f32.partialorder %v4655_v24, 0.0  ;;  %v4919_v25 = vmul.f32 0.2, %v4655_v24  ;;  %v4515_v26 = vpop.f32.mrf.mxu3 }
 0x48b   : > { %v5051_v29 = vsel %vm4787_vm8, %v4655_v24, %v4919_v25 }
 0x48c   : > { %v6648_v31 = vpack.c.bf16 %v5051_v29, %v5050_v28  ;;  %v3699_v32 = vpop.f32.mrf.mxu2  ;;  %v1680_v33 = vpop.f32.mrf.mxu0 }
 0x48d   : > { %v3840_v34 = vadd.f32 %v3699_v32, %v2156_v30  ;;  %v2158_v38 = vadd.f32 %v2157_v27, %v1680_v33  ;;  %v2160_v36 = vpop.f32.mrf.mxu1 }
 0x48e   : > { %6730 = vst [vmem:[%s6901_s26 + $0x1f0] sm:$0xff] %v6648_v31  }
 0x48f   : > { %v4656_v37 = vadd.f32 %v4515_v26, %v3840_v34 }
 0x491   : > { %v4517_v35 = vpop.f32.mrf.mxu3  ;;  %v4920_v42 = vmul.f32 0.2, %v4656_v37  ;;  %vm4788_vm9 = vcmp.gt.f32.partialorder %v4656_v37, 0.0 }
 0x493   : > { %v5052_v46 = vsel %vm4788_vm9, %v4656_v37, %v4920_v42 }
 0x494   : > { %v3701_v39 = vpop.f32.mrf.mxu2  ;;  %v1683_v41 = vpop.f32.mrf.mxu0 }
 0x495   : > { %v3841_v40 = vadd.f32 %v3701_v39, %v2158_v38  ;;  %v2161_v48 = vadd.f32 %v2160_v36, %v1683_v41  ;;  %v2162_v52 = vpop.f32.mrf.mxu1 }
 0x497   : > { %v4657_v43 = vadd.f32 %v4517_v35, %v3841_v40 }
 0x499   : > { %vm4789_vm10 = vcmp.gt.f32.partialorder %v4657_v43, 0.0  ;;  %v4921_v44 = vmul.f32 0.2, %v4657_v43  ;;  %v4520_v45 = vpop.f32.mrf.mxu3 }
 0x49b   : > { %v5053_v47 = vsel %vm4789_vm10, %v4657_v43, %v4921_v44 }
 0x49c   : > { %v6653_v49 = vpack.c.bf16 %v5053_v47, %v5052_v46  ;;  %v3704_v50 = vpop.f32.mrf.mxu2  ;;  %v1685_v51 = vpop.f32.mrf.mxu0 }
 0x49d   : > { %v3842_v53 = vadd.f32 %v3704_v50, %v2161_v48  ;;  %v2163_v56 = vadd.f32 %v2162_v52, %v1685_v51  ;;  %v2165_v62 = vpop.f32.mrf.mxu1 }
 0x49e   : > { %6731 = vst [vmem:[%s6901_s26 + $0x1f8] sm:$0xff] %v6653_v49  }
 0x49f   : > { %v4658_v55 = vadd.f32 %v4520_v45, %v3842_v53 }
 0x4a1   : > { %v4522_v54 = vpop.f32.mrf.mxu3  ;;  %v4922_v60 = vmul.f32 0.2, %v4658_v55  ;;  %vm4790_vm11 = vcmp.gt.f32.partialorder %v4658_v55, 0.0 }
 0x4a3   : > { %v5054_v0 = vsel %vm4790_vm11, %v4658_v55, %v4922_v60 }
 0x4a4   : > { %v3706_v57 = vpop.f32.mrf.mxu2  ;;  %v1688_v59 = vpop.f32.mrf.mxu0 }
 0x4a5   : > { %v3843_v58 = vadd.f32 %v3706_v57, %v2163_v56  ;;  %v2166_v2 = vadd.f32 %v2165_v62, %v1688_v59  ;;  %v2167_v8 = vpop.f32.mrf.mxu1 }
 0x4a7   : > { %v4659_v61 = vadd.f32 %v4522_v54, %v3843_v58 }
 0x4a9   : > { %vm4791_vm12 = vcmp.gt.f32.partialorder %v4659_v61, 0.0  ;;  %v4923_v63 = vmul.f32 0.2, %v4659_v61  ;;  %v4525_v4 = vpop.f32.mrf.mxu3 }
 0x4ab   : > { %v5055_v1 = vsel %vm4791_vm12, %v4659_v61, %v4923_v63 }
 0x4ac   : > { %v6658_v3 = vpack.c.bf16 %v5055_v1, %v5054_v0  ;;  %v3709_v5 = vpop.f32.mrf.mxu2  ;;  %v1690_v7 = vpop.f32.mrf.mxu0 }
 0x4ad   : > { %v3844_v6 = vadd.f32 %v3709_v5, %v2166_v2  ;;  %v2168_v10 = vadd.f32 %v2167_v8, %v1690_v7 }
 0x4ae   : > { %6732 = vst [vmem:[%s6901_s26 + $0x200] sm:$0xff] %v6658_v3  }
 0x4af   : > { %v4660_v9 = vadd.f32 %v4525_v4, %v3844_v6 }
 0x4b1   : > { %v4527_v13 = vpop.f32.mrf.mxu3  ;;  %v4924_v14 = vmul.f32 0.2, %v4660_v9  ;;  %vm4792_vm0 = vcmp.gt.f32.partialorder %v4660_v9, 0.0 }
 0x4b3   : > { %v5056_v17 = vsel %vm4792_vm0, %v4660_v9, %v4924_v14 }
 0x4b4   : > { %v3711_v11 = vpop.f32.mrf.mxu2 }
 0x4b5   : > { %v3845_v12 = vadd.f32 %v3711_v11, %v2168_v10 }
 0x4b7   : > { %v4661_v15 = vadd.f32 %v4527_v13, %v3845_v12 }
 0x4b9   : > { %vm4793_vm1 = vcmp.gt.f32.partialorder %v4661_v15, 0.0  ;;  %v4925_v16 = vmul.f32 0.2, %v4661_v15 }
 0x4bb   : > { %v5057_v18 = vsel %vm4793_vm1, %v4661_v15, %v4925_v16 }
 0x4bc   : > { %v6663_v19 = vpack.c.bf16 %v5057_v18, %v5056_v17 }
 0x4be   : > { %6733 = vst [vmem:[%s6901_s26 + $0x208] sm:$0xff] %v6663_v19  }
 0x4bf PF: > { %s12_s9 = sadd.s32 1, %s6750_s9  }
 0x4c0   : > { %p9_p4 = scmp.ge.s32.totalorder %s12_s9, 4  }
 0x4c2   :  { %11 = sbr.rel (!%p9_p4) target bundleno = 1 (0x1), region = 61 }

// kernel: stage1_d_img_forward.5
= control target key start
LH: loop header
LB: loop body
LE: loop exit
PB: predicated region body
PF: predicated region fallthrough
CT: control target
= control target key end

     0   :  { %v4587_v3 = vmov 0   ;;  %vm340_vm0 = vcmask 261120   ;;  %vm187_vm1 = vsmask.f32 7424  ;;  %vm1094_vm2 = vcmask 1046528   ;;  %s6618_s1 = inlined_call_operand.vmem [shape: bf16[4,32,128], index: 1, kind: input, shape index: {}]   ;;  %s6619_s0 = inlined_call_operand.vmem [shape: bf16[2,306,32], index: 0, kind: input, shape index: {}]   ;;  %s6620_s2 = inlined_call_operand.vmem [shape: f32[272,1], index: 2, kind: input, shape index: {}]   ;;  %s6621_s3 = inlined_call_operand.vmem [shape: f32[1,128], index: 3, kind: input, shape index: {}]   ;;  %s6622_s4 = inlined_call_operand.vmem [shape: f32[1,128], index: 4, kind: input, shape index: {}]   ;;  %s6623_s5 = inlined_call_operand.vmem [shape: bf16[2,272,128], index: 5, kind: output, shape index: {}]  }
   0x1   :  { %v4305_v0 = vld [vmem:[%s6618_s1 + $0x18] sm:$0xff]  ;;  %v4303_v1 = vld [vmem:[%s6618_s1 + $0x8] sm:$0xff]  ;;  %4579 = vset.pattern.permute.xlu0 %v4587_v3  ;;  %4580 = vset.pattern.permute.xlu1 %v4587_v3  ;;  %v4304_v5 = vld [vmem:[%s6618_s1 + $0x10] sm:$0xff] }
   0x2   :  { %v4323_v2 = vld [vmem:[%s6618_s1 + $0x28] sm:$0xff]  ;;  %v4325_v4 = vld [vmem:[%s6618_s1 + $0x38] sm:$0xff]  ;;  %v4302_v6 = vld [vmem:[%s6618_s1] sm:$0xff]  ;;  %4581 = vset.pattern.permute.xlu2 %v4587_v3  ;;  %398 = vmatpush.bf16.msra.mxu0 %v4305_v0 }
   0x3   :  { %538 = vmatpush.bf16.msra.mxu1 %v4303_v1  ;;  %v4322_v7 = vld [vmem:[%s6618_s1 + $0x20] sm:$0xff]  ;;  %v4324_v8 = vld [vmem:[%s6618_s1 + $0x30] sm:$0xff]  ;;  %963 = vmatpush.bf16.msra.mxu2 %v4323_v2  ;;  %v4648_v10 = vld [vmem:[%s6619_s0 + $0x8] sm:$0xff] }
   0x4   :  { %v4285_v9 = vld [vmem:[%s6619_s0] sm:$0xff]  ;;  %1199 = vmatpush.bf16.msra.mxu3 %v4325_v4  ;;  %v4541_v11 = vld [vmem:[%s6619_s0 + $0x8] sm:$0xff]   ;;  %v4656_v12 = vld [vmem:[%s6619_s0 + $0x10] sm:$0xff]  ;;  %v196_v18 = vshll.u32 %v4648_v10, 16  ;;  %v200_v42 = vshrl.u32 %v4648_v10, 16 }
   0x5   :  { %v189_v13 = vshrl.u32 %v4285_v9, 16  ;;  %v191_v14 = vshll.u32 %v4285_v9, 16  ;;  %v755_v15 = vshrl.u32 %v4541_v11, 16  ;;  %v757_v16 = vshll.u32 %v4541_v11, 16  ;;  %v4542_v17 = vld [vmem:[%s6619_s0 + $0x8] sm:$0xf0] }
   0x6   :  { %v762_v19 = vshll.u32 %v4656_v12, 16  ;;  %v4543_v20 = vld [vmem:[%s6619_s0 + $0x8] sm:$0xe]  ;;  %399 = vmatpush.bf16.msra.mxu0 %v4304_v5  ;;  %v1096_v25 = vrot.slane %v4656_v12, 1  ;;  %v4366_v26 = vld [vmem:[%s6618_s1 + $0x38] sm:$0xff]  ;;  %v198_v29 = vrot.slane %v196_v18, 1 }
   0x7   :  { %v4364_v21 = vld [vmem:[%s6618_s1 + $0x28] sm:$0xff]  ;;  %539 = vmatpush.bf16.msra.mxu1 %v4302_v6  ;;  %v193_v22 = vrot.slane %v191_v14, 1  ;;  %v759_v23 = vrot.slane %v757_v16, 1  ;;  %v4544_v24 = vor.u32 %v4543_v20, %v4542_v17  ;;  %v4346_v27 = vld [vmem:[%s6618_s1 + $0x18] sm:$0xff]  ;;  %964 = vmatpush.bf16.msra.mxu2 %v4322_v7  ;;  %v21_v31 = vld [vmem:[%s6620_s2] sm:$0xff]  ;;  %v766_v44 = vshrl.u32 %v4656_v12, 16 }
   0x8   :  { %v4344_v28 = vld [vmem:[%s6618_s1 + $0x8] sm:$0xff]  ;;  %1200 = vmatpush.bf16.msra.mxu3 %v4324_v8  ;;  %v764_v30 = vrot.slane %v762_v19, 1  ;;  %1357 = vperm.xlu0 %4579, %v21_v31   ;;  %v4287_v38 = vld [vmem:[%s6619_s0 + $0x10] sm:$0xff]  ;;  %v4307_v39 = vld [vmem:[%s6619_s0 + $0x18] sm:$0xff]  ;;  %v202_v47 = vor.u32 %v200_v42, %v198_v29 }
   0x9   :  { %v194_v32 = vor.u32 %v193_v22, %v189_v13  ;;  %v760_v33 = vor.u32 %v759_v23, %v755_v15  ;;  %v1095_v34 = vrot.slane %v4544_v24, 1  ;;  %v23_v40 = vld [vmem:[%s6620_s2 + $0x10] sm:$0xff]  ;;  %v22_v41 = vld [vmem:[%s6620_s2 + $0x8] sm:$0xff]  ;;  %v204_v43 = vshll.u32 %v4287_v38, 16  ;;  %v24_v46 = vld [vmem:[%s6620_s2 + $0x18] sm:$0xff] }
   0xa   :  { %3797 = vmatmul.msk.bf16.vlgmr.msra.gmra.mxu1 %vm340_vm0, %v4285_v9  ;;  %2014 = vmatpush.bf16.msrb.mxu0 %v4346_v27  ;;  %v770_v45 = vshll.u32 %v4307_v39, 16  ;;  %v768_v49 = vor.u32 %v766_v44, %v764_v30  ;;  %v1098_v51 = vrot.slane %v4307_v39, 1  ;;  %v4288_v55 = vld [vmem:[%s6619_s0 + $0x18] sm:$0xff]  ;;  %v4308_v56 = vld [vmem:[%s6619_s0 + $0x20] sm:$0xff]  ;;  %v208_v57 = vshrl.u32 %v4287_v38, 16  ;;  %v4309_v6 = vld [vmem:[%s6619_s0 + $0x28] sm:$0xff] }
   0xb   :  { %2578 = vmatpush.bf16.msrb.mxu2 %v4364_v21  ;;  %v199_v35 = vsel %vm187_vm1, %v194_v32, %v198_v29  ;;  %v765_v36 = vsel %vm187_vm1, %v760_v33, %v764_v30  ;;  %v1097_v37 = vsel %vm1094_vm2, %v1095_v34, %v1096_v25  ;;  %2154 = vmatpush.bf16.msrb.mxu1 %v4344_v28  ;;  %v206_v48 = vrot.slane %v204_v43, 1  ;;  %v4289_v5 = vld [vmem:[%s6619_s0 + $0x20] sm:$0xff]  ;;  %v27_v7 = vld [vmem:[%s6620_s2 + $0x30] sm:$0xff]  ;;  %v28_v9 = vld [vmem:[%s6620_s2 + $0x38] sm:$0xff] }
   0xc   :  { %2812 = vmatpush.bf16.msrb.mxu3 %v4366_v26  ;;  %3772 = vmatmul.msk.bf16.vlgmr.msra.gmra.mxu0 %vm340_vm0, %v199_v35  ;;  %v772_v50 = vrot.slane %v770_v45, 1  ;;  %v1099_v54 = vsel %vm1094_vm2, %v1096_v25, %v1098_v51  ;;  %v212_v58 = vshll.u32 %v4288_v55, 16  ;;  %v774_v59 = vshrl.u32 %v4307_v39, 16  ;;  %v25_v8 = vld [vmem:[%s6620_s2 + $0x20] sm:$0xff]  ;;  %v4290_v22 = vld [vmem:[%s6619_s0 + $0x28] sm:$0xff]  ;;  %v4310_v23 = vld [vmem:[%s6619_s0 + $0x30] sm:$0xff] }
   0xd   :  { %3890 = vmatmul.msk.bf16.vlgmr.msra.gmra.mxu2 %vm340_vm0, %v765_v36  ;;  %3919 = vmatmul.msk.bf16.vlgmr.msra.gmra.mxu3 %vm340_vm0, %v1097_v37  ;;  %v207_v52 = vsel %vm187_vm1, %v202_v47, %v206_v48  ;;  %v778_v60 = vshll.u32 %v4308_v56, 16  ;;  %v210_v61 = vor.u32 %v208_v57, %v206_v48  ;;  %v1100_v1 = vrot.slane %v4308_v56, 1  ;;  %v26_v24 = vld [vmem:[%s6620_s2 + $0x28] sm:$0xff]  ;;  %v4311_v39 = vld [vmem:[%s6619_s0 + $0x38] sm:$0xff] }
   0xe   :  { %1367 = vperm.xlu1 %4580, %v23_v40   ;;  %v773_v53 = vsel %vm187_vm1, %v768_v49, %v772_v50  ;;  %v214_v62 = vrot.slane %v212_v58, 1  ;;  %v776_v63 = vor.u32 %v774_v59, %v772_v50  ;;  %1377 = vperm.xlu2 %4581, %v25_v8   ;;  %v220_v11 = vshll.u32 %v4289_v5, 16  ;;  %v30_v25 = vld [vmem:[%s6620_s2 + $0x48] sm:$0xff]  ;;  %v31_v40 = vld [vmem:[%s6620_s2 + $0x50] sm:$0xff] }
   0xf   :  { %v780_v0 = vrot.slane %v778_v60, 1  ;;  %v1101_v4 = vsel %vm1094_vm2, %v1098_v51, %v1100_v1  ;;  %v782_v12 = vshrl.u32 %v4308_v56, 16  ;;  %v786_v13 = vshll.u32 %v4309_v6, 16  ;;  %v33_v56 = vld [vmem:[%s6620_s2 + $0x60] sm:$0xff]  ;;  %v34_v57 = vld [vmem:[%s6620_s2 + $0x68] sm:$0xff] }
  0x10   :  { %1362 = vperm.xlu0 %4579, %v22_v41   ;;  %v215_v2 = vsel %vm187_vm1, %v210_v61, %v214_v62  ;;  %v222_v15 = vrot.slane %v220_v11, 1  ;;  %v1102_v18 = vrot.slane %v4309_v6, 1  ;;  %v224_v26 = vshrl.u32 %v4289_v5, 16  ;;  %v29_v41 = vld [vmem:[%s6620_s2 + $0x40] sm:$0xff] }
  0x11   :  { %v781_v3 = vsel %vm187_vm1, %v776_v63, %v780_v0  ;;  %v784_v16 = vor.u32 %v782_v12, %v780_v0  ;;  %v788_v17 = vrot.slane %v786_v13, 1  ;;  %v228_v27 = vshll.u32 %v4290_v22, 16  ;;  %v32_v12 = vld [vmem:[%s6620_s2 + $0x58] sm:$0xff] }
  0x12   :  { %v1103_v21 = vsel %vm1094_vm2, %v1100_v1, %v1102_v18  ;;  %v790_v28 = vshrl.u32 %v4309_v6, 16  ;;  %v794_v29 = vshll.u32 %v4310_v23, 16  ;;  %v226_v30 = vor.u32 %v224_v26, %v222_v15  ;;  %v4293_v6 = vld [vmem:[%s6619_s0 + $0x40] sm:$0xff]  ;;  %v4294_v26 = vld [vmem:[%s6619_s0 + $0x48] sm:$0xff] }
  0x13   :  { %v789_v20 = vsel %vm187_vm1, %v784_v16, %v788_v17  ;;  %v230_v31 = vrot.slane %v228_v27, 1  ;;  %v1104_v34 = vrot.slane %v4310_v23, 1  ;;  %v232_v42 = vshrl.u32 %v4290_v22, 16  ;;  %v4314_v27 = vld [vmem:[%s6619_s0 + $0x50] sm:$0xff] }
  0x14   :  { %v792_v32 = vor.u32 %v790_v28, %v788_v17  ;;  %v796_v33 = vrot.slane %v794_v29, 1  ;;  %v798_v44 = vshrl.u32 %v4310_v23, 16  ;;  %v802_v45 = vshll.u32 %v4311_v39, 16 }
  0x15   :  { %v231_v35 = vsel %vm187_vm1, %v226_v30, %v230_v31  ;;  %v1105_v37 = vsel %vm1094_vm2, %v1102_v18, %v1104_v34  ;;  %v1106_v50 = vrot.slane %v4311_v39, 1  ;;  %v806_v60 = vshrl.u32 %v4311_v39, 16  ;;  %v4363_v18 = vld [vmem:[%s6618_s1 + $0x20] sm:$0xff] }
  0x16   :  { %1372 = vperm.xlu1 %4580, %v24_v46   ;;  %1382 = vperm.xlu2 %4581, %v26_v24   ;;  %v797_v36 = vsel %vm187_vm1, %v792_v32, %v796_v33  ;;  %v234_v46 = vor.u32 %v232_v42, %v230_v31  ;;  %v800_v48 = vor.u32 %v798_v44, %v796_v33  ;;  %v804_v49 = vrot.slane %v802_v45, 1  ;;  %v4345_v24 = vld [vmem:[%s6618_s1 + $0x10] sm:$0xff]  ;;  %v37_v32 = vld [vmem:[%s6620_s2 + $0x80] sm:$0xff] }
  0x17   :  { %2579 = vmatpush.bf16.msrb.mxu2 %v4363_v18  ;;  %2015 = vmatpush.bf16.msrb.mxu0 %v4345_v24  ;;  %v256_v28 = vshrl.u32 %v4293_v6, 16  ;;  %v260_v29 = vshll.u32 %v4294_v26, 16  ;;  %v826_v31 = vshll.u32 %v4314_v27, 16  ;;  %v35_v42 = vld [vmem:[%s6620_s2 + $0x70] sm:$0xff] }
  0x18   :  { %1387 = vperm.xlu0 %4579, %v27_v7   ;;  %v808_v0 = vor.u32 %v806_v60, %v804_v49  ;;  %v4313_v7 = vld [vmem:[%s6619_s0 + $0x48] sm:$0xff]  ;;  %v4859_v45 = vld [vmem:[%s6619_s0 + $0x50] sm:$0xff] }
  0x19   :  { %v818_v11 = vshll.u32 %v4313_v7, 16  ;;  %v1110_v17 = vrot.slane %v4313_v7, 1  ;;  %v822_v30 = vshrl.u32 %v4313_v7, 16  ;;  %v40_v7 = vld [vmem:[%s6620_s2 + $0x98] sm:$0xff]  ;;  %v272_v18 = vshrl.u32 %v4859_v45, 16 }
  0x1a   :  { %3798 = vmatmul.msk.bf16.gmra.mxu1 %vm340_vm0, %v4648_v10  ;;  %v216_v10 = vshrl.u32 %v4288_v55, 16 }
  0x1b   :  { %v820_v16 = vrot.slane %v818_v11, 1  ;;  %v4889_v11 = vld [vmem:[%s6619_s0 + $0x58] sm:$0xff] }
  0x1c   :  { %3773 = vmatmul.msk.bf16.gmra.mxu0 %vm340_vm0, %v207_v52  ;;  %v218_v14 = vor.u32 %v216_v10, %v214_v62  ;;  %v805_v52 = vsel %vm187_vm1, %v800_v48, %v804_v49 }
  0x1d   :  { %3891 = vmatmul.msk.bf16.gmra.mxu2 %vm340_vm0, %v773_v53  ;;  %3920 = vmatmul.msk.bf16.gmra.mxu3 %vm340_vm0, %v1099_v54  ;;  %v1107_v53 = vsel %vm1094_vm2, %v1104_v34, %v1106_v50  ;;  %v4292_v54 = vld [vmem:[%s6619_s0 + $0x38] sm:$0xff]  ;;  %v262_v34 = vrot.slane %v260_v29, 1 }
  0x1e   :  { %1392 = vperm.xlu1 %4580, %v28_v9   ;;  %v223_v19 = vsel %vm187_vm1, %v218_v14, %v222_v15  ;;  %1397 = vperm.xlu2 %4581, %v29_v41   ;;  %v244_v59 = vshll.u32 %v4292_v54, 16  ;;  %v248_v8 = vshrl.u32 %v4292_v54, 16  ;;  %v252_v9 = vshll.u32 %v4293_v6, 16 }
  0x20   :  { %1402 = vperm.xlu0 %4579, %v30_v25   ;;  %v246_v63 = vrot.slane %v244_v59, 1  ;;  %v254_v14 = vrot.slane %v252_v9, 1  ;;  %v4343_v25 = vld [vmem:[%s6618_s1] sm:$0xff] }
  0x21   :  { %2155 = vmatpush.bf16.msrb.mxu1 %v4343_v25 }
  0x22   :  { %v250_v13 = vor.u32 %v248_v8, %v246_v63  ;;  %v258_v33 = vor.u32 %v256_v28, %v254_v14 }
  0x26   :  { %1407 = vperm.xlu1 %4580, %v31_v40   ;;  %1412 = vperm.xlu2 %4581, %v32_v12   ;;  %v263_v40 = vsel %vm187_vm1, %v258_v33, %v262_v34  ;;  %v4894_v12 = vld [vmem:[%s6619_s0 + $0x60] sm:$0xff] }
  0x27   :  { %v1116_v29 = vrot.slane %v4894_v12, 1 }
  0x28   :  { %1417 = vperm.xlu0 %4579, %v33_v56   ;;  %v39_v56 = vld [vmem:[%s6620_s2 + $0x90] sm:$0xff] }
  0x2a   :  { %3799 = vmatmul.msk.bf16.gmra.mxu1 %vm340_vm0, %v4287_v38  ;;  %v4291_v38 = vld [vmem:[%s6619_s0 + $0x30] sm:$0xff] }
  0x2b   :  { %v236_v43 = vshll.u32 %v4291_v38, 16  ;;  %v240_v58 = vshrl.u32 %v4291_v38, 16 }
  0x2c   :  { %3774 = vmatmul.msk.bf16.gmra.mxu0 %vm340_vm0, %v215_v2 }
  0x2d   :  { %3892 = vmatmul.msk.bf16.gmra.mxu2 %vm340_vm0, %v781_v3  ;;  %3921 = vmatmul.msk.bf16.gmra.mxu3 %vm340_vm0, %v1101_v4  ;;  %v238_v47 = vrot.slane %v236_v43, 1 }
  0x2e   :  { %1422 = vperm.xlu1 %4580, %v34_v57   ;;  %1427 = vperm.xlu2 %4581, %v35_v42   ;;  %v4927_v42 = vld [vmem:[%s6619_s0 + $0x68] sm:$0xff] }
  0x2f   :  { %v239_v51 = vsel %vm187_vm1, %v234_v46, %v238_v47  ;;  %v242_v62 = vor.u32 %v240_v58, %v238_v47  ;;  %v4864_v46 = vld [vmem:[%s6619_s0 + $0x58] sm:$0xff] }
  0x31   :  { %v247_v3 = vsel %vm187_vm1, %v242_v62, %v246_v63  ;;  %v1114_v63 = vrot.slane %v4864_v46, 1 }
  0x36   :  { %1437 = vperm.xlu1 %4580, %v37_v32  }
  0x3a   :  { %3800 = vmatmul.msk.bf16.gmra.mxu1 %vm340_vm0, %v4288_v55  ;;  %v4312_v55 = vld [vmem:[%s6619_s0 + $0x40] sm:$0xff] }
  0x3b   :  { %v810_v61 = vshll.u32 %v4312_v55, 16  ;;  %v1108_v2 = vrot.slane %v4312_v55, 1  ;;  %v814_v10 = vshrl.u32 %v4312_v55, 16  ;;  %v834_v55 = vshll.u32 %v4864_v46, 16 }
  0x3c   :  { %3775 = vmatmul.msk.bf16.gmra.mxu0 %vm340_vm0, %v223_v19  ;;  %v4365_v19 = vld [vmem:[%s6618_s1 + $0x30] sm:$0xff] }
  0x3d   :  { %3893 = vmatmul.msk.bf16.gmra.mxu2 %vm340_vm0, %v789_v20  ;;  %3922 = vmatmul.msk.bf16.gmra.mxu3 %vm340_vm0, %v1103_v21  ;;  %v812_v1 = vrot.slane %v810_v61, 1  ;;  %v255_v20 = vsel %vm187_vm1, %v250_v13, %v254_v14  ;;  %v1111_v23 = vsel %vm1094_vm2, %v1108_v2, %v1110_v17  ;;  %v836_v62 = vrot.slane %v834_v55, 1 }
  0x3e   :  { %2813 = vmatpush.bf16.msrb.mxu3 %v4365_v19  ;;  %1452 = vperm.xlu1 %4580, %v40_v7   ;;  %v276_v19 = vshll.u32 %v4889_v11, 16 }
  0x3f   :  { %v813_v4 = vsel %vm187_vm1, %v808_v0, %v812_v1  ;;  %v816_v15 = vor.u32 %v814_v10, %v812_v1 }
  0x41   :  { %v821_v21 = vsel %vm187_vm1, %v816_v15, %v820_v16 }
  0x4a   :  { %3801 = vmatmul.msk.bf16.gmra.mxu1 %vm340_vm0, %v4289_v5  ;;  %v1109_v5 = vsel %vm1094_vm2, %v1106_v50, %v1108_v2 }
  0x4c   :  { %3776 = vmatmul.msk.bf16.gmra.mxu0 %vm340_vm0, %v231_v35  ;;  %v824_v35 = vor.u32 %v822_v30, %v820_v16 }
  0x4d   :  { %3894 = vmatmul.msk.bf16.gmra.mxu2 %vm340_vm0, %v797_v36  ;;  %3923 = vmatmul.msk.bf16.gmra.mxu3 %vm340_vm0, %v1105_v37  ;;  %v828_v36 = vrot.slane %v826_v31, 1  ;;  %v1112_v37 = vrot.slane %v4314_v27, 1 }
  0x4f   :  { %v829_v41 = vsel %vm187_vm1, %v824_v35, %v828_v36  ;;  %v1113_v44 = vsel %vm1094_vm2, %v1110_v17, %v1112_v37  ;;  %v1115_v10 = vsel %vm1094_vm2, %v1112_v37, %v1114_v63  ;;  %v42_v37 = vld [vmem:[%s6620_s2 + $0xa8] sm:$0xff] }
  0x5a   :  { %3802 = vmatmul.msk.bf16.gmra.mxu1 %vm340_vm0, %v4290_v22  ;;  %v36_v22 = vld [vmem:[%s6620_s2 + $0x78] sm:$0xff] }
  0x5b   :  { %1432 = vperm.xlu0 %4579, %v36_v22   ;;  %v38_v22 = vld [vmem:[%s6620_s2 + $0x88] sm:$0xff] }
  0x5c   :  { %3777 = vmatmul.msk.bf16.gmra.mxu0 %vm340_vm0, %v239_v51  ;;  %1442 = vperm.xlu2 %4581, %v38_v22  }
  0x5d   :  { %3895 = vmatmul.msk.bf16.gmra.mxu2 %vm340_vm0, %v805_v52  ;;  %3924 = vmatmul.msk.bf16.gmra.mxu3 %vm340_vm0, %v1107_v53  ;;  %v264_v52 = vshrl.u32 %v4294_v26, 16  ;;  %v268_v53 = vshll.u32 %v4859_v45, 16 }
  0x5f   :  { %v266_v59 = vor.u32 %v264_v52, %v262_v34  ;;  %v270_v60 = vrot.slane %v268_v53, 1  ;;  %v43_v52 = vld [vmem:[%s6620_s2 + $0xb0] sm:$0xff] }
  0x60   :  { %1467 = vperm.xlu1 %4580, %v43_v52   ;;  %v44_v52 = vld [vmem:[%s6620_s2 + $0xb8] sm:$0xff] }
  0x61   :  { %v274_v25 = vor.u32 %v272_v18, %v270_v60  ;;  %v854_v18 = vshrl.u32 %v4927_v42, 16 }
  0x63   :  { %1447 = vperm.xlu0 %4579, %v39_v56  }
  0x6a   :  { %3803 = vmatmul.msk.bf16.gmra.mxu1 %vm340_vm0, %v4291_v38 }
  0x6b   :  { %1462 = vperm.xlu0 %4579, %v42_v37  }
  0x6c   :  { %3778 = vmatmul.msk.bf16.gmra.mxu0 %vm340_vm0, %v247_v3 }
  0x6d   :  { %3896 = vmatmul.msk.bf16.gmra.mxu2 %vm340_vm0, %v813_v4  ;;  %3925 = vmatmul.msk.bf16.gmra.mxu3 %vm340_vm0, %v1109_v5  ;;  %v271_v5 = vsel %vm187_vm1, %v266_v59, %v270_v60  ;;  %v1118_v60 = vrot.slane %v4927_v42, 1 }
  0x6f   :  { %v1119_v7 = vsel %vm1094_vm2, %v1116_v29, %v1118_v60 }
  0x7a   :  { %3804 = vmatmul.msk.bf16.gmra.mxu1 %vm340_vm0, %v4292_v54  ;;  %v830_v54 = vshrl.u32 %v4314_v27, 16 }
  0x7c   :  { %3779 = vmatmul.msk.bf16.gmra.mxu0 %vm340_vm0, %v255_v20  ;;  %v832_v61 = vor.u32 %v830_v54, %v828_v36  ;;  %v838_v20 = vshrl.u32 %v4864_v46, 16 }
  0x7d   :  { %3897 = vmatmul.msk.bf16.gmra.mxu2 %vm340_vm0, %v821_v21  ;;  %3926 = vmatmul.msk.bf16.gmra.mxu3 %vm340_vm0, %v1111_v23  ;;  %v842_v21 = vshll.u32 %v4894_v12, 16 }
  0x7e   :  { %v840_v27 = vor.u32 %v838_v20, %v836_v62  ;;  %v45_v20 = vld [vmem:[%s6620_s2 + $0xc0] sm:$0xff] }
  0x7f   :  { %v844_v28 = vrot.slane %v842_v21, 1  ;;  %1477 = vperm.xlu0 %4579, %v45_v20  }
  0x81   :  { %v845_v36 = vsel %vm187_vm1, %v840_v27, %v844_v28 }
  0x87   :  { %v541_v38 = vpop.f32.mrf.mxu1 }
  0x89   :  { %v401_v39 = vpop.f32.mrf.mxu0 }
  0x8a   :  { %v542_v43 = vadd.f32 %v541_v38, %v401_v39  ;;  %3805 = vmatmul.msk.bf16.gmra.mxu1 %vm340_vm0, %v4293_v6  ;;  %v837_v6 = vsel %vm187_vm1, %v832_v61, %v836_v62 }
  0x8c   :  { %3780 = vmatmul.msk.bf16.gmra.mxu0 %vm340_vm0, %v263_v40  ;;  %v1117_v40 = vsel %vm1094_vm2, %v1114_v63, %v1116_v29 }
  0x8d   :  { %3898 = vmatmul.msk.bf16.gmra.mxu2 %vm340_vm0, %v829_v41  ;;  %3927 = vmatmul.msk.bf16.gmra.mxu3 %vm340_vm0, %v1113_v44  ;;  %v4922_v41 = vld [vmem:[%s6619_s0 + $0x60] sm:$0xff] }
  0x8f   :  { %v543_v48 = vpop.f32.mrf.mxu1 }
  0x90   :  { %v966_v47 = vpop.f32.mrf.mxu2  ;;  %v1202_v50 = vpop.f32.mrf.mxu3 }
  0x91   :  { %v1051_v49 = vadd.f32 %v966_v47, %v542_v43  ;;  %v403_v51 = vpop.f32.mrf.mxu0 }
  0x92   :  { %v544_v58 = vadd.f32 %v543_v48, %v403_v51  ;;  %v280_v48 = vshrl.u32 %v4889_v11, 16  ;;  %v850_v51 = vshll.u32 %v4927_v42, 16  ;;  %v4988_v42 = vld [vmem:[%s6619_s0 + $0x70] sm:$0xff] }
  0x93   :  { %v4871_v57 = vadd.f32 %v1202_v50, %v1051_v49  ;;  %v284_v49 = vshll.u32 %v4922_v41, 16  ;;  %v846_v50 = vshrl.u32 %v4894_v12, 16 }
  0x94   :  { %v852_v59 = vrot.slane %v850_v51, 1 }
  0x95   :  { %6707 = vst [vmem:[#allocation3_spill] sm:$0xff] %v4871_v57  ;;  %v286_v56 = vrot.slane %v284_v49, 1  ;;  %v300_v49 = vshll.u32 %v4988_v42, 16 }
  0x97   :  { %v546_v1 = vpop.f32.mrf.mxu1 }
  0x98   :  { %v968_v0 = vpop.f32.mrf.mxu2  ;;  %v1204_v3 = vpop.f32.mrf.mxu3 }
  0x99   :  { %v1052_v2 = vadd.f32 %v968_v0, %v544_v58  ;;  %v406_v4 = vpop.f32.mrf.mxu0  ;;  %v848_v58 = vor.u32 %v846_v50, %v844_v28 }
  0x9a   :  { %v547_v9 = vadd.f32 %v546_v1, %v406_v4  ;;  %3806 = vmatmul.msk.bf16.gmra.mxu1 %vm340_vm0, %v4294_v26  ;;  %v278_v26 = vrot.slane %v276_v19, 1  ;;  %v41_v4 = vld [vmem:[%s6620_s2 + $0xa0] sm:$0xff] }
  0x9b   :  { %v4879_v8 = vadd.f32 %v1204_v3, %v1052_v2  ;;  %v853_v3 = vsel %vm187_vm1, %v848_v58, %v852_v59  ;;  %1457 = vperm.xlu2 %4581, %v41_v4   ;;  %v302_v58 = vrot.slane %v300_v49, 1 }
  0x9c   :  { %3781 = vmatmul.msk.bf16.gmra.mxu0 %vm340_vm0, %v271_v5  ;;  %v279_v35 = vsel %vm187_vm1, %v274_v25, %v278_v26  ;;  %v282_v55 = vor.u32 %v280_v48, %v278_v26  ;;  %v856_v26 = vor.u32 %v854_v18, %v852_v59  ;;  %v304_v18 = vshrl.u32 %v4988_v42, 16 }
  0x9d   :  { %6708 = vst [vmem:[#allocation4_spill] sm:$0xff] %v4879_v8  ;;  %3899 = vmatmul.msk.bf16.gmra.mxu2 %vm340_vm0, %v837_v6  ;;  %3928 = vmatmul.msk.bf16.gmra.mxu3 %vm340_vm0, %v1115_v10  ;;  %v4960_v10 = vld [vmem:[%s6619_s0 + $0x70] sm:$0xff] }
  0x9e   :  { %v287_v2 = vsel %vm187_vm1, %v282_v55, %v286_v56  ;;  %v858_v19 = vshll.u32 %v4960_v10, 16  ;;  %v1120_v28 = vrot.slane %v4960_v10, 1  ;;  %v862_v50 = vshrl.u32 %v4960_v10, 16 }
  0x9f   :  { %v548_v14 = vpop.f32.mrf.mxu1 }
  0xa0   :  { %v971_v13 = vpop.f32.mrf.mxu2  ;;  %v1207_v16 = vpop.f32.mrf.mxu3  ;;  %v860_v27 = vrot.slane %v858_v19, 1 }
  0xa1   :  { %v1053_v15 = vadd.f32 %v971_v13, %v547_v9  ;;  %v408_v17 = vpop.f32.mrf.mxu0  ;;  %v4955_v9 = vld [vmem:[%s6619_s0 + $0x68] sm:$0xff] }
  0xa2   :  { %v549_v24 = vadd.f32 %v548_v14, %v408_v17  ;;  %v292_v17 = vshll.u32 %v4955_v9, 16  ;;  %v296_v48 = vshrl.u32 %v4955_v9, 16  ;;  %v864_v59 = vor.u32 %v862_v50, %v860_v27 }
  0xa3   :  { %v4903_v23 = vadd.f32 %v1207_v16, %v1053_v15  ;;  %v288_v16 = vshrl.u32 %v4922_v41, 16  ;;  %1472 = vperm.xlu2 %4581, %v44_v52  }
  0xa4   :  { %v294_v25 = vrot.slane %v292_v17, 1 }
  0xa5   :  { %6709 = vst [vmem:[#allocation5_spill] sm:$0xff] %v4903_v23 }
  0xa7   :  { %v551_v31 = vpop.f32.mrf.mxu1 }
  0xa8   :  { %v973_v30 = vpop.f32.mrf.mxu2  ;;  %v1209_v33 = vpop.f32.mrf.mxu3 }
  0xa9   :  { %v1054_v32 = vadd.f32 %v973_v30, %v549_v24  ;;  %v411_v34 = vpop.f32.mrf.mxu0  ;;  %v290_v24 = vor.u32 %v288_v16, %v286_v56  ;;  %v298_v56 = vor.u32 %v296_v48, %v294_v25 }
  0xaa   :  { %v552_v39 = vadd.f32 %v551_v31, %v411_v34  ;;  %3807 = vmatmul.msk.bf16.gmra.mxu1 %vm340_vm0, %v4859_v45 }
  0xab   :  { %v4911_v38 = vadd.f32 %v1209_v33, %v1054_v32  ;;  %v295_v34 = vsel %vm187_vm1, %v290_v24, %v294_v25  ;;  %v49_v24 = vld [vmem:[%s6620_s2 + $0xe0] sm:$0xff] }
  0xac   :  { %3782 = vmatmul.msk.bf16.gmra.mxu0 %vm340_vm0, %v279_v35  ;;  %v861_v35 = vsel %vm187_vm1, %v856_v26, %v860_v27  ;;  %v306_v27 = vor.u32 %v304_v18, %v302_v58  ;;  %v52_v18 = vld [vmem:[%s6620_s2 + $0xf8] sm:$0xff] }
  0xad   :  { %6710 = vst [vmem:[#allocation6_spill] sm:$0xff] %v4911_v38  ;;  %3900 = vmatmul.msk.bf16.gmra.mxu2 %vm340_vm0, %v845_v36  ;;  %3929 = vmatmul.msk.bf16.gmra.mxu3 %vm340_vm0, %v1117_v40  ;;  %v46_v36 = vld [vmem:[%s6620_s2 + $0xc8] sm:$0xff]  ;;  %v1121_v40 = vsel %vm1094_vm2, %v1118_v60, %v1120_v28 }
  0xae   :  { %1482 = vperm.xlu1 %4580, %v46_v36  }
  0xaf   :  { %v553_v44 = vpop.f32.mrf.mxu1 }
  0xb0   :  { %v976_v43 = vpop.f32.mrf.mxu2  ;;  %v1212_v46 = vpop.f32.mrf.mxu3 }
  0xb1   :  { %v1055_v45 = vadd.f32 %v976_v43, %v552_v39  ;;  %v413_v47 = vpop.f32.mrf.mxu0  ;;  %v4993_v43 = vld [vmem:[%s6619_s0 + $0x78] sm:$0xff] }
  0xb2   :  { %v554_v54 = vadd.f32 %v553_v44, %v413_v47  ;;  %v866_v51 = vshll.u32 %v4993_v43, 16  ;;  %v870_v20 = vshrl.u32 %v4993_v43, 16 }
  0xb3   :  { %v4936_v53 = vadd.f32 %v1212_v46, %v1055_v45 }
  0xb4   :  { %v868_v60 = vrot.slane %v866_v51, 1 }
  0xb5   :  { %6711 = vst [vmem:[#allocation7_spill] sm:$0xff] %v4936_v53 }
  0xb6   :  { %v869_v4 = vsel %vm187_vm1, %v864_v59, %v868_v60  ;;  %1497 = vperm.xlu1 %4580, %v49_v24   ;;  %v51_v59 = vld [vmem:[%s6620_s2 + $0xf0] sm:$0xff] }
  0xb7   :  { %v556_v62 = vpop.f32.mrf.mxu1 }
  0xb8   :  { %v978_v61 = vpop.f32.mrf.mxu2  ;;  %v1214_v0 = vpop.f32.mrf.mxu3 }
  0xb9   :  { %v1056_v63 = vadd.f32 %v978_v61, %v554_v54  ;;  %v416_v1 = vpop.f32.mrf.mxu0  ;;  %v1122_v61 = vrot.slane %v4993_v43, 1  ;;  %v47_v43 = vld [vmem:[%s6620_s2 + $0xd0] sm:$0xff] }
  0xba   :  { %v557_v6 = vadd.f32 %v556_v62, %v416_v1  ;;  %3808 = vmatmul.msk.bf16.gmra.mxu1 %vm340_vm0, %v4889_v11  ;;  %1487 = vperm.xlu2 %4581, %v47_v43   ;;  %v4584_v43 = vld [vmem:[%s6619_s0 + $0xa4] sm:$0xf0] }
  0xbb   :  { %v4944_v5 = vadd.f32 %v1214_v0, %v1056_v63 }
  0xbc   :  { %3783 = vmatmul.msk.bf16.gmra.mxu0 %vm340_vm0, %v287_v2 }
  0xbd   :  { %6712 = vst [vmem:[#allocation8_spill] sm:$0xff] %v4944_v5  ;;  %3901 = vmatmul.msk.bf16.gmra.mxu2 %vm340_vm0, %v853_v3  ;;  %3930 = vmatmul.msk.bf16.gmra.mxu3 %vm340_vm0, %v1119_v7  ;;  %v303_v3 = vsel %vm187_vm1, %v298_v56, %v302_v58 }
  0xbe   :  { %1512 = vperm.xlu1 %4580, %v52_v18  }
  0xbf   :  { %v558_v12 = vpop.f32.mrf.mxu1 }
  0xc0   :  { %v981_v11 = vpop.f32.mrf.mxu2  ;;  %v1217_v14 = vpop.f32.mrf.mxu3 }
  0xc1   :  { %v1057_v13 = vadd.f32 %v981_v11, %v557_v6  ;;  %v418_v15 = vpop.f32.mrf.mxu0  ;;  %v48_v6 = vld [vmem:[%s6620_s2 + $0xd8] sm:$0xff]  ;;  %v1123_v11 = vsel %vm1094_vm2, %v1120_v28, %v1122_v61 }
  0xc2   :  { %v559_v22 = vadd.f32 %v558_v12, %v418_v15  ;;  %1492 = vperm.xlu0 %4579, %v48_v6   ;;  %v5021_v12 = vld [vmem:[%s6619_s0 + $0x78] sm:$0xff] }
  0xc3   :  { %v4969_v21 = vadd.f32 %v1217_v14, %v1057_v13  ;;  %v5026_v13 = vld [vmem:[%s6619_s0 + $0x80] sm:$0xff]  ;;  %v308_v19 = vshll.u32 %v5021_v12, 16  ;;  %v312_v52 = vshrl.u32 %v5021_v12, 16 }
  0xc4   :  { %v878_v56 = vshrl.u32 %v5026_v13, 16 }
  0xc5   :  { %6713 = vst [vmem:[#allocation9_spill] sm:$0xff] %v4969_v21  ;;  %v310_v28 = vrot.slane %v308_v19, 1 }
  0xc7   :  { %v561_v30 = vpop.f32.mrf.mxu1 }
  0xc8   :  { %v983_v29 = vpop.f32.mrf.mxu2  ;;  %v1219_v32 = vpop.f32.mrf.mxu3 }
  0xc9   :  { %v1058_v31 = vadd.f32 %v983_v29, %v559_v22  ;;  %v421_v33 = vpop.f32.mrf.mxu0  ;;  %v874_v22 = vshll.u32 %v5026_v13, 16  ;;  %v872_v29 = vor.u32 %v870_v20, %v868_v60 }
  0xca   :  { %v562_v39 = vadd.f32 %v561_v30, %v421_v33  ;;  %3809 = vmatmul.msk.bf16.gmra.mxu1 %vm340_vm0, %v4922_v41  ;;  %1507 = vperm.xlu0 %4579, %v51_v59  }
  0xcb   :  { %v4977_v37 = vadd.f32 %v1219_v32, %v1058_v31  ;;  %v876_v30 = vrot.slane %v874_v22, 1  ;;  %v1124_v31 = vrot.slane %v5026_v13, 1 }
  0xcc   :  { %3784 = vmatmul.msk.bf16.gmra.mxu0 %vm340_vm0, %v295_v34 }
  0xcd   :  { %6714 = vst [vmem:[#allocation10_spill] sm:$0xff] %v4977_v37  ;;  %3902 = vmatmul.msk.bf16.gmra.mxu2 %vm340_vm0, %v861_v35  ;;  %3931 = vmatmul.msk.bf16.gmra.mxu3 %vm340_vm0, %v1121_v40  ;;  %v877_v40 = vsel %vm187_vm1, %v872_v29, %v876_v30 }
  0xcf   :  { %v563_v44 = vpop.f32.mrf.mxu1 }
  0xd0   :  { %v986_v41 = vpop.f32.mrf.mxu2  ;;  %v1222_v46 = vpop.f32.mrf.mxu3 }
  0xd1   :  { %v1059_v45 = vadd.f32 %v986_v41, %v562_v39  ;;  %v423_v47 = vpop.f32.mrf.mxu0  ;;  %v311_v39 = vsel %vm187_vm1, %v306_v27, %v310_v28 }
  0xd2   :  { %v564_v55 = vadd.f32 %v563_v44, %v423_v47  ;;  %v5059_v47 = vld [vmem:[%s6619_s0 + $0x88] sm:$0xff] }
  0xd3   :  { %v5002_v54 = vadd.f32 %v1222_v46, %v1059_v45  ;;  %v1125_v45 = vsel %vm1094_vm2, %v1122_v61, %v1124_v31  ;;  %v5054_v46 = vld [vmem:[%s6619_s0 + $0x80] sm:$0xff]  ;;  %v882_v58 = vshll.u32 %v5059_v47, 16 }
  0xd5   :  { %6715 = vst [vmem:[#allocation11_spill] sm:$0xff] %v5002_v54 }
  0xd7   :  { %v566_v63 = vpop.f32.mrf.mxu1 }
  0xd8   :  { %v988_v62 = vpop.f32.mrf.mxu2  ;;  %v1224_v1 = vpop.f32.mrf.mxu3 }
  0xd9   :  { %v1060_v0 = vadd.f32 %v988_v62, %v564_v55  ;;  %v426_v2 = vpop.f32.mrf.mxu0  ;;  %v316_v55 = vshll.u32 %v5054_v46, 16  ;;  %v314_v62 = vor.u32 %v312_v52, %v310_v28 }
  0xda   :  { %v567_v10 = vadd.f32 %v566_v63, %v426_v2  ;;  %3810 = vmatmul.msk.bf16.gmra.mxu1 %vm340_vm0, %v4955_v9  ;;  %v93_v2 = vld [vmem:[%s6619_s0 + $0x88] sm:$0x1] }
  0xdb   :  { %v5010_v7 = vadd.f32 %v1224_v1, %v1060_v0  ;;  %v318_v63 = vrot.slane %v316_v55, 1  ;;  %v880_v0 = vor.u32 %v878_v56, %v876_v30  ;;  %v884_v1 = vrot.slane %v882_v58, 1  ;;  %v4326_v55 = vld [vmem:[%s6619_s0 + $0x9c] sm:$0xff] }
  0xdc   :  { %3785 = vmatmul.msk.bf16.gmra.mxu0 %vm340_vm0, %v303_v3  ;;  %v1126_v3 = vrot.slane %v5059_v47, 1 }
  0xdd   :  { %6716 = vst [vmem:[#allocation12_spill] sm:$0xff] %v5010_v7  ;;  %3903 = vmatmul.msk.bf16.gmra.mxu2 %vm340_vm0, %v869_v4  ;;  %3932 = vmatmul.msk.bf16.gmra.mxu3 %vm340_vm0, %v1123_v11  ;;  %v660_v4 = vld [vmem:[%s6619_s0 + $0x90] sm:$0x1] }
  0xde   :  { %v1127_v22 = vsel %vm1094_vm2, %v1124_v31, %v1126_v3 }
  0xdf   :  { %v568_v14 = vpop.f32.mrf.mxu1 }
  0xe0   :  { %v991_v9 = vpop.f32.mrf.mxu2  ;;  %v1227_v16 = vpop.f32.mrf.mxu3 }
  0xe1   :  { %v1061_v15 = vadd.f32 %v991_v9, %v567_v10  ;;  %v428_v17 = vpop.f32.mrf.mxu0  ;;  %v168_v9 = vunpack.c.l.b16 %v93_v2  ;;  %v1808_v2 = vshll.u32 %v4326_v55, 16 }
  0xe2   :  { %v569_v26 = vadd.f32 %v568_v14, %v428_v17  ;;  %v735_v17 = vunpack.c.l.b16 %v660_v4  ;;  %v5125_v4 = vld [vmem:[%s6619_s0 + $0xa4] sm:$0xff] }
  0xe3   :  { %v5035_v25 = vadd.f32 %v1227_v16, %v1061_v15  ;;  %v319_v15 = vsel %vm187_vm1, %v314_v62, %v318_v63  ;;  %v885_v16 = vsel %vm187_vm1, %v880_v0, %v884_v1  ;;  %v186_v24 = vpack.c.b16 %v168_v9, %v168_v9 }
  0xe4   :  { %v1806_v9 = vshrl.u32 %v4326_v55, 16 }
  0xe5   :  { %6717 = vst [vmem:[#allocation13_spill] sm:$0xff] %v5035_v25 }
  0xe7   :  { %v571_v33 = vpop.f32.mrf.mxu1 }
  0xe8   :  { %v993_v32 = vpop.f32.mrf.mxu2  ;;  %v1229_v35 = vpop.f32.mrf.mxu3 }
  0xe9   :  { %v1062_v34 = vadd.f32 %v993_v32, %v569_v26  ;;  %v431_v36 = vpop.f32.mrf.mxu0  ;;  %v753_v26 = vpack.c.b16 %v735_v17, %v735_v17  ;;  %v320_v32 = vshrl.u32 %v5054_v46, 16 }
  0xea   :  { %v572_v44 = vadd.f32 %v571_v33, %v431_v36  ;;  %3811 = vmatmul.msk.bf16.gmra.mxu1 %vm340_vm0, %v4988_v42  ;;  %v324_v33 = vshll.u32 %v186_v24, 16 }
  0xeb   :  { %v5043_v41 = vadd.f32 %v1229_v35, %v1062_v34  ;;  %v890_v31 = vshll.u32 %v753_v26, 16  ;;  %v50_v35 = vld [vmem:[%s6620_s2 + $0xe8] sm:$0xff] }
  0xec   :  { %3786 = vmatmul.msk.bf16.gmra.mxu0 %vm340_vm0, %v311_v39  ;;  %1502 = vperm.xlu2 %4581, %v50_v35  }
  0xed   :  { %6718 = vst [vmem:[#allocation14_spill] sm:$0xff] %v5043_v41  ;;  %3904 = vmatmul.msk.bf16.gmra.mxu2 %vm340_vm0, %v877_v40  ;;  %3933 = vmatmul.msk.bf16.gmra.mxu3 %vm340_vm0, %v1125_v45  ;;  %v4093_v40 = vld [vmem:[%s6619_s0 + $0xa4] sm:$0xff]   ;;  %v326_v45 = vrot.slane %v324_v33, 1 }
  0xee   :  { %v2370_v17 = vshrl.u32 %v4093_v40, 16 }
  0xef   :  { %v573_v48 = vpop.f32.mrf.mxu1 }
  0xf0   :  { %v996_v42 = vpop.f32.mrf.mxu2  ;;  %v1232_v50 = vpop.f32.mrf.mxu3 }
  0xf1   :  { %v1063_v49 = vadd.f32 %v996_v42, %v572_v44  ;;  %v433_v51 = vpop.f32.mrf.mxu0  ;;  %v322_v44 = vor.u32 %v320_v32, %v318_v63  ;;  %v892_v42 = vrot.slane %v890_v31, 1 }
  0xf2   :  { %v574_v61 = vadd.f32 %v573_v48, %v433_v51  ;;  %v1128_v48 = vrot.slane %v753_v26, 1 }
  0xf3   :  { %v5068_v60 = vadd.f32 %v1232_v50, %v1063_v49  ;;  %v327_v58 = vsel %vm187_vm1, %v322_v44, %v326_v45 }
  0xf4   :  { %v1129_v0 = vsel %vm1094_vm2, %v1126_v3, %v1128_v48  ;;  %v2372_v3 = vshll.u32 %v4093_v40, 16  ;;  %v4328_v48 = vld [vmem:[%s6619_s0 + $0xac] sm:$0xff] }
  0xf5   :  { %6719 = vst [vmem:[#allocation15_spill] sm:$0xff] %v5068_v60 }
  0xf6   :  { %v2374_v18 = vrot.slane %v2372_v3, 1 }
  0xf7   :  { %v576_v10 = vpop.f32.mrf.mxu1 }
  0xf8   :  { %v998_v6 = vpop.f32.mrf.mxu2  ;;  %v1234_v13 = vpop.f32.mrf.mxu3 }
  0xf9   :  { %v1064_v11 = vadd.f32 %v998_v6, %v574_v61  ;;  %v436_v14 = vpop.f32.mrf.mxu0  ;;  %v54_v61 = vld [vmem:[%s6620_s2 + $0x108] sm:$0xff] }
  0xfa   :  { %v577_v20 = vadd.f32 %v576_v10, %v436_v14  ;;  %3812 = vmatmul.msk.bf16.gmra.mxu1 %vm340_vm0, %v5021_v12  ;;  %v886_v12 = vshrl.u32 %v5059_v47, 16  ;;  %1522 = vperm.xlu0 %4579, %v54_v61   ;;  %v1810_v14 = vrot.slane %v1808_v2, 1 }
  0xfb   :  { %v5082_v19 = vadd.f32 %v1234_v13, %v1064_v11 }
  0xfc   :  { %3787 = vmatmul.msk.bf16.gmra.mxu0 %vm340_vm0, %v319_v15  ;;  %v888_v47 = vor.u32 %v886_v12, %v884_v1  ;;  %v4585_v1 = vld [vmem:[%s6619_s0 + $0xa4] sm:$0xe] }
  0xfd   :  { %6720 = vst [vmem:[#allocation16_spill] sm:$0xff] %v5082_v19  ;;  %3905 = vmatmul.msk.bf16.gmra.mxu2 %vm340_vm0, %v885_v16  ;;  %3934 = vmatmul.msk.bf16.gmra.mxu3 %vm340_vm0, %v1127_v22  ;;  %v1813_v16 = vshll.u32 %v5125_v4, 16  ;;  %v4586_v26 = vor.u32 %v4585_v1, %v4584_v43  ;;  %v53_v43 = vld [vmem:[%s6620_s2 + $0x100] sm:$0xff] }
  0xfe   :  { %v893_v59 = vsel %vm187_vm1, %v888_v47, %v892_v42  ;;  %1517 = vperm.xlu2 %4581, %v53_v43  }
  0xff   :  { %v578_v28 = vpop.f32.mrf.mxu1  ;;  %v2708_v32 = vrot.slane %v4586_v26, 1  ;;  %v4329_v26 = vld [vmem:[%s6619_s0 + $0xb4] sm:$0xff] }
 0x100   :  { %v1001_v27 = vpop.f32.mrf.mxu2  ;;  %v1237_v30 = vpop.f32.mrf.mxu3 }
 0x101   :  { %v1065_v29 = vadd.f32 %v1001_v27, %v577_v20  ;;  %v438_v34 = vpop.f32.mrf.mxu0  ;;  %v1811_v27 = vor.u32 %v1810_v14, %v1806_v9 }
 0x102   :  { %v579_v39 = vadd.f32 %v578_v28, %v438_v34  ;;  %v1815_v28 = vrot.slane %v1813_v16, 1 }
 0x103   :  { %v5095_v36 = vadd.f32 %v1237_v30, %v1065_v29  ;;  %v2375_v29 = vor.u32 %v2374_v18, %v2370_v17 }
 0x104   :  { %v1816_v40 = vsel %vm187_vm1, %v1811_v27, %v1815_v28  ;;  %v4349_v27 = vld [vmem:[%s6619_s0 + $0xbc] sm:$0xff] }
 0x105   :  { %6721 = vst [vmem:[#allocation17_spill] sm:$0xff] %v5095_v36 }
 0x107   :  { %v581_v50 = vpop.f32.mrf.mxu1 }
 0x108   :  { %v1003_v49 = vpop.f32.mrf.mxu2  ;;  %v1239_v52 = vpop.f32.mrf.mxu3 }
 0x109   :  { %v1066_v51 = vadd.f32 %v1003_v49, %v579_v39  ;;  %v441_v56 = vpop.f32.mrf.mxu0  ;;  %v4348_v49 = vld [vmem:[%s6619_s0 + $0xb4] sm:$0xff] }
 0x10a   :  { %v582_v63 = vadd.f32 %v581_v50, %v441_v56  ;;  %3813 = vmatmul.msk.bf16.gmra.mxu1 %vm340_vm0, %v5054_v46  ;;  %v5130_v46 = vld [vmem:[%s6619_s0 + $0xac] sm:$0xff] }
 0x10b   :  { %v5111_v62 = vadd.f32 %v1239_v52, %v1066_v51  ;;  %v2377_v20 = vshll.u32 %v5130_v46, 16  ;;  %v2709_v33 = vrot.slane %v5130_v46, 1  ;;  %v2381_v61 = vshrl.u32 %v5130_v46, 16 }
 0x10c   :  { %3788 = vmatmul.msk.bf16.gmra.mxu0 %vm340_vm0, %v327_v58  ;;  %v1817_v58 = vshrl.u32 %v5125_v4, 16 }
 0x10d   :  { %6722 = vst [vmem:[#allocation18_spill] sm:$0xff] %v5111_v62  ;;  %3906 = vmatmul.msk.bf16.gmra.mxu2 %vm340_vm0, %v893_v59  ;;  %3935 = vmatmul.msk.bf16.gmra.mxu3 %vm340_vm0, %v1129_v0  ;;  %v2379_v30 = vrot.slane %v2377_v20, 1  ;;  %v2710_v42 = vsel %vm1094_vm2, %v2708_v32, %v2709_v33  ;;  %v1821_v59 = vshll.u32 %v4328_v48, 16 }
 0x10e   :  { %v1819_v2 = vor.u32 %v1817_v58, %v1815_v28 }
 0x10f   :  { %v583_v10 = vpop.f32.mrf.mxu1  ;;  %v2380_v44 = vsel %vm187_vm1, %v2375_v29, %v2379_v30  ;;  %v1823_v3 = vrot.slane %v1821_v59, 1 }
 0x110   :  { %v1006_v6 = vpop.f32.mrf.mxu2  ;;  %v1242_v13 = vpop.f32.mrf.mxu3 }
 0x111   :  { %v1067_v11 = vadd.f32 %v1006_v6, %v582_v63  ;;  %v443_v15 = vpop.f32.mrf.mxu0  ;;  %v2385_v63 = vshll.u32 %v4348_v49, 16  ;;  %v2383_v6 = vor.u32 %v2381_v61, %v2379_v30  ;;  %v1824_v17 = vsel %vm187_vm1, %v1819_v2, %v1823_v3  ;;  %v4350_v2 = vld [vmem:[%s6619_s0 + $0xc4] sm:$0xff] }
 0x112   :  { %v584_v24 = vadd.f32 %v583_v10, %v443_v15 }
 0x113   :  { %v5134_v22 = vadd.f32 %v1242_v13, %v1067_v11  ;;  %v2387_v10 = vrot.slane %v2385_v63, 1  ;;  %v2711_v11 = vrot.slane %v4348_v49, 1 }
 0x115   :  { %6723 = vst [vmem:[#allocation19_spill] sm:$0xff] %v5134_v22  ;;  %v2388_v18 = vsel %vm187_vm1, %v2383_v6, %v2387_v10 }
 0x117   :  { %v586_v12 = vpop.f32.mrf.mxu1 }
 0x118   :  { %v1008_v34 = vpop.f32.mrf.mxu2  ;;  %v1244_v35 = vpop.f32.mrf.mxu3 }
 0x119   :  { %v1068_v31 = vadd.f32 %v1008_v34, %v584_v24  ;;  %v446_v39 = vpop.f32.mrf.mxu0  ;;  %v2712_v24 = vsel %vm1094_vm2, %v2709_v33, %v2711_v11  ;;  %v1825_v33 = vshrl.u32 %v4328_v48, 16  ;;  %v1829_v34 = vshll.u32 %v4329_v26, 16 }
 0x11a   :  { %v587_v47 = vadd.f32 %v586_v12, %v446_v39  ;;  %4076 = vmatmul.msk.bf16.vlgmr.msrb.gmra.mxu1 %vm340_vm0, %v4326_v55  ;;  %v2389_v12 = vshrl.u32 %v4348_v49, 16 }
 0x11b   :  { %v5142_v45 = vadd.f32 %v1244_v35, %v1068_v31  ;;  %v2393_v31 = vshll.u32 %v4349_v27, 16 }
 0x11c   :  { %4051 = vmatmul.msk.bf16.vlgmr.msrb.gmra.mxu0 %vm340_vm0, %v1816_v40  ;;  %v1827_v40 = vor.u32 %v1825_v33, %v1823_v3  ;;  %v2391_v43 = vor.u32 %v2389_v12, %v2387_v10 }
 0x11d   :  { %4204 = vmatmul.msk.bf16.vlgmr.msrb.gmra.mxu2 %vm340_vm0, %v2380_v44  ;;  %4234 = vmatmul.msk.bf16.vlgmr.msrb.gmra.mxu3 %vm340_vm0, %v2710_v42  ;;  %v1831_v44 = vrot.slane %v1829_v34, 1  ;;  %v2713_v42 = vrot.slane %v4349_v27, 1 }
 0x11f   :  { %v588_v51 = vpop.f32.mrf.mxu1  ;;  %v1832_v58 = vsel %vm187_vm1, %v1827_v40, %v1831_v44  ;;  %v2714_v63 = vsel %vm1094_vm2, %v2711_v11, %v2713_v42  ;;  %v1833_v11 = vshrl.u32 %v4329_v26, 16 }
 0x120   :  { %v1011_v50 = vpop.f32.mrf.mxu2  ;;  %v1247_v55 = vpop.f32.mrf.mxu3 }
 0x121   :  { %v1069_v52 = vadd.f32 %v1011_v50, %v587_v47  ;;  %v448_v56 = vpop.f32.mrf.mxu0  ;;  %v2395_v47 = vrot.slane %v2393_v31, 1 }
 0x122   :  { %v589_v1 = vadd.f32 %v588_v51, %v448_v56 }
 0x123   :  { %v5157_v0 = vadd.f32 %v1247_v55, %v1069_v52  ;;  %v2396_v59 = vsel %vm187_vm1, %v2391_v43, %v2395_v47  ;;  %v4351_v43 = vld [vmem:[%s6619_s0 + $0xcc] sm:$0xff] }
 0x125   :  { %6724 = vst [vmem:[#allocation20_spill] sm:$0xff] %v5157_v0 }
 0x127   :  { %v591_v9 = vpop.f32.mrf.mxu1 }
 0x128   :  { %v1013_v13 = vpop.f32.mrf.mxu2  ;;  %v1249_v15 = vpop.f32.mrf.mxu3 }
 0x129   :  { %v1070_v14 = vadd.f32 %v1013_v13, %v589_v1  ;;  %v451_v16 = vpop.f32.mrf.mxu0  ;;  %v4330_v1 = vld [vmem:[%s6619_s0 + $0xbc] sm:$0xff] }
 0x12a   :  { %v592_v46 = vadd.f32 %v591_v9, %v451_v16  ;;  %4077 = vmatmul.msk.bf16.gmra.mxu1 %vm340_vm0, %v5125_v4  ;;  %v1837_v9 = vshll.u32 %v4330_v1, 16 }
 0x12b   :  { %v5161_v20 = vadd.f32 %v1249_v15, %v1070_v14  ;;  %v2397_v14 = vshrl.u32 %v4349_v27, 16  ;;  %v2401_v15 = vshll.u32 %v4350_v2, 16 }
 0x12c   :  { %4052 = vmatmul.msk.bf16.gmra.mxu0 %vm340_vm0, %v1824_v17 }
 0x12d   :  { %6725 = vst [vmem:[#allocation21_spill] sm:$0xff] %v5161_v20  ;;  %4205 = vmatmul.msk.bf16.gmra.mxu2 %vm340_vm0, %v2388_v18  ;;  %4235 = vmatmul.msk.bf16.gmra.mxu3 %vm340_vm0, %v2712_v24  ;;  %v1835_v18 = vor.u32 %v1833_v11, %v1831_v44  ;;  %v2399_v24 = vor.u32 %v2397_v14, %v2395_v47  ;;  %v4331_v44 = vld [vmem:[%s6619_s0 + $0xc4] sm:$0xff] }
 0x12f   :  { %v593_v29 = vpop.f32.mrf.mxu1 }
 0x130   :  { %v1016_v28 = vpop.f32.mrf.mxu2  ;;  %v1252_v4 = vpop.f32.mrf.mxu3 }
 0x131   :  { %v1071_v30 = vadd.f32 %v1016_v28, %v592_v46  ;;  %v453_v32 = vpop.f32.mrf.mxu0  ;;  %v1839_v46 = vrot.slane %v1837_v9, 1  ;;  %v2403_v28 = vrot.slane %v2401_v15, 1 }
 0x132   :  { %v594_v39 = vadd.f32 %v593_v29, %v453_v32  ;;  %v2715_v29 = vrot.slane %v4350_v2, 1 }
 0x133   :  { %v5175_v35 = vadd.f32 %v1252_v4, %v1071_v30  ;;  %v1840_v12 = vsel %vm187_vm1, %v1835_v18, %v1839_v46  ;;  %v2404_v31 = vsel %vm187_vm1, %v2399_v24, %v2403_v28 }
 0x134   :  { %v2716_v40 = vsel %vm1094_vm2, %v2713_v42, %v2715_v29  ;;  %v1841_v42 = vshrl.u32 %v4330_v1, 16 }
 0x135   :  { %6726 = vst [vmem:[#allocation22_spill] sm:$0xff] %v5175_v35 }
 0x137   :  { %v596_v51 = vpop.f32.mrf.mxu1 }
 0x138   :  { %v1018_v50 = vpop.f32.mrf.mxu2  ;;  %v1254_v55 = vpop.f32.mrf.mxu3 }
 0x139   :  { %v1072_v52 = vadd.f32 %v1018_v50, %v594_v39  ;;  %v456_v56 = vpop.f32.mrf.mxu0 }
 0x13a   :  { %v597_v49 = vadd.f32 %v596_v51, %v456_v56  ;;  %4078 = vmatmul.msk.bf16.gmra.mxu1 %vm340_vm0, %v4328_v48  ;;  %v2405_v56 = vshrl.u32 %v4350_v2, 16 }
 0x13b   :  { %v5179_v61 = vadd.f32 %v1254_v55, %v1072_v52  ;;  %v1845_v55 = vshll.u32 %v4331_v44, 16 }
 0x13c   :  { %4053 = vmatmul.msk.bf16.gmra.mxu0 %vm340_vm0, %v1832_v58  ;;  %v2409_v58 = vshll.u32 %v4351_v43, 16 }
 0x13d   :  { %6727 = vst [vmem:[#allocation23_spill] sm:$0xff] %v5179_v61  ;;  %4206 = vmatmul.msk.bf16.gmra.mxu2 %vm340_vm0, %v2396_v59  ;;  %4236 = vmatmul.msk.bf16.gmra.mxu3 %vm340_vm0, %v2714_v63  ;;  %v1843_v63 = vor.u32 %v1841_v42, %v1839_v46 }
 0x13f   :  { %v598_v6 = vpop.f32.mrf.mxu1 }
 0x140   :  { %v1021_v3 = vpop.f32.mrf.mxu2  ;;  %v1257_v48 = vpop.f32.mrf.mxu3 }
 0x141   :  { %v1073_v10 = vadd.f32 %v1021_v3, %v597_v49  ;;  %v458_v13 = vpop.f32.mrf.mxu0  ;;  %v1847_v3 = vrot.slane %v1845_v55, 1 }
 0x142   :  { %v599_v17 = vadd.f32 %v598_v6, %v458_v13  ;;  %v2407_v6 = vor.u32 %v2405_v56, %v2403_v28  ;;  %v4332_v28 = vld [vmem:[%s6619_s0 + $0xcc] sm:$0xff] }
 0x143   :  { %v5192_v16 = vadd.f32 %v1257_v48, %v1073_v10  ;;  %v2411_v10 = vrot.slane %v2409_v58, 1  ;;  %v2717_v48 = vrot.slane %v4351_v43, 1 }
 0x145   :  { %6728 = vst [vmem:[#allocation24_spill] sm:$0xff] %v5192_v16  ;;  %v2412_v18 = vsel %vm187_vm1, %v2407_v6, %v2411_v10  ;;  %v2718_v46 = vsel %vm1094_vm2, %v2715_v29, %v2717_v48  ;;  %v1849_v29 = vshrl.u32 %v4331_v44, 16 }
 0x147   :  { %v601_v4 = vpop.f32.mrf.mxu1 }
 0x148   :  { %v1023_v30 = vpop.f32.mrf.mxu2  ;;  %v1259_v33 = vpop.f32.mrf.mxu3 }
 0x149   :  { %v1074_v32 = vadd.f32 %v1023_v30, %v599_v17  ;;  %v461_v34 = vpop.f32.mrf.mxu0  ;;  %v1848_v17 = vsel %vm187_vm1, %v1843_v63, %v1847_v3  ;;  %v4352_v30 = vld [vmem:[%s6619_s0 + $0xd4] sm:$0xff] }
 0x14a   :  { %v602_v27 = vadd.f32 %v601_v4, %v461_v34  ;;  %4079 = vmatmul.msk.bf16.gmra.mxu1 %vm340_vm0, %v4329_v26  ;;  %v2719_v42 = vrot.slane %v4352_v30, 1 }
 0x14b   :  { %v5196_v39 = vadd.f32 %v1259_v33, %v1074_v32 }
 0x14c   :  { %4054 = vmatmul.msk.bf16.gmra.mxu0 %vm340_vm0, %v1840_v12  ;;  %v1853_v12 = vshll.u32 %v4332_v28, 16 }
 0x14d   :  { %6729 = vst [vmem:[#allocation25_spill] sm:$0xff] %v5196_v39  ;;  %4207 = vmatmul.msk.bf16.gmra.mxu2 %vm340_vm0, %v2404_v31  ;;  %4237 = vmatmul.msk.bf16.gmra.mxu3 %vm340_vm0, %v2716_v40  ;;  %v2413_v31 = vshrl.u32 %v4351_v43, 16 }
 0x14f   :  { %v603_v50 = vpop.f32.mrf.mxu1 }
 0x150   :  { %v1026_v47 = vpop.f32.mrf.mxu2  ;;  %v1262_v26 = vpop.f32.mrf.mxu3 }
 0x151   :  { %v1075_v51 = vadd.f32 %v1026_v47, %v602_v27  ;;  %v463_v52 = vpop.f32.mrf.mxu0  ;;  %v2417_v27 = vshll.u32 %v4352_v30, 16 }
 0x152   :  { %v604_v49 = vadd.f32 %v603_v50, %v463_v52  ;;  %v1851_v50 = vor.u32 %v1849_v29, %v1847_v3  ;;  %v2720_v3 = vsel %vm1094_vm2, %v2717_v48, %v2719_v42  ;;  %v1857_v48 = vshrl.u32 %v4332_v28, 16 }
 0x153   :  { %v5209_v59 = vadd.f32 %v1262_v26, %v1075_v51  ;;  %v1855_v51 = vrot.slane %v1853_v12, 1  ;;  %v2415_v26 = vor.u32 %v2413_v31, %v2411_v10  ;;  %v2419_v52 = vrot.slane %v2417_v27, 1  ;;  %v4333_v10 = vld [vmem:[%s6619_s0 + $0xd4] sm:$0xff] }
 0x155   :  { %6730 = vst [vmem:[#allocation26_spill] sm:$0xff] %v5209_v59  ;;  %v1856_v6 = vsel %vm187_vm1, %v1851_v50, %v1855_v51 }
 0x157   :  { %v606_v11 = vpop.f32.mrf.mxu1 }
 0x158   :  { %v1028_v13 = vpop.f32.mrf.mxu2  ;;  %v1264_v14 = vpop.f32.mrf.mxu3 }
 0x159   :  { %v1076_v9 = vadd.f32 %v1028_v13, %v604_v49  ;;  %v466_v15 = vpop.f32.mrf.mxu0  ;;  %v2420_v13 = vsel %vm187_vm1, %v2415_v26, %v2419_v52 }
 0x15a   :  { %v607_v2 = vadd.f32 %v606_v11, %v466_v15  ;;  %4080 = vmatmul.msk.bf16.gmra.mxu1 %vm340_vm0, %v4330_v1 }
 0x15b   :  { %v5213_v24 = vadd.f32 %v1264_v14, %v1076_v9  ;;  %v4353_v9 = vld [vmem:[%s6619_s0 + $0xdc] sm:$0xff] }
 0x15c   :  { %4055 = vmatmul.msk.bf16.gmra.mxu0 %vm340_vm0, %v1848_v17  ;;  %v2721_v31 = vrot.slane %v4353_v9, 1 }
 0x15d   :  { %6731 = vst [vmem:[#allocation27_spill] sm:$0xff] %v5213_v24  ;;  %4208 = vmatmul.msk.bf16.gmra.mxu2 %vm340_vm0, %v2412_v18  ;;  %4238 = vmatmul.msk.bf16.gmra.mxu3 %vm340_vm0, %v2718_v46  ;;  %v2421_v46 = vshrl.u32 %v4352_v30, 16 }
 0x15f   :  { %v608_v32 = vpop.f32.mrf.mxu1  ;;  %v2423_v29 = vor.u32 %v2421_v46, %v2419_v52  ;;  %v4334_v52 = vld [vmem:[%s6619_s0 + $0xdc] sm:$0xff] }
 0x160   :  { %v1031_v4 = vpop.f32.mrf.mxu2  ;;  %v1267_v1 = vpop.f32.mrf.mxu3 }
 0x161   :  { %v1077_v33 = vadd.f32 %v1031_v4, %v607_v2  ;;  %v468_v34 = vpop.f32.mrf.mxu0  ;;  %v1861_v2 = vshll.u32 %v4333_v10, 16  ;;  %v2425_v4 = vshll.u32 %v4353_v9, 16 }
 0x162   :  { %v609_v47 = vadd.f32 %v608_v32, %v468_v34 }
 0x163   :  { %v5226_v40 = vadd.f32 %v1267_v1, %v1077_v33  ;;  %v1859_v1 = vor.u32 %v1857_v48, %v1855_v51  ;;  %v1863_v34 = vrot.slane %v1861_v2, 1  ;;  %v2427_v12 = vrot.slane %v2425_v4, 1 }
 0x164   :  { %v2722_v51 = vsel %vm1094_vm2, %v2719_v42, %v2721_v31  ;;  %v1865_v42 = vshrl.u32 %v4333_v10, 16 }
 0x165   :  { %6732 = vst [vmem:[#allocation28_spill] sm:$0xff] %v5226_v40 }
 0x166   :  { %v1867_v48 = vor.u32 %v1865_v42, %v1863_v34 }
 0x167   :  { %v611_v56 = vpop.f32.mrf.mxu1 }
 0x168   :  { %v1033_v55 = vpop.f32.mrf.mxu2  ;;  %v1269_v49 = vpop.f32.mrf.mxu3 }
 0x169   :  { %v1078_v58 = vadd.f32 %v1033_v55, %v609_v47  ;;  %v471_v63 = vpop.f32.mrf.mxu0 }
 0x16a   :  { %v612_v43 = vadd.f32 %v611_v56, %v471_v63  ;;  %4081 = vmatmul.msk.bf16.gmra.mxu1 %vm340_vm0, %v4331_v44  ;;  %v1864_v56 = vsel %vm187_vm1, %v1859_v1, %v1863_v34  ;;  %v4354_v63 = vld [vmem:[%s6619_s0 + $0xe4] sm:$0xff] }
 0x16b   :  { %v5230_v11 = vadd.f32 %v1269_v49, %v1078_v58  ;;  %v2428_v58 = vsel %vm187_vm1, %v2423_v29, %v2427_v12 }
 0x16c   :  { %4056 = vmatmul.msk.bf16.gmra.mxu0 %vm340_vm0, %v1856_v6 }
 0x16d   :  { %6733 = vst [vmem:[#allocation29_spill] sm:$0xff] %v5230_v11  ;;  %4209 = vmatmul.msk.bf16.gmra.mxu2 %vm340_vm0, %v2420_v13  ;;  %4239 = vmatmul.msk.bf16.gmra.mxu3 %vm340_vm0, %v2720_v3 }
 0x16f   :  { %v613_v15 = vpop.f32.mrf.mxu1 }
 0x170   :  { %v1036_v14 = vpop.f32.mrf.mxu2  ;;  %v1272_v44 = vpop.f32.mrf.mxu3 }
 0x171   :  { %v1079_v17 = vadd.f32 %v1036_v14, %v612_v43  ;;  %v473_v18 = vpop.f32.mrf.mxu0  ;;  %v1869_v14 = vshll.u32 %v4334_v52, 16 }
 0x172   :  { %v614_v33 = vadd.f32 %v613_v15, %v473_v18  ;;  %v2429_v15 = vshrl.u32 %v4353_v9, 16 }
 0x173   :  { %v5243_v32 = vadd.f32 %v1272_v44, %v1079_v17  ;;  %v2433_v17 = vshll.u32 %v4354_v63, 16  ;;  %v1871_v2 = vrot.slane %v1869_v14, 1 }
 0x174   :  { %v2431_v46 = vor.u32 %v2429_v15, %v2427_v12  ;;  %v4335_v12 = vld [vmem:[%s6619_s0 + $0xe4] sm:$0xff] }
 0x175   :  { %6734 = vst [vmem:[#allocation30_spill] sm:$0xff] %v5243_v32  ;;  %v2435_v4 = vrot.slane %v2433_v17, 1 }
 0x177   :  { %v616_v47 = vpop.f32.mrf.mxu1 }
 0x178   :  { %v1038_v27 = vpop.f32.mrf.mxu2  ;;  %v1274_v26 = vpop.f32.mrf.mxu3 }
 0x179   :  { %v1080_v50 = vadd.f32 %v1038_v27, %v614_v33  ;;  %v476_v55 = vpop.f32.mrf.mxu0  ;;  %v2723_v33 = vrot.slane %v4354_v63, 1 }
 0x17a   :  { %v617_v30 = vadd.f32 %v616_v47, %v476_v55  ;;  %4082 = vmatmul.msk.bf16.gmra.mxu1 %vm340_vm0, %v4332_v28  ;;  %v2436_v55 = vsel %vm187_vm1, %v2431_v46, %v2435_v4 }
 0x17b   :  { %v5247_v49 = vadd.f32 %v1274_v26, %v1080_v50  ;;  %v1872_v26 = vsel %vm187_vm1, %v1867_v48, %v1871_v2  ;;  %v2724_v34 = vsel %vm1094_vm2, %v2721_v31, %v2723_v33  ;;  %v1873_v31 = vshrl.u32 %v4334_v52, 16 }
 0x17c   :  { %4057 = vmatmul.msk.bf16.gmra.mxu0 %vm340_vm0, %v1864_v56 }
 0x17d   :  { %6735 = vst [vmem:[#allocation31_spill] sm:$0xff] %v5247_v49  ;;  %4210 = vmatmul.msk.bf16.gmra.mxu2 %vm340_vm0, %v2428_v58  ;;  %4240 = vmatmul.msk.bf16.gmra.mxu3 %vm340_vm0, %v2722_v51  ;;  %v4355_v58 = vld [vmem:[%s6619_s0 + $0xec] sm:$0xff]  ;;  %v1875_v15 = vor.u32 %v1873_v31, %v1871_v2 }
 0x17e   :  { %v2725_v46 = vrot.slane %v4355_v58, 1  ;;  %v2445_v31 = vshrl.u32 %v4355_v58, 16 }
 0x17f   :  { %v618_v13 = vpop.f32.mrf.mxu1 }
 0x180   :  { %v1041_v6 = vpop.f32.mrf.mxu2  ;;  %v1277_v28 = vpop.f32.mrf.mxu3  ;;  %v2726_v2 = vsel %vm1094_vm2, %v2723_v33, %v2725_v46  ;;  %v1881_v33 = vshrl.u32 %v4335_v12, 16 }
 0x181   :  { %v1081_v43 = vadd.f32 %v1041_v6, %v617_v30  ;;  %v478_v3 = vpop.f32.mrf.mxu0 }
 0x182   :  { %v619_v18 = vadd.f32 %v618_v13, %v478_v3  ;;  %v2441_v3 = vshll.u32 %v4355_v58, 16 }
 0x183   :  { %v5260_v44 = vadd.f32 %v1277_v28, %v1081_v43  ;;  %v1877_v43 = vshll.u32 %v4335_v12, 16  ;;  %v2437_v28 = vshrl.u32 %v4354_v63, 16 }
 0x184   :  { %v2443_v48 = vrot.slane %v2441_v3, 1 }
 0x185   :  { %6736 = vst [vmem:[#allocation32_spill] sm:$0xff] %v5260_v44  ;;  %v1879_v17 = vrot.slane %v1877_v43, 1 }
 0x187   :  { %v621_v29 = vpop.f32.mrf.mxu1 }
 0x188   :  { %v1043_v1 = vpop.f32.mrf.mxu2  ;;  %v1279_v47 = vpop.f32.mrf.mxu3 }
 0x189   :  { %v1082_v27 = vadd.f32 %v1043_v1, %v619_v18  ;;  %v481_v50 = vpop.f32.mrf.mxu0  ;;  %v2439_v18 = vor.u32 %v2437_v28, %v2435_v4  ;;  %v4336_v4 = vld [vmem:[%s6619_s0 + $0xec] sm:$0xff] }
 0x18a   :  { %v622_v9 = vadd.f32 %v621_v29, %v481_v50  ;;  %4083 = vmatmul.msk.bf16.gmra.mxu1 %vm340_vm0, %v4333_v10 }
 0x18b   :  { %v5264_v56 = vadd.f32 %v1279_v47, %v1082_v27 }
 0x18c   :  { %4058 = vmatmul.msk.bf16.gmra.mxu0 %vm340_vm0, %v1872_v26  ;;  %v1880_v26 = vsel %vm187_vm1, %v1875_v15, %v1879_v17 }
 0x18d   :  { %6737 = vst [vmem:[#allocation33_spill] sm:$0xff] %v5264_v56  ;;  %4211 = vmatmul.msk.bf16.gmra.mxu2 %vm340_vm0, %v2436_v55  ;;  %4241 = vmatmul.msk.bf16.gmra.mxu3 %vm340_vm0, %v2724_v34  ;;  %v2444_v55 = vsel %vm187_vm1, %v2439_v18, %v2443_v48  ;;  %v4356_v34 = vld [vmem:[%s6619_s0 + $0xf4] sm:$0xff]  ;;  %v2447_v18 = vor.u32 %v2445_v31, %v2443_v48 }
 0x18e   :  { %v2449_v43 = vshll.u32 %v4356_v34, 16  ;;  %v4337_v48 = vld [vmem:[%s6619_s0 + $0xf4] sm:$0xff]  ;;  %v2453_v31 = vshrl.u32 %v4356_v34, 16 }
 0x18f   :  { %v623_v51 = vpop.f32.mrf.mxu1 }
 0x190   :  { %v1046_v30 = vpop.f32.mrf.mxu2  ;;  %v1282_v10 = vpop.f32.mrf.mxu3 }
 0x191   :  { %v1083_v6 = vadd.f32 %v1046_v30, %v622_v9  ;;  %v483_v13 = vpop.f32.mrf.mxu0 }
 0x192   :  { %v624_v14 = vadd.f32 %v623_v51, %v483_v13  ;;  %v1885_v13 = vshll.u32 %v4336_v4, 16 }
 0x193   :  { %v5277_v42 = vadd.f32 %v1282_v10, %v1083_v6 }
 0x194   :  { %v1887_v15 = vrot.slane %v1885_v13, 1  ;;  %v1893_v13 = vshll.u32 %v4337_v48, 16 }
 0x195   :  { %6738 = vst [vmem:[#allocation34_spill] sm:$0xff] %v5277_v42 }
 0x197   :  { %v2157_v29 = vpop.f32.mrf.mxu1 }
 0x198   :  { %v1048_v1 = vpop.f32.mrf.mxu2  ;;  %v1284_v47 = vpop.f32.mrf.mxu3 }
 0x199   :  { %v1084_v27 = vadd.f32 %v1048_v1, %v624_v14  ;;  %v2017_v50 = vpop.f32.mrf.mxu0  ;;  %v1883_v14 = vor.u32 %v1881_v33, %v1879_v17  ;;  %v2451_v1 = vrot.slane %v2449_v43, 1 }
 0x19a   :  { %v2158_v63 = vadd.f32 %v2157_v29, %v2017_v50  ;;  %4084 = vmatmul.msk.bf16.gmra.mxu1 %vm340_vm0, %v4334_v52  ;;  %v2727_v29 = vrot.slane %v4356_v34, 1 }
 0x19b   :  { %v5281_v9 = vadd.f32 %v1284_v47, %v1084_v27 }
 0x19c   :  { %4059 = vmatmul.msk.bf16.gmra.mxu0 %vm340_vm0, %v1880_v26  ;;  %v2728_v17 = vsel %vm1094_vm2, %v2725_v46, %v2727_v29  ;;  %v1889_v46 = vshrl.u32 %v4336_v4, 16 }
 0x19d   :  { %6739 = vst [vmem:[#allocation35_spill] sm:$0xff] %v5281_v9  ;;  %4212 = vmatmul.msk.bf16.gmra.mxu2 %vm340_vm0, %v2444_v55  ;;  %4242 = vmatmul.msk.bf16.gmra.mxu3 %vm340_vm0, %v2726_v2  ;;  %v2452_v2 = vsel %vm187_vm1, %v2447_v18, %v2451_v1 }
 0x19e   :  { %v1891_v18 = vor.u32 %v1889_v46, %v1887_v15 }
 0x19f   :  { %v2159_v51 = vpop.f32.mrf.mxu1 }
 0x1a0   :  { %v2581_v30 = vpop.f32.mrf.mxu2  ;;  %v2815_v52 = vpop.f32.mrf.mxu3 }
 0x1a1   :  { %v2666_v6 = vadd.f32 %v2581_v30, %v2158_v63  ;;  %v2019_v10 = vpop.f32.mrf.mxu0  ;;  %v1888_v63 = vsel %vm187_vm1, %v1883_v14, %v1887_v15 }
 0x1a2   :  { %v2160_v3 = vadd.f32 %v2159_v51, %v2019_v10  ;;  %v4357_v51 = vld [vmem:[%s6619_s0 + $0xfc] sm:$0xff] }
 0x1a3   :  { %v5294_v28 = vadd.f32 %v2815_v52, %v2666_v6  ;;  %v2457_v43 = vshll.u32 %v4357_v51, 16 }
 0x1a5   :  { %6740 = vst [vmem:[#allocation36_spill] sm:$0xff] %v5294_v28 }
 0x1a7   :  { %v2162_v47 = vpop.f32.mrf.mxu1 }
 0x1a8   :  { %v2583_v27 = vpop.f32.mrf.mxu2  ;;  %v2817_v26 = vpop.f32.mrf.mxu3 }
 0x1a9   :  { %v2667_v50 = vadd.f32 %v2583_v27, %v2160_v3  ;;  %v2022_v55 = vpop.f32.mrf.mxu0  ;;  %v1895_v27 = vrot.slane %v1893_v13, 1  ;;  %v2461_v13 = vshrl.u32 %v4357_v51, 16 }
 0x1aa   :  { %v2163_v58 = vadd.f32 %v2162_v47, %v2022_v55  ;;  %4085 = vmatmul.msk.bf16.gmra.mxu1 %vm340_vm0, %v4335_v12  ;;  %v2455_v47 = vor.u32 %v2453_v31, %v2451_v1  ;;  %v4338_v1 = vld [vmem:[%s6619_s0 + $0xfc] sm:$0xff] }
 0x1ab   :  { %v5298_v30 = vadd.f32 %v2817_v26, %v2667_v50  ;;  %v2459_v50 = vrot.slane %v2457_v43, 1  ;;  %v2729_v26 = vrot.slane %v4357_v51, 1  ;;  %v1901_v46 = vshll.u32 %v4338_v1, 16 }
 0x1ac   :  { %4060 = vmatmul.msk.bf16.gmra.mxu0 %vm340_vm0, %v1888_v63 }
 0x1ad   :  { %6741 = vst [vmem:[#allocation37_spill] sm:$0xff] %v5298_v30  ;;  %4213 = vmatmul.msk.bf16.gmra.mxu2 %vm340_vm0, %v2452_v2  ;;  %4243 = vmatmul.msk.bf16.gmra.mxu3 %vm340_vm0, %v2728_v17  ;;  %v2730_v15 = vsel %vm1094_vm2, %v2727_v29, %v2729_v26  ;;  %v1897_v29 = vshrl.u32 %v4337_v48, 16 }
 0x1af   :  { %v2164_v52 = vpop.f32.mrf.mxu1 }
 0x1b0   :  { %v2586_v6 = vpop.f32.mrf.mxu2  ;;  %v2820_v12 = vpop.f32.mrf.mxu3 }
 0x1b1   :  { %v2668_v10 = vadd.f32 %v2586_v6, %v2163_v58  ;;  %v2024_v33 = vpop.f32.mrf.mxu0  ;;  %v1896_v58 = vsel %vm187_vm1, %v1891_v18, %v1895_v27  ;;  %v2460_v6 = vsel %vm187_vm1, %v2455_v47, %v2459_v50  ;;  %v1899_v18 = vor.u32 %v1897_v29, %v1895_v27 }
 0x1b2   :  { %v2165_v14 = vadd.f32 %v2164_v52, %v2024_v33  ;;  %v4358_v52 = vld [vmem:[%s6619_s0 + $0x104] sm:$0xff]  ;;  %v1903_v47 = vrot.slane %v1901_v46, 1 }
 0x1b3   :  { %v5311_v3 = vadd.f32 %v2820_v12, %v2668_v10  ;;  %v2465_v31 = vshll.u32 %v4358_v52, 16  ;;  %v2469_v46 = vshrl.u32 %v4358_v52, 16 }
 0x1b5   :  { %6742 = vst [vmem:[#allocation38_spill] sm:$0xff] %v5311_v3 }
 0x1b7   :  { %v2167_v63 = vpop.f32.mrf.mxu1 }
 0x1b8   :  { %v2588_v55 = vpop.f32.mrf.mxu2  ;;  %v2822_v17 = vpop.f32.mrf.mxu3 }
 0x1b9   :  { %v2669_v2 = vadd.f32 %v2588_v55, %v2165_v14  ;;  %v2027_v9 = vpop.f32.mrf.mxu0  ;;  %v2463_v55 = vor.u32 %v2461_v13, %v2459_v50  ;;  %v4339_v50 = vld [vmem:[%s6619_s0 + $0x104] sm:$0xff] }
 0x1ba   :  { %v2168_v34 = vadd.f32 %v2167_v63, %v2027_v9  ;;  %4086 = vmatmul.msk.bf16.gmra.mxu1 %vm340_vm0, %v4336_v4  ;;  %v2467_v63 = vrot.slane %v2465_v31, 1  ;;  %v1909_v29 = vshll.u32 %v4339_v50, 16 }
 0x1bb   :  { %v5315_v42 = vadd.f32 %v2822_v17, %v2669_v2  ;;  %v2731_v2 = vrot.slane %v4358_v52, 1 }
 0x1bc   :  { %4061 = vmatmul.msk.bf16.gmra.mxu0 %vm340_vm0, %v1896_v58 }
 0x1bd   :  { %6743 = vst [vmem:[#allocation39_spill] sm:$0xff] %v5315_v42  ;;  %4214 = vmatmul.msk.bf16.gmra.mxu2 %vm340_vm0, %v2460_v6  ;;  %4244 = vmatmul.msk.bf16.gmra.mxu3 %vm340_vm0, %v2730_v15  ;;  %v2732_v27 = vsel %vm1094_vm2, %v2729_v26, %v2731_v2  ;;  %v1905_v26 = vshrl.u32 %v4338_v1, 16 }
 0x1bf   :  { %v2169_v9 = vpop.f32.mrf.mxu1 }
 0x1c0   :  { %v2591_v10 = vpop.f32.mrf.mxu2  ;;  %v2825_v4 = vpop.f32.mrf.mxu3 }
 0x1c1   :  { %v2670_v12 = vadd.f32 %v2591_v10, %v2168_v34  ;;  %v2029_v33 = vpop.f32.mrf.mxu0  ;;  %v1904_v34 = vsel %vm187_vm1, %v1899_v18, %v1903_v47  ;;  %v2468_v10 = vsel %vm187_vm1, %v2463_v55, %v2467_v63  ;;  %v1907_v18 = vor.u32 %v1905_v26, %v1903_v47 }
 0x1c2   :  { %v2170_v14 = vadd.f32 %v2169_v9, %v2029_v33  ;;  %v4359_v9 = vld [vmem:[%s6619_s0 + $0x10c] sm:$0xff]  ;;  %v1911_v55 = vrot.slane %v1909_v29, 1 }
 0x1c3   :  { %v5328_v43 = vadd.f32 %v2825_v4, %v2670_v12  ;;  %v2473_v13 = vshll.u32 %v4359_v9, 16  ;;  %v2477_v29 = vshrl.u32 %v4359_v9, 16 }
 0x1c5   :  { %6744 = vst [vmem:[#allocation40_spill] sm:$0xff] %v5328_v43 }
 0x1c7   :  { %v2172_v58 = vpop.f32.mrf.mxu1 }
 0x1c8   :  { %v2593_v17 = vpop.f32.mrf.mxu2  ;;  %v2827_v15 = vpop.f32.mrf.mxu3 }
 0x1c9   :  { %v2671_v6 = vadd.f32 %v2593_v17, %v2170_v14  ;;  %v2032_v56 = vpop.f32.mrf.mxu0  ;;  %v2471_v17 = vor.u32 %v2469_v46, %v2467_v63  ;;  %v4340_v63 = vld [vmem:[%s6619_s0 + $0x10c] sm:$0xff] }
 0x1ca   :  { %v2173_v51 = vadd.f32 %v2172_v58, %v2032_v56  ;;  %4087 = vmatmul.msk.bf16.gmra.mxu1 %vm340_vm0, %v4337_v48  ;;  %v2475_v58 = vrot.slane %v2473_v13, 1  ;;  %v1917_v26 = vshll.u32 %v4340_v63, 16 }
 0x1cb   :  { %v5332_v44 = vadd.f32 %v2827_v15, %v2671_v6  ;;  %v2733_v6 = vrot.slane %v4359_v9, 1 }
 0x1cc   :  { %4062 = vmatmul.msk.bf16.gmra.mxu0 %vm340_vm0, %v1904_v34 }
 0x1cd   :  { %6745 = vst [vmem:[#allocation41_spill] sm:$0xff] %v5332_v44  ;;  %4215 = vmatmul.msk.bf16.gmra.mxu2 %vm340_vm0, %v2468_v10  ;;  %4245 = vmatmul.msk.bf16.gmra.mxu3 %vm340_vm0, %v2732_v27  ;;  %v2734_v47 = vsel %vm1094_vm2, %v2731_v2, %v2733_v6  ;;  %v1913_v2 = vshrl.u32 %v4339_v50, 16 }
 0x1cf   :  { %v2174_v56 = vpop.f32.mrf.mxu1 }
 0x1d0   :  { %v2596_v12 = vpop.f32.mrf.mxu2  ;;  %v2830_v48 = vpop.f32.mrf.mxu3 }
 0x1d1   :  { %v2672_v4 = vadd.f32 %v2596_v12, %v2173_v51  ;;  %v2034_v33 = vpop.f32.mrf.mxu0  ;;  %v1912_v51 = vsel %vm187_vm1, %v1907_v18, %v1911_v55  ;;  %v2476_v12 = vsel %vm187_vm1, %v2471_v17, %v2475_v58  ;;  %v1915_v18 = vor.u32 %v1913_v2, %v1911_v55 }
 0x1d2   :  { %v2175_v14 = vadd.f32 %v2174_v56, %v2034_v33  ;;  %v4360_v56 = vld [vmem:[%s6619_s0 + $0x114] sm:$0xff]  ;;  %v1919_v17 = vrot.slane %v1917_v26, 1 }
 0x1d3   :  { %v5345_v31 = vadd.f32 %v2830_v48, %v2672_v4  ;;  %v2481_v46 = vshll.u32 %v4360_v56, 16  ;;  %v2485_v26 = vshrl.u32 %v4360_v56, 16 }
 0x1d5   :  { %6746 = vst [vmem:[#allocation42_spill] sm:$0xff] %v5345_v31 }
 0x1d7   :  { %v2177_v34 = vpop.f32.mrf.mxu1 }
 0x1d8   :  { %v2598_v15 = vpop.f32.mrf.mxu2  ;;  %v2832_v27 = vpop.f32.mrf.mxu3 }
 0x1d9   :  { %v2673_v10 = vadd.f32 %v2598_v15, %v2175_v14  ;;  %v2037_v49 = vpop.f32.mrf.mxu0  ;;  %v2479_v15 = vor.u32 %v2477_v29, %v2475_v58  ;;  %v5376_v58 = vld [vmem:[%s6619_s0 + $0x114] sm:$0xff] }
 0x1da   :  { %v2178_v52 = vadd.f32 %v2177_v34, %v2037_v49  ;;  %4088 = vmatmul.msk.bf16.gmra.mxu1 %vm340_vm0, %v4338_v1  ;;  %v2483_v34 = vrot.slane %v2481_v46, 1  ;;  %v1925_v2 = vshll.u32 %v5376_v58, 16 }
 0x1db   :  { %v5349_v32 = vadd.f32 %v2832_v27, %v2673_v10  ;;  %v2735_v10 = vrot.slane %v4360_v56, 1 }
 0x1dc   :  { %4063 = vmatmul.msk.bf16.gmra.mxu0 %vm340_vm0, %v1912_v51 }
 0x1dd   :  { %6747 = vst [vmem:[#allocation43_spill] sm:$0xff] %v5349_v32  ;;  %4216 = vmatmul.msk.bf16.gmra.mxu2 %vm340_vm0, %v2476_v12  ;;  %4246 = vmatmul.msk.bf16.gmra.mxu3 %vm340_vm0, %v2734_v47  ;;  %v2736_v55 = vsel %vm1094_vm2, %v2733_v6, %v2735_v10 }
 0x1df   :  { %v2179_v49 = vpop.f32.mrf.mxu1 }
 0x1e0   :  { %v2601_v4 = vpop.f32.mrf.mxu2  ;;  %v2835_v1 = vpop.f32.mrf.mxu3 }
 0x1e1   :  { %v2674_v48 = vadd.f32 %v2601_v4, %v2178_v52  ;;  %v2039_v33 = vpop.f32.mrf.mxu0  ;;  %v1920_v52 = vsel %vm187_vm1, %v1915_v18, %v1919_v17  ;;  %v2484_v4 = vsel %vm187_vm1, %v2479_v15, %v2483_v34  ;;  %v1927_v15 = vrot.slane %v1925_v2, 1 }
 0x1e2   :  { %v2180_v14 = vadd.f32 %v2179_v49, %v2039_v33  ;;  %v5381_v49 = vld [vmem:[%s6619_s0 + $0x11c] sm:$0xff]  ;;  %v1921_v33 = vshrl.u32 %v4340_v63, 16  ;;  %v1929_v2 = vshrl.u32 %v5376_v58, 16 }
 0x1e3   :  { %v5362_v13 = vadd.f32 %v2835_v1, %v2674_v48  ;;  %v2489_v29 = vshll.u32 %v5381_v49, 16 }
 0x1e4   :  { %v1923_v18 = vor.u32 %v1921_v33, %v1919_v17 }
 0x1e5   :  { %6748 = vst [vmem:[#allocation44_spill] sm:$0xff] %v5362_v13 }
 0x1e7   :  { %v2182_v51 = vpop.f32.mrf.mxu1 }
 0x1e8   :  { %v2603_v27 = vpop.f32.mrf.mxu2  ;;  %v2837_v47 = vpop.f32.mrf.mxu3 }
 0x1e9   :  { %v2675_v12 = vadd.f32 %v2603_v27, %v2180_v14  ;;  %v2042_v11 = vpop.f32.mrf.mxu0  ;;  %v2487_v27 = vor.u32 %v2485_v26, %v2483_v34  ;;  %v5400_v34 = vld [vmem:[%s6619_s0 + $0x11c] sm:$0xff] }
 0x1ea   :  { %v2183_v9 = vadd.f32 %v2182_v51, %v2042_v11  ;;  %4089 = vmatmul.msk.bf16.gmra.mxu1 %vm340_vm0, %v4339_v50  ;;  %v2491_v51 = vrot.slane %v2489_v29, 1  ;;  %v1933_v26 = vshll.u32 %v5400_v34, 16  ;;  %v2493_v29 = vshrl.u32 %v5381_v49, 16 }
 0x1eb   :  { %v5366_v40 = vadd.f32 %v2837_v47, %v2675_v12  ;;  %v2737_v12 = vrot.slane %v5381_v49, 1 }
 0x1ec   :  { %4064 = vmatmul.msk.bf16.gmra.mxu0 %vm340_vm0, %v1920_v52  ;;  %v2492_v56 = vsel %vm187_vm1, %v2487_v27, %v2491_v51 }
 0x1ed   :  { %6749 = vst [vmem:[#allocation45_spill] sm:$0xff] %v5366_v40  ;;  %4217 = vmatmul.msk.bf16.gmra.mxu2 %vm340_vm0, %v2484_v4  ;;  %4247 = vmatmul.msk.bf16.gmra.mxu3 %vm340_vm0, %v2736_v55  ;;  %v2738_v17 = vsel %vm1094_vm2, %v2735_v10, %v2737_v12 }
 0x1ef   :  { %v2184_v50 = vpop.f32.mrf.mxu1 }
 0x1f0   :  { %v2606_v11 = vpop.f32.mrf.mxu2  ;;  %v2840_v6 = vpop.f32.mrf.mxu3 }
 0x1f1   :  { %v2676_v48 = vadd.f32 %v2606_v11, %v2183_v9  ;;  %v2044_v1 = vpop.f32.mrf.mxu0  ;;  %v1928_v11 = vsel %vm187_vm1, %v1923_v18, %v1927_v15 }
 0x1f2   :  { %v2185_v14 = vadd.f32 %v2184_v50, %v2044_v1  ;;  %v5405_v50 = vld [vmem:[%s6619_s0 + $0x124] sm:$0xff] }
 0x1f3   :  { %v5385_v46 = vadd.f32 %v2840_v6, %v2676_v48 }
 0x1f5   :  { %6750 = vst [vmem:[#allocation46_spill] sm:$0xff] %v5385_v46 }
 0x1f7   :  { %v2187_v52 = vpop.f32.mrf.mxu1 }
 0x1f8   :  { %v2608_v47 = vpop.f32.mrf.mxu2  ;;  %v2842_v9 = vpop.f32.mrf.mxu3 }
 0x1f9   :  { %v2677_v4 = vadd.f32 %v2608_v47, %v2185_v14  ;;  %v2047_v55 = vpop.f32.mrf.mxu0  ;;  %v2497_v14 = vshll.u32 %v5405_v50, 16  ;;  %v1931_v47 = vor.u32 %v1929_v2, %v1927_v15 }
 0x1fa   :  { %v2188_v48 = vadd.f32 %v2187_v52, %v2047_v55  ;;  %4090 = vmatmul.msk.bf16.gmra.mxu1 %vm340_vm0, %v4340_v63  ;;  %v1935_v52 = vrot.slane %v1933_v26, 1  ;;  %v2739_v55 = vrot.slane %v5405_v50, 1 }
 0x1fb   :  { %v5390_v24 = vadd.f32 %v2842_v9, %v2677_v4  ;;  %v2495_v4 = vor.u32 %v2493_v29, %v2491_v51  ;;  %v2499_v9 = vrot.slane %v2497_v14, 1 }
 0x1fc   :  { %4065 = vmatmul.msk.bf16.gmra.mxu0 %vm340_vm0, %v1928_v11  ;;  %v3970_v11 = vld [vmem:[%s6619_s0 + $0x124] sm:$0x1]  ;;  %v1936_v15 = vsel %vm187_vm1, %v1931_v47, %v1935_v52  ;;  %v2740_v26 = vsel %vm1094_vm2, %v2737_v12, %v2739_v55 }
 0x1fd   :  { %6751 = vst [vmem:[#allocation47_spill] sm:$0xff] %v5390_v24  ;;  %4218 = vmatmul.msk.bf16.gmra.mxu2 %vm340_vm0, %v2492_v56  ;;  %4248 = vmatmul.msk.bf16.gmra.mxu3 %vm340_vm0, %v2738_v17  ;;  %v4127_v56 = vld [vmem:[%s6619_s0 + $0x12c] sm:$0x1]  ;;  %v2500_v51 = vsel %vm187_vm1, %v2495_v4, %v2499_v9 }
 0x1ff   :  { %v2189_v63 = vpop.f32.mrf.mxu1 }
 0x200   :  { %v2611_v6 = vpop.f32.mrf.mxu2  ;;  %v2845_v10 = vpop.f32.mrf.mxu3 }
 0x201   :  { %v2678_v1 = vadd.f32 %v2611_v6, %v2188_v48  ;;  %v2049_v33 = vpop.f32.mrf.mxu0 }
 0x202   :  { %v2190_v27 = vadd.f32 %v2189_v63, %v2049_v33  ;;  %v1786_v63 = vunpack.c.l.b16 %v3970_v11 }
 0x203   :  { %v5411_v18 = vadd.f32 %v2845_v10, %v2678_v1  ;;  %v2350_v10 = vunpack.c.l.b16 %v4127_v56 }
 0x204   :  { %v1804_v29 = vpack.c.b16 %v1786_v63, %v1786_v63 }
 0x205   :  { %6752 = vst [vmem:[#allocation48_spill] sm:$0xff] %v5411_v18  ;;  %v2368_v14 = vpack.c.b16 %v2350_v10, %v2350_v10 }
 0x207   :  { %v2192_v48 = vpop.f32.mrf.mxu1  ;;  %v2741_v63 = vrot.slane %v2368_v14, 1 }
 0x208   :  { %v2613_v49 = vpop.f32.mrf.mxu2  ;;  %v2847_v6 = vpop.f32.mrf.mxu3 }
 0x209   :  { %v2679_v17 = vadd.f32 %v2613_v49, %v2190_v27  ;;  %v2052_v1 = vpop.f32.mrf.mxu0  ;;  %v1937_v49 = vshrl.u32 %v5400_v34, 16 }
 0x20a   :  { %v2193_v2 = vadd.f32 %v2192_v48, %v2052_v1  ;;  %4091 = vmatmul.msk.bf16.gmra.mxu1 %vm340_vm0, %v5376_v58  ;;  %v1941_v48 = vshll.u32 %v1804_v29, 16  ;;  %v2501_v58 = vshrl.u32 %v5405_v50, 16 }
 0x20b   :  { %v5422_v33 = vadd.f32 %v2847_v6, %v2679_v17  ;;  %v2505_v17 = vshll.u32 %v2368_v14, 16  ;;  %v1939_v1 = vor.u32 %v1937_v49, %v1935_v52  ;;  %v2742_v52 = vsel %vm1094_vm2, %v2739_v55, %v2741_v63 }
 0x20c   :  { %4066 = vmatmul.msk.bf16.gmra.mxu0 %vm340_vm0, %v1936_v15  ;;  %v1943_v15 = vrot.slane %v1941_v48, 1 }
 0x20d   :  { %6753 = vst [vmem:[#allocation49_spill] sm:$0xff] %v5422_v33  ;;  %4219 = vmatmul.msk.bf16.gmra.mxu2 %vm340_vm0, %v2500_v51  ;;  %4249 = vmatmul.msk.bf16.gmra.mxu3 %vm340_vm0, %v2740_v26  ;;  %v2503_v51 = vor.u32 %v2501_v58, %v2499_v9  ;;  %v2507_v26 = vrot.slane %v2505_v17, 1 }
 0x20e   :  { %v1944_v59 = vsel %vm187_vm1, %v1939_v1, %v1943_v15 }
 0x20f   :  { %v2194_v47 = vpop.f32.mrf.mxu1  ;;  %v2508_v29 = vsel %vm187_vm1, %v2503_v51, %v2507_v26 }
 0x210   :  { %v2616_v27 = vpop.f32.mrf.mxu2  ;;  %v2850_v11 = vpop.f32.mrf.mxu3 }
 0x211   :  { %v2680_v4 = vadd.f32 %v2616_v27, %v2193_v2  ;;  %v2054_v56 = vpop.f32.mrf.mxu0 }
 0x212   :  { %v2195_v6 = vadd.f32 %v2194_v47, %v2054_v56 }
 0x213   :  { %v5432_v12 = vadd.f32 %v2850_v11, %v2680_v4 }
 0x215   :  { %6754 = vst [vmem:[#allocation50_spill] sm:$0xff] %v5432_v12 }
 0x217   :  { %v2197_v33 = vpop.f32.mrf.mxu1 }
 0x218   :  { %v2618_v10 = vpop.f32.mrf.mxu2  ;;  %v2852_v2 = vpop.f32.mrf.mxu3 }
 0x219   :  { %v2681_v18 = vadd.f32 %v2618_v10, %v2195_v6  ;;  %v2057_v27 = vpop.f32.mrf.mxu0  ;;  %v5450_v10 = vpop.permute.xlu0 %1357 }
 0x21a   :  { %v2198_v50 = vadd.f32 %v2197_v33, %v2057_v27  ;;  %4092 = vmatmul.msk.bf16.gmra.mxu1 %vm340_vm0, %v5400_v34 }
 0x21b   :  { %v5436_v24 = vadd.f32 %v2852_v2, %v2681_v18  ;;  %v5452_v2 = vpop.permute.xlu1 %1367 }
 0x21c   :  { %4067 = vmatmul.msk.bf16.gmra.mxu0 %vm340_vm0, %v1944_v59 }
 0x21d   :  { %6755 = vst [vmem:[#allocation51_spill] sm:$0xff] %v5436_v24  ;;  %4220 = vmatmul.msk.bf16.gmra.mxu2 %vm340_vm0, %v2508_v29  ;;  %4250 = vmatmul.msk.bf16.gmra.mxu3 %vm340_vm0, %v2742_v52 }
 0x21f   :  { %v2199_v14 = vpop.f32.mrf.mxu1 }
 0x220   :  { %v2621_v9 = vpop.f32.mrf.mxu2  ;;  %v2855_v4 = vpop.f32.mrf.mxu3 }
 0x221   :  { %v2682_v47 = vadd.f32 %v2621_v9, %v2198_v50  ;;  %v2059_v11 = vpop.f32.mrf.mxu0 }
 0x222   :  { %v2200_v18 = vadd.f32 %v2199_v14, %v2059_v11  ;;  %v5454_v14 = vpop.permute.xlu2 %1377  ;;  %v5458_v11 = vpop.permute.xlu0 %1362 }
 0x223   :  { %v5444_v56 = vadd.f32 %v2855_v4, %v2682_v47 }
 0x225   :  { %6756 = vst [vmem:[#allocation52_spill] sm:$0xff] %v5444_v56 }
 0x227   :  { %v2202_v49 = vpop.f32.mrf.mxu1 }
 0x228   :  { %v2623_v33 = vpop.f32.mrf.mxu2  ;;  %v2857_v34 = vpop.f32.mrf.mxu3 }
 0x229   :  { %v2683_v48 = vadd.f32 %v2623_v33, %v2200_v18  ;;  %v2062_v58 = vpop.f32.mrf.mxu0 }
 0x22a   :  { %v2203_v59 = vadd.f32 %v2202_v49, %v2062_v58  ;;  %v5460_v49 = vpop.permute.xlu1 %1372 }
 0x22b   :  { %v5446_v55 = vadd.f32 %v2857_v34, %v2683_v48 }
 0x22d   :  { %6757 = vst [vmem:[#allocation53_spill] sm:$0xff] %v5446_v55 }
 0x22f   :  { %v2204_v6 = vpop.f32.mrf.mxu1 }
 0x230   :  { %v2626_v17 = vpop.f32.mrf.mxu2  ;;  %v2860_v15 = vpop.f32.mrf.mxu3 }
 0x231   :  { %v2684_v1 = vadd.f32 %v2626_v17, %v2203_v59  ;;  %v2064_v51 = vpop.f32.mrf.mxu0 }
 0x232   :  { %v2205_v63 = vadd.f32 %v2204_v6, %v2064_v51  ;;  %v5464_v6 = vpop.permute.xlu2 %1382 }
 0x233   :  { %v5448_v26 = vadd.f32 %v2860_v15, %v2684_v1  ;;  %v5466_v1 = vpop.permute.xlu0 %1387  ;;  %v1530_v24 = vmul.f32 %v5464_v6, %v4944_v5 }
 0x235   :  { %6758 = vst [vmem:[#allocation54_spill] sm:$0xff] %v5448_v26 }
 0x237   :  { %v2207_v29 = vpop.f32.mrf.mxu1 }
 0x238   :  { %v2628_v27 = vpop.f32.mrf.mxu2  ;;  %v2862_v52 = vpop.f32.mrf.mxu3 }
 0x239   :  { %v2685_v50 = vadd.f32 %v2628_v27, %v2205_v63  ;;  %v2067_v9 = vpop.f32.mrf.mxu0  ;;  %v5468_v63 = vpop.permute.xlu1 %1392 }
 0x23a   :  { %v2208_v4 = vadd.f32 %v2207_v29, %v2067_v9 }
 0x23b   :  { %v5456_v47 = vadd.f32 %v2862_v52, %v2685_v50 }
 0x23d   :  { %6759 = vst [vmem:[#allocation55_spill] sm:$0xff] %v5456_v47 }
 0x23f   :  { %v2209_v33 = vpop.f32.mrf.mxu1 }
 0x240   :  { %v2631_v18 = vpop.f32.mrf.mxu2  ;;  %v2865_v34 = vpop.f32.mrf.mxu3 }
 0x241   :  { %v2686_v48 = vadd.f32 %v2631_v18, %v2208_v4  ;;  %v2069_v58 = vpop.f32.mrf.mxu0  ;;  %v5472_v4 = vpop.permute.xlu2 %1397  ;;  %v1526_v18 = vmul.f32 %v5458_v11, %v4879_v8 }
 0x242   :  { %v2210_v17 = vadd.f32 %v2209_v33, %v2069_v58  ;;  %v5476_v33 = vpop.permute.xlu0 %1402 }
 0x243   :  { %v5462_v59 = vadd.f32 %v2865_v34, %v2686_v48  ;;  %v1525_v48 = vmul.f32 %v5450_v10, %v4871_v57  ;;  %v1527_v34 = vmul.f32 %v5452_v2, %v4903_v23 }
 0x245   :  { %6760 = vst [vmem:[#allocation56_spill] sm:$0xff] %v5462_v59  ;;  %v1599_v47 = vmul.f32 %v1525_v48, %v4871_v57  ;;  %v1559_v26 = vadd.f32 %v1526_v18, %v1525_v48  ;;  %v1601_v55 = vmul.f32 %v1527_v34, %v4903_v23  ;;  %v1531_v48 = vmul.f32 %v5466_v1, %v4969_v21 }
 0x247   :  { %v2212_v51 = vpop.f32.mrf.mxu1 }
 0x248   :  { %v2633_v15 = vpop.f32.mrf.mxu2  ;;  %v2867_v29 = vpop.f32.mrf.mxu3 }
 0x249   :  { %v2687_v27 = vadd.f32 %v2633_v15, %v2210_v17  ;;  %v2072_v50 = vpop.f32.mrf.mxu0  ;;  %v5484_v15 = vpop.permute.xlu1 %1407 }
 0x24a   :  { %v2213_v9 = vadd.f32 %v2212_v51, %v2072_v50  ;;  %v1528_v50 = vmul.f32 %v5460_v49, %v4911_v38  ;;  %v5497_v56 = vpop.permute.xlu2 %1412 }
 0x24b   :  { %v5470_v52 = vadd.f32 %v2867_v29, %v2687_v27  ;;  %v1600_v29 = vmul.f32 %v1526_v18, %v4879_v8 }
 0x24c   :  { %v1602_v8 = vmul.f32 %v1528_v50, %v4911_v38  ;;  %v1604_v38 = vmul.f32 %v1530_v24, %v4944_v5 }
 0x24d   :  { %6761 = vst [vmem:[#allocation57_spill] sm:$0xff] %v5470_v52 }
 0x24f   :  { %v5482_v17 = vpop.f32.mrf.mxu1 }
 0x250   :  { %v2636_v58 = vpop.f32.mrf.mxu2  ;;  %6762 = vst [vmem:[#allocation58_spill] sm:$0xff] %v5482_v17  ;;  %v2870_v51 = vpop.f32.mrf.mxu3  ;;  %v1529_v17 = vmul.f32 %v5454_v14, %v4936_v53 }
 0x251   :  { %v2688_v27 = vadd.f32 %v2636_v58, %v2213_v9  ;;  %v5489_v52 = vpop.f32.mrf.mxu0  ;;  %v1633_v9 = vadd.f32 %v1600_v29, %v1599_v47  ;;  %v1560_v58 = vadd.f32 %v1559_v26, %v1527_v34  ;;  %v5511_v47 = vpop.permute.xlu1 %1422 }
 0x252   :  { %6763 = vst [vmem:[#allocation59_spill] sm:$0xff] %v5489_v52  ;;  %v5502_v52 = vpop.permute.xlu0 %1417  ;;  %v1603_v18 = vmul.f32 %v1529_v17, %v4936_v53  ;;  %v1605_v53 = vmul.f32 %v1531_v48, %v4969_v21 }
 0x253   :  { %v5491_v59 = vadd.f32 %v2870_v51, %v2688_v27  ;;  %v1634_v27 = vadd.f32 %v1633_v9, %v1601_v55  ;;  %v1561_v51 = vadd.f32 %v1560_v58, %v1528_v50  ;;  %v1532_v55 = vmul.f32 %v5468_v63, %v4977_v37 }
 0x254   :  { %v1537_v21 = vmul.f32 %v5502_v52, %v5068_v60 }
 0x255   :  { %6764 = vst [vmem:[#allocation60_spill] sm:$0xff] %v5491_v59  ;;  %v1635_v34 = vadd.f32 %v1634_v27, %v1602_v8  ;;  %v1562_v29 = vadd.f32 %v1561_v51, %v1529_v17  ;;  %v1533_v59 = vmul.f32 %v5472_v4, %v5002_v54  ;;  %v1606_v8 = vmul.f32 %v1532_v55, %v4977_v37 }
 0x256   :  { %v1534_v17 = vmul.f32 %v5476_v33, %v5010_v7 }
 0x257   :  { %v5509_v57 = vpop.f32.mrf.mxu1  ;;  %v1636_v9 = vadd.f32 %v1635_v34, %v1603_v18  ;;  %v1563_v58 = vadd.f32 %v1562_v29, %v1530_v24  ;;  %v1607_v24 = vmul.f32 %v1533_v59, %v5002_v54  ;;  %v1535_v18 = vmul.f32 %v5484_v15, %v5035_v25 }
 0x258   :  { %v5507_v23 = vpop.f32.mrf.mxu2  ;;  %6766 = vst [vmem:[#allocation62_spill] sm:$0xff] %v5509_v57  ;;  %v5513_v26 = vpop.f32.mrf.mxu3  ;;  %v1608_v37 = vmul.f32 %v1534_v17, %v5010_v7  ;;  %v2972_v7 = vmul.f32 %v5315_v42, %v5460_v49 }
 0x259   :  { %6765 = vst [vmem:[#allocation61_spill] sm:$0xff] %v5507_v23  ;;  %v5518_v50 = vpop.f32.mrf.mxu0  ;;  %v5523_v23 = vpop.permute.xlu2 %1427  ;;  %v1637_v57 = vadd.f32 %v1636_v9, %v1604_v38  ;;  %v1609_v54 = vmul.f32 %v1535_v18, %v5035_v25 }
 0x25a   :  { %6767 = vst [vmem:[#allocation63_spill] sm:$0xff] %v5513_v26  ;;  %v1564_v26 = vadd.f32 %v1563_v58, %v1531_v48  ;;  %v5528_v27 = vpop.permute.xlu0 %1432  ;;  %v5537_v38 = vpop.permute.xlu1 %1437 }
 0x25b   :  { %v1638_v51 = vadd.f32 %v1637_v57, %v1605_v53  ;;  %v1536_v57 = vmul.f32 %v5497_v56, %v5043_v41 }
 0x25c   :  { %v1565_v5 = vadd.f32 %v1564_v26, %v1532_v55 }
 0x25d   :  { %v1639_v9 = vadd.f32 %v1638_v51, %v1606_v8  ;;  %v2970_v51 = vmul.f32 %v5298_v30, %v5458_v11 }
 0x25e   :  { %v1566_v58 = vadd.f32 %v1565_v5, %v1533_v59  ;;  %v1610_v5 = vmul.f32 %v1536_v57, %v5043_v41  ;;  %v1538_v59 = vmul.f32 %v5511_v47, %v5082_v19 }
 0x25f   :  { %v5535_v29 = vpop.f32.mrf.mxu1  ;;  %v1640_v26 = vadd.f32 %v1639_v9, %v1607_v24  ;;  %v1611_v9 = vmul.f32 %v1537_v21, %v5068_v60  ;;  %v3044_v41 = vmul.f32 %v2970_v51, %v5298_v30 }
 0x260   :  { %v5533_v34 = vpop.f32.mrf.mxu2  ;;  %6769 = vst [vmem:[#allocation65_spill] sm:$0xff] %v5535_v29  ;;  %v5539_v48 = vpop.f32.mrf.mxu3  ;;  %v1567_v55 = vadd.f32 %v1566_v58, %v1534_v17  ;;  %v1539_v58 = vmul.f32 %v5523_v23, %v5095_v36 }
 0x261   :  { %6768 = vst [vmem:[#allocation64_spill] sm:$0xff] %v5533_v34  ;;  %v5544_v53 = vpop.f32.mrf.mxu0  ;;  %v5549_v29 = vpop.permute.xlu2 %1442  ;;  %v1641_v34 = vadd.f32 %v1640_v26, %v1608_v37  ;;  %v2969_v26 = vmul.f32 %v5294_v28, %v5450_v10 }
 0x262   :  { %6770 = vst [vmem:[#allocation66_spill] sm:$0xff] %v5539_v48  ;;  %v1568_v48 = vadd.f32 %v1567_v55, %v1535_v18  ;;  %v5554_v8 = vpop.permute.xlu0 %1447  ;;  %v5565_v18 = vpop.permute.xlu1 %1452  ;;  %v2971_v55 = vmul.f32 %v5311_v3, %v5452_v2  ;;  %v1613_v2 = vmul.f32 %v1539_v58, %v5095_v36  ;;  %v3046_v36 = vmul.f32 %v2972_v7, %v5315_v42 }
 0x263   :  { %v1642_v17 = vadd.f32 %v1641_v34, %v1609_v54 }
 0x264   :  { %v1569_v24 = vadd.f32 %v1568_v48, %v1536_v57  ;;  %v1612_v48 = vmul.f32 %v1538_v59, %v5082_v19  ;;  %v1540_v57 = vmul.f32 %v5528_v27, %v5111_v62  ;;  %v2973_v19 = vmul.f32 %v5328_v43, %v5454_v14 }
 0x265   :  { %v1643_v54 = vadd.f32 %v1642_v17, %v1610_v5  ;;  %v1541_v5 = vmul.f32 %v5537_v38, %v5134_v22  ;;  %v3043_v17 = vmul.f32 %v2969_v26, %v5294_v28  ;;  %v2974_v28 = vmul.f32 %v5332_v44, %v5464_v6 }
 0x266   :  { %v1570_v34 = vadd.f32 %v1569_v24, %v1537_v21  ;;  %v3045_v24 = vmul.f32 %v2971_v55, %v5311_v3  ;;  %v1614_v49 = vmul.f32 %v1540_v57, %v5111_v62  ;;  %v2975_v6 = vmul.f32 %v5345_v31, %v5466_v1 }
 0x267   :  { %v5563_v37 = vpop.f32.mrf.mxu1  ;;  %v1644_v10 = vadd.f32 %v1643_v54, %v1611_v9  ;;  %v3003_v54 = vadd.f32 %v2970_v51, %v2969_v26  ;;  %v1615_v14 = vmul.f32 %v1541_v5, %v5134_v22  ;;  %v3047_v26 = vmul.f32 %v2973_v19, %v5328_v43 }
 0x268   :  { %v5561_v25 = vpop.f32.mrf.mxu2  ;;  %6772 = vst [vmem:[#allocation68_spill] sm:$0xff] %v5563_v37  ;;  %v5571_v11 = vpop.f32.mrf.mxu3  ;;  %v3049_v43 = vmul.f32 %v2975_v6, %v5345_v31 }
 0x269   :  { %6771 = vst [vmem:[#allocation67_spill] sm:$0xff] %v5561_v25  ;;  %v5576_v60 = vpop.f32.mrf.mxu0  ;;  %v1571_v25 = vadd.f32 %v1570_v34, %v1538_v59  ;;  %v5584_v21 = vpop.permute.xlu2 %1457  ;;  %v1645_v30 = vadd.f32 %v1644_v10, %v1612_v48  ;;  %v1542_v59 = vmul.f32 %v5549_v29, %v5142_v45  ;;  %v3077_v34 = vadd.f32 %v3044_v41, %v3043_v17 }
 0x26a   :  { %6773 = vst [vmem:[#allocation69_spill] sm:$0xff] %v5571_v11  ;;  %v5593_v9 = vpop.permute.xlu0 %1462  ;;  %v5605_v10 = vpop.permute.xlu1 %1467  ;;  %v3004_v51 = vadd.f32 %v3003_v54, %v2971_v55  ;;  %v1544_v17 = vmul.f32 %v5565_v18, %v5161_v20  ;;  %v3048_v55 = vmul.f32 %v2974_v28, %v5332_v44 }
 0x26b   :  { %v1572_v11 = vadd.f32 %v1571_v25, %v1539_v58  ;;  %v1646_v3 = vadd.f32 %v1645_v30, %v1613_v2  ;;  %v1543_v25 = vmul.f32 %v5554_v8, %v5157_v0  ;;  %v3078_v41 = vadd.f32 %v3077_v34, %v3045_v24 }
 0x26c   :  { %v1616_v2 = vmul.f32 %v1542_v59, %v5142_v45  ;;  %v3005_v22 = vadd.f32 %v3004_v51, %v2972_v7  ;;  %v2976_v24 = vmul.f32 %v5349_v32, %v5468_v63  ;;  %v2977_v7 = vmul.f32 %v5362_v13, %v5472_v4 }
 0x26d   :  { %v1573_v37 = vadd.f32 %v1572_v11, %v1540_v57  ;;  %v1647_v11 = vadd.f32 %v1646_v3, %v1614_v49  ;;  %v3079_v62 = vadd.f32 %v3078_v41, %v3046_v36  ;;  %v1617_v34 = vmul.f32 %v1543_v25, %v5157_v0 }
 0x26e   :  { %v1545_v3 = vmul.f32 %v5584_v21, %v5175_v35  ;;  %v1618_v63 = vmul.f32 %v1544_v17, %v5161_v20  ;;  %v6783_v20 = vld [vmem:[#allocation52_spill] sm:$0xff] }
 0x26f   :  { %v5603_v48 = vpop.f32.mrf.mxu1  ;;  %v1574_v57 = vadd.f32 %v1573_v37, %v1541_v5  ;;  %v1648_v54 = vadd.f32 %v1647_v11, %v1615_v14  ;;  %v3006_v5 = vadd.f32 %v3005_v22, %v2973_v19  ;;  %v3080_v49 = vadd.f32 %v3079_v62, %v3047_v26 }
 0x270   :  { %v5601_v58 = vpop.f32.mrf.mxu2  ;;  %v5610_v30 = vpop.f32.mrf.mxu3  ;;  %v2978_v19 = vmul.f32 %v5366_v40, %v5476_v33  ;;  %v1619_v4 = vmul.f32 %v1545_v3, %v5175_v35  ;;  %v2979_v33 = vmul.f32 %v5385_v46, %v5484_v15 }
 0x271   :  { %v5615_v42 = vpop.f32.mrf.mxu0  ;;  %v1575_v1 = vadd.f32 %v1574_v57, %v1542_v59  ;;  %v5623_v37 = vpop.permute.xlu2 %1472  ;;  %v1649_v36 = vadd.f32 %v1648_v54, %v1616_v2  ;;  %v1546_v59 = vmul.f32 %v5593_v9, %v5179_v61  ;;  %v3007_v41 = vadd.f32 %v3006_v5, %v2974_v28 }
 0x272   :  { %v5631_v14 = vpop.permute.xlu0 %1477  ;;  %v3081_v11 = vadd.f32 %v3080_v49, %v3048_v55  ;;  %v3050_v57 = vmul.f32 %v2976_v24, %v5349_v32  ;;  %v5643_v54 = vpop.permute.xlu1 %1482 }
 0x273   :  { %v1576_v51 = vadd.f32 %v1575_v1, %v1543_v25  ;;  %v1650_v62 = vadd.f32 %v1649_v36, %v1617_v34  ;;  %v1547_v25 = vmul.f32 %v5605_v10, %v5192_v16  ;;  %v3008_v28 = vadd.f32 %v3007_v41, %v2975_v6  ;;  %v6774_v6 = vld [vmem:[#allocation47_spill] sm:$0xff] }
 0x274   :  { %v3082_v55 = vadd.f32 %v3081_v11, %v3049_v43  ;;  %v3051_v1 = vmul.f32 %v2977_v7, %v5362_v13  ;;  %v1620_v49 = vmul.f32 %v1546_v59, %v5179_v61  ;;  %v1548_v36 = vmul.f32 %v5623_v37, %v5196_v39 }
 0x275   :  { %v1577_v22 = vadd.f32 %v1576_v51, %v1544_v17  ;;  %v1651_v17 = vadd.f32 %v1650_v62, %v1618_v63  ;;  %v3009_v32 = vadd.f32 %v3008_v28, %v2976_v24  ;;  %v3052_v43 = vmul.f32 %v2978_v19, %v5366_v40  ;;  %v6775_v63 = vld [vmem:[#allocation26_spill] sm:$0xff]  ;;  %v6776_v24 = vld [vmem:[#allocation48_spill] sm:$0xff] }
 0x276   :  { %v3083_v31 = vadd.f32 %v3082_v55, %v3050_v57  ;;  %v2980_v41 = vmul.f32 %v6774_v6, %v5497_v56  ;;  %v1621_v13 = vmul.f32 %v1547_v25, %v5192_v16  ;;  %v3053_v61 = vmul.f32 %v2979_v33, %v5385_v46 }
 0x277   :  { %v5641_v2 = vpop.f32.mrf.mxu1  ;;  %v1578_v5 = vadd.f32 %v1577_v22, %v1545_v3  ;;  %v1652_v11 = vadd.f32 %v1651_v17, %v1619_v4  ;;  %v1549_v3 = vmul.f32 %v5631_v14, %v6775_v63  ;;  %v3010_v22 = vadd.f32 %v3009_v32, %v2977_v7  ;;  %v6777_v4 = vld [vmem:[#allocation27_spill] sm:$0xff]  ;;  %v6778_v32 = vld [vmem:[#allocation49_spill] sm:$0xff] }
 0x278   :  { %v5639_v26 = vpop.f32.mrf.mxu2  ;;  %v5648_v34 = vpop.f32.mrf.mxu3  ;;  %v3084_v44 = vadd.f32 %v3083_v31, %v3051_v1  ;;  %v2981_v57 = vmul.f32 %v6776_v24, %v5502_v52  ;;  %v1622_v56 = vmul.f32 %v1548_v36, %v5196_v39  ;;  %v3054_v16 = vmul.f32 %v2980_v41, %v6774_v6 }
 0x279   :  { %v5653_v51 = vpop.f32.mrf.mxu0  ;;  %v1579_v15 = vadd.f32 %v1578_v5, %v1546_v59  ;;  %v5661_v62 = vpop.permute.xlu2 %1487  ;;  %v1653_v28 = vadd.f32 %v1652_v11, %v1620_v49  ;;  %v1550_v59 = vmul.f32 %v5643_v54, %v6777_v4  ;;  %v3011_v5 = vadd.f32 %v3010_v22, %v2978_v19  ;;  %v6779_v49 = vld [vmem:[#allocation28_spill] sm:$0xff] }
 0x27a   :  { %v5669_v17 = vpop.permute.xlu0 %1492  ;;  %v3085_v40 = vadd.f32 %v3084_v44, %v3052_v43  ;;  %v2982_v31 = vmul.f32 %v6778_v32, %v5511_v47  ;;  %v1623_v52 = vmul.f32 %v1549_v3, %v6775_v63  ;;  %v5681_v46 = vpop.permute.xlu1 %1497  ;;  %v3055_v43 = vmul.f32 %v2981_v57, %v6776_v24 }
 0x27b   :  { %v1580_v55 = vadd.f32 %v1579_v15, %v1547_v25  ;;  %v1654_v7 = vadd.f32 %v1653_v28, %v1621_v13  ;;  %v1551_v25 = vmul.f32 %v5661_v62, %v6779_v49  ;;  %v3012_v19 = vadd.f32 %v3011_v5, %v2979_v33 }
 0x27c   :  { %v3086_v44 = vadd.f32 %v3085_v40, %v3053_v61  ;;  %v2983_v47 = vmul.f32 %v5432_v12, %v5523_v23  ;;  %v1624_v28 = vmul.f32 %v1550_v59, %v6777_v4  ;;  %v3056_v61 = vmul.f32 %v2982_v31, %v6778_v32  ;;  %v6781_v40 = vld [vmem:[#allocation51_spill] sm:$0xff] }
 0x27d   :  { %v1581_v1 = vadd.f32 %v1580_v55, %v1548_v36  ;;  %v1655_v36 = vadd.f32 %v1654_v7, %v1622_v56  ;;  %v6780_v55 = vld [vmem:[#allocation29_spill] sm:$0xff]  ;;  %v3013_v39 = vadd.f32 %v3012_v19, %v2980_v41  ;;  %v2984_v33 = vmul.f32 %v6781_v40, %v5528_v27  ;;  %v6782_v56 = vld [vmem:[#allocation30_spill] sm:$0xff] }
 0x27e   :  { %v1552_v6 = vmul.f32 %v5669_v17, %v6780_v55  ;;  %v3087_v35 = vadd.f32 %v3086_v44, %v3054_v16  ;;  %v1625_v24 = vmul.f32 %v1551_v25, %v6779_v49  ;;  %v3057_v4 = vmul.f32 %v2983_v47, %v5432_v12 }
 0x27f   :  { %v5679_v15 = vpop.f32.mrf.mxu1  ;;  %v1582_v22 = vadd.f32 %v1581_v1, %v1549_v3  ;;  %v1656_v5 = vadd.f32 %v1655_v36, %v1623_v52  ;;  %v1553_v3 = vmul.f32 %v5681_v46, %v6782_v56  ;;  %v3014_v7 = vadd.f32 %v3013_v39, %v2981_v57  ;;  %v6784_v36 = vld [vmem:[#allocation53_spill] sm:$0xff] }
 0x280   :  { %v5677_v11 = vpop.f32.mrf.mxu2  ;;  %v5686_v13 = vpop.f32.mrf.mxu3  ;;  %v3088_v1 = vadd.f32 %v3087_v35, %v3055_v43  ;;  %v2985_v41 = vmul.f32 %v6783_v20, %v5537_v38  ;;  %v1626_v44 = vmul.f32 %v1552_v6, %v6780_v55  ;;  %v3058_v52 = vmul.f32 %v2984_v33, %v6781_v40 }
 0x281   :  { %v5691_v63 = vpop.f32.mrf.mxu0  ;;  %v1583_v23 = vadd.f32 %v1582_v22, %v1550_v59  ;;  %v1657_v16 = vadd.f32 %v1656_v5, %v1624_v28  ;;  %v5703_v32 = vpop.permute.xlu2 %1502  ;;  %v3015_v27 = vadd.f32 %v3014_v7, %v2982_v31  ;;  %v2986_v22 = vmul.f32 %v6784_v36, %v5549_v29  ;;  %v6785_v31 = vld [vmem:[#allocation54_spill] sm:$0xff] }
 0x282   :  { %v3089_v59 = vadd.f32 %v3088_v1, %v3056_v61  ;;  %v1627_v57 = vmul.f32 %v1553_v3, %v6782_v56  ;;  %v3059_v5 = vmul.f32 %v2985_v41, %v6783_v20  ;;  %v2987_v61 = vmul.f32 %v6785_v31, %v5554_v8  ;;  %v6786_v1 = vld [vmem:[#allocation31_spill] sm:$0xff] }
 0x283   :  { %v1584_v19 = vadd.f32 %v1583_v23, %v1551_v25  ;;  %v1658_v39 = vadd.f32 %v1657_v16, %v1625_v24  ;;  %v3016_v25 = vadd.f32 %v3015_v27, %v2983_v47  ;;  %v1554_v29 = vmul.f32 %v5703_v32, %v6786_v1  ;;  %v6788_v24 = vld [vmem:[#allocation58_spill] sm:$0xff] }
 0x284   :  { %v3090_v28 = vadd.f32 %v3089_v59, %v3057_v4  ;;  %v3060_v27 = vmul.f32 %v2986_v22, %v6784_v36  ;;  %v6790_v59 = vld [vmem:[#allocation55_spill] sm:$0xff] }
 0x285   :  { %v1585_v35 = vadd.f32 %v1584_v19, %v1552_v6  ;;  %v1659_v7 = vadd.f32 %v1658_v39, %v1626_v44  ;;  %v6787_v6 = vld [vmem:[#allocation59_spill] sm:$0xff]  ;;  %v6789_v19 = vld [vmem:[#allocation62_spill] sm:$0xff]  ;;  %v3017_v47 = vadd.f32 %v3016_v25, %v2984_v33  ;;  %v2988_v8 = vmul.f32 %v6790_v59, %v5565_v18  ;;  %v5727_v44 = vpop.permute.xlu0 %1507  ;;  %v6791_v39 = vld [vmem:[#allocation61_spill] sm:$0xff] }
 0x286   :  { %v2215_v16 = vadd.f32 %v6788_v24, %v6787_v6  ;;  %v2218_v40 = vadd.f32 %v6789_v19, %v5518_v50  ;;  %v3091_v4 = vadd.f32 %v3090_v28, %v3058_v52  ;;  %v3061_v6 = vmul.f32 %v2987_v61, %v6785_v31  ;;  %v6792_v50 = vld [vmem:[#allocation56_spill] sm:$0xff]  ;;  %v6794_v28 = vld [vmem:[#allocation65_spill] sm:$0xff] }
 0x287   :  { %v5711_v38 = vpop.f32.mrf.mxu1  ;;  %v1586_v20 = vadd.f32 %v1585_v35, %v1553_v3  ;;  %v1660_v56 = vadd.f32 %v1659_v7, %v1627_v57  ;;  %v3018_v49 = vadd.f32 %v3017_v47, %v2985_v41  ;;  %v2989_v24 = vmul.f32 %v6792_v50, %v5584_v21  ;;  %v6793_v52 = vld [vmem:[#allocation64_spill] sm:$0xff]  ;;  %v6797_v21 = vld [vmem:[#allocation57_spill] sm:$0xff] }
 0x288   :  { %v5709_v43 = vpop.f32.mrf.mxu2  ;;  %v5716_v23 = vpop.f32.mrf.mxu3  ;;  %v2689_v55 = vadd.f32 %v6791_v39, %v2215_v16  ;;  %v3092_v0 = vadd.f32 %v3091_v4, %v3059_v5  ;;  %v1628_v33 = vmul.f32 %v1554_v29, %v6786_v1  ;;  %v2690_v25 = vadd.f32 %v6793_v52, %v2218_v40  ;;  %v6795_v3 = vld [vmem:[#allocation68_spill] sm:$0xff]  ;;  %v6798_v4 = vld [vmem:[#allocation63_spill] sm:$0xff] }
 0x289   :  { %v2092_v12 = vpop.f32.mrf.mxu0  ;;  %v2220_v18 = vadd.f32 %v6794_v28, %v5544_v53  ;;  %v2223_v35 = vadd.f32 %v6795_v3, %v5576_v60  ;;  %v6796_v57 = vld [vmem:[#allocation32_spill] sm:$0xff]  ;;  %v3019_v41 = vadd.f32 %v3018_v49, %v2986_v22  ;;  %v3062_v16 = vmul.f32 %v2988_v8, %v6790_v59  ;;  %v6800_v40 = vld [vmem:[#allocation67_spill] sm:$0xff] }
 0x28a   :  { %v1555_v7 = vmul.f32 %v5727_v44, %v6796_v57  ;;  %v3093_v5 = vadd.f32 %v3092_v0, %v3060_v27  ;;  %v1587_v19 = vadd.f32 %v1586_v20, %v1554_v29  ;;  %v2990_v47 = vmul.f32 %v6797_v21, %v5593_v9  ;;  %v6801_v49 = vld [vmem:[#allocation60_spill] sm:$0xff]  ;;  %v5753_v20 = vpop.permute.xlu1 %1512  ;;  %v6802_v29 = vld [vmem:[#allocation66_spill] sm:$0xff] }
 0x28b   :  { %v5745_v39 = vadd.f32 %v6798_v4, %v2689_v55  ;;  %v2691_v52 = vadd.f32 %v6800_v40, %v2220_v18  ;;  %v3020_v31 = vadd.f32 %v3019_v41, %v2987_v61  ;;  %v3063_v3 = vmul.f32 %v2989_v24, %v6792_v50  ;;  %v6804_v40 = vld [vmem:[#allocation69_spill] sm:$0xff] }
 0x28c   :  { %v3094_v60 = vadd.f32 %v3093_v5, %v3061_v6  ;;  %v2991_v0 = vmul.f32 %v6801_v49, %v5605_v10  ;;  %v5756_v9 = vadd.f32 %v6802_v29, %v2690_v25  ;;  %v2692_v55 = vadd.f32 %v5601_v58, %v2223_v35 }
 0x28d   :  { %6799 = vst [vmem:[#allocation31_spill] sm:$0xff] %v5745_v39  ;;  %v2225_v27 = vadd.f32 %v5603_v48, %v5615_v42  ;;  %v2228_v61 = vadd.f32 %v5641_v2, %v5653_v51  ;;  %v1661_v18 = vadd.f32 %v1660_v56, %v1628_v33  ;;  %v1629_v41 = vmul.f32 %v1555_v7, %v6796_v57  ;;  %v6806_v48 = vld [vmem:[#allocation33_spill] sm:$0xff]  ;;  %v5773_v33 = vpop.permute.xlu2 %1517 }
 0x28e   :  { %6803 = vst [vmem:[#allocation59_spill] sm:$0xff] %v5756_v9  ;;  %v3021_v10 = vadd.f32 %v3020_v31, %v2988_v8  ;;  %v3095_v5 = vadd.f32 %v3094_v60, %v3062_v16  ;;  %v3064_v4 = vmul.f32 %v2990_v47, %v6797_v21  ;;  %v2992_v25 = vmul.f32 %v5745_v39, %v5623_v37 }
 0x28f   :  { %v2234_v28 = vpop.f32.mrf.mxu1  ;;  %v5768_v29 = vadd.f32 %v6804_v40, %v2691_v52  ;;  %v2693_v58 = vadd.f32 %v5639_v26, %v2225_v27  ;;  %v1588_v42 = vadd.f32 %v1587_v19, %v1555_v7  ;;  %v1556_v2 = vmul.f32 %v5753_v20, %v6806_v48 }
 0x290   :  { %v2656_v53 = vpop.f32.mrf.mxu2  ;;  %v5751_v22 = vpop.f32.mrf.mxu3  ;;  %v3022_v51 = vadd.f32 %v3021_v10, %v2989_v24  ;;  %v3096_v56 = vadd.f32 %v3095_v5, %v3063_v3  ;;  %v3065_v31 = vmul.f32 %v2991_v0, %v6801_v49  ;;  %v2993_v8 = vmul.f32 %v5756_v9, %v5631_v14 }
 0x291   :  { %v2094_v6 = vpop.f32.mrf.mxu0  ;;  %6805 = vst [vmem:[#allocation58_spill] sm:$0xff] %v5768_v29  ;;  %v5779_v37 = vadd.f32 %v5610_v30, %v2692_v55  ;;  %v2694_v35 = vadd.f32 %v5677_v11, %v2228_v61  ;;  %v1662_v16 = vadd.f32 %v1661_v18, %v1629_v41  ;;  %v2230_v7 = vadd.f32 %v5679_v15, %v5691_v63  ;;  %v6809_v55 = vld [vmem:[#allocation34_spill] sm:$0xff] }
 0x292   :  { %v3023_v26 = vadd.f32 %v3022_v51, %v2990_v47  ;;  %v2233_v24 = vadd.f32 %v5711_v38, %v2092_v12  ;;  %v3097_v19 = vadd.f32 %v3096_v56, %v3064_v4  ;;  %v3066_v52 = vmul.f32 %v2992_v25, %v5745_v39  ;;  %v5793_v47 = vpop.permute.xlu0 %1522 }
 0x293   :  { %6807 = vst [vmem:[#allocation62_spill] sm:$0xff] %v5779_v37  ;;  %v2994_v60 = vmul.f32 %v5768_v29, %v5643_v54  ;;  %v5789_v14 = vadd.f32 %v5648_v34, %v2693_v58  ;;  %v1589_v3 = vadd.f32 %v1588_v42, %v1556_v2  ;;  %v1557_v11 = vmul.f32 %v5773_v33, %v6809_v55 }
 0x294   :  { %v3024_v27 = vadd.f32 %v3023_v26, %v2991_v0  ;;  %v2695_v63 = vadd.f32 %v5709_v43, %v2230_v7  ;;  %v3098_v15 = vadd.f32 %v3097_v19, %v3065_v31  ;;  %v3067_v38 = vmul.f32 %v2993_v8, %v5756_v9  ;;  %v6811_v0 = vld [vmem:[#allocation35_spill] sm:$0xff] }
 0x295   :  { %6808 = vst [vmem:[#allocation61_spill] sm:$0xff] %v5789_v14  ;;  %v2995_v54 = vmul.f32 %v5779_v37, %v5661_v62  ;;  %v5800_v34 = vadd.f32 %v5686_v13, %v2694_v35  ;;  %v1630_v41 = vmul.f32 %v1556_v2, %v6806_v48  ;;  %v2696_v5 = vadd.f32 %v2656_v53, %v2233_v24 }
 0x296   :  { %v3025_v10 = vadd.f32 %v3024_v27, %v2992_v25  ;;  %v2235_v4 = vadd.f32 %v2234_v28, %v2094_v6  ;;  %v1558_v43 = vmul.f32 %v5793_v47, %v6811_v0  ;;  %v3099_v40 = vadd.f32 %v3098_v15, %v3066_v52 }
 0x297   :  { %6810 = vst [vmem:[#allocation64_spill] sm:$0xff] %v5800_v34  ;;  %v2237_v18 = vpop.f32.mrf.mxu1  ;;  %v3068_v58 = vmul.f32 %v2994_v60, %v5768_v29  ;;  %v2996_v42 = vmul.f32 %v5789_v14, %v5669_v17  ;;  %v5809_v13 = vadd.f32 %v5716_v23, %v2695_v63  ;;  %v1631_v2 = vmul.f32 %v1557_v11, %v6809_v55 }
 0x298   :  { %v2658_v30 = vpop.f32.mrf.mxu2  ;;  %v2892_v12 = vpop.f32.mrf.mxu3  ;;  %v3026_v62 = vadd.f32 %v3025_v10, %v2993_v8  ;;  %v3100_v25 = vadd.f32 %v3099_v40, %v3067_v38  ;;  %v3069_v53 = vmul.f32 %v2995_v54, %v5779_v37  ;;  %v2997_v28 = vmul.f32 %v5800_v34, %v5681_v46 }
 0x299   :  { %v2097_v61 = vpop.f32.mrf.mxu0  ;;  %6812 = vst [vmem:[#allocation65_spill] sm:$0xff] %v5809_v13  ;;  %v2697_v51 = vadd.f32 %v2658_v30, %v2235_v4  ;;  %v1663_v6 = vadd.f32 %v1662_v16, %v1630_v41  ;;  %v5816_v35 = vadd.f32 %v5751_v22, %v2696_v5  ;;  %v1590_v17 = vadd.f32 %v1589_v3, %v1557_v11 }
 0x29a   :  { %v2238_v56 = vadd.f32 %v2237_v18, %v2097_v61  ;;  %v3027_v31 = vadd.f32 %v3026_v62, %v2994_v60  ;;  %v1632_v8 = vmul.f32 %v1558_v43, %v6811_v0  ;;  %v3101_v23 = vadd.f32 %v3100_v25, %v3068_v58 }
 0x29b   :  { %6813 = vst [vmem:[#allocation68_spill] sm:$0xff] %v5816_v35  ;;  %v3070_v26 = vmul.f32 %v2996_v42, %v5789_v14  ;;  %v2998_v19 = vmul.f32 %v5809_v13, %v5703_v32  ;;  %v5822_v52 = vadd.f32 %v2892_v12, %v2697_v51  ;;  %v1664_v16 = vadd.f32 %v1663_v6, %v1631_v2 }
 0x29c   :  { %v3028_v24 = vadd.f32 %v3027_v31, %v2995_v54  ;;  %v1591_v60 = vadd.f32 %v1590_v17, %v1558_v43  ;;  %v3102_v27 = vadd.f32 %v3101_v23, %v3069_v53  ;;  %v3071_v22 = vmul.f32 %v2997_v28, %v5800_v34 }
 0x29d   :  { %6814 = vst [vmem:[#allocation32_spill] sm:$0xff] %v5822_v52  ;;  %v2999_v11 = vmul.f32 %v5816_v35, %v5727_v44  ;;  %v1665_v15 = vadd.f32 %v1664_v16, %v1632_v8  ;;  %v3072_v12 = vmul.f32 %v2998_v19, %v5809_v13  ;;  %v3000_v18 = vmul.f32 %v5822_v52, %v5753_v20 }
 0x29e   :  { %v3029_v3 = vadd.f32 %v3028_v24, %v2996_v42  ;;  %v3103_v38 = vadd.f32 %v3102_v27, %v3070_v26  ;;  %v1592_v41 = vrot.slane %v1591_v60, 4 }
 0x29f   :  { %v2239_v61 = vpop.f32.mrf.mxu1  ;;  %v3073_v4 = vmul.f32 %v2999_v11, %v5816_v35  ;;  %v1666_v40 = vrot.slane %v1665_v15, 4  ;;  %v3074_v51 = vmul.f32 %v3000_v18, %v5822_v52 }
 0x2a0   :  { %v2661_v7 = vpop.f32.mrf.mxu2  ;;  %v2895_v46 = vpop.f32.mrf.mxu3  ;;  %v3030_v32 = vadd.f32 %v3029_v3, %v2997_v28  ;;  %v3104_v10 = vadd.f32 %v3103_v38, %v3071_v22  ;;  %v1593_v2 = vadd.f32 %v1592_v41, %v1591_v60 }
 0x2a1   :  { %v2698_v30 = vadd.f32 %v2661_v7, %v2238_v56  ;;  %v2099_v54 = vpop.f32.mrf.mxu0  ;;  %v1667_v31 = vadd.f32 %v1666_v40, %v1665_v15 }
 0x2a2   :  { %v3031_v5 = vadd.f32 %v3030_v32, %v2998_v19  ;;  %v2240_v43 = vadd.f32 %v2239_v61, %v2099_v54  ;;  %v3105_v42 = vadd.f32 %v3104_v10, %v3072_v12  ;;  %v1594_v23 = vrot.slane %v1593_v2, 2 }
 0x2a3   :  { %v5827_v63 = vadd.f32 %v2895_v46, %v2698_v30  ;;  %v1668_v19 = vrot.slane %v1667_v31, 2 }
 0x2a4   :  { %v3032_v62 = vadd.f32 %v3031_v5, %v2999_v11  ;;  %v3106_v53 = vadd.f32 %v3105_v42, %v3073_v4  ;;  %v1595_v16 = vadd.f32 %v1594_v23, %v1593_v2  ;;  %v3134_v23 = vld [vmem:[%s6622_s4] sm:$0x1] }
 0x2a5   :  { %v3001_v44 = vmul.f32 %v5827_v63, %v5773_v33  ;;  %v1669_v22 = vadd.f32 %v1668_v19, %v1667_v31  ;;  %v6816_v19 = vld [vmem:[#allocation4_spill] sm:$0xff] }
 0x2a6   :  { %v3033_v20 = vadd.f32 %v3032_v62, %v3000_v18  ;;  %v3107_v17 = vadd.f32 %v3106_v53, %v3074_v51  ;;  %v1596_v15 = vrot.slane %v1595_v16, 1 }
 0x2a7   :  { %v3075_v28 = vmul.f32 %v3001_v44, %v5827_v63  ;;  %v1670_v61 = vrot.slane %v1669_v22, 1 }
 0x2a8   :  { %v2663_v58 = vpop.f32.mrf.mxu2  ;;  %v2897_v25 = vpop.f32.mrf.mxu3  ;;  %v3034_v8 = vadd.f32 %v3033_v20, %v3001_v44  ;;  %v1597_v12 = vadd.f32 %v1596_v15, %v1595_v16 }
 0x2a9   :  { %v2699_v56 = vadd.f32 %v2663_v58, %v2240_v43  ;;  %v3108_v26 = vadd.f32 %v3107_v17, %v3075_v28  ;;  %v1671_v10 = vadd.f32 %v1670_v61, %v1669_v22  ;;  %v3121_v28 = vld [vmem:[%s6621_s3] sm:$0x1]  ;;  %v6822_v61 = vld [vmem:[#allocation10_spill] sm:$0xff] }
 0x2aa   :  { %v6819_v22 = vld [vmem:[#allocation7_spill] sm:$0xff] }
 0x2ab   :  { %v5837_v6 = vadd.f32 %v2897_v25, %v2699_v56 }
 0x2ad   :  { %v3002_v33 = vmul.f32 %v5837_v6, %v5793_v47 }
 0x2af   :  { %v3035_v7 = vadd.f32 %v3034_v8, %v3002_v33  ;;  %v3076_v24 = vmul.f32 %v3002_v33, %v5837_v6 }
 0x2b1   :  { %v3036_v30 = vrot.slane %v3035_v7, 4  ;;  %v3109_v46 = vadd.f32 %v3108_v26, %v3076_v24 }
 0x2b3   :  { %v3037_v60 = vadd.f32 %v3036_v30, %v3035_v7  ;;  %v3110_v27 = vrot.slane %v3109_v46, 4  ;;  %v6815_v7 = vld [vmem:[#allocation3_spill] sm:$0xff] }
 0x2b5   :  { %v3038_v3 = vrot.slane %v3037_v60, 2  ;;  %v3111_v11 = vadd.f32 %v3110_v27, %v3109_v46  ;;  %v6817_v46 = vld [vmem:[#allocation5_spill] sm:$0xff] }
 0x2b7   :  { %v3039_v38 = vadd.f32 %v3038_v3, %v3037_v60  ;;  %v3112_v54 = vrot.slane %v3111_v11, 2  ;;  %v6818_v60 = vld [vmem:[#allocation6_spill] sm:$0xff] }
 0x2b9   :  { %v3040_v32 = vrot.slane %v3039_v38, 1  ;;  %v3113_v47 = vadd.f32 %v3112_v54, %v3111_v11  ;;  %v6820_v11 = vld [vmem:[#allocation8_spill] sm:$0xff] }
 0x2bb   :  { %v3041_v18 = vadd.f32 %v3040_v32, %v3039_v38  ;;  %v3114_v41 = vrot.slane %v3113_v47, 1  ;;  %v6821_v38 = vld [vmem:[#allocation9_spill] sm:$0xff] }
 0x2bd   :  { %v3042_v5 = vadd.f32 %v3041_v18, %v1597_v12  ;;  %v3115_v4 = vadd.f32 %v3114_v41, %v3113_v47  ;;  %v6823_v47 = vld [vmem:[#allocation11_spill] sm:$0xff]  ;;  %v6824_v18 = vld [vmem:[#allocation12_spill] sm:$0xff] }
 0x2bf   :  { %v3116_v44 = vadd.f32 %v3115_v4, %v1671_v10  ;;  %v3117_v43 = vmul.f32 0.001953125, %v3042_v5  ;;  %v6825_v10 = vld [vmem:[#allocation13_spill] sm:$0xff]  ;;  %v6826_v4 = vld [vmem:[#allocation14_spill] sm:$0xff] }
 0x2c1   :  { %v3118_v40 = vmul.f32 0.001953125, %v3116_v44  ;;  %v3119_v58 = vmul.f32 %v3117_v43, %v3117_v43 }
 0x2c3   :  { %v3120_v42 = vsub.f32 %v3118_v40, %v3119_v58  ;;  %v6828_v58 = vld [vmem:[#allocation16_spill] sm:$0xff] }
 0x2c5   :  { %v3122_v62 = vadd.f32 1e-05, %v3120_v42 }
 0x2c7   :  { %4582 = vrsqrt.f32 %v3122_v62  ;;  %vm3129_vm4 = vweird.f32 %v3122_v62 }
 0x2cd   :  { %v4583_v51 = vpop.eup %4582 }
 0x2ce   :  { %v3124_v56 = vmul.f32 %v4583_v51, %v3122_v62  ;;  %vm3130_vm3 = vweird.f32 %v4583_v51  ;;  %v6829_v62 = vld [vmem:[#allocation17_spill] sm:$0xff] }
 0x2cf   :  { %vm3131_vm5 = vmor %vm3129_vm4, %vm3130_vm3 }
 0x2d0   :  { %v3125_v2 = vmul.f32 %v4583_v51, %v3124_v56  ;;  %v6830_v56 = vld [vmem:[#allocation18_spill] sm:$0xff] }
 0x2d2   :  { %v3126_v25 = vmul.f32 0.5, %v3125_v2 }
 0x2d4   :  { %v3127_v53 = vsub.f32 1.5, %v3126_v25  ;;  %v6831_v25 = vld [vmem:[#allocation19_spill] sm:$0xff] }
 0x2d6   :  { %v3128_v20 = vmul.f32 %v4583_v51, %v3127_v53 }
 0x2d8   :  { %v3132_v31 = vsel %vm3131_vm5, %v4583_v51, %v3128_v20 }
 0x2d9   :  { %v3133_v17 = vmul.f32 %v3132_v31, %v3121_v28  ;;  %v6832_v28 = vld [vmem:[#allocation20_spill] sm:$0xff] }
 0x2db   :  { %v3135_v8 = vmul.f32 %v3133_v17, %v3117_v43  ;;  %v5845_v33 = vperm.slane %v3133_v17, 0  ;;  %v6827_v43 = vld [vmem:[#allocation15_spill] sm:$0xff]  ;;  %v6833_v17 = vld [vmem:[#allocation21_spill] sm:$0xff] }
 0x2dd   :  { %v3136_v26 = vsub.f32 %v3134_v23, %v3135_v8  ;;  %v3174_v24 = vmul.f32 %v5845_v33, %v6815_v7  ;;  %v3175_v30 = vmul.f32 %v5845_v33, %v6816_v19  ;;  %v3176_v16 = vmul.f32 %v5845_v33, %v6817_v46  ;;  %v6835_v7 = vld [vmem:[#allocation22_spill] sm:$0xff]  ;;  %v6836_v46 = vld [vmem:[#allocation23_spill] sm:$0xff] }
 0x2de   :  { %v3177_v27 = vmul.f32 %v5845_v33, %v6818_v60  ;;  %v3178_v3 = vmul.f32 %v5845_v33, %v6819_v22  ;;  %v3179_v15 = vmul.f32 %v5845_v33, %v6820_v11  ;;  %v3180_v54 = vmul.f32 %v5845_v33, %v6821_v38  ;;  %v6837_v22 = vld [vmem:[#allocation24_spill] sm:$0xff]  ;;  %v6838_v38 = vld [vmem:[#allocation25_spill] sm:$0xff] }
 0x2df   :  { %v3181_v32 = vmul.f32 %v5845_v33, %v6822_v61  ;;  %v3182_v12 = vmul.f32 %v5845_v33, %v6823_v47  ;;  %v3183_v41 = vmul.f32 %v5845_v33, %v6824_v18  ;;  %v3184_v5 = vmul.f32 %v5845_v33, %v6825_v10  ;;  %v6839_v61 = vld [vmem:[#allocation26_spill] sm:$0xff]  ;;  %v6840_v18 = vld [vmem:[#allocation27_spill] sm:$0xff] }
 0x2e0   :  { %v3185_v44 = vmul.f32 %v5845_v33, %v6826_v4  ;;  %v3186_v40 = vmul.f32 %v5845_v33, %v6827_v43  ;;  %v3187_v42 = vmul.f32 %v5845_v33, %v6828_v58  ;;  %v3188_v51 = vmul.f32 %v5845_v33, %v6829_v62  ;;  %v6842_v43 = vld [vmem:[#allocation29_spill] sm:$0xff]  ;;  %v6843_v62 = vld [vmem:[#allocation30_spill] sm:$0xff] }
 0x2e1   :  { %v3189_v2 = vmul.f32 %v5845_v33, %v6830_v56  ;;  %v3190_v53 = vmul.f32 %v5845_v33, %v6831_v25  ;;  %v3191_v20 = vmul.f32 %v5845_v33, %v5142_v45  ;;  %v3192_v31 = vmul.f32 %v5845_v33, %v6832_v28 }
 0x2e2   :  { %v3193_v8 = vmul.f32 %v5845_v33, %v6833_v17  ;;  %v5890_v23 = vperm.slane %v3136_v26, 0  ;;  %v3194_v19 = vmul.f32 %v5845_v33, %v6835_v7  ;;  %v3195_v60 = vmul.f32 %v5845_v33, %v6836_v46  ;;  %v6841_v26 = vld [vmem:[#allocation28_spill] sm:$0xff] }
 0x2e3   :  { %v3196_v11 = vmul.f32 %v5845_v33, %v6837_v22  ;;  %v3197_v45 = vmul.f32 %v5845_v33, %v6838_v38  ;;  %v3198_v47 = vmul.f32 %v5845_v33, %v6839_v61  ;;  %v3199_v10 = vmul.f32 %v5845_v33, %v6840_v18 }
 0x2e4   :  { %6834 = vst [vmem:[#allocation63_spill] sm:$0xff] %v5890_v23  ;;  %v3200_v4 = vmul.f32 %v5845_v33, %v6841_v26  ;;  %v3201_v58 = vmul.f32 %v5845_v33, %v6842_v43  ;;  %v3202_v56 = vmul.f32 %v5845_v33, %v6843_v62  ;;  %v3203_v25 = vmul.f32 %v5845_v33, %v6786_v1 }
 0x2e5   :  { %v3204_v28 = vmul.f32 %v5845_v33, %v6796_v57  ;;  %v3205_v17 = vmul.f32 %v5845_v33, %v6806_v48  ;;  %v3206_v7 = vmul.f32 %v5845_v33, %v6809_v55  ;;  %v3207_v46 = vmul.f32 %v5845_v33, %v6811_v0 }
 0x2e6   :  { %v3211_v22 = vadd.f32 %v5890_v23, %v3174_v24  ;;  %v5922_v38 = vadd.f32 %v5890_v23, %v3175_v30  ;;  %v5925_v61 = vadd.f32 %v5890_v23, %v3176_v16  ;;  %v5928_v1 = vadd.f32 %v5890_v23, %v3177_v27 }
 0x2e7   :  { %v5931_v57 = vadd.f32 %v5890_v23, %v3178_v3  ;;  %v5934_v48 = vadd.f32 %v5890_v23, %v3179_v15  ;;  %v5937_v55 = vadd.f32 %v5890_v23, %v3180_v54  ;;  %v5940_v0 = vadd.f32 %v5890_v23, %v3181_v32 }
 0x2e8   :  { %v5943_v24 = vadd.f32 %v5890_v23, %v3182_v12  ;;  %v5946_v30 = vadd.f32 %v5890_v23, %v3183_v41  ;;  %v5949_v16 = vadd.f32 %v5890_v23, %v3184_v5  ;;  %v5952_v27 = vadd.f32 %v5890_v23, %v3185_v44 }
 0x2e9   :  { %v5955_v3 = vadd.f32 %v5890_v23, %v3186_v40  ;;  %v5958_v15 = vadd.f32 %v5890_v23, %v3187_v42  ;;  %v5961_v54 = vadd.f32 %v5890_v23, %v3188_v51  ;;  %v5964_v32 = vadd.f32 %v5890_v23, %v3189_v2 }
 0x2ea   :  { %v5967_v12 = vadd.f32 %v5890_v23, %v3190_v53  ;;  %v5970_v41 = vadd.f32 %v5890_v23, %v3191_v20  ;;  %v5973_v5 = vadd.f32 %v5890_v23, %v3192_v31  ;;  %v5976_v44 = vadd.f32 %v5890_v23, %v3193_v8 }
 0x2eb   :  { %v5979_v40 = vadd.f32 %v5890_v23, %v3194_v19  ;;  %v5982_v42 = vadd.f32 %v5890_v23, %v3195_v60  ;;  %v5985_v51 = vadd.f32 %v5890_v23, %v3196_v11  ;;  %v5988_v2 = vadd.f32 %v5890_v23, %v3197_v45 }
 0x2ec   :  { %v5991_v53 = vadd.f32 %v5890_v23, %v3198_v47  ;;  %v5994_v20 = vadd.f32 %v5890_v23, %v3199_v10  ;;  %v5997_v31 = vadd.f32 %v5890_v23, %v3200_v4  ;;  %v6000_v8 = vadd.f32 %v5890_v23, %v3201_v58 }
 0x2ed   :  { %v6003_v19 = vadd.f32 %v5890_v23, %v3202_v56  ;;  %v6006_v60 = vadd.f32 %v5890_v23, %v3203_v25  ;;  %v6009_v11 = vadd.f32 %v5890_v23, %v3204_v28  ;;  %v6012_v45 = vadd.f32 %v5890_v23, %v3205_v17 }
 0x2ee   :  { %v6015_v47 = vadd.f32 %v5890_v23, %v3206_v7  ;;  %vm3245_vm6 = vcmp.gt.f32.partialorder %v3211_v22, 0.0  ;;  %vm3246_vm7 = vcmp.gt.f32.partialorder %v5922_v38, 0.0  ;;  %vm3247_vm8 = vcmp.gt.f32.partialorder %v5925_v61, 0.0 }
 0x2ef   :  { %vm3248_vm9 = vcmp.gt.f32.partialorder %v5928_v1, 0.0  ;;  %vm3249_vm10 = vcmp.gt.f32.partialorder %v5931_v57, 0.0  ;;  %vm3250_vm11 = vcmp.gt.f32.partialorder %v5934_v48, 0.0  ;;  %vm3251_vm12 = vcmp.gt.f32.partialorder %v5937_v55, 0.0 }
 0x2f0   :  { %vm3252_vm13 = vcmp.gt.f32.partialorder %v5940_v0, 0.0  ;;  %v3279_v18 = vmul.f32 0.2, %v3211_v22  ;;  %vm3253_vm14 = vcmp.gt.f32.partialorder %v5943_v24, 0.0  ;;  %vm3254_vm15 = vcmp.gt.f32.partialorder %v5946_v30, 0.0 }
 0x2f1   :  { %vm3255_vm0 = vcmp.gt.f32.partialorder %v5949_v16, 0.0  ;;  %v3280_v10 = vmul.f32 0.2, %v5922_v38  ;;  %vm3258_vm3 = vcmp.gt.f32.partialorder %v5958_v15, 0.0  ;;  %v3281_v26 = vmul.f32 0.2, %v5925_v61 }
 0x2f2   :  { %v6033_v4 = vadd.f32 %v5890_v23, %v3207_v46  ;;  %v3282_v43 = vmul.f32 0.2, %v5928_v1  ;;  %v3283_v58 = vmul.f32 0.2, %v5931_v57  ;;  %v3284_v62 = vmul.f32 0.2, %v5934_v48 }
 0x2f3   :  { %v3285_v56 = vmul.f32 0.2, %v5937_v55  ;;  %v3286_v25 = vmul.f32 0.2, %v5940_v0  ;;  %v3287_v28 = vmul.f32 0.2, %v5943_v24  ;;  %v3313_v17 = vsel %vm3245_vm6, %v3211_v22, %v3279_v18 }
 0x2f4   :  { %vm3263_vm5 = vcmp.gt.f32.partialorder %v5973_v5, 0.0  ;;  %v3288_v7 = vmul.f32 0.2, %v5946_v30  ;;  %v3289_v46 = vmul.f32 0.2, %v5949_v16  ;;  %v3314_v35 = vsel %vm3246_vm7, %v5922_v38, %v3280_v10 }
 0x2f5   :  { %v3290_v52 = vmul.f32 0.2, %v5952_v27  ;;  %vm3265_vm2 = vcmp.gt.f32.partialorder %v5979_v40, 0.0  ;;  %v3291_v22 = vmul.f32 0.2, %v5955_v3  ;;  %v3315_v34 = vsel %vm3247_vm8, %v5925_v61, %v3281_v26 }
 0x2f6   :  { %v3292_v18 = vmul.f32 0.2, %v5958_v15  ;;  %v3293_v13 = vmul.f32 0.2, %v5961_v54  ;;  %vm3267_vm6 = vcmp.gt.f32.partialorder %v5985_v51, 0.0  ;;  %v3316_v37 = vsel %vm3248_vm9, %v5928_v1, %v3282_v43 }
 0x2f7   :  { %v3294_v38 = vmul.f32 0.2, %v5964_v32  ;;  %v3295_v10 = vmul.f32 0.2, %v5967_v12  ;;  %v3296_v14 = vmul.f32 0.2, %v5970_v41  ;;  %v3317_v9 = vsel %vm3249_vm10, %v5931_v57, %v3283_v58 }
 0x2f8   :  { %vm3269_vm7 = vcmp.gt.f32.partialorder %v5991_v53, 0.0  ;;  %v3297_v61 = vmul.f32 0.2, %v5973_v5  ;;  %v3298_v26 = vmul.f32 0.2, %v5976_v44  ;;  %vm3271_vm8 = vcmp.gt.f32.partialorder %v5997_v31, 0.0 }
 0x2f9   :  { %v3299_v29 = vmul.f32 0.2, %v5979_v40  ;;  %vm3272_vm4 = vcmp.gt.f32.partialorder %v6000_v8, 0.0  ;;  %v3300_v1 = vmul.f32 0.2, %v5982_v42  ;;  %v3318_v49 = vsel %vm3250_vm11, %v5934_v48, %v3284_v62 }
 0x2fa   :  { %v3301_v43 = vmul.f32 0.2, %v5985_v51  ;;  %v3302_v39 = vmul.f32 0.2, %v5988_v2  ;;  %vm3273_vm9 = vcmp.gt.f32.partialorder %v6003_v19, 0.0  ;;  %vm3274_vm1 = vcmp.gt.f32.partialorder %v6006_v60, 0.0 }
 0x2fb   :  { %v3303_v57 = vmul.f32 0.2, %v5991_v53  ;;  %v3304_v58 = vmul.f32 0.2, %v5994_v20  ;;  %v3319_v21 = vsel %vm3251_vm12, %v5937_v55, %v3285_v56  ;;  %v3320_v50 = vsel %vm3252_vm13, %v5940_v0, %v3286_v25 }
 0x2fc   :  { %vm3275_vm10 = vcmp.gt.f32.partialorder %v6009_v11, 0.0  ;;  %v3305_v48 = vmul.f32 0.2, %v5997_v31  ;;  %v3306_v62 = vmul.f32 0.2, %v6000_v8  ;;  %v3321_v59 = vsel %vm3253_vm14, %v5943_v24, %v3287_v28 }
 0x2fd   :  { %v3322_v55 = vsel %vm3254_vm15, %v5946_v30, %v3288_v7  ;;  %vm3277_vm12 = vcmp.gt.f32.partialorder %v6015_v47, 0.0  ;;  %v3323_v0 = vsel %vm3255_vm0, %v5949_v16, %v3289_v46  ;;  %vm6844_vm13 = vcmp.gt.f32.partialorder %v5952_v27, 0.0  ;;  %v6856_v46 = vld [vmem:[#allocation37_spill] sm:$0xff] }
 0x2fe   :  { %v3324_v56 = vsel %vm6844_vm13, %v5952_v27, %v3290_v52  ;;  %v4374_v25 = vpack.c.bf16 %v3314_v35, %v3313_v17  ;;  %v4379_v36 = vpack.c.bf16 %v3316_v37, %v3315_v34  ;;  %vm6845_vm11 = vcmp.gt.f32.partialorder %v5955_v3, 0.0 }
 0x2ff   :  { %v3325_v24 = vsel %vm6845_vm11, %v5955_v3, %v3291_v22  ;;  %v3326_v30 = vsel %vm3258_vm3, %v5958_v15, %v3292_v18  ;;  %v4384_v28 = vpack.c.bf16 %v3318_v49, %v3317_v9  ;;  %v4389_v7 = vpack.c.bf16 %v3320_v50, %v3319_v21  ;;  %v6857_v18 = vld [vmem:[#allocation38_spill] sm:$0xff] }
 0x300   :  { %v3307_v23 = vmul.f32 0.2, %v6003_v19  ;;  %vm6846_vm14 = vcmp.gt.f32.partialorder %v5961_v54, 0.0  ;;  %vm6847_vm15 = vcmp.gt.f32.partialorder %v5964_v32, 0.0  ;;  %4375 = vst [vmem:[%s6623_s5] sm:$0xff] %v4374_v25   ;;  %v4394_v34 = vpack.c.bf16 %v3322_v55, %v3321_v59  ;;  %v6864_v25 = vld [vmem:[#allocation45_spill] sm:$0xff] }
 0x301   :  { %v3327_v16 = vsel %vm6846_vm14, %v5961_v54, %v3293_v13  ;;  %v3328_v37 = vsel %vm6847_vm15, %v5964_v32, %v3294_v38  ;;  %v3308_v35 = vmul.f32 0.2, %v6006_v60  ;;  %vm6848_vm0 = vcmp.gt.f32.partialorder %v5967_v12, 0.0  ;;  %4545 = vst [vmem:[%s6623_s5 + $0x8] sm:$0xff] %v4379_v36  }
 0x302   :  { %v3329_v50 = vsel %vm6848_vm0, %v5967_v12, %v3295_v10  ;;  %vm6849_vm3 = vcmp.gt.f32.partialorder %v5970_v41, 0.0  ;;  %v4399_v49 = vpack.c.bf16 %v3324_v56, %v3323_v0  ;;  %v3309_v9 = vmul.f32 0.2, %v6009_v11  ;;  %4546 = vst [vmem:[%s6623_s5 + $0x10] sm:$0xff] %v4384_v28   ;;  %v6858_v10 = vld [vmem:[#allocation39_spill] sm:$0xff]  ;;  %v6863_v0 = vld [vmem:[#allocation44_spill] sm:$0xff] }
 0x303   :  { %v3330_v21 = vsel %vm6849_vm3, %v5970_v41, %v3296_v14  ;;  %v3331_v59 = vsel %vm3263_vm5, %v5973_v5, %v3297_v61  ;;  %vm6850_vm11 = vcmp.gt.f32.partialorder %v5976_v44, 0.0  ;;  %v4404_v14 = vpack.c.bf16 %v3326_v30, %v3325_v24  ;;  %4547 = vst [vmem:[%s6623_s5 + $0x18] sm:$0xff] %v4389_v7   ;;  %v6865_v28 = vld [vmem:[#allocation46_spill] sm:$0xff] }
 0x304   :  { %v3332_v13 = vsel %vm6850_vm11, %v5976_v44, %v3298_v26  ;;  %v3310_v52 = vmul.f32 0.2, %v6012_v45  ;;  %v3333_v36 = vsel %vm3265_vm2, %v5979_v40, %v3299_v29  ;;  %vm6851_vm13 = vcmp.gt.f32.partialorder %v5982_v42, 0.0  ;;  %4548 = vst [vmem:[%s6623_s5 + $0x20] sm:$0xff] %v4394_v34   ;;  %v6859_v26 = vld [vmem:[#allocation40_spill] sm:$0xff] }
 0x305   :  { %v3334_v27 = vsel %vm6851_vm13, %v5982_v42, %v3300_v1  ;;  %v4409_v3 = vpack.c.bf16 %v3328_v37, %v3327_v16  ;;  %v3311_v15 = vmul.f32 0.2, %v6015_v47  ;;  %v3335_v54 = vsel %vm3267_vm6, %v5985_v51, %v3301_v43  ;;  %4549 = vst [vmem:[%s6623_s5 + $0x28] sm:$0xff] %v4399_v49   ;;  %v6860_v43 = vld [vmem:[#allocation41_spill] sm:$0xff]  ;;  %v6866_v16 = vld [vmem:[#allocation47_spill] sm:$0xff]  ;;  %v6867_v34 = vld [vmem:[#allocation48_spill] sm:$0xff] }
 0x306   :  { %vm6852_vm5 = vcmp.gt.f32.partialorder %v5988_v2, 0.0  ;;  %v4414_v29 = vpack.c.bf16 %v3330_v21, %v3329_v50  ;;  %v3312_v12 = vmul.f32 0.2, %v6033_v4  ;;  %v3337_v41 = vsel %vm3269_vm7, %v5991_v53, %v3303_v57  ;;  %4550 = vst [vmem:[%s6623_s5 + $0x30] sm:$0xff] %v4404_v14   ;;  %v6868_v21 = vld [vmem:[#allocation49_spill] sm:$0xff]  ;;  %v6871_v14 = vld [vmem:[#allocation63_spill] sm:$0xff] }
 0x307   :  { %v3336_v32 = vsel %vm6852_vm5, %v5988_v2, %v3302_v39  ;;  %vm6853_vm2 = vcmp.gt.f32.partialorder %v5994_v20, 0.0  ;;  %v4419_v39 = vpack.c.bf16 %v3332_v13, %v3331_v59  ;;  %vm3278_vm6 = vcmp.gt.f32.partialorder %v6033_v4, 0.0  ;;  %4551 = vst [vmem:[%s6623_s5 + $0x38] sm:$0xff] %v4409_v3   ;;  %v6870_v13 = vld [vmem:[#allocation51_spill] sm:$0xff]  ;;  %v6873_v3 = vld [vmem:[#allocation53_spill] sm:$0xff] }
 0x308   :  { %v3338_v5 = vsel %vm6853_vm2, %v5994_v20, %v3304_v58  ;;  %v3339_v44 = vsel %vm3271_vm8, %v5997_v31, %v3305_v48  ;;  %v3340_v40 = vsel %vm3272_vm4, %v6000_v8, %v3306_v62  ;;  %v4424_v42 = vpack.c.bf16 %v3334_v27, %v3333_v36  ;;  %4552 = vst [vmem:[%s6623_s5 + $0x40] sm:$0xff] %v4414_v29   ;;  %v6861_v58 = vld [vmem:[#allocation42_spill] sm:$0xff]  ;;  %v6862_v62 = vld [vmem:[#allocation43_spill] sm:$0xff]  ;;  %v6872_v36 = vld [vmem:[#allocation52_spill] sm:$0xff] }
 0x309   :  { %v3341_v51 = vsel %vm3273_vm9, %v6003_v19, %v3307_v23  ;;  %v3342_v2 = vsel %vm3274_vm1, %v6006_v60, %v3308_v35  ;;  %v4429_v53 = vpack.c.bf16 %v3336_v32, %v3335_v54  ;;  %v3343_v20 = vsel %vm3275_vm10, %v6009_v11, %v3309_v9  ;;  %4553 = vst [vmem:[%s6623_s5 + $0x48] sm:$0xff] %v4419_v39   ;;  %v6869_v9 = vld [vmem:[#allocation50_spill] sm:$0xff]  ;;  %v6875_v29 = vld [vmem:[#allocation55_spill] sm:$0xff]  ;;  %v6877_v39 = vld [vmem:[#allocation57_spill] sm:$0xff] }
 0x30a   :  { %vm6854_vm4 = vcmp.gt.f32.partialorder %v6012_v45, 0.0  ;;  %v4434_v23 = vpack.c.bf16 %v3338_v5, %v3337_v41  ;;  %v3345_v8 = vsel %vm3277_vm12, %v6015_v47, %v3311_v15  ;;  %v3346_v19 = vsel %vm3278_vm6, %v6033_v4, %v3312_v12  ;;  %4554 = vst [vmem:[%s6623_s5 + $0x50] sm:$0xff] %v4424_v42   ;;  %v6855_v4 = vld [vmem:[#allocation36_spill] sm:$0xff]  ;;  %v6874_v54 = vld [vmem:[#allocation54_spill] sm:$0xff] }
 0x30b   :  { %v3344_v31 = vsel %vm6854_vm4, %v6012_v45, %v3310_v52  ;;  %v4439_v60 = vpack.c.bf16 %v3340_v40, %v3339_v44  ;;  %v4444_v11 = vpack.c.bf16 %v3342_v2, %v3341_v51  ;;  %4555 = vst [vmem:[%s6623_s5 + $0x58] sm:$0xff] %v4429_v53   ;;  %v4454_v47 = vpack.c.bf16 %v3346_v19, %v3345_v8  ;;  %v6876_v41 = vld [vmem:[#allocation56_spill] sm:$0xff]  ;;  %v6879_v51 = vld [vmem:[#allocation31_spill] sm:$0xff]  ;;  %v6882_v8 = vld [vmem:[#allocation62_spill] sm:$0xff] }
 0x30c   :  { %v4449_v45 = vpack.c.bf16 %v3344_v31, %v3343_v20  ;;  %4556 = vst [vmem:[%s6623_s5 + $0x60] sm:$0xff] %v4434_v23   ;;  %v3449_v17 = vmul.f32 %v5845_v33, %v6855_v4  ;;  %v3450_v22 = vmul.f32 %v5845_v33, %v6856_v46  ;;  %v3451_v38 = vmul.f32 %v5845_v33, %v6857_v18  ;;  %v6878_v40 = vld [vmem:[#allocation60_spill] sm:$0xff]  ;;  %v6880_v53 = vld [vmem:[#allocation59_spill] sm:$0xff]  ;;  %v6881_v31 = vld [vmem:[#allocation58_spill] sm:$0xff] }
 0x30d   :  { %4557 = vst [vmem:[%s6623_s5 + $0x68] sm:$0xff] %v4439_v60   ;;  %v3452_v61 = vmul.f32 %v5845_v33, %v6858_v10  ;;  %v3453_v1 = vmul.f32 %v5845_v33, %v6859_v26  ;;  %v3454_v57 = vmul.f32 %v5845_v33, %v6860_v43  ;;  %v3455_v48 = vmul.f32 %v5845_v33, %v6861_v58  ;;  %v6883_v60 = vld [vmem:[#allocation61_spill] sm:$0xff]  ;;  %v6886_v18 = vld [vmem:[#allocation68_spill] sm:$0xff] }
 0x30e   :  { %4558 = vst [vmem:[%s6623_s5 + $0x70] sm:$0xff] %v4444_v11   ;;  %v3456_v55 = vmul.f32 %v5845_v33, %v6862_v62  ;;  %v3457_v56 = vmul.f32 %v5845_v33, %v6863_v0  ;;  %v3458_v24 = vmul.f32 %v5845_v33, %v6864_v25  ;;  %v3481_v30 = vmul.f32 %v5845_v33, %v5827_v63  ;;  %v6885_v4 = vld [vmem:[#allocation65_spill] sm:$0xff]  ;;  %v6887_v26 = vld [vmem:[#allocation32_spill] sm:$0xff] }
 0x30f   :  { %4559 = vst [vmem:[%s6623_s5 + $0x78] sm:$0xff] %v4449_v45   ;;  %v3459_v7 = vmul.f32 %v5845_v33, %v6865_v28  ;;  %v3460_v37 = vmul.f32 %v5845_v33, %v6866_v16  ;;  %v3461_v35 = vmul.f32 %v5845_v33, %v6867_v34  ;;  %v3482_v50 = vmul.f32 %v5845_v33, %v5837_v6  ;;  %v6884_v45 = vld [vmem:[#allocation64_spill] sm:$0xff] }
 0x310   :  { %4560 = vst [vmem:[%s6623_s5 + $0x80] sm:$0xff] %v4454_v47   ;;  %v3462_v49 = vmul.f32 %v5845_v33, %v6868_v21  ;;  %v3463_v59 = vmul.f32 %v5845_v33, %v6869_v9  ;;  %v3464_v63 = vmul.f32 %v5845_v33, %v6870_v13  ;;  %v6272_v52 = vadd.f32 %v3481_v30, %v6871_v14 }
 0x311   :  { %v3465_v27 = vmul.f32 %v5845_v33, %v6872_v36  ;;  %v3466_v15 = vmul.f32 %v5845_v33, %v6873_v3  ;;  %v3467_v6 = vmul.f32 %v5845_v33, %v6874_v54  ;;  %v6281_v32 = vadd.f32 %v3482_v50, %v6871_v14 }
 0x312   :  { %v3468_v12 = vmul.f32 %v5845_v33, %v6875_v29  ;;  %v3469_v5 = vmul.f32 %v5845_v33, %v6876_v41  ;;  %v3470_v44 = vmul.f32 %v5845_v33, %v6877_v39  ;;  %v3471_v42 = vmul.f32 %v5845_v33, %v6878_v40 }
 0x313   :  { %v3472_v2 = vmul.f32 %v5845_v33, %v6879_v51  ;;  %v3473_v20 = vmul.f32 %v5845_v33, %v6880_v53  ;;  %v3474_v23 = vmul.f32 %v5845_v33, %v6881_v31  ;;  %v3475_v19 = vmul.f32 %v5845_v33, %v6882_v8 }
 0x314   :  { %v3476_v11 = vmul.f32 %v5845_v33, %v6883_v60  ;;  %v3477_v47 = vmul.f32 %v5845_v33, %v6884_v45  ;;  %v3478_v46 = vmul.f32 %v5845_v33, %v6885_v4  ;;  %v3479_v10 = vmul.f32 %v5845_v33, %v6886_v18 }
 0x315   :  { %v3480_v43 = vmul.f32 %v5845_v33, %v6887_v26  ;;  %v3483_v58 = vadd.f32 %v3449_v17, %v6871_v14  ;;  %v6311_v62 = vadd.f32 %v3450_v22, %v6871_v14  ;;  %v6314_v0 = vadd.f32 %v3451_v38, %v6871_v14 }
 0x316   :  { %v6317_v25 = vadd.f32 %v3452_v61, %v6871_v14  ;;  %v6320_v30 = vadd.f32 %v3453_v1, %v6871_v14  ;;  %v6323_v28 = vadd.f32 %v3454_v57, %v6871_v14  ;;  %v6326_v16 = vadd.f32 %v3455_v48, %v6871_v14 }
 0x317   :  { %v6329_v33 = vadd.f32 %v3456_v55, %v6871_v14  ;;  %v6332_v17 = vadd.f32 %v3457_v56, %v6871_v14  ;;  %v6335_v22 = vadd.f32 %v3458_v24, %v6871_v14  ;;  %v6338_v38 = vadd.f32 %v3459_v7, %v6871_v14 }
 0x318   :  { %v6341_v61 = vadd.f32 %v3460_v37, %v6871_v14  ;;  %v6344_v1 = vadd.f32 %v3461_v35, %v6871_v14  ;;  %v6347_v57 = vadd.f32 %v3462_v49, %v6871_v14  ;;  %v6350_v48 = vadd.f32 %v3463_v59, %v6871_v14 }
 0x319   :  { %v6353_v55 = vadd.f32 %v3464_v63, %v6871_v14  ;;  %v6356_v56 = vadd.f32 %v3465_v27, %v6871_v14  ;;  %v6359_v24 = vadd.f32 %v3466_v15, %v6871_v14  ;;  %v6362_v7 = vadd.f32 %v3467_v6, %v6871_v14 }
 0x31a   :  { %v6365_v37 = vadd.f32 %v3468_v12, %v6871_v14  ;;  %v6368_v34 = vadd.f32 %v3469_v5, %v6871_v14  ;;  %v6371_v35 = vadd.f32 %v3470_v44, %v6871_v14  ;;  %v6374_v50 = vadd.f32 %v3471_v42, %v6871_v14 }
 0x31b   :  { %v6377_v21 = vadd.f32 %v3472_v2, %v6871_v14  ;;  %v6380_v49 = vadd.f32 %v3473_v20, %v6871_v14  ;;  %v6383_v9 = vadd.f32 %v3474_v23, %v6871_v14  ;;  %v6386_v59 = vadd.f32 %v3475_v19, %v6871_v14 }
 0x31c   :  { %v6389_v13 = vadd.f32 %v3476_v11, %v6871_v14  ;;  %v6392_v63 = vadd.f32 %v3477_v47, %v6871_v14  ;;  %v6395_v36 = vadd.f32 %v3478_v46, %v6871_v14  ;;  %v6398_v27 = vadd.f32 %v3479_v10, %v6871_v14 }
 0x31d   :  { %vm3517_vm1 = vcmp.gt.f32.partialorder %v3483_v58, 0.0  ;;  %vm3518_vm7 = vcmp.gt.f32.partialorder %v6311_v62, 0.0  ;;  %vm3519_vm8 = vcmp.gt.f32.partialorder %v6314_v0, 0.0  ;;  %vm3520_vm9 = vcmp.gt.f32.partialorder %v6317_v25, 0.0 }
 0x31e   :  { %vm3521_vm10 = vcmp.gt.f32.partialorder %v6320_v30, 0.0  ;;  %vm3522_vm12 = vcmp.gt.f32.partialorder %v6323_v28, 0.0  ;;  %vm3523_vm14 = vcmp.gt.f32.partialorder %v6326_v16, 0.0  ;;  %v3551_v3 = vmul.f32 0.2, %v3483_v58 }
 0x31f   :  { %vm3524_vm15 = vcmp.gt.f32.partialorder %v6329_v33, 0.0  ;;  %vm3525_vm0 = vcmp.gt.f32.partialorder %v6332_v17, 0.0  ;;  %vm3526_vm3 = vcmp.gt.f32.partialorder %v6335_v22, 0.0  ;;  %v3552_v15 = vmul.f32 0.2, %v6311_v62 }
 0x320   :  { %vm3527_vm11 = vcmp.gt.f32.partialorder %v6338_v38, 0.0  ;;  %v3553_v54 = vmul.f32 0.2, %v6314_v0  ;;  %v6415_v6 = vadd.f32 %v3480_v43, %v6871_v14  ;;  %vm3530_vm2 = vcmp.gt.f32.partialorder %v6347_v57, 0.0 }
 0x321   :  { %v3554_v29 = vmul.f32 0.2, %v6317_v25  ;;  %v3555_v12 = vmul.f32 0.2, %v6320_v30  ;;  %v3556_v41 = vmul.f32 0.2, %v6323_v28  ;;  %v3585_v44 = vsel %vm3517_vm1, %v3483_v58, %v3551_v3 }
 0x322   :  { %v3557_v5 = vmul.f32 0.2, %v6326_v16  ;;  %v3558_v14 = vmul.f32 0.2, %v6329_v33  ;;  %v3559_v39 = vmul.f32 0.2, %v6332_v17  ;;  %v3586_v2 = vsel %vm3518_vm7, %v6311_v62, %v3552_v15 }
 0x323   :  { %vm3533_vm4 = vcmp.gt.f32.partialorder %v6356_v56, 0.0  ;;  %v3560_v40 = vmul.f32 0.2, %v6335_v22  ;;  %v3561_v42 = vmul.f32 0.2, %v6338_v38  ;;  %vm3535_vm5 = vcmp.gt.f32.partialorder %v6362_v7, 0.0 }
 0x324   :  { %v3562_v51 = vmul.f32 0.2, %v6341_v61  ;;  %v3563_v53 = vmul.f32 0.2, %v6344_v1  ;;  %v3564_v20 = vmul.f32 0.2, %v6347_v57  ;;  %v3587_v23 = vsel %vm3519_vm8, %v6314_v0, %v3553_v54 }
 0x325   :  { %v3565_v31 = vmul.f32 0.2, %v6350_v48  ;;  %vm3537_vm1 = vcmp.gt.f32.partialorder %v6368_v34, 0.0  ;;  %v3566_v8 = vmul.f32 0.2, %v6353_v55  ;;  %v3588_v11 = vsel %vm3520_vm9, %v6317_v25, %v3554_v29 }
 0x326   :  { %v3567_v19 = vmul.f32 0.2, %v6356_v56  ;;  %v3568_v60 = vmul.f32 0.2, %v6359_v24  ;;  %vm3539_vm7 = vcmp.gt.f32.partialorder %v6374_v50, 0.0  ;;  %v3589_v46 = vsel %vm3521_vm10, %v6320_v30, %v3555_v12 }
 0x327   :  { %v3569_v45 = vmul.f32 0.2, %v6362_v7  ;;  %v3570_v47 = vmul.f32 0.2, %v6365_v37  ;;  %v3571_v4 = vmul.f32 0.2, %v6368_v34  ;;  %v3590_v43 = vsel %vm3522_vm12, %v6323_v28, %v3556_v41 }
 0x328   :  { %vm3541_vm8 = vcmp.gt.f32.partialorder %v6380_v49, 0.0  ;;  %v3572_v18 = vmul.f32 0.2, %v6371_v35  ;;  %v3573_v10 = vmul.f32 0.2, %v6374_v50  ;;  %vm3543_vm9 = vcmp.gt.f32.partialorder %v6386_v59, 0.0 }
 0x329   :  { %v3574_v26 = vmul.f32 0.2, %v6377_v21  ;;  %vm3544_vm13 = vcmp.gt.f32.partialorder %v6389_v13, 0.0  ;;  %v3575_v58 = vmul.f32 0.2, %v6380_v49  ;;  %v3591_v25 = vsel %vm3523_vm14, %v6326_v16, %v3557_v5 }
 0x32a   :  { %v3583_v62 = vmul.f32 0.2, %v6272_v52  ;;  %v3584_v0 = vmul.f32 0.2, %v6281_v32  ;;  %vm3545_vm10 = vcmp.gt.f32.partialorder %v6392_v63, 0.0  ;;  %vm3546_vm6 = vcmp.gt.f32.partialorder %v6395_v36, 0.0 }
 0x32b   :  { %v3576_v30 = vmul.f32 0.2, %v6383_v9  ;;  %v3577_v28 = vmul.f32 0.2, %v6386_v59  ;;  %v3578_v3 = vmul.f32 0.2, %v6389_v13  ;;  %v3592_v15 = vsel %vm3524_vm15, %v6329_v33, %v3558_v14 }
 0x32c   :  { %vm3547_vm12 = vcmp.gt.f32.partialorder %v6398_v27, 0.0  ;;  %v3593_v16 = vsel %vm3525_vm0, %v6332_v17, %v3559_v39  ;;  %v3594_v54 = vsel %vm3526_vm3, %v6335_v22, %v3560_v40  ;;  %v3595_v29 = vsel %vm3527_vm11, %v6338_v38, %v3561_v42 }
 0x32d   :  { %vm6888_vm14 = vcmp.gt.f32.partialorder %v6341_v61, 0.0  ;;  %vm6889_vm15 = vcmp.gt.f32.partialorder %v6344_v1, 0.0  ;;  %v4459_v41 = vpack.c.bf16 %v3586_v2, %v3585_v44  ;;  %v4464_v5 = vpack.c.bf16 %v3588_v11, %v3587_v23 }
 0x32e   :  { %v3596_v12 = vsel %vm6888_vm14, %v6341_v61, %v3562_v51  ;;  %v3597_v33 = vsel %vm6889_vm15, %v6344_v1, %v3563_v53  ;;  %v4469_v14 = vpack.c.bf16 %v3590_v43, %v3589_v46  ;;  %v3598_v17 = vsel %vm3530_vm2, %v6347_v57, %v3564_v20 }
 0x32f   :  { %vm6890_vm0 = vcmp.gt.f32.partialorder %v6272_v52, 0.0  ;;  %vm6891_vm3 = vcmp.gt.f32.partialorder %v6281_v32, 0.0  ;;  %v4474_v61 = vpack.c.bf16 %v3592_v15, %v3591_v25  ;;  %v3579_v39 = vmul.f32 0.2, %v6392_v63  ;;  %4561 = vst [vmem:[%s6623_s5 + $0x88] sm:$0xff] %v4459_v41  }
 0x330   :  { %v3617_v22 = vsel %vm6890_vm0, %v6272_v52, %v3583_v62  ;;  %v3618_v38 = vsel %vm6891_vm3, %v6281_v32, %v3584_v0  ;;  %vm6892_vm11 = vcmp.gt.f32.partialorder %v6350_v48, 0.0  ;;  %vm6893_vm14 = vcmp.gt.f32.partialorder %v6353_v55, 0.0  ;;  %4562 = vst [vmem:[%s6623_s5 + $0x90] sm:$0xff] %v4464_v5  }
 0x331   :  { %v3599_v1 = vsel %vm6892_vm11, %v6350_v48, %v3565_v31  ;;  %v3600_v44 = vsel %vm6893_vm14, %v6353_v55, %v3566_v8  ;;  %v4479_v52 = vpack.c.bf16 %v3594_v54, %v3593_v16  ;;  %v3580_v57 = vmul.f32 0.2, %v6395_v36  ;;  %4563 = vst [vmem:[%s6623_s5 + $0x98] sm:$0xff] %v4469_v14  }
 0x332   :  { %v3601_v32 = vsel %vm3533_vm4, %v6356_v56, %v3567_v19  ;;  %vm6894_vm2 = vcmp.gt.f32.partialorder %v6359_v24, 0.0  ;;  %v4484_v48 = vpack.c.bf16 %v3596_v12, %v3595_v29  ;;  %v3603_v55 = vsel %vm3535_vm5, %v6362_v7, %v3569_v45  ;;  %4564 = vst [vmem:[%s6623_s5 + $0xa0] sm:$0xff] %v4474_v61  }
 0x333   :  { %v3602_v40 = vsel %vm6894_vm2, %v6359_v24, %v3568_v60  ;;  %vm6895_vm15 = vcmp.gt.f32.partialorder %v6365_v37, 0.0  ;;  %v4489_v56 = vpack.c.bf16 %v3598_v17, %v3597_v33  ;;  %v4539_v51 = vpack.c.bf16 %v3618_v38, %v3617_v22  ;;  %4565 = vst [vmem:[%s6623_s5 + $0xa8] sm:$0xff] %v4479_v52  }
 0x334   :  { %v3604_v42 = vsel %vm6895_vm15, %v6365_v37, %v3570_v47  ;;  %v3581_v24 = vmul.f32 0.2, %v6398_v27  ;;  %v3605_v2 = vsel %vm3537_vm1, %v6368_v34, %v3571_v4  ;;  %vm6896_vm4 = vcmp.gt.f32.partialorder %v6371_v35, 0.0  ;;  %4566 = vst [vmem:[%s6623_s5 + $0xb0] sm:$0xff] %v4484_v48  }
 0x335   :  { %v3606_v7 = vsel %vm6896_vm4, %v6371_v35, %v3572_v18  ;;  %v4494_v37 = vpack.c.bf16 %v3600_v44, %v3599_v1  ;;  %v3582_v53 = vmul.f32 0.2, %v6415_v6  ;;  %v3607_v20 = vsel %vm3539_vm7, %v6374_v50, %v3573_v10  ;;  %4567 = vst [vmem:[%s6623_s5 + $0xb8] sm:$0xff] %v4489_v56  }
 0x336   :  { %vm6897_vm5 = vcmp.gt.f32.partialorder %v6377_v21, 0.0  ;;  %v4499_v34 = vpack.c.bf16 %v3602_v40, %v3601_v32  ;;  %vm3548_vm1 = vcmp.gt.f32.partialorder %v6415_v6, 0.0  ;;  %v3609_v35 = vsel %vm3541_vm8, %v6380_v49, %v3575_v58  ;;  %4577 = vst [vmem:[%s6623_s5 + $0x108] sm:$0xff] %v4539_v51  }
 0x337   :  { %v3608_v31 = vsel %vm6897_vm5, %v6377_v21, %v3574_v26  ;;  %vm6898_vm0 = vcmp.gt.f32.partialorder %v6383_v9, 0.0  ;;  %v4504_v50 = vpack.c.bf16 %v3604_v42, %v3603_v55  ;;  %v3611_v21 = vsel %vm3543_vm9, %v6386_v59, %v3577_v28  ;;  %4568 = vst [vmem:[%s6623_s5 + $0xc0] sm:$0xff] %v4494_v37  }
 0x338   :  { %v3610_v23 = vsel %vm6898_vm0, %v6383_v9, %v3576_v30  ;;  %v3612_v8 = vsel %vm3544_vm13, %v6389_v13, %v3578_v3  ;;  %v4509_v49 = vpack.c.bf16 %v3606_v7, %v3605_v2  ;;  %v3613_v9 = vsel %vm3545_vm10, %v6392_v63, %v3579_v39  ;;  %4569 = vst [vmem:[%s6623_s5 + $0xc8] sm:$0xff] %v4499_v34  }
 0x339   :  { %v3614_v19 = vsel %vm3546_vm6, %v6395_v36, %v3580_v57  ;;  %v4514_v59 = vpack.c.bf16 %v3608_v31, %v3607_v20  ;;  %v3615_v13 = vsel %vm3547_vm12, %v6398_v27, %v3581_v24  ;;  %v3616_v60 = vsel %vm3548_vm1, %v6415_v6, %v3582_v53  ;;  %4570 = vst [vmem:[%s6623_s5 + $0xd0] sm:$0xff] %v4504_v50  }
 0x33a   :  { %v4519_v63 = vpack.c.bf16 %v3610_v23, %v3609_v35  ;;  %v4524_v36 = vpack.c.bf16 %v3612_v8, %v3611_v21  ;;  %4571 = vst [vmem:[%s6623_s5 + $0xd8] sm:$0xff] %v4509_v49   ;;  %v4529_v11 = vpack.c.bf16 %v3614_v19, %v3613_v9  ;;  %v4534_v27 = vpack.c.bf16 %v3616_v60, %v3615_v13 }
 0x33b   :  { %4572 = vst [vmem:[%s6623_s5 + $0xe0] sm:$0xff] %v4514_v59  }
 0x33c   :  { %4573 = vst [vmem:[%s6623_s5 + $0xe8] sm:$0xff] %v4519_v63  }
 0x33d   :  { %4574 = vst [vmem:[%s6623_s5 + $0xf0] sm:$0xff] %v4524_v36  }
 0x33e   :  { %4575 = vst [vmem:[%s6623_s5 + $0xf8] sm:$0xff] %v4529_v11  }
 0x33f   :  { %4576 = vst [vmem:[%s6623_s5 + $0x100] sm:$0xff] %v4534_v27  }

// kernel: stage1_d_img_forward.6
= control target key start
LH: loop header
LB: loop body
LE: loop exit
PB: predicated region body
PF: predicated region fallthrough
CT: control target
= control target key end

     0   :  { %v1781_v9 = vmov 0   ;;  %vm82_vm0 = vsmask.f32 7424  ;;  %vm441_vm1 = vcmask 1046528   ;;  %vm146_vm2 = vcmask 523264   ;;  %s2330_s1 = inlined_call_operand.vmem [shape: bf16[4,64,128], index: 1, kind: input, shape index: {}]   ;;  %s2331_s0 = inlined_call_operand.vmem [shape: bf16[2,90,64], index: 0, kind: input, shape index: {}]   ;;  %s2332_s2 = inlined_call_operand.vmem [shape: f32[72,1], index: 2, kind: input, shape index: {}]   ;;  %s2333_s3 = inlined_call_operand.vmem [shape: f32[1,128], index: 3, kind: input, shape index: {}]   ;;  %s2334_s4 = inlined_call_operand.vmem [shape: f32[1,128], index: 4, kind: input, shape index: {}]   ;;  %s2335_s5 = inlined_call_operand.vmem [shape: bf16[2,72,128], index: 5, kind: output, shape index: {}]  }
   0x1   :  { %v1685_v0 = vld [vmem:[%s2330_s1 + $0x38] sm:$0xff]  ;;  %v1684_v4 = vld [vmem:[%s2330_s1 + $0x30] sm:$0xff]  ;;  %v1683_v8 = vld [vmem:[%s2330_s1 + $0x28] sm:$0xff]  ;;  %1770 = vset.pattern.permute.xlu0 %v1781_v9  ;;  %1771 = vset.pattern.permute.xlu1 %v1781_v9 }
   0x2   :  { %v1681_v1 = vld [vmem:[%s2330_s1 + $0x18] sm:$0xff]  ;;  %166 = vmatpush.bf16.msra.mxu0 %v1685_v0  ;;  %v1680_v5 = vld [vmem:[%s2330_s1 + $0x10] sm:$0xff]  ;;  %v1679_v10 = vld [vmem:[%s2330_s1 + $0x8] sm:$0xff]  ;;  %1772 = vset.pattern.permute.xlu2 %v1781_v9 }
   0x3   :  { %v1693_v2 = vld [vmem:[%s2330_s1 + $0x58] sm:$0xff]  ;;  %235 = vmatpush.bf16.msra.mxu1 %v1681_v1  ;;  %v1692_v6 = vld [vmem:[%s2330_s1 + $0x50] sm:$0xff]  ;;  %v1674_v11 = vld [vmem:[%s2331_s0] sm:$0xff] }
   0x4   :  { %v1697_v3 = vld [vmem:[%s2330_s1 + $0x78] sm:$0xff]  ;;  %390 = vmatpush.bf16.msra.mxu2 %v1693_v2  ;;  %v1696_v7 = vld [vmem:[%s2330_s1 + $0x70] sm:$0xff]  ;;  %v1848_v12 = vld [vmem:[%s2331_s0 + $0x8] sm:$0xff]  ;;  %v84_v19 = vshrl.u32 %v1674_v11, 16  ;;  %v86_v20 = vshll.u32 %v1674_v11, 16 }
   0x5   :  { %494 = vmatpush.bf16.msra.mxu3 %v1697_v3  ;;  %v264_v13 = vld [vmem:[%s2331_s0 + $0x4] sm:$0xff]   ;;  %v1859_v15 = vld [vmem:[%s2331_s0 + $0xc] sm:$0xff]  ;;  %v91_v21 = vshll.u32 %v1848_v12, 16  ;;  %v1717_v36 = vld [vmem:[%s2330_s1 + $0x58] sm:$0xff]  ;;  %v95_v56 = vshrl.u32 %v1848_v12, 16 }
   0x6   :  { %167 = vmatpush.bf16.msra.mxu0 %v1684_v4  ;;  %v1775_v14 = vld [vmem:[%s2331_s0 + $0x4] sm:$0xf0]  ;;  %v1776_v16 = vld [vmem:[%s2331_s0 + $0x4] sm:$0xe]  ;;  %v88_v22 = vrot.slane %v86_v20, 1  ;;  %v316_v27 = vshll.u32 %v1859_v15, 16 }
   0x7   :  { %236 = vmatpush.bf16.msra.mxu1 %v1680_v5  ;;  %v1691_v17 = vld [vmem:[%s2330_s1 + $0x48] sm:$0xff]  ;;  %v21_v23 = vld [vmem:[%s2332_s2] sm:$0xff]  ;;  %v93_v26 = vrot.slane %v91_v21, 1  ;;  %v1777_v28 = vor.u32 %v1776_v16, %v1775_v14  ;;  %v443_v32 = vrot.slane %v1859_v15, 1  ;;  %v309_v33 = vshrl.u32 %v264_v13, 16  ;;  %v1721_v37 = vld [vmem:[%s2330_s1 + $0x78] sm:$0xff] }
   0x8   :  { %391 = vmatpush.bf16.msra.mxu2 %v1692_v6  ;;  %v1695_v18 = vld [vmem:[%s2330_s1 + $0x68] sm:$0xff]  ;;  %v1682_v24 = vld [vmem:[%s2330_s1 + $0x20] sm:$0xff]  ;;  %v89_v31 = vor.u32 %v88_v22, %v84_v19  ;;  %v311_v34 = vshll.u32 %v264_v13, 16  ;;  %543 = vperm.xlu0 %1770, %v21_v23   ;;  %v318_v40 = vrot.slane %v316_v27, 1  ;;  %v1709_v41 = vld [vmem:[%s2330_s1 + $0x38] sm:$0xff]  ;;  %v320_v60 = vshrl.u32 %v1859_v15, 16 }
   0x9   :  { %495 = vmatpush.bf16.msra.mxu3 %v1696_v7  ;;  %v1678_v25 = vld [vmem:[%s2330_s1] sm:$0xff]  ;;  %v442_v35 = vrot.slane %v1777_v28, 1  ;;  %v1705_v43 = vld [vmem:[%s2330_s1 + $0x18] sm:$0xff]  ;;  %v1716_v45 = vld [vmem:[%s2330_s1 + $0x50] sm:$0xff]  ;;  %v97_v62 = vor.u32 %v95_v56, %v93_v26 }
   0xa   :  { %168 = vmatpush.bf16.msra.mxu0 %v1683_v8  ;;  %v1690_v29 = vld [vmem:[%s2330_s1 + $0x40] sm:$0xff]  ;;  %v94_v38 = vsel %vm82_vm0, %v89_v31, %v93_v26  ;;  %v313_v39 = vrot.slane %v311_v34, 1  ;;  %v1720_v46 = vld [vmem:[%s2330_s1 + $0x70] sm:$0xff]  ;;  %v22_v50 = vld [vmem:[%s2332_s2 + $0x8] sm:$0xff]  ;;  %v322_v2 = vor.u32 %v320_v60, %v318_v40 }
   0xb   :  { %237 = vmatpush.bf16.msra.mxu1 %v1679_v10  ;;  %v1694_v30 = vld [vmem:[%s2330_s1 + $0x60] sm:$0xff]  ;;  %v444_v42 = vsel %vm441_vm1, %v442_v35, %v443_v32  ;;  %v1917_v48 = vld [vmem:[%s2331_s0 + $0x10] sm:$0xff]  ;;  %v1715_v54 = vld [vmem:[%s2330_s1 + $0x48] sm:$0xff] }
   0xc   :  { %392 = vmatpush.bf16.msra.mxu2 %v1691_v17  ;;  %v314_v44 = vor.u32 %v313_v39, %v309_v33  ;;  %v1708_v49 = vld [vmem:[%s2330_s1 + $0x30] sm:$0xff]  ;;  %v1719_v55 = vld [vmem:[%s2330_s1 + $0x68] sm:$0xff]  ;;  %v99_v57 = vshll.u32 %v1917_v48, 16  ;;  %v24_v0 = vld [vmem:[%s2332_s2 + $0x18] sm:$0xff] }
   0xd   :  { %496 = vmatpush.bf16.msra.mxu3 %v1695_v18  ;;  %v1704_v51 = vld [vmem:[%s2330_s1 + $0x10] sm:$0xff]  ;;  %v1707_v58 = vld [vmem:[%s2330_s1 + $0x28] sm:$0xff]  ;;  %v1677_v7 = vld [vmem:[%s2331_s0 + $0x18] sm:$0xff] }
   0xe   :  { %169 = vmatpush.bf16.msra.mxu0 %v1682_v24  ;;  %v319_v47 = vsel %vm82_vm0, %v314_v44, %v318_v40  ;;  %v23_v52 = vld [vmem:[%s2332_s2 + $0x10] sm:$0xff]  ;;  %v1703_v59 = vld [vmem:[%s2330_s1 + $0x8] sm:$0xff]  ;;  %v101_v63 = vrot.slane %v99_v57, 1  ;;  %v1714_v8 = vld [vmem:[%s2330_s1 + $0x40] sm:$0xff] }
   0xf   :  { %238 = vmatpush.bf16.msra.mxu1 %v1678_v25  ;;  %v1687_v53 = vld [vmem:[%s2331_s0 + $0x14] sm:$0xff]  ;;  %553 = vperm.xlu1 %1771, %v23_v52   ;;  %v1718_v9 = vld [vmem:[%s2330_s1 + $0x60] sm:$0xff]  ;;  %v1689_v28 = vld [vmem:[%s2331_s0 + $0x24] sm:$0x10] }
  0x10   :  { %393 = vmatpush.bf16.msra.mxu2 %v1690_v29  ;;  %548 = vperm.xlu0 %1770, %v22_v50   ;;  %v324_v61 = vshll.u32 %v1687_v53, 16  ;;  %v445_v1 = vrot.slane %v1687_v53, 1  ;;  %v102_v4 = vsel %vm82_vm0, %v97_v62, %v101_v63  ;;  %v1688_v10 = vld [vmem:[%s2331_s0 + $0x1c] sm:$0xff]  ;;  %v328_v13 = vshrl.u32 %v1687_v53, 16  ;;  %v47_v19 = vld [vmem:[%s2331_s0 + $0x24] sm:$0x1] }
  0x11   :  { %497 = vmatpush.bf16.msra.mxu3 %v1694_v30  ;;  %1404 = vmatmul.msk.bf16.vlgmr.msra.gmra.mxu0 %vm146_vm2, %v94_v38  ;;  %v332_v14 = vshll.u32 %v1688_v10, 16  ;;  %v447_v17 = vrot.slane %v1688_v10, 1  ;;  %v38_v18 = vld [vmem:[%s2331_s0 + $0x20] sm:$0xf]  ;;  %v76_v24 = vunpack.c.l.b16 %v47_v19  ;;  %v1452_v27 = vld [vmem:[%s2331_s0 + $0x24] sm:$0xf] }
  0x12   :  { %1425 = vmatmul.msk.bf16.vlgmr.msra.gmra.mxu1 %vm146_vm2, %v1674_v11  ;;  %768 = vmatpush.bf16.msrb.mxu0 %v1709_v41  ;;  %v326_v3 = vrot.slane %v324_v61, 1  ;;  %v446_v5 = vsel %vm441_vm1, %v443_v32, %v445_v1  ;;  %v103_v11 = vshrl.u32 %v1917_v48, 16  ;;  %v75_v23 = vunpack.c.l.b16 %v38_v18  ;;  %v1706_v30 = vld [vmem:[%s2330_s1 + $0x20] sm:$0xff]  ;;  %v27_v32 = vld [vmem:[%s2332_s2 + $0x30] sm:$0xff]  ;;  %v28_v35 = vld [vmem:[%s2332_s2 + $0x38] sm:$0xff] }
  0x13   :  { %1470 = vmatmul.msk.bf16.vlgmr.msra.gmra.mxu2 %vm146_vm2, %v319_v47  ;;  %837 = vmatpush.bf16.msrb.mxu1 %v1705_v43  ;;  %v334_v21 = vrot.slane %v332_v14, 1  ;;  %v448_v25 = vsel %vm441_vm1, %v445_v1, %v447_v17  ;;  %v1702_v31 = vld [vmem:[%s2330_s1] sm:$0xff]  ;;  %v1453_v33 = vor.u32 %v1689_v28, %v1452_v27  ;;  %v336_v38 = vshrl.u32 %v1688_v10, 16  ;;  %v1580_v50 = vld [vmem:[%s2331_s0 + $0x34] sm:$0xff]  }
  0x14   :  { %991 = vmatpush.bf16.msrb.mxu2 %v1717_v36  ;;  %1499 = vmatmul.msk.bf16.vlgmr.msra.gmra.mxu3 %vm146_vm2, %v444_v42  ;;  %v327_v6 = vsel %vm82_vm0, %v322_v2, %v326_v3  ;;  %v105_v15 = vor.u32 %v103_v11, %v101_v63  ;;  %v330_v20 = vor.u32 %v328_v13, %v326_v3  ;;  %v25_v34 = vld [vmem:[%s2332_s2 + $0x20] sm:$0xff]  ;;  %v111_v36 = vshrl.u32 %v1677_v7, 16  ;;  %v1779_v57 = vld [vmem:[%s2331_s0 + $0x34] sm:$0xe] }
  0x15   :  { %1093 = vmatpush.bf16.msrb.mxu3 %v1721_v37  ;;  %v81_v29 = vpack.c.b16 %v76_v24, %v75_v23  ;;  %563 = vperm.xlu2 %1772, %v25_v34   ;;  %v340_v39 = vshll.u32 %v1453_v33, 16  ;;  %v449_v42 = vrot.slane %v1453_v33, 1  ;;  %v338_v43 = vor.u32 %v336_v38, %v334_v21  ;;  %v29_v60 = vld [vmem:[%s2332_s2 + $0x40] sm:$0xff]  ;;  %v1512_v38 = vld [vmem:[%s2331_s0 + $0x50] sm:$0xf] }
  0x16   :  { %769 = vmatpush.bf16.msrb.mxu0 %v1708_v49  ;;  %v335_v26 = vsel %vm82_vm0, %v330_v20, %v334_v21  ;;  %v344_v52 = vshrl.u32 %v1453_v33, 16  ;;  %v1710_v61 = vld [vmem:[%s2331_s0 + $0x3c] sm:$0xff]  ;;  %v912_v62 = vshll.u32 %v1580_v50, 16  ;;  %v910_v3 = vshrl.u32 %v1580_v50, 16 }
  0x17   :  { %838 = vmatpush.bf16.msrb.mxu1 %v1704_v51  ;;  %558 = vperm.xlu1 %1771, %v24_v0   ;;  %v115_v37 = vshll.u32 %v81_v29, 16  ;;  %v342_v44 = vrot.slane %v340_v39, 1  ;;  %v119_v49 = vshrl.u32 %v81_v29, 16  ;;  %v1778_v51 = vld [vmem:[%s2331_s0 + $0x34] sm:$0xf0]  ;;  %v921_v19 = vshrl.u32 %v1710_v61, 16 }
  0x18   :  { %992 = vmatpush.bf16.msrb.mxu2 %v1716_v45  ;;  %573 = vperm.xlu0 %1770, %v27_v32   ;;  %v1780_v2 = vor.u32 %v1779_v57, %v1778_v51  ;;  %v1701_v29 = vld [vmem:[%s2331_s0 + $0x48] sm:$0xff]  ;;  %v1513_v39 = vld [vmem:[%s2331_s0 + $0x54] sm:$0x1] }
  0x19   :  { %1094 = vmatpush.bf16.msrb.mxu3 %v1720_v46  ;;  %v117_v41 = vrot.slane %v115_v37, 1  ;;  %v450_v46 = vsel %vm441_vm1, %v447_v17, %v449_v42  ;;  %v343_v47 = vsel %vm82_vm0, %v338_v43, %v342_v44  ;;  %v346_v56 = vor.u32 %v344_v52, %v342_v44 }
  0x1a   :  { %770 = vmatpush.bf16.msrb.mxu0 %v1707_v58  ;;  %v1699_v58 = vld [vmem:[%s2331_s0 + $0x38] sm:$0xff]  ;;  %v710_v32 = vshll.u32 %v1701_v29, 16  ;;  %v679_v43 = vunpack.c.l.b16 %v1512_v38  ;;  %v680_v44 = vunpack.c.l.b16 %v1513_v39  ;;  %v714_v51 = vshrl.u32 %v1701_v29, 16 }
  0x1b   :  { %839 = vmatpush.bf16.msrb.mxu1 %v1703_v59  ;;  %v121_v53 = vor.u32 %v119_v49, %v117_v41  ;;  %v694_v1 = vshll.u32 %v1699_v58, 16  ;;  %v698_v17 = vshrl.u32 %v1699_v58, 16 }
  0x1c   :  { %993 = vmatpush.bf16.msrb.mxu2 %v1715_v54  ;;  %v195_v54 = vpack.c.b16 %v75_v23, %v75_v23  ;;  %v685_v49 = vpack.c.b16 %v680_v44, %v679_v43 }
  0x1d   :  { %1095 = vmatpush.bf16.msrb.mxu3 %v1719_v55  ;;  %v1698_v55 = vld [vmem:[%s2331_s0 + $0x30] sm:$0xff] }
  0x1e   :  { %771 = vmatpush.bf16.msrb.mxu0 %v1706_v30  ;;  %v689_v59 = vshll.u32 %v1698_v55, 16  ;;  %v687_v63 = vshrl.u32 %v1698_v55, 16  ;;  %v1712_v30 = vld [vmem:[%s2331_s0 + $0x4c] sm:$0xff]  ;;  %v718_v52 = vshll.u32 %v685_v49, 16 }
  0x1f   :  { %840 = vmatpush.bf16.msrb.mxu1 %v1702_v31  ;;  %578 = vperm.xlu1 %1771, %v28_v35   ;;  %v933_v34 = vshll.u32 %v1712_v30, 16  ;;  %v1046_v37 = vrot.slane %v1712_v30, 1 }
  0x20   :  { %994 = vmatpush.bf16.msrb.mxu2 %v1714_v8  ;;  %v691_v0 = vrot.slane %v689_v59, 1  ;;  %v1041_v8 = vrot.slane %v1780_v2, 1 }
  0x21   :  { %1405 = vmatmul.msk.bf16.gmra.mxu0 %vm146_vm2, %v102_v4  ;;  %1096 = vmatpush.bf16.msrb.mxu3 %v1718_v9  ;;  %v914_v4 = vrot.slane %v912_v62, 1  ;;  %v1042_v9 = vrot.slane %v1710_v61, 1 }
  0x22   :  { %1426 = vmatmul.msk.bf16.gmra.mxu1 %vm146_vm2, %v1848_v12  ;;  %v107_v12 = vshll.u32 %v1677_v7, 16 }
  0x23   :  { %1471 = vmatmul.msk.bf16.gmra.mxu2 %vm146_vm2, %v327_v6  ;;  %v692_v6 = vor.u32 %v691_v0, %v687_v63  ;;  %v915_v10 = vor.u32 %v914_v4, %v910_v3  ;;  %v1043_v13 = vsel %vm441_vm1, %v1041_v8, %v1042_v9 }
  0x24   :  { %1500 = vmatmul.msk.bf16.gmra.mxu3 %vm146_vm2, %v446_v5  ;;  %v109_v16 = vrot.slane %v107_v12, 1  ;;  %v917_v5 = vshll.u32 %v1710_v61, 16 }
  0x26   :  { %v110_v22 = vsel %vm82_vm0, %v105_v15, %v109_v16  ;;  %v113_v40 = vor.u32 %v111_v36, %v109_v16  ;;  %v919_v11 = vrot.slane %v917_v5, 1  ;;  %v1700_v15 = vld [vmem:[%s2331_s0 + $0x40] sm:$0xff]  ;;  %v712_v36 = vrot.slane %v710_v32, 1 }
  0x27   :  { %v1711_v16 = vld [vmem:[%s2331_s0 + $0x44] sm:$0xff]  ;;  %v702_v18 = vshll.u32 %v1700_v15, 16  ;;  %v706_v31 = vshrl.u32 %v1700_v15, 16 }
  0x28   :  { %v118_v45 = vsel %vm82_vm0, %v113_v40, %v117_v41  ;;  %v920_v14 = vsel %vm82_vm0, %v915_v10, %v919_v11  ;;  %v925_v20 = vshll.u32 %v1711_v16, 16  ;;  %v1044_v23 = vrot.slane %v1711_v16, 1 }
  0x29   :  { %v923_v24 = vor.u32 %v921_v19, %v919_v11  ;;  %v929_v33 = vshrl.u32 %v1711_v16, 16  ;;  %v935_v41 = vrot.slane %v933_v34, 1  ;;  %v722_v10 = vshrl.u32 %v685_v49, 16 }
  0x2a   :  { %v1045_v27 = vsel %vm441_vm1, %v1042_v9, %v1044_v23 }
  0x31   :  { %1406 = vmatmul.msk.bf16.gmra.mxu0 %vm146_vm2, %v110_v22  ;;  %v704_v22 = vrot.slane %v702_v18, 1 }
  0x32   :  { %1427 = vmatmul.msk.bf16.gmra.mxu1 %vm146_vm2, %v1917_v48  ;;  %v26_v48 = vld [vmem:[%s2332_s2 + $0x28] sm:$0xff] }
  0x33   :  { %1472 = vmatmul.msk.bf16.gmra.mxu2 %vm146_vm2, %v335_v26  ;;  %568 = vperm.xlu2 %1772, %v26_v48   ;;  %v708_v35 = vor.u32 %v706_v31, %v704_v22  ;;  %v1713_v48 = vld [vmem:[%s2331_s0 + $0x54] sm:$0x10] }
  0x34   :  { %1501 = vmatmul.msk.bf16.gmra.mxu3 %vm146_vm2, %v448_v25  ;;  %v927_v25 = vrot.slane %v925_v20, 1 }
  0x36   :  { %v928_v28 = vsel %vm82_vm0, %v923_v24, %v927_v25  ;;  %v931_v40 = vor.u32 %v929_v33, %v927_v25 }
  0x3b   :  { %583 = vperm.xlu2 %1772, %v29_v60  }
  0x41   :  { %1407 = vmatmul.msk.bf16.gmra.mxu0 %vm146_vm2, %v118_v45  ;;  %v1047_v45 = vsel %vm441_vm1, %v1044_v23, %v1046_v37 }
  0x42   :  { %1428 = vmatmul.msk.bf16.gmra.mxu1 %vm146_vm2, %v1677_v7  ;;  %v696_v7 = vrot.slane %v694_v1, 1 }
  0x43   :  { %1473 = vmatmul.msk.bf16.gmra.mxu2 %vm146_vm2, %v343_v47  ;;  %v1612_v47 = vld [vmem:[%s2331_s0 + $0x54] sm:$0xf] }
  0x44   :  { %1502 = vmatmul.msk.bf16.gmra.mxu3 %vm146_vm2, %v450_v46  ;;  %v697_v12 = vsel %vm82_vm0, %v692_v6, %v696_v7  ;;  %v700_v21 = vor.u32 %v698_v17, %v696_v7  ;;  %v936_v46 = vsel %vm82_vm0, %v931_v40, %v935_v41  ;;  %v1613_v50 = vor.u32 %v1713_v48, %v1612_v47 }
  0x46   :  { %v705_v26 = vsel %vm82_vm0, %v700_v21, %v704_v22  ;;  %v1048_v57 = vrot.slane %v1613_v50, 1  ;;  %v945_v11 = vshrl.u32 %v1613_v50, 16 }
  0x48   :  { %v1049_v0 = vsel %vm441_vm1, %v1046_v37, %v1048_v57 }
  0x51   :  { %1408 = vmatmul.msk.bf16.gmra.mxu0 %vm146_vm2, %v121_v53  ;;  %v937_v53 = vshrl.u32 %v1712_v30, 16 }
  0x52   :  { %1429 = vmatmul.msk.bf16.gmra.mxu1 %vm146_vm2, %v195_v54  ;;  %v941_v54 = vshll.u32 %v1613_v50, 16 }
  0x53   :  { %1474 = vmatmul.msk.bf16.gmra.mxu2 %vm146_vm2, %v346_v56  ;;  %v720_v56 = vrot.slane %v718_v52, 1 }
  0x54   :  { %1503 = vmatmul.msk.bf16.gmra.mxu3 %vm146_vm2, %v449_v42  ;;  %v713_v42 = vsel %vm82_vm0, %v708_v35, %v712_v36  ;;  %v943_v59 = vrot.slane %v941_v54, 1 }
  0x56   :  { %v947_v19 = vor.u32 %v945_v11, %v943_v59 }
  0x61   :  { %1554 = vmatmul.msk.bf16.vlgmr.msrb.gmra.mxu0 %vm146_vm2, %v697_v12 }
  0x62   :  { %1575 = vmatmul.msk.bf16.vlgmr.msrb.gmra.mxu1 %vm146_vm2, %v1698_v55  ;;  %v716_v55 = vor.u32 %v714_v51, %v712_v36 }
  0x63   :  { %1630 = vmatmul.msk.bf16.vlgmr.msrb.gmra.mxu2 %vm146_vm2, %v920_v14  ;;  %v797_v14 = vpack.c.b16 %v679_v43, %v679_v43 }
  0x64   :  { %1660 = vmatmul.msk.bf16.vlgmr.msrb.gmra.mxu3 %vm146_vm2, %v1043_v13  ;;  %v721_v62 = vsel %vm82_vm0, %v716_v55, %v720_v56  ;;  %v724_v13 = vor.u32 %v722_v10, %v720_v56 }
  0x71   :  { %1555 = vmatmul.msk.bf16.gmra.mxu0 %vm146_vm2, %v705_v26 }
  0x72   :  { %1576 = vmatmul.msk.bf16.gmra.mxu1 %vm146_vm2, %v1699_v58  ;;  %v939_v58 = vor.u32 %v937_v53, %v935_v41  ;;  %v2130_v53 = vpop.permute.xlu2 %563 }
  0x73   :  { %1631 = vmatmul.msk.bf16.gmra.mxu2 %vm146_vm2, %v928_v28 }
  0x74   :  { %1661 = vmatmul.msk.bf16.gmra.mxu3 %vm146_vm2, %v1045_v27  ;;  %v944_v1 = vsel %vm82_vm0, %v939_v58, %v943_v59 }
  0x7a   :  { %v2098_v3 = vpop.permute.xlu0 %543 }
  0x81   :  { %1556 = vmatmul.msk.bf16.gmra.mxu0 %vm146_vm2, %v713_v42 }
  0x82   :  { %1577 = vmatmul.msk.bf16.gmra.mxu1 %vm146_vm2, %v1700_v15  ;;  %v2102_v21 = vpop.permute.xlu0 %548 }
  0x83   :  { %1632 = vmatmul.msk.bf16.gmra.mxu2 %vm146_vm2, %v936_v46 }
  0x84   :  { %1662 = vmatmul.msk.bf16.gmra.mxu3 %vm146_vm2, %v1047_v45 }
  0x8e   :  { %v171_v60 = vpop.f32.mrf.mxu0 }
  0x8f   :  { %v240_v61 = vpop.f32.mrf.mxu1 }
  0x90   :  { %v241_v63 = vadd.f32 %v240_v61, %v171_v60 }
  0x91   :  { %1557 = vmatmul.msk.bf16.gmra.mxu0 %vm146_vm2, %v721_v62 }
  0x92   :  { %1578 = vmatmul.msk.bf16.gmra.mxu1 %vm146_vm2, %v1701_v29  ;;  %v2116_v29 = vpop.permute.xlu1 %553 }
  0x93   :  { %1633 = vmatmul.msk.bf16.gmra.mxu2 %vm146_vm2, %v944_v1 }
  0x94   :  { %1663 = vmatmul.msk.bf16.gmra.mxu3 %vm146_vm2, %v1049_v0 }
  0x96   :  { %v395_v4 = vpop.f32.mrf.mxu2  ;;  %v173_v5 = vpop.f32.mrf.mxu0 }
  0x97   :  { %v499_v2 = vpop.f32.mrf.mxu3  ;;  %v419_v6 = vadd.f32 %v395_v4, %v241_v63  ;;  %v242_v7 = vpop.f32.mrf.mxu1 }
  0x98   :  { %v243_v8 = vadd.f32 %v242_v7, %v173_v5 }
  0x99   :  { %v2100_v9 = vadd.f32 %v499_v2, %v419_v6 }
  0x9a   :  { %v2123_v47 = vpop.permute.xlu1 %558 }
  0x9b   :  { %v586_v22 = vmul.f32 %v2098_v3, %v2100_v9 }
  0x9d   :  { %v610_v25 = vmul.f32 %v586_v22, %v2100_v9 }
  0x9e   :  { %v397_v15 = vpop.f32.mrf.mxu2  ;;  %v176_v16 = vpop.f32.mrf.mxu0 }
  0x9f   :  { %v501_v12 = vpop.f32.mrf.mxu3  ;;  %v420_v17 = vadd.f32 %v397_v15, %v243_v8  ;;  %v245_v18 = vpop.f32.mrf.mxu1 }
  0xa0   :  { %v246_v20 = vadd.f32 %v245_v18, %v176_v16  ;;  %v2137_v8 = vpop.permute.xlu2 %568 }
  0xa1   :  { %v2106_v23 = vadd.f32 %v501_v12, %v420_v17  ;;  %1558 = vmatmul.msk.bf16.gmra.mxu0 %vm146_vm2, %v724_v13 }
  0xa2   :  { %1579 = vmatmul.msk.bf16.gmra.mxu1 %vm146_vm2, %v797_v14 }
  0xa3   :  { %v587_v24 = vmul.f32 %v2102_v21, %v2106_v23  ;;  %1634 = vmatmul.msk.bf16.gmra.mxu2 %vm146_vm2, %v947_v19 }
  0xa4   :  { %1664 = vmatmul.msk.bf16.gmra.mxu3 %vm146_vm2, %v1048_v57 }
  0xa5   :  { %v595_v26 = vadd.f32 %v587_v24, %v586_v22  ;;  %v611_v27 = vmul.f32 %v587_v24, %v2106_v23  ;;  %v2144_v22 = vpop.permute.xlu0 %573 }
  0xa6   :  { %v400_v30 = vpop.f32.mrf.mxu2  ;;  %v178_v31 = vpop.f32.mrf.mxu0 }
  0xa7   :  { %v504_v28 = vpop.f32.mrf.mxu3  ;;  %v619_v32 = vadd.f32 %v611_v27, %v610_v25  ;;  %v421_v33 = vadd.f32 %v400_v30, %v246_v20  ;;  %v247_v34 = vpop.f32.mrf.mxu1 }
  0xa8   :  { %v248_v35 = vadd.f32 %v247_v34, %v178_v31 }
  0xa9   :  { %v2118_v36 = vadd.f32 %v504_v28, %v421_v33 }
  0xab   :  { %v588_v37 = vmul.f32 %v2116_v29, %v2118_v36 }
  0xad   :  { %v596_v38 = vadd.f32 %v595_v26, %v588_v37  ;;  %v612_v39 = vmul.f32 %v588_v37, %v2118_v36  ;;  %v2151_v37 = vpop.permute.xlu1 %578 }
  0xae   :  { %v402_v41 = vpop.f32.mrf.mxu2  ;;  %v181_v42 = vpop.f32.mrf.mxu0 }
  0xaf   :  { %v506_v40 = vpop.f32.mrf.mxu3  ;;  %v620_v43 = vadd.f32 %v619_v32, %v612_v39  ;;  %v422_v44 = vadd.f32 %v402_v41, %v248_v35  ;;  %v250_v45 = vpop.f32.mrf.mxu1 }
  0xb0   :  { %v251_v46 = vadd.f32 %v250_v45, %v181_v42 }
  0xb1   :  { %v2125_v48 = vadd.f32 %v506_v40, %v422_v44 }
  0xb3   :  { %v589_v49 = vmul.f32 %v2123_v47, %v2125_v48 }
  0xb5   :  { %v597_v50 = vadd.f32 %v596_v38, %v589_v49  ;;  %v613_v51 = vmul.f32 %v589_v49, %v2125_v48 }
  0xb6   :  { %v405_v54 = vpop.f32.mrf.mxu2  ;;  %v183_v55 = vpop.f32.mrf.mxu0 }
  0xb7   :  { %v509_v52 = vpop.f32.mrf.mxu3  ;;  %v621_v56 = vadd.f32 %v620_v43, %v613_v51  ;;  %v423_v57 = vadd.f32 %v405_v54, %v251_v46  ;;  %v252_v58 = vpop.f32.mrf.mxu1 }
  0xb8   :  { %v253_v59 = vadd.f32 %v252_v58, %v183_v55 }
  0xb9   :  { %v2132_v60 = vadd.f32 %v509_v52, %v423_v57 }
  0xbb   :  { %v590_v61 = vmul.f32 %v2130_v53, %v2132_v60 }
  0xbd   :  { %v598_v62 = vadd.f32 %v597_v50, %v590_v61  ;;  %v614_v63 = vmul.f32 %v590_v61, %v2132_v60  ;;  %v2158_v50 = vpop.permute.xlu2 %583 }
  0xbe   :  { %v407_v1 = vpop.f32.mrf.mxu2  ;;  %v186_v2 = vpop.f32.mrf.mxu0 }
  0xbf   :  { %v511_v0 = vpop.f32.mrf.mxu3  ;;  %v622_v4 = vadd.f32 %v621_v56, %v614_v63  ;;  %v424_v5 = vadd.f32 %v407_v1, %v253_v59  ;;  %v255_v6 = vpop.f32.mrf.mxu1 }
  0xc0   :  { %v256_v7 = vadd.f32 %v255_v6, %v186_v2 }
  0xc1   :  { %v2139_v10 = vadd.f32 %v511_v0, %v424_v5 }
  0xc3   :  { %v591_v11 = vmul.f32 %v2137_v8, %v2139_v10 }
  0xc5   :  { %v599_v12 = vadd.f32 %v598_v62, %v591_v11  ;;  %v615_v13 = vmul.f32 %v591_v11, %v2139_v10 }
  0xc6   :  { %v410_v15 = vpop.f32.mrf.mxu2  ;;  %v188_v16 = vpop.f32.mrf.mxu0 }
  0xc7   :  { %v514_v14 = vpop.f32.mrf.mxu3  ;;  %v623_v17 = vadd.f32 %v622_v4, %v615_v13  ;;  %v425_v18 = vadd.f32 %v410_v15, %v256_v7  ;;  %v257_v19 = vpop.f32.mrf.mxu1 }
  0xc8   :  { %v258_v20 = vadd.f32 %v257_v19, %v188_v16 }
  0xc9   :  { %v2146_v24 = vadd.f32 %v514_v14, %v425_v18 }
  0xcb   :  { %v592_v25 = vmul.f32 %v2144_v22, %v2146_v24 }
  0xcd   :  { %v600_v26 = vadd.f32 %v599_v12, %v592_v25  ;;  %v616_v27 = vmul.f32 %v592_v25, %v2146_v24 }
  0xce   :  { %v412_v30 = vpop.f32.mrf.mxu2  ;;  %v191_v31 = vpop.f32.mrf.mxu0 }
  0xcf   :  { %v516_v28 = vpop.f32.mrf.mxu3  ;;  %v624_v32 = vadd.f32 %v623_v17, %v616_v27  ;;  %v426_v33 = vadd.f32 %v412_v30, %v258_v20  ;;  %v260_v34 = vpop.f32.mrf.mxu1 }
  0xd0   :  { %v261_v35 = vadd.f32 %v260_v34, %v191_v31 }
  0xd1   :  { %v2153_v38 = vadd.f32 %v516_v28, %v426_v33 }
  0xd3   :  { %v593_v39 = vmul.f32 %v2151_v37, %v2153_v38 }
  0xd5   :  { %v601_v40 = vadd.f32 %v600_v26, %v593_v39  ;;  %v617_v41 = vmul.f32 %v593_v39, %v2153_v38 }
  0xd6   :  { %v415_v43 = vpop.f32.mrf.mxu2  ;;  %v193_v44 = vpop.f32.mrf.mxu0 }
  0xd7   :  { %v519_v42 = vpop.f32.mrf.mxu3  ;;  %v625_v45 = vadd.f32 %v624_v32, %v617_v41  ;;  %v427_v46 = vadd.f32 %v415_v43, %v261_v35  ;;  %v262_v49 = vpop.f32.mrf.mxu1 }
  0xd9   :  { %v2160_v51 = vadd.f32 %v519_v42, %v427_v46 }
  0xdb   :  { %v594_v52 = vmul.f32 %v2158_v50, %v2160_v51 }
  0xdd   :  { %v2164_v54 = vadd.f32 %v601_v40, %v594_v52  ;;  %v618_v55 = vmul.f32 %v594_v52, %v2160_v51 }
  0xde   :  { %v417_v57 = vpop.f32.mrf.mxu2  ;;  %v773_v58 = vpop.f32.mrf.mxu0 }
  0xdf   :  { %v521_v56 = vpop.f32.mrf.mxu3  ;;  %v2167_v59 = vadd.f32 %v625_v45, %v618_v55  ;;  %v842_v61 = vpop.f32.mrf.mxu1 }
  0xe0   :  { %v843_v27 = vadd.f32 %v842_v61, %v773_v58 }
  0xe6   :  { %v996_v63 = vpop.f32.mrf.mxu2  ;;  %v775_v0 = vpop.f32.mrf.mxu0 }
  0xe7   :  { %v1098_v62 = vpop.f32.mrf.mxu3  ;;  %v844_v1 = vpop.f32.mrf.mxu1  ;;  %v1020_v35 = vadd.f32 %v996_v63, %v843_v27 }
  0xe8   :  { %v845_v28 = vadd.f32 %v844_v1, %v775_v0 }
  0xe9   :  { %v2171_v45 = vadd.f32 %v1098_v62, %v1020_v35 }
  0xeb   :  { %v1141_v1 = vmul.f32 %v2171_v45, %v2098_v3 }
  0xee   :  { %v998_v4 = vpop.f32.mrf.mxu2  ;;  %v778_v5 = vpop.f32.mrf.mxu0 }
  0xef   :  { %v1100_v2 = vpop.f32.mrf.mxu3  ;;  %v847_v6 = vpop.f32.mrf.mxu1  ;;  %v1021_v34 = vadd.f32 %v998_v4, %v845_v28 }
  0xf0   :  { %v848_v30 = vadd.f32 %v847_v6, %v778_v5 }
  0xf1   :  { %v2169_v42 = vadd.f32 %v1100_v2, %v1021_v34 }
  0xf3   :  { %v1142_v61 = vmul.f32 %v2169_v42, %v2102_v21 }
  0xf5   :  { %v1166_v5 = vmul.f32 %v1142_v61, %v2169_v42 }
  0xf6   :  { %v1001_v11 = vpop.f32.mrf.mxu2  ;;  %v780_v12 = vpop.f32.mrf.mxu0 }
  0xf7   :  { %v1103_v7 = vpop.f32.mrf.mxu3  ;;  %v849_v13 = vpop.f32.mrf.mxu1  ;;  %v1022_v39 = vadd.f32 %v1001_v11, %v848_v30 }
  0xf8   :  { %v850_v40 = vadd.f32 %v849_v13, %v780_v12  ;;  %v1165_v12 = vmul.f32 %v1141_v1, %v2171_v45 }
  0xf9   :  { %v2173_v46 = vadd.f32 %v1103_v7, %v1022_v39 }
  0xfb   :  { %v1143_v62 = vmul.f32 %v2173_v46, %v2116_v29 }
  0xfd   :  { %v1167_v13 = vmul.f32 %v1143_v62, %v2173_v46 }
  0xfe   :  { %v1003_v15 = vpop.f32.mrf.mxu2  ;;  %v783_v16 = vpop.f32.mrf.mxu0 }
  0xff   :  { %v1105_v14 = vpop.f32.mrf.mxu3  ;;  %v852_v17 = vpop.f32.mrf.mxu1  ;;  %v1023_v43 = vadd.f32 %v1003_v15, %v850_v40  ;;  %v1150_v15 = vadd.f32 %v1142_v61, %v1141_v1  ;;  %v627_v40 = vrot.slane %v2167_v59, 4 }
 0x100   :  { %v853_v41 = vadd.f32 %v852_v17, %v783_v16 }
 0x101   :  { %v2177_v63 = vadd.f32 %v1105_v14, %v1023_v43 }
 0x103   :  { %v1144_v6 = vmul.f32 %v2177_v63, %v2123_v47  ;;  %v1151_v47 = vadd.f32 %v1150_v15, %v1143_v62 }
 0x105   :  { %v1152_v28 = vadd.f32 %v1151_v47, %v1144_v6 }
 0x106   :  { %v1006_v19 = vpop.f32.mrf.mxu2  ;;  %v785_v20 = vpop.f32.mrf.mxu0 }
 0x107   :  { %v1108_v18 = vpop.f32.mrf.mxu3  ;;  %v854_v25 = vpop.f32.mrf.mxu1  ;;  %v1024_v55 = vadd.f32 %v1006_v19, %v853_v41  ;;  %v1174_v19 = vadd.f32 %v1166_v5, %v1165_v12 }
 0x108   :  { %v855_v56 = vadd.f32 %v854_v25, %v785_v20  ;;  %v1168_v20 = vmul.f32 %v1144_v6, %v2177_v63 }
 0x109   :  { %v2183_v2 = vadd.f32 %v1108_v18, %v1024_v55  ;;  %v1175_v27 = vadd.f32 %v1174_v19, %v1167_v13 }
 0x10b   :  { %v1145_v29 = vmul.f32 %v2183_v2, %v2130_v53 }
 0x10d   :  { %v1169_v30 = vmul.f32 %v1145_v29, %v2183_v2  ;;  %v1153_v34 = vadd.f32 %v1152_v28, %v1145_v29 }
 0x10e   :  { %v1008_v31 = vpop.f32.mrf.mxu2  ;;  %v788_v32 = vpop.f32.mrf.mxu0 }
 0x10f   :  { %v1110_v26 = vpop.f32.mrf.mxu3  ;;  %v857_v33 = vpop.f32.mrf.mxu1  ;;  %v1025_v0 = vadd.f32 %v1008_v31, %v855_v56 }
 0x110   :  { %v858_v57 = vadd.f32 %v857_v33, %v788_v32  ;;  %v603_v32 = vrot.slane %v2164_v54, 4  ;;  %v1176_v33 = vadd.f32 %v1175_v27, %v1168_v20 }
 0x111   :  { %v2188_v7 = vadd.f32 %v1110_v26, %v1025_v0 }
 0x112   :  { %v604_v56 = vadd.f32 %v603_v32, %v2164_v54 }
 0x113   :  { %v1146_v25 = vmul.f32 %v2188_v7, %v2137_v8 }
 0x114   :  { %v605_v5 = vrot.slane %v604_v56, 2 }
 0x115   :  { %v1170_v35 = vmul.f32 %v1146_v25, %v2188_v7 }
 0x116   :  { %v1011_v49 = vpop.f32.mrf.mxu2  ;;  %v790_v52 = vpop.f32.mrf.mxu0  ;;  %v606_v15 = vadd.f32 %v605_v5, %v604_v56  ;;  %v1193_v56 = vld [vmem:[%s2333_s3] sm:$0x1] }
 0x117   :  { %v1113_v44 = vpop.f32.mrf.mxu3  ;;  %v859_v58 = vpop.f32.mrf.mxu1  ;;  %v1026_v4 = vadd.f32 %v1011_v49, %v858_v57  ;;  %v1154_v49 = vadd.f32 %v1153_v34, %v1146_v25 }
 0x118   :  { %v860_v21 = vadd.f32 %v859_v58, %v790_v52  ;;  %v607_v47 = vrot.slane %v606_v15, 1 }
 0x119   :  { %v2194_v16 = vadd.f32 %v1113_v44, %v1026_v4  ;;  %v1177_v44 = vadd.f32 %v1176_v33, %v1169_v30 }
 0x11a   :  { %v608_v30 = vadd.f32 %v607_v47, %v606_v15 }
 0x11b   :  { %v1147_v53 = vmul.f32 %v2194_v16, %v2144_v22  ;;  %v1178_v57 = vadd.f32 %v1177_v44, %v1170_v35 }
 0x11d   :  { %v1171_v52 = vmul.f32 %v1147_v53, %v2194_v16  ;;  %v1155_v58 = vadd.f32 %v1154_v49, %v1147_v53 }
 0x11e   :  { %v1013_v3 = vpop.f32.mrf.mxu2  ;;  %v793_v14 = vpop.f32.mrf.mxu0 }
 0x11f   :  { %v1115_v11 = vpop.f32.mrf.mxu3  ;;  %v1027_v17 = vadd.f32 %v1013_v3, %v860_v21  ;;  %v862_v18 = vpop.f32.mrf.mxu1  ;;  %v1179_v1 = vadd.f32 %v1178_v57, %v1171_v52 }
 0x120   :  { %v863_v31 = vadd.f32 %v862_v18, %v793_v14 }
 0x121   :  { %v2199_v26 = vadd.f32 %v1115_v11, %v1027_v17 }
 0x123   :  { %v1148_v39 = vmul.f32 %v2199_v26, %v2151_v37  ;;  %v628_v37 = vadd.f32 %v627_v40, %v2167_v59 }
 0x125   :  { %v1172_v61 = vmul.f32 %v1148_v39, %v2199_v26  ;;  %v1156_v62 = vadd.f32 %v1155_v58, %v1148_v39  ;;  %v629_v13 = vrot.slane %v628_v37, 2 }
 0x126   :  { %v1016_v41 = vpop.f32.mrf.mxu2  ;;  %v795_v43 = vpop.f32.mrf.mxu0 }
 0x127   :  { %v1118_v8 = vpop.f32.mrf.mxu3  ;;  %v1028_v22 = vadd.f32 %v1016_v41, %v863_v31  ;;  %v864_v55 = vpop.f32.mrf.mxu1  ;;  %v1180_v6 = vadd.f32 %v1179_v1, %v1172_v61  ;;  %v630_v18 = vadd.f32 %v629_v13, %v628_v37  ;;  %v1206_v37 = vld [vmem:[%s2334_s4] sm:$0x1] }
 0x129   :  { %v2212_v0 = vadd.f32 %v1118_v8, %v1028_v22 }
 0x12b   :  { %v1149_v4 = vmul.f32 %v2212_v0, %v2158_v50  ;;  %v631_v50 = vrot.slane %v630_v18, 1 }
 0x12d   :  { %v1157_v21 = vadd.f32 %v1156_v62, %v1149_v4  ;;  %v1173_v11 = vmul.f32 %v1149_v4, %v2212_v0  ;;  %v632_v32 = vadd.f32 %v631_v50, %v630_v18 }
 0x12e   :  { %v1018_v54 = vpop.f32.mrf.mxu2 }
 0x12f   :  { %v1120_v12 = vpop.f32.mrf.mxu3  ;;  %v1158_v3 = vrot.slane %v1157_v21, 4  ;;  %v1181_v14 = vadd.f32 %v1180_v6, %v1173_v11 }
 0x131   :  { %v1159_v29 = vadd.f32 %v1158_v3, %v1157_v21  ;;  %v1182_v17 = vrot.slane %v1181_v14, 4 }
 0x133   :  { %v1160_v59 = vrot.slane %v1159_v29, 2  ;;  %v1183_v19 = vadd.f32 %v1182_v17, %v1181_v14 }
 0x135   :  { %v1161_v20 = vadd.f32 %v1160_v59, %v1159_v29  ;;  %v1184_v25 = vrot.slane %v1183_v19, 2 }
 0x137   :  { %v1162_v27 = vrot.slane %v1161_v20, 1  ;;  %v1185_v28 = vadd.f32 %v1184_v25, %v1183_v19 }
 0x139   :  { %v1163_v53 = vadd.f32 %v1162_v27, %v1161_v20  ;;  %v1186_v31 = vrot.slane %v1185_v28, 1 }
 0x13b   :  { %v1164_v33 = vadd.f32 %v1163_v53, %v608_v30  ;;  %v1187_v34 = vadd.f32 %v1186_v31, %v1185_v28 }
 0x13d   :  { %v1188_v35 = vadd.f32 %v1187_v34, %v632_v32  ;;  %v1189_v39 = vmul.f32 0.0078125, %v1164_v33 }
 0x13f   :  { %v1190_v8 = vmul.f32 0.0078125, %v1188_v35  ;;  %v1191_v40 = vmul.f32 %v1189_v39, %v1189_v39 }
 0x141   :  { %v1192_v41 = vsub.f32 %v1190_v8, %v1191_v40 }
 0x143   :  { %v1194_v43 = vadd.f32 1e-05, %v1192_v41 }
 0x145   :  { %1773 = vrsqrt.f32 %v1194_v43  ;;  %vm1201_vm4 = vweird.f32 %v1194_v43 }
 0x14b   :  { %v1774_v44 = vpop.eup %1773 }
 0x14c   :  { %v1196_v49 = vmul.f32 %v1774_v44, %v1194_v43  ;;  %vm1202_vm3 = vweird.f32 %v1774_v44 }
 0x14d   :  { %vm1203_vm5 = vmor %vm1201_vm4, %vm1202_vm3 }
 0x14e   :  { %v1197_v52 = vmul.f32 %v1774_v44, %v1196_v49 }
 0x150   :  { %v1198_v22 = vmul.f32 0.5, %v1197_v52 }
 0x152   :  { %v1199_v55 = vsub.f32 1.5, %v1198_v22 }
 0x154   :  { %v1200_v57 = vmul.f32 %v1774_v44, %v1199_v55 }
 0x156   :  { %v1204_v58 = vsel %vm1203_vm5, %v1774_v44, %v1200_v57 }
 0x157   :  { %v1205_v61 = vmul.f32 %v1204_v58, %v1193_v56 }
 0x159   :  { %v1207_v1 = vmul.f32 %v1205_v61, %v1189_v39  ;;  %v2224_v62 = vperm.slane %v1205_v61, 0 }
 0x15b   :  { %v1208_v4 = vsub.f32 %v1206_v37, %v1207_v1  ;;  %v1221_v5 = vmul.f32 %v2224_v62, %v2100_v9  ;;  %v1222_v6 = vmul.f32 %v2224_v62, %v2106_v23  ;;  %v1223_v21 = vmul.f32 %v2224_v62, %v2118_v36 }
 0x15c   :  { %v1224_v11 = vmul.f32 %v2224_v62, %v2125_v48  ;;  %v1225_v12 = vmul.f32 %v2224_v62, %v2132_v60  ;;  %v1226_v54 = vmul.f32 %v2224_v62, %v2139_v10  ;;  %v1227_v13 = vmul.f32 %v2224_v62, %v2146_v24 }
 0x15d   :  { %v1228_v9 = vmul.f32 %v2224_v62, %v2153_v38  ;;  %v1229_v23 = vmul.f32 %v2224_v62, %v2160_v51  ;;  %v2244_v3 = vperm.slane %v1208_v4, 0  ;;  %v1296_v36 = vmul.f32 %v2224_v62, %v2171_v45 }
 0x15e   :  { %v1297_v48 = vmul.f32 %v2224_v62, %v2169_v42  ;;  %v1298_v60 = vmul.f32 %v2224_v62, %v2173_v46  ;;  %v1299_v10 = vmul.f32 %v2224_v62, %v2177_v63  ;;  %v1300_v24 = vmul.f32 %v2224_v62, %v2183_v2 }
 0x15f   :  { %v1233_v38 = vadd.f32 %v2244_v3, %v1221_v5  ;;  %v1234_v51 = vadd.f32 %v2244_v3, %v1222_v6  ;;  %v1235_v14 = vadd.f32 %v2244_v3, %v1223_v21  ;;  %v1236_v45 = vadd.f32 %v2244_v3, %v1224_v11 }
 0x160   :  { %v1237_v15 = vadd.f32 %v2244_v3, %v1225_v12  ;;  %v1238_v42 = vadd.f32 %v2244_v3, %v1226_v54  ;;  %v1239_v46 = vadd.f32 %v2244_v3, %v1227_v13  ;;  %v1240_v29 = vadd.f32 %v2244_v3, %v1228_v9 }
 0x161   :  { %v1241_v63 = vadd.f32 %v2244_v3, %v1229_v23  ;;  %vm1242_vm6 = vcmp.gt.f32.partialorder %v1233_v38, 0.0  ;;  %vm1243_vm7 = vcmp.gt.f32.partialorder %v1234_v51, 0.0  ;;  %vm1244_vm8 = vcmp.gt.f32.partialorder %v1235_v14, 0.0 }
 0x162   :  { %vm1245_vm9 = vcmp.gt.f32.partialorder %v1236_v45, 0.0  ;;  %vm1246_vm10 = vcmp.gt.f32.partialorder %v1237_v15, 0.0  ;;  %vm1247_vm11 = vcmp.gt.f32.partialorder %v1238_v42, 0.0  ;;  %vm1248_vm12 = vcmp.gt.f32.partialorder %v1239_v46, 0.0 }
 0x163   :  { %vm1249_vm13 = vcmp.gt.f32.partialorder %v1240_v29, 0.0  ;;  %vm1250_vm14 = vcmp.gt.f32.partialorder %v1241_v63, 0.0  ;;  %v1251_v2 = vmul.f32 0.2, %v1233_v38  ;;  %v1252_v17 = vmul.f32 0.2, %v1234_v51 }
 0x164   :  { %v1253_v18 = vmul.f32 0.2, %v1235_v14  ;;  %v1254_v59 = vmul.f32 0.2, %v1236_v45  ;;  %v1255_v19 = vmul.f32 0.2, %v1237_v15  ;;  %v1301_v47 = vmul.f32 %v2224_v62, %v2188_v7 }
 0x165   :  { %v1256_v20 = vmul.f32 0.2, %v1238_v42  ;;  %v1257_v25 = vmul.f32 0.2, %v1239_v46  ;;  %v1258_v50 = vmul.f32 0.2, %v1240_v29  ;;  %v1260_v27 = vsel %vm1242_vm6, %v1233_v38, %v1251_v2 }
 0x166   :  { %v1259_v28 = vmul.f32 0.2, %v1241_v63  ;;  %v1261_v30 = vsel %vm1243_vm7, %v1234_v51, %v1252_v17  ;;  %v1262_v53 = vsel %vm1244_vm8, %v1235_v14, %v1253_v18  ;;  %v1263_v31 = vsel %vm1245_vm9, %v1236_v45, %v1254_v59 }
 0x167   :  { %v1264_v32 = vsel %vm1246_vm10, %v1237_v15, %v1255_v19  ;;  %v1265_v33 = vsel %vm1247_vm11, %v1238_v42, %v1256_v20  ;;  %v1266_v34 = vsel %vm1248_vm12, %v1239_v46, %v1257_v25  ;;  %v1267_v7 = vsel %vm1249_vm13, %v1240_v29, %v1258_v50 }
 0x168   :  { %v1268_v35 = vsel %vm1250_vm14, %v1241_v63, %v1259_v28  ;;  %v1725_v39 = vpack.c.bf16 %v1261_v30, %v1260_v27  ;;  %v1730_v8 = vpack.c.bf16 %v1263_v31, %v1262_v53  ;;  %v1735_v40 = vpack.c.bf16 %v1265_v33, %v1264_v32 }
 0x169   :  { %v1277_v41 = vpack.c.bf16 %v1268_v35, %v1268_v35  ;;  %v1740_v43 = vpack.c.bf16 %v1267_v7, %v1266_v34  ;;  %v1302_v44 = vmul.f32 %v2224_v62, %v2194_v16  ;;  %v1303_v49 = vmul.f32 %v2224_v62, %v2199_v26 }
 0x16a   :  { %1726 = vst [vmem:[%s2335_s5] sm:$0xff] %v1725_v39   ;;  %v1304_v52 = vmul.f32 %v2224_v62, %v2212_v0  ;;  %v1305_v22 = vadd.f32 %v1296_v36, %v2244_v3  ;;  %v1306_v55 = vadd.f32 %v1297_v48, %v2244_v3  ;;  %v1307_v56 = vadd.f32 %v1298_v60, %v2244_v3 }
 0x16b   :  { %1762 = vst [vmem:[%s2335_s5 + $0x8] sm:$0xff] %v1730_v8   ;;  %v1308_v16 = vadd.f32 %v1299_v10, %v2244_v3  ;;  %v1309_v26 = vadd.f32 %v1300_v24, %v2244_v3  ;;  %v1310_v57 = vadd.f32 %v1301_v47, %v2244_v3  ;;  %v1311_v58 = vadd.f32 %v1302_v44, %v2244_v3 }
 0x16c   :  { %1763 = vst [vmem:[%s2335_s5 + $0x10] sm:$0xff] %v1735_v40   ;;  %v1312_v0 = vadd.f32 %v1303_v49, %v2244_v3  ;;  %v1313_v61 = vadd.f32 %v1304_v52, %v2244_v3  ;;  %vm1314_vm15 = vcmp.gt.f32.partialorder %v1305_v22, 0.0  ;;  %vm1315_vm0 = vcmp.gt.f32.partialorder %v1306_v55, 0.0 }
 0x16d   :  { %1764 = vst [vmem:[%s2335_s5 + $0x18] sm:$0xff] %v1740_v43   ;;  %vm1316_vm1 = vcmp.gt.f32.partialorder %v1307_v56, 0.0  ;;  %vm1317_vm2 = vcmp.gt.f32.partialorder %v1308_v16, 0.0  ;;  %vm1318_vm3 = vcmp.gt.f32.partialorder %v1309_v26, 0.0  ;;  %vm1319_vm4 = vcmp.gt.f32.partialorder %v1310_v57, 0.0 }
 0x16e   :  { %1286 = vst [vmem:[%s2335_s5 + $0x20] sm:$0xf] %v1277_v41  ;;  %vm1320_vm5 = vcmp.gt.f32.partialorder %v1311_v58, 0.0  ;;  %vm1321_vm6 = vcmp.gt.f32.partialorder %v1312_v0, 0.0  ;;  %vm1322_vm7 = vcmp.gt.f32.partialorder %v1313_v61, 0.0 }
 0x16f   :  { %v1323_v37 = vmul.f32 0.2, %v1305_v22  ;;  %v1324_v1 = vmul.f32 0.2, %v1306_v55  ;;  %v1325_v62 = vmul.f32 0.2, %v1307_v56 }
 0x170   :  { %v1326_v4 = vmul.f32 0.2, %v1308_v16  ;;  %v1327_v5 = vmul.f32 0.2, %v1309_v26  ;;  %v1328_v6 = vmul.f32 0.2, %v1310_v57 }
 0x171   :  { %v1329_v21 = vmul.f32 0.2, %v1311_v58  ;;  %v1330_v11 = vmul.f32 0.2, %v1312_v0  ;;  %v1331_v12 = vmul.f32 0.2, %v1313_v61  ;;  %v1332_v54 = vsel %vm1314_vm15, %v1305_v22, %v1323_v37 }
 0x172   :  { %v1333_v13 = vsel %vm1315_vm0, %v1306_v55, %v1324_v1  ;;  %v1334_v9 = vsel %vm1316_vm1, %v1307_v56, %v1325_v62  ;;  %v1335_v23 = vsel %vm1317_vm2, %v1308_v16, %v1326_v4  ;;  %v1336_v3 = vsel %vm1318_vm3, %v1309_v26, %v1327_v5 }
 0x173   :  { %v1337_v36 = vsel %vm1319_vm4, %v1310_v57, %v1328_v6  ;;  %v1338_v48 = vsel %vm1320_vm5, %v1311_v58, %v1329_v21  ;;  %v1339_v60 = vsel %vm1321_vm6, %v1312_v0, %v1330_v11  ;;  %v1340_v10 = vsel %vm1322_vm7, %v1313_v61, %v1331_v12 }
 0x174   :  { %v1341_v24 = vpack.c.bf16 %v1332_v54, %v1332_v54  ;;  %v1745_v38 = vpack.c.bf16 %v1334_v9, %v1333_v13  ;;  %v1750_v51 = vpack.c.bf16 %v1336_v3, %v1335_v23  ;;  %v1755_v14 = vpack.c.bf16 %v1338_v48, %v1337_v36 }
 0x175   :  { %v1760_v45 = vpack.c.bf16 %v1340_v10, %v1339_v60 }
 0x176   :  { %1665 = vst [vmem:[%s2335_s5 + $0x24] sm:$0xf] %v1341_v24 }
 0x177   :  { %1765 = vst [vmem:[%s2335_s5 + $0x28] sm:$0xff] %v1745_v38  }
 0x178   :  { %1766 = vst [vmem:[%s2335_s5 + $0x30] sm:$0xff] %v1750_v51  }
 0x179   :  { %1767 = vst [vmem:[%s2335_s5 + $0x38] sm:$0xff] %v1755_v14  }
 0x17a   :  { %1768 = vst [vmem:[%s2335_s5 + $0x40] sm:$0xff] %v1760_v45  }

// kernel: stage1_d_img_forward.7
= control target key start
LH: loop header
LB: loop body
LE: loop exit
PB: predicated region body
PF: predicated region fallthrough
CT: control target
= control target key end

     0   :  { %v1451_v56 = vmov 0   ;;  %vm68_vm0 = vsmask.f32 7424  ;;  %vm254_vm1 = vsmask.f32 5376  ;;  %vm364_vm2 = vcmask 1044480   ;;  %s1824_s1 = inlined_call_operand.vmem [shape: bf16[4,128,128], index: 1, kind: input, shape index: {}]   ;;  %s1825_s0 = inlined_call_operand.vmem [shape: bf16[2,30,128], index: 0, kind: input, shape index: {}]   ;;  %s1826_s2 = inlined_call_operand.vmem [shape: f32[20,1], index: 2, kind: input, shape index: {}]   ;;  %s1827_s3 = inlined_call_operand.vmem [shape: f32[1,128], index: 3, kind: input, shape index: {}]   ;;  %s1828_s4 = inlined_call_operand.vmem [shape: f32[1,128], index: 4, kind: input, shape index: {}]   ;;  %s1829_s5 = inlined_call_operand.vmem [shape: f32[2,20,128], index: 5, kind: output, shape index: {}]  }
   0x1   :  { %v1394_v0 = vld [vmem:[%s1824_s1 + $0x78] sm:$0xff]  ;;  %v1393_v4 = vld [vmem:[%s1824_s1 + $0x70] sm:$0xff]  ;;  %v1392_v8 = vld [vmem:[%s1824_s1 + $0x68] sm:$0xff]  ;;  %1447 = vset.pattern.permute.xlu0 %v1451_v56  ;;  %1448 = vset.pattern.permute.xlu1 %v1451_v56  ;;  %vm461_vm3 = vcmask 1043456  }
   0x2   :  { %v1386_v1 = vld [vmem:[%s1824_s1 + $0x38] sm:$0xff]  ;;  %134 = vmatpush.bf16.msra.mxu0 %v1394_v0  ;;  %v1385_v5 = vld [vmem:[%s1824_s1 + $0x30] sm:$0xff]  ;;  %v1384_v9 = vld [vmem:[%s1824_s1 + $0x28] sm:$0xff] }
   0x3   :  { %v1403_v2 = vld [vmem:[%s1824_s1 + $0xb8] sm:$0xff]  ;;  %205 = vmatpush.bf16.msra.mxu1 %v1386_v1  ;;  %v1402_v6 = vld [vmem:[%s1824_s1 + $0xb0] sm:$0xff]  ;;  %v1401_v10 = vld [vmem:[%s1824_s1 + $0xa8] sm:$0xff] }
   0x4   :  { %v1411_v3 = vld [vmem:[%s1824_s1 + $0xf8] sm:$0xff]  ;;  %322 = vmatpush.bf16.msra.mxu2 %v1403_v2  ;;  %v1410_v7 = vld [vmem:[%s1824_s1 + $0xf0] sm:$0xff]  ;;  %v1409_v11 = vld [vmem:[%s1824_s1 + $0xe8] sm:$0xff] }
   0x5   :  { %418 = vmatpush.bf16.msra.mxu3 %v1411_v3  ;;  %v1391_v12 = vld [vmem:[%s1824_s1 + $0x60] sm:$0xff]  ;;  %v42_v16 = vld [vmem:[%s1825_s0 + $0x8] sm:$0x7]  ;;  %v1395_v20 = vld [vmem:[%s1825_s0 + $0x8] sm:$0x10] }
   0x6   :  { %135 = vmatpush.bf16.msra.mxu0 %v1393_v4  ;;  %v1383_v13 = vld [vmem:[%s1824_s1 + $0x20] sm:$0xff]  ;;  %v1100_v19 = vld [vmem:[%s1825_s0 + $0x8] sm:$0xf]  ;;  %v1390_v23 = vld [vmem:[%s1824_s1 + $0x58] sm:$0xff]  ;;  %v65_v26 = vunpack.c.l.b16 %v42_v16 }
   0x7   :  { %206 = vmatpush.bf16.msra.mxu1 %v1385_v5  ;;  %v1400_v14 = vld [vmem:[%s1824_s1 + $0xa0] sm:$0xff]  ;;  %v1382_v24 = vld [vmem:[%s1824_s1 + $0x18] sm:$0xff]  ;;  %v1562_v30 = vor.u32 %v1395_v20, %v1100_v19  ;;  %v1389_v32 = vld [vmem:[%s1824_s1 + $0x50] sm:$0xff] }
   0x8   :  { %323 = vmatpush.bf16.msra.mxu2 %v1402_v6  ;;  %v1408_v15 = vld [vmem:[%s1824_s1 + $0xe0] sm:$0xff]  ;;  %v1399_v27 = vld [vmem:[%s1824_s1 + $0x98] sm:$0xff]  ;;  %v1381_v33 = vld [vmem:[%s1824_s1 + $0x10] sm:$0xff]  ;;  %v1573_v34 = vpack.c.b16 %v65_v26, %v65_v26 }
   0x9   :  { %419 = vmatpush.bf16.msra.mxu3 %v1410_v7  ;;  %v223_v17 = vld [vmem:[%s1825_s0] sm:$0xc]  ;;  %v224_v18 = vld [vmem:[%s1825_s0 + $0x4] sm:$0xf]  ;;  %v1407_v28 = vld [vmem:[%s1824_s1 + $0xd8] sm:$0xff]  ;;  %v264_v41 = vshrl.u32 %v1562_v30, 16 }
   0xa   :  { %136 = vmatpush.bf16.msra.mxu0 %v1392_v8  ;;  %v248_v21 = vunpack.c.l.b16 %v223_v17  ;;  %v249_v22 = vunpack.c.l.b16 %v224_v18  ;;  %v1554_v25 = vld [vmem:[%s1825_s0] sm:$0xff]  ;;  %v1398_v37 = vld [vmem:[%s1824_s1 + $0x90] sm:$0xff]  ;;  %v267_v42 = vshll.u32 %v1562_v30, 16  ;;  %v1388_v43 = vld [vmem:[%s1824_s1 + $0x48] sm:$0xff]  ;;  %v77_v47 = vshll.u32 %v1573_v34, 16 }
   0xb   :  { %207 = vmatpush.bf16.msra.mxu1 %v1384_v9  ;;  %v343_v31 = vld [vmem:[%s1825_s0] sm:$0x8]  ;;  %v72_v35 = vshll.u32 %v1554_v25, 16  ;;  %v1406_v38 = vld [vmem:[%s1824_s1 + $0xd0] sm:$0xff]  ;;  %v1380_v44 = vld [vmem:[%s1824_s1 + $0x8] sm:$0xff]  ;;  %v70_v45 = vshrl.u32 %v1554_v25, 16 }
   0xc   :  { %324 = vmatpush.bf16.msra.mxu2 %v1401_v10  ;;  %v252_v29 = vpack.c.b16 %v249_v22, %v248_v21  ;;  %v362_v36 = vunpack.c.l.b16 %v343_v31  ;;  %v20_v49 = vld [vmem:[%s1826_s2] sm:$0xff]  ;;  %v1397_v50 = vld [vmem:[%s1824_s1 + $0x88] sm:$0xff]  ;;  %v266_v54 = vrot.slane %v264_v41, 2  ;;  %v269_v55 = vrot.slane %v267_v42, 3  ;;  %v1437_v3 = vld [vmem:[%s1824_s1 + $0xb8] sm:$0xff] }
   0xd   :  { %420 = vmatpush.bf16.msra.mxu3 %v1409_v11  ;;  %v74_v46 = vrot.slane %v72_v35, 1  ;;  %v1405_v51 = vld [vmem:[%s1824_s1 + $0xc8] sm:$0xff]  ;;  %444 = vperm.xlu0 %1447, %v20_v49   ;;  %v1387_v57 = vld [vmem:[%s1824_s1 + $0x40] sm:$0xff]  ;;  %v1607_v60 = vrot.slane %v77_v47, 1  ;;  %v366_v2 = vrot.slane %v1562_v30, 3  ;;  %v1428_v4 = vld [vmem:[%s1824_s1 + $0x78] sm:$0xff] }
   0xe   :  { %137 = vmatpush.bf16.msra.mxu0 %v1391_v12  ;;  %v256_v39 = vshrl.u32 %v252_v29, 16  ;;  %v259_v40 = vshll.u32 %v252_v29, 16  ;;  %v363_v48 = vpack.c.b16 %v249_v22, %v362_v36  ;;  %v1379_v58 = vld [vmem:[%s1824_s1] sm:$0xff]  ;;  %v1615_v0 = vor.u32 %v269_v55, %v266_v54  ;;  %v1420_v8 = vld [vmem:[%s1824_s1 + $0x38] sm:$0xff]  ;;  %v1436_v10 = vld [vmem:[%s1824_s1 + $0xb0] sm:$0xff] }
   0xf   :  { %208 = vmatpush.bf16.msra.mxu1 %v1383_v13  ;;  %v75_v59 = vor.u32 %v74_v46, %v70_v45  ;;  %v1396_v61 = vld [vmem:[%s1824_s1 + $0x80] sm:$0xff]  ;;  %v1445_v9 = vld [vmem:[%s1824_s1 + $0xf8] sm:$0xff]  ;;  %v1427_v11 = vld [vmem:[%s1824_s1 + $0x70] sm:$0xff] }
  0x10   :  { %325 = vmatpush.bf16.msra.mxu2 %v1400_v14  ;;  %v258_v52 = vrot.slane %v256_v39, 2  ;;  %v261_v53 = vrot.slane %v259_v40, 3  ;;  %v1404_v62 = vld [vmem:[%s1824_s1 + $0xc0] sm:$0xff]  ;;  %v365_v1 = vrot.slane %v363_v48, 3  ;;  %v21_v12 = vld [vmem:[%s1826_s2 + $0x8] sm:$0xff]  ;;  %v1419_v13 = vld [vmem:[%s1824_s1 + $0x30] sm:$0xff] }
  0x11   :  { %421 = vmatpush.bf16.msra.mxu3 %v1408_v15  ;;  %v80_v5 = vsel %vm68_vm0, %v75_v59, %v1607_v60  ;;  %v1444_v14 = vld [vmem:[%s1824_s1 + $0xf0] sm:$0xff]  ;;  %v1435_v16 = vld [vmem:[%s1824_s1 + $0xa8] sm:$0xff]  ;;  %v1434_v21 = vld [vmem:[%s1824_s1 + $0xa0] sm:$0xff] }
  0x12   :  { %138 = vmatpush.bf16.msra.mxu0 %v1390_v23  ;;  %v262_v63 = vor.u32 %v261_v53, %v258_v52  ;;  %v367_v7 = vsel %vm364_vm2, %v365_v1, %v366_v2  ;;  %v22_v15 = vld [vmem:[%s1826_s2 + $0x10] sm:$0xf]  ;;  %v1426_v17 = vld [vmem:[%s1824_s1 + $0x68] sm:$0xff]  ;;  %v1425_v22 = vld [vmem:[%s1824_s1 + $0x60] sm:$0xff] }
  0x13   :  { %209 = vmatpush.bf16.msra.mxu1 %v1382_v24  ;;  %454 = vperm.xlu1 %1448, %v22_v15   ;;  %v25_v18 = vld [vmem:[%s1825_s0 + $0x8] sm:$0x3]  ;;  %v1270_v23 = vld [vmem:[%s1825_s0 + $0x10] sm:$0xc]  ;;  %v1683_v24 = vld [vmem:[%s1825_s0 + $0x14] sm:$0xf] }
  0x14   :  { %326 = vmatpush.bf16.msra.mxu2 %v1399_v27  ;;  %v271_v6 = vsel %vm254_vm1, %v262_v63, %v1615_v0  ;;  %v1418_v19 = vld [vmem:[%s1824_s1 + $0x28] sm:$0xff]  ;;  %v153_v26 = vunpack.c.l.b16 %v25_v18  ;;  %v1417_v27 = vld [vmem:[%s1824_s1 + $0x20] sm:$0xff]  ;;  %v1433_v29 = vld [vmem:[%s1824_s1 + $0x98] sm:$0xff] }
  0x15   :  { %422 = vmatpush.bf16.msra.mxu3 %v1407_v28  ;;  %449 = vperm.xlu0 %1447, %v21_v12   ;;  %v1443_v20 = vld [vmem:[%s1824_s1 + $0xe8] sm:$0xff]  ;;  %v1442_v28 = vld [vmem:[%s1824_s1 + $0xe0] sm:$0xff]  ;;  %v1185_v31 = vld [vmem:[%s1825_s0 + $0x18] sm:$0x7] }
  0x16   :  { %139 = vmatpush.bf16.msra.mxu0 %v1389_v32  ;;  %v707_v32 = vunpack.c.l.b16 %v1270_v23  ;;  %v1292_v35 = vld [vmem:[%s1825_s0 + $0x18] sm:$0xf]  ;;  %v1429_v36 = vld [vmem:[%s1825_s0 + $0x18] sm:$0x10]  ;;  %v1712_v39 = vld [vmem:[%s1825_s0 + $0x10] sm:$0xff]  ;;  %v526_v40 = vunpack.c.l.b16 %v1185_v31 }
  0x17   :  { %210 = vmatpush.bf16.msra.mxu1 %v1381_v33  ;;  %v708_v33 = vunpack.c.l.b16 %v1683_v24  ;;  %v1416_v41 = vld [vmem:[%s1824_s1 + $0x18] sm:$0xff]  ;;  %v1432_v45 = vld [vmem:[%s1824_s1 + $0x90] sm:$0xff]  ;;  %v532_v49 = vshll.u32 %v1712_v39, 16  ;;  %v1431_v55 = vld [vmem:[%s1824_s1 + $0x88] sm:$0xff] }
  0x18   :  { %327 = vmatpush.bf16.msra.mxu2 %v1398_v37  ;;  %v1441_v42 = vld [vmem:[%s1824_s1 + $0xd8] sm:$0xff]  ;;  %v1423_v46 = vld [vmem:[%s1824_s1 + $0x50] sm:$0xff]  ;;  %v528_v48 = vpack.c.b16 %v526_v40, %v526_v40  ;;  %v1422_v56 = vld [vmem:[%s1824_s1 + $0x48] sm:$0xff] }
  0x19   :  { %423 = vmatpush.bf16.msra.mxu3 %v1406_v38  ;;  %v154_v38 = vpack.c.b16 %v153_v26, %v153_v26  ;;  %v1326_v47 = vld [vmem:[%s1825_s0 + $0x10] sm:$0x8]  ;;  %v534_v59 = vrot.slane %v532_v49, 1 }
  0x1a   :  { %140 = vmatpush.bf16.msra.mxu0 %v1388_v43  ;;  %v711_v43 = vpack.c.b16 %v708_v33, %v707_v32  ;;  %v541_v18 = vshrl.u32 %v528_v48, 16 }
  0x1b   :  { %211 = vmatpush.bf16.msra.mxu1 %v1380_v44  ;;  %v1720_v44 = vor.u32 %v1429_v36, %v1292_v35 }
  0x1c   :  { %328 = vmatpush.bf16.msra.mxu2 %v1397_v50  ;;  %v1415_v50 = vld [vmem:[%s1824_s1 + $0x10] sm:$0xff]  ;;  %v714_v52 = vshrl.u32 %v711_v43, 16  ;;  %v717_v53 = vshll.u32 %v711_v43, 16 }
  0x1d   :  { %424 = vmatpush.bf16.msra.mxu3 %v1405_v51  ;;  %v1440_v51 = vld [vmem:[%s1824_s1 + $0xd0] sm:$0xff]  ;;  %v722_v54 = vshrl.u32 %v1720_v44, 16  ;;  %v725_v30 = vshll.u32 %v1720_v44, 16 }
  0x1e   :  { %141 = vmatpush.bf16.msra.mxu0 %v1387_v57  ;;  %v819_v57 = vunpack.c.l.b16 %v1326_v47  ;;  %v716_v63 = vrot.slane %v714_v52, 2 }
  0x1f   :  { %212 = vmatpush.bf16.msra.mxu1 %v1379_v58  ;;  %v530_v58 = vshrl.u32 %v1712_v39, 16  ;;  %v724_v1 = vrot.slane %v722_v54, 2 }
  0x20   :  { %329 = vmatpush.bf16.msra.mxu2 %v1396_v61  ;;  %v1414_v61 = vld [vmem:[%s1824_s1 + $0x8] sm:$0xff] }
  0x21   :  { %425 = vmatpush.bf16.msra.mxu3 %v1404_v62  ;;  %142 = vmatmul.bf16.vlgmr.msra.gmra.mxu0 %v80_v5  ;;  %v1439_v62 = vld [vmem:[%s1824_s1 + $0xc8] sm:$0xff]  ;;  %v820_v5 = vpack.c.b16 %v708_v33, %v819_v57 }
  0x22   :  { %594 = vmatpush.bf16.msrb.mxu0 %v1428_v4  ;;  %213 = vmatmul.bf16.vlgmr.msra.gmra.mxu1 %v1554_v25  ;;  %v81_v25 = vshrl.u32 %v1573_v34, 16  ;;  %v1424_v34 = vld [vmem:[%s1824_s1 + $0x58] sm:$0xff]  ;;  %v1421_v4 = vld [vmem:[%s1824_s1 + $0x40] sm:$0xff] }
  0x23   :  { %330 = vmatmul.bf16.vlgmr.msra.gmra.mxu2 %v271_v6  ;;  %665 = vmatpush.bf16.msrb.mxu1 %v1420_v8  ;;  %v535_v6 = vor.u32 %v534_v59, %v530_v58  ;;  %v1413_v8 = vld [vmem:[%s1824_s1] sm:$0xff]  ;;  %v821_v12 = vrot.slane %v820_v5, 3 }
  0x24   :  { %780 = vmatpush.bf16.msrb.mxu2 %v1437_v3  ;;  %426 = vmatmul.bf16.vlgmr.msra.gmra.mxu3 %v367_v7  ;;  %v83_v37 = vor.u32 %v81_v25, %v1607_v60  ;;  %v537_v60 = vshll.u32 %v528_v48, 16  ;;  %v1430_v3 = vld [vmem:[%s1824_s1 + $0x80] sm:$0xff] }
  0x25   :  { %874 = vmatpush.bf16.msrb.mxu3 %v1445_v9  ;;  %v1438_v9 = vld [vmem:[%s1824_s1 + $0xc0] sm:$0xff] }
  0x26   :  { %595 = vmatpush.bf16.msrb.mxu0 %v1427_v11  ;;  %v539_v7 = vrot.slane %v537_v60, 1 }
  0x27   :  { %666 = vmatpush.bf16.msrb.mxu1 %v1419_v13  ;;  %v822_v13 = vrot.slane %v1720_v44, 3 }
  0x28   :  { %781 = vmatpush.bf16.msrb.mxu2 %v1436_v10 }
  0x29   :  { %875 = vmatpush.bf16.msrb.mxu3 %v1444_v14  ;;  %v540_v14 = vsel %vm68_vm0, %v535_v6, %v539_v7 }
  0x2a   :  { %596 = vmatpush.bf16.msrb.mxu0 %v1426_v17  ;;  %v1184_v17 = vld [vmem:[%s1825_s0 + $0x18] sm:$0x3] }
  0x2b   :  { %667 = vmatpush.bf16.msrb.mxu1 %v1418_v19  ;;  %v613_v19 = vunpack.c.l.b16 %v1184_v17 }
  0x2c   :  { %782 = vmatpush.bf16.msrb.mxu2 %v1435_v16  ;;  %v823_v16 = vsel %vm364_vm2, %v821_v12, %v822_v13 }
  0x2d   :  { %876 = vmatpush.bf16.msrb.mxu3 %v1443_v20  ;;  %v543_v20 = vor.u32 %v541_v18, %v539_v7 }
  0x2e   :  { %597 = vmatpush.bf16.msrb.mxu0 %v1425_v22 }
  0x2f   :  { %668 = vmatpush.bf16.msrb.mxu1 %v1417_v27 }
  0x30   :  { %783 = vmatpush.bf16.msrb.mxu2 %v1434_v21  ;;  %v614_v21 = vpack.c.b16 %v613_v19, %v613_v19 }
  0x31   :  { %877 = vmatpush.bf16.msrb.mxu3 %v1442_v28  ;;  %147 = vmatmul.bf16.gmra.mxu0 %v83_v37 }
  0x32   :  { %598 = vmatpush.bf16.msrb.mxu0 %v1424_v34  ;;  %218 = vmatmul.bf16.gmra.mxu1 %v154_v38 }
  0x33   :  { %335 = vmatmul.bf16.gmra.mxu2 %v1615_v0  ;;  %669 = vmatpush.bf16.msrb.mxu1 %v1416_v41  ;;  %v719_v0 = vrot.slane %v717_v53, 3 }
  0x34   :  { %784 = vmatpush.bf16.msrb.mxu2 %v1433_v29  ;;  %431 = vmatmul.bf16.gmra.mxu3 %v366_v2  ;;  %v727_v2 = vrot.slane %v725_v30, 3 }
  0x35   :  { %878 = vmatpush.bf16.msrb.mxu3 %v1441_v42  ;;  %v720_v10 = vor.u32 %v719_v0, %v716_v63 }
  0x36   :  { %599 = vmatpush.bf16.msrb.mxu0 %v1423_v46  ;;  %v728_v11 = vor.u32 %v727_v2, %v724_v1 }
  0x37   :  { %670 = vmatpush.bf16.msrb.mxu1 %v1415_v50 }
  0x38   :  { %785 = vmatpush.bf16.msrb.mxu2 %v1432_v45  ;;  %v729_v15 = vsel %vm254_vm1, %v720_v10, %v728_v11 }
  0x39   :  { %879 = vmatpush.bf16.msrb.mxu3 %v1440_v51 }
  0x3a   :  { %600 = vmatpush.bf16.msrb.mxu0 %v1422_v56 }
  0x3b   :  { %671 = vmatpush.bf16.msrb.mxu1 %v1414_v61 }
  0x3c   :  { %786 = vmatpush.bf16.msrb.mxu2 %v1431_v55 }
  0x3d   :  { %880 = vmatpush.bf16.msrb.mxu3 %v1439_v62 }
  0x3e   :  { %601 = vmatpush.bf16.msrb.mxu0 %v1421_v4 }
  0x3f   :  { %672 = vmatpush.bf16.msrb.mxu1 %v1413_v8 }
  0x40   :  { %787 = vmatpush.bf16.msrb.mxu2 %v1430_v3 }
  0x41   :  { %881 = vmatpush.bf16.msrb.mxu3 %v1438_v9  ;;  %602 = vmatmul.bf16.vlgmr.msrb.gmra.mxu0 %v540_v14 }
  0x42   :  { %673 = vmatmul.bf16.vlgmr.msrb.gmra.mxu1 %v1712_v39 }
  0x43   :  { %788 = vmatmul.bf16.vlgmr.msrb.gmra.mxu2 %v729_v15 }
  0x44   :  { %882 = vmatmul.bf16.vlgmr.msrb.gmra.mxu3 %v823_v16 }
  0x51   :  { %607 = vmatmul.bf16.gmra.mxu0 %v543_v20 }
  0x52   :  { %678 = vmatmul.bf16.gmra.mxu1 %v614_v21 }
  0x53   :  { %793 = vmatmul.bf16.gmra.mxu2 %v728_v11 }
  0x54   :  { %887 = vmatmul.bf16.gmra.mxu3 %v822_v13 }
  0x7f   :  { %v445_v46 = vpop.permute.xlu0 %444 }
  0x85   :  { %v455_v53 = vpop.permute.xlu1 %454 }
  0x87   :  { %v450_v52 = vpop.permute.xlu0 %449 }
  0x9e   :  { %v143_v22 = vpop.f32.mrf.mxu0 }
  0x9f   :  { %v214_v23 = vpop.f32.mrf.mxu1 }
  0xa0   :  { %v215_v24 = vadd.f32 %v214_v23, %v143_v22 }
  0xa6   :  { %v331_v25 = vpop.f32.mrf.mxu2  ;;  %v145_v28 = vpop.f32.mrf.mxu0 }
  0xa7   :  { %v427_v26 = vpop.f32.mrf.mxu3  ;;  %v340_v27 = vadd.f32 %v331_v25, %v215_v24  ;;  %v216_v29 = vpop.f32.mrf.mxu1 }
  0xa8   :  { %v217_v32 = vadd.f32 %v216_v29, %v145_v28 }
  0xa9   :  { %v1776_v31 = vadd.f32 %v427_v26, %v340_v27 }
  0xab   :  { %v457_v61 = vmul.f32 %v445_v46, %v1776_v31 }
  0xad   :  { %v471_v6 = vmul.f32 %v457_v61, %v1776_v31 }
  0xae   :  { %v333_v33 = vpop.f32.mrf.mxu2  ;;  %v148_v36 = vpop.f32.mrf.mxu0 }
  0xaf   :  { %v429_v34 = vpop.f32.mrf.mxu3  ;;  %v341_v35 = vadd.f32 %v333_v33, %v217_v32  ;;  %v219_v37 = vpop.f32.mrf.mxu1 }
  0xb0   :  { %v220_v39 = vadd.f32 %v219_v37, %v148_v36 }
  0xb1   :  { %v1778_v38 = vadd.f32 %v429_v34, %v341_v35 }
  0xb3   :  { %v458_v60 = vmul.f32 %v450_v52, %v1778_v38 }
  0xb5   :  { %v472_v0 = vmul.f32 %v458_v60, %v1778_v38  ;;  %v460_v7 = vadd.f32 %v458_v60, %v457_v61 }
  0xb6   :  { %v336_v40 = vpop.f32.mrf.mxu2  ;;  %v150_v43 = vpop.f32.mrf.mxu0 }
  0xb7   :  { %v432_v41 = vpop.f32.mrf.mxu3  ;;  %v342_v42 = vadd.f32 %v336_v40, %v220_v39  ;;  %v221_v44 = vpop.f32.mrf.mxu1  ;;  %v474_v11 = vadd.f32 %v472_v0, %v471_v6 }
  0xb9   :  { %v438_v45 = vadd.f32 %v432_v41, %v342_v42 }
  0xbb   :  { %441 = vst [vmem:[#allocation2 + $0x8] sm:$0xf] %v438_v45  ;;  %v459_v58 = vmul.f32 %v455_v53, %v438_v45 }
  0xbd   :  { %v473_v62 = vmul.f32 %v459_v58, %v438_v45  ;;  %v462_v2 = vsel %vm461_vm3, %v459_v58, 0.0 }
  0xbe   :  { %v338_v47 = vpop.f32.mrf.mxu2  ;;  %v603_v49 = vpop.f32.mrf.mxu0  ;;  %v463_v12 = vadd.f32 %v462_v2, %v460_v7 }
  0xbf   :  { %v434_v48 = vpop.f32.mrf.mxu3  ;;  %v674_v50 = vpop.f32.mrf.mxu1  ;;  %v475_v9 = vsel %vm461_vm3, %v473_v62, 0.0 }
  0xc0   :  { %v675_v51 = vadd.f32 %v674_v50, %v603_v49  ;;  %v476_v14 = vadd.f32 %v475_v9, %v474_v11  ;;  %v464_v15 = vrot.slane %v463_v12, 4  ;;  %v929_v11 = vld [vmem:[%s1827_s3] sm:$0x1] }
  0xc2   :  { %v477_v21 = vrot.slane %v476_v14, 4  ;;  %v465_v25 = vadd.f32 %v464_v15, %v463_v12  ;;  %v942_v15 = vld [vmem:[%s1828_s4] sm:$0x1] }
  0xc4   :  { %v478_v28 = vadd.f32 %v477_v21, %v476_v14  ;;  %v466_v35 = vrot.slane %v465_v25, 2 }
  0xc6   :  { %v789_v54 = vpop.f32.mrf.mxu2  ;;  %v605_v56 = vpop.f32.mrf.mxu0  ;;  %v479_v42 = vrot.slane %v478_v28, 2  ;;  %v467_v45 = vadd.f32 %v466_v35, %v465_v25 }
  0xc7   :  { %v798_v30 = vadd.f32 %v789_v54, %v675_v51  ;;  %v883_v55 = vpop.f32.mrf.mxu3  ;;  %v676_v57 = vpop.f32.mrf.mxu1 }
  0xc8   :  { %v677_v63 = vadd.f32 %v676_v57, %v605_v56  ;;  %v480_v48 = vadd.f32 %v479_v42, %v478_v28  ;;  %v468_v51 = vrot.slane %v467_v45, 1 }
  0xc9   :  { %v1780_v59 = vadd.f32 %v883_v55, %v798_v30 }
  0xca   :  { %v481_v54 = vrot.slane %v480_v48, 1  ;;  %v469_v56 = vadd.f32 %v468_v51, %v467_v45 }
  0xcb   :  { %v899_v22 = vmul.f32 %v1780_v59, %v445_v46 }
  0xcc   :  { %v482_v60 = vadd.f32 %v481_v54, %v480_v48 }
  0xcd   :  { %v912_v29 = vmul.f32 %v899_v22, %v1780_v59 }
  0xce   :  { %v791_v1 = vpop.f32.mrf.mxu2  ;;  %v608_v5 = vpop.f32.mrf.mxu0 }
  0xcf   :  { %v799_v3 = vadd.f32 %v791_v1, %v677_v63  ;;  %v885_v4 = vpop.f32.mrf.mxu3  ;;  %v679_v8 = vpop.f32.mrf.mxu1 }
  0xd0   :  { %v680_v13 = vadd.f32 %v679_v8, %v608_v5 }
  0xd1   :  { %v1788_v10 = vadd.f32 %v885_v4, %v799_v3 }
  0xd3   :  { %v900_v16 = vmul.f32 %v1788_v10, %v450_v52 }
  0xd5   :  { %v913_v26 = vmul.f32 %v900_v16, %v1788_v10  ;;  %v902_v32 = vadd.f32 %v900_v16, %v899_v22 }
  0xd6   :  { %v794_v17 = vpop.f32.mrf.mxu2  ;;  %v610_v20 = vpop.f32.mrf.mxu0 }
  0xd7   :  { %v800_v18 = vadd.f32 %v794_v17, %v680_v13  ;;  %v888_v19 = vpop.f32.mrf.mxu3  ;;  %v681_v23 = vpop.f32.mrf.mxu1  ;;  %v915_v36 = vadd.f32 %v913_v26, %v912_v29 }
  0xd9   :  { %v894_v24 = vadd.f32 %v888_v19, %v800_v18  ;;  %v947_v19 = vld [vmem:[#allocation2 + $0x8] sm:$0xf] }
  0xdb   :  { %898 = vst [vmem:[#allocation2 + $0x20] sm:$0xf] %v894_v24  ;;  %v901_v27 = vmul.f32 %v894_v24, %v455_v53 }
  0xdd   :  { %v903_v33 = vsel %vm461_vm3, %v901_v27, 0.0  ;;  %v914_v34 = vmul.f32 %v901_v27, %v894_v24 }
  0xde   :  { %v904_v37 = vadd.f32 %v903_v33, %v902_v32  ;;  %v796_v39 = vpop.f32.mrf.mxu2 }
  0xdf   :  { %v916_v40 = vsel %vm461_vm3, %v914_v34, 0.0  ;;  %v890_v41 = vpop.f32.mrf.mxu3 }
  0xe0   :  { %v905_v43 = vrot.slane %v904_v37, 4  ;;  %v917_v44 = vadd.f32 %v916_v40, %v915_v36 }
  0xe2   :  { %v906_v46 = vadd.f32 %v905_v43, %v904_v37  ;;  %v918_v47 = vrot.slane %v917_v44, 4  ;;  %v974_v24 = vld [vmem:[#allocation2 + $0x20] sm:$0xf] }
  0xe4   :  { %v907_v49 = vrot.slane %v906_v46, 2  ;;  %v919_v50 = vadd.f32 %v918_v47, %v917_v44 }
  0xe6   :  { %v908_v52 = vadd.f32 %v907_v49, %v906_v46  ;;  %v920_v53 = vrot.slane %v919_v50, 2 }
  0xe8   :  { %v909_v30 = vrot.slane %v908_v52, 1  ;;  %v921_v55 = vadd.f32 %v920_v53, %v919_v50 }
  0xea   :  { %v910_v57 = vadd.f32 %v909_v30, %v908_v52  ;;  %v922_v58 = vrot.slane %v921_v55, 1 }
  0xec   :  { %v911_v61 = vadd.f32 %v910_v57, %v469_v56  ;;  %v923_v62 = vadd.f32 %v922_v58, %v921_v55 }
  0xee   :  { %v924_v63 = vadd.f32 %v923_v62, %v482_v60  ;;  %v925_v0 = vmul.f32 0.03125, %v911_v61 }
  0xf0   :  { %v926_v1 = vmul.f32 0.03125, %v924_v63  ;;  %v927_v2 = vmul.f32 %v925_v0, %v925_v0 }
  0xf2   :  { %v928_v3 = vsub.f32 %v926_v1, %v927_v2 }
  0xf4   :  { %v930_v4 = vadd.f32 1e-05, %v928_v3 }
  0xf6   :  { %1449 = vrsqrt.f32 %v930_v4  ;;  %vm937_vm5 = vweird.f32 %v930_v4 }
  0xfc   :  { %v1450_v5 = vpop.eup %1449 }
  0xfd   :  { %v932_v6 = vmul.f32 %v1450_v5, %v930_v4  ;;  %vm938_vm4 = vweird.f32 %v1450_v5 }
  0xfe   :  { %vm939_vm6 = vmor %vm937_vm5, %vm938_vm4 }
  0xff   :  { %v933_v7 = vmul.f32 %v1450_v5, %v932_v6 }
 0x101   :  { %v934_v8 = vmul.f32 0.5, %v933_v7 }
 0x103   :  { %v935_v9 = vsub.f32 1.5, %v934_v8 }
 0x105   :  { %v936_v12 = vmul.f32 %v1450_v5, %v935_v9 }
 0x107   :  { %v940_v13 = vsel %vm939_vm6, %v1450_v5, %v936_v12 }
 0x108   :  { %v941_v14 = vmul.f32 %v940_v13, %v929_v11 }
 0x10a   :  { %v943_v16 = vmul.f32 %v941_v14, %v925_v0  ;;  %v949_v17 = vperm.slane %v941_v14, 0 }
 0x10c   :  { %v944_v18 = vsub.f32 %v942_v15, %v943_v16  ;;  %v951_v20 = vmul.f32 %v949_v17, %v1776_v31  ;;  %v952_v21 = vmul.f32 %v949_v17, %v1778_v38  ;;  %v953_v22 = vmul.f32 %v949_v17, %v947_v19 }
 0x10d   :  { %v975_v25 = vmul.f32 %v949_v17, %v1780_v59  ;;  %v976_v26 = vmul.f32 %v949_v17, %v1788_v10  ;;  %v977_v27 = vmul.f32 %v974_v24, %v949_v17 }
 0x10e   :  { %v955_v23 = vperm.slane %v944_v18, 0 }
 0x110   :  { %v957_v28 = vadd.f32 %v955_v23, %v951_v20  ;;  %v958_v29 = vadd.f32 %v955_v23, %v952_v21  ;;  %v959_v32 = vadd.f32 %v955_v23, %v953_v22  ;;  %v978_v33 = vadd.f32 %v975_v25, %v955_v23 }
 0x111   :  { %v979_v34 = vadd.f32 %v976_v26, %v955_v23  ;;  %v980_v35 = vadd.f32 %v977_v27, %v955_v23 }
 0x112   :  { %vm960_vm7 = vcmp.gt.f32.partialorder %v957_v28, 0.0  ;;  %vm961_vm8 = vcmp.gt.f32.partialorder %v958_v29, 0.0  ;;  %vm962_vm9 = vcmp.gt.f32.partialorder %v959_v32, 0.0  ;;  %v963_v31 = vmul.f32 0.2, %v957_v28 }
 0x113   :  { %v964_v36 = vmul.f32 0.2, %v958_v29  ;;  %v965_v38 = vmul.f32 0.2, %v959_v32  ;;  %vm981_vm10 = vcmp.gt.f32.partialorder %v978_v33, 0.0  ;;  %vm982_vm11 = vcmp.gt.f32.partialorder %v979_v34, 0.0 }
 0x114   :  { %v966_v37 = vsel %vm960_vm7, %v957_v28, %v963_v31  ;;  %vm983_vm12 = vcmp.gt.f32.partialorder %v980_v35, 0.0  ;;  %v984_v59 = vmul.f32 0.2, %v978_v33  ;;  %v985_v39 = vmul.f32 0.2, %v979_v34 }
 0x115   :  { %v967_v10 = vsel %vm961_vm8, %v958_v29, %v964_v36  ;;  %v968_v40 = vsel %vm962_vm9, %v959_v32, %v965_v38  ;;  %969 = vst [vmem:[%s1829_s5] sm:$0xff] %v966_v37  ;;  %v986_v41 = vmul.f32 0.2, %v980_v35 }
 0x116   :  { %970 = vst [vmem:[%s1829_s5 + $0x8] sm:$0xff] %v967_v10  ;;  %v987_v42 = vsel %vm981_vm10, %v978_v33, %v984_v59  ;;  %v988_v43 = vsel %vm982_vm11, %v979_v34, %v985_v39 }
 0x117   :  { %971 = vst [vmem:[%s1829_s5 + $0x10] sm:$0xf] %v968_v40  ;;  %v989_v44 = vsel %vm983_vm12, %v980_v35, %v986_v41 }
 0x118   :  { %1375 = vst [vmem:[%s1829_s5 + $0x18] sm:$0xff] %v987_v42 }
 0x119   :  { %1376 = vst [vmem:[%s1829_s5 + $0x20] sm:$0xff] %v988_v43 }
 0x11a   :  { %1377 = vst [vmem:[%s1829_s5 + $0x28] sm:$0xf] %v989_v44 }

</bundles_post_ra>
